<compile_context>
chip_gen: v5e
topology: v5e:2x2
jax: 0.10.0
libtpu: 0.0.40
codegen_flags: <defaults>
</compile_context>

<pallas_src>
import functools
import math

import jax
import jax.numpy as jnp
from jax.experimental import pallas as pl
from jax.experimental.pallas import tpu as pltpu


# ----------------------------- fused forward kernel --------------------------
def _fused_kernel(xc_ref, w0_ref, b0_ref, w1_hbm, b1_ref, w2_hbm, b2_ref,
                  wl_hbm, bl_ref, o_ref,
                  x1_ref, w1_ref, w2_ref, wl_ref, sems,
                  *, BB, K1, K2, L1, L2):
    # xc_ref : (K1*BB*L1, CKp) bf16  conv0 im2col, rows ordered (k1, b, l1)
    # w0_ref : (CKp, 128)      bf16  conv0 weight (BN folded, zero-padded rows)
    # w1_hbm : (K1*128, 256)   bf16  conv1 weight in HBM (manual DMA)
    # w2_hbm : (K2*256, 512)   bf16  conv2 weight in HBM (manual DMA)
    # wl_hbm : (512, O)        bf16  linear weight in HBM (manual DMA)
    # b*_ref : (1, C)          f32   biases
    # o_ref  : (BB, O)         f32   output rows for this batch block
    # x1_ref : (BB*L1, K1*128) bf16  VMEM scratch: conv1 im2col
    # w*_ref : VMEM scratch for the manually-DMA'd weights; sems: 3 DMA sems
    M1 = BB * L1                      # conv1 output rows in this batch block
    M2 = BB * L2                      # conv2 output rows
    first = pl.program_id(0) == 0

    # Kick off the big weight DMAs immediately (step 0 only; the VMEM scratch
    # persists across the sequentially-executed grid steps).
    @pl.when(first)
    def _start_weight_dmas():
        pltpu.make_async_copy(w1_hbm, w1_ref, sems.at[0]).start()
        pltpu.make_async_copy(w2_hbm, w2_ref, sems.at[1]).start()
        pltpu.make_async_copy(wl_hbm, wl_ref, sems.at[2]).start()

    # ---- BN (folded) + conv0 + ReLU: one deep MXU matmul ----
    y0 = jnp.dot(xc_ref[...], w0_ref[...], preferred_element_type=jnp.float32)
    y0 = jnp.maximum(y0 + b0_ref[...], 0.0).astype(jnp.bfloat16)    # (K1*M1, 128)

    # conv0 output row-block k1 == lane-aligned column block k1 of conv1's im2col.
    for k in range(K1):                                             # static unroll
        x1_ref[:, k * 128:(k + 1) * 128] = y0[k * M1:(k + 1) * M1, :]

    # ---- conv1 + ReLU: one depth K1*128 matmul ----
    @pl.when(first)
    def _wait_w1():
        pltpu.make_async_copy(w1_hbm, w1_ref, sems.at[0]).wait()
    y1 = jnp.dot(x1_ref[...], w1_ref[...], preferred_element_type=jnp.float32)
    y1 = jnp.maximum(y1 + b1_ref[...], 0.0)                         # (M1, 256) f32

    # ---- conv2 + ReLU: stride 1 -> im2col from tiny contiguous value slices ----
    x2_cols = []
    for k in range(K2):                                             # static unroll
        x2_cols.append(jnp.concatenate(
            [y1[b * L1 + k: b * L1 + k + L2, :] for b in range(BB)], axis=0))
    x2 = jnp.concatenate(x2_cols, axis=1).astype(jnp.bfloat16)      # (M2, K2*256)

    @pl.when(first)
    def _wait_w2():
        pltpu.make_async_copy(w2_hbm, w2_ref, sems.at[1]).wait()
    y2 = jnp.dot(x2, w2_ref[...], preferred_element_type=jnp.float32)
    y2 = jnp.maximum(y2 + b2_ref[...], 0.0)                         # (M2, 512) f32

    # ---- temporal mean + Linear (dropout = identity at inference) ----
    m = jnp.concatenate(
        [jnp.mean(y2[b * L2:(b + 1) * L2, :], axis=0, keepdims=True)
         for b in range(BB)], axis=0)                               # (BB, 512) f32

    @pl.when(first)
    def _wait_wl():
        pltpu.make_async_copy(wl_hbm, wl_ref, sems.at[2]).wait()
    out = jnp.dot(m.astype(jnp.bfloat16), wl_ref[...],
                  preferred_element_type=jnp.float32) + bl_ref[...]
    o_ref[...] = out.astype(o_ref.dtype)


# ----------------------------- wrapper ---------------------------------------
def cnn_1d_forward(params, x):
    # x: (B, T, C_in) — same data as the PyTorch var_input; the torch.permute
    # to NCL is absorbed into the channels-last layout.
    B, T, C_in = x.shape
    K0, S0 = 29, 13
    K1, S1 = 15, 7
    K2, S2 = 3, 1
    L0 = (T - K0) // S0 + 1
    L1 = (L0 - K1) // S1 + 1
    L2 = (L1 - K2) // S2 + 1
    assert L0 >= K1 and L1 >= K2 and L2 >= 1, \
        "time dimension too short for the stride-13/7/1 conv chain"
    O = params["wl"].shape[-1]

    BB = min(B, 8)                         # batch block folded into matmul M dims
    nb = -(-B // BB)
    Bp = nb * BB

    # -------- zero-cost prep (plain XLA inside the same jit) --------
    # Fold eval-mode BatchNorm1d (per-channel affine) into conv0.
    scale = params["bn_scale"][0]                       # (C_in,)
    shift = params["bn_shift"][0]                       # (C_in,)
    w0 = params["w0"] * scale[None, :, None]            # (K0, C_in, 128)
    b0 = params["b0"] + jnp.einsum("kic,i->c", params["w0"], shift)[None, :]

    CK = K0 * C_in
    CKp = -(-CK // 128) * 128                           # pad contraction to lanes
    w0_col = w0.reshape(CK, 128)
    if CKp > CK:
        w0_col = jnp.pad(w0_col, ((0, CKp - CK), (0, 0)))
    w0_col = w0_col.astype(jnp.bfloat16)

    # conv0 im2col at the (duplicated) positions conv1 needs, rows ordered
    # (k1, b_local, l1) within each batch block.
    span = (L0 - 1) * S0 + 1
    cols = [x[:, k0: k0 + span: S0, :] for k0 in range(K0)]
    xcol = jnp.concatenate(cols, axis=-1)               # (B, L0, CK), cols (k0, c)
    pos = jnp.array([l1 * S1 + k1 for k1 in range(K1) for l1 in range(L1)],
                    dtype=jnp.int32)
    xg = xcol[:, pos, :]                                # (B, K1*L1, CK)
    if Bp > B:
        xg = jnp.pad(xg, ((0, Bp - B), (0, 0), (0, 0)))
    xg = (xg.reshape(nb, BB, K1, L1, CK)
            .transpose(0, 2, 1, 3, 4)
            .reshape(nb, K1 * BB * L1, CK))
    if CKp > CK:
        xg = jnp.pad(xg, ((0, 0), (0, 0), (0, CKp - CK)))
    x_col = xg.astype(jnp.bfloat16)                     # (nb, M0, CKp)
    M0 = K1 * BB * L1

    w1_flat = params["w1"].reshape(K1 * 128, 256).astype(jnp.bfloat16)
    w2_flat = params["w2"].reshape(K2 * 256, 512).astype(jnp.bfloat16)
    wl = params["wl"].astype(jnp.bfloat16)

    kernel = functools.partial(_fused_kernel, BB=BB, K1=K1, K2=K2, L1=L1, L2=L2)

    out = pl.pallas_call(
        kernel,
        out_shape=jax.ShapeDtypeStruct((Bp, O), jnp.float32),
        grid=(nb,),
        in_specs=[
            pl.BlockSpec((None, M0, CKp), lambda i: (i, 0, 0)),   # x_col block
            pl.BlockSpec((CKp, 128), lambda i: (0, 0)),           # w0 (BN folded)
            pl.BlockSpec((1, 128), lambda i: (0, 0)),             # b0
            pl.BlockSpec(memory_space=pl.ANY),                    # w1 (manual DMA)
            pl.BlockSpec((1, 256), lambda i: (0, 0)),             # b1
            pl.BlockSpec(memory_space=pl.ANY),                    # w2 (manual DMA)
            pl.BlockSpec((1, 512), lambda i: (0, 0)),             # b2
            pl.BlockSpec(memory_space=pl.ANY),                    # wl (manual DMA)
            pl.BlockSpec((1, O), lambda i: (0, 0)),               # bl
        ],
        out_specs=pl.BlockSpec((BB, O), lambda i: (i, 0)),
        scratch_shapes=[
            pltpu.VMEM((BB * L1, K1 * 128), jnp.bfloat16),   # conv1 im2col
            pltpu.VMEM((K1 * 128, 256), jnp.bfloat16),       # w1
            pltpu.VMEM((K2 * 256, 512), jnp.bfloat16),       # w2
            pltpu.VMEM((512, O), jnp.bfloat16),              # wl
            pltpu.SemaphoreType.DMA((3,)),
        ],
        # "arbitrary": grid steps run sequentially on one core, so the
        # step-0-only weight DMAs stay valid for later steps; also avoids
        # duplicating the dominant weight fetch across v7x's TensorCores
        # for tiny batches.
        compiler_params=pltpu.CompilerParams(
            dimension_semantics=("arbitrary",)),
    )(x_col, w0_col, b0, w1_flat, params["b1"], w2_flat, params["b2"],
      wl, params["bl"])
    return out[:B]


# ----------------------------- pure-JAX reference ----------------------------
def _ref_forward(params, x):
    scale = params["bn_scale"][0]
    shift = params["bn_shift"][0]
    h = x * scale[None, None, :] + shift[None, None, :]       # eval-mode BN
    h = jnp.transpose(h, (0, 2, 1))                           # (B, C, T)

    def conv(h, w_kio, b, stride):
        w = jnp.transpose(w_kio, (2, 1, 0))                   # (C_out, C_in, K)
        y = jax.lax.conv_general_dilated(
            h, w, (stride,), "VALID",
            dimension_numbers=("NCW", "OIW", "NCW"))
        return jnp.maximum(y + b[0][None, :, None], 0.0)

    h = conv(h, params["w0"], params["b0"], 13)
    h = conv(h, params["w1"], params["b1"], 7)
    h = conv(h, params["w2"], params["b2"], 1)
    m = jnp.mean(h, axis=-1)                                  # (B, 512)
    return m @ params["wl"] + params["bl"]


# ----------------------------- parameters ------------------------------------
def init_params(key, dim_input, dim_output=512):
    ks = jax.random.split(key, 8)

    def xavier(k, shape, fan_in, fan_out):
        bound = math.sqrt(6.0 / (fan_in + fan_out))
        return jax.random.uniform(k, shape, jnp.float32, -bound, bound)

    def bias_init(k, shape, fan_in):
        bound = 1.0 / math.sqrt(fan_in)
        return jax.random.uniform(k, shape, jnp.float32, -bound, bound)

    eps = 1e-5
    # BatchNorm1d eval: gamma=1, beta=0, running_mean=0, running_var=1.
    bn_scale = jnp.full((1, dim_input), 1.0 / math.sqrt(1.0 + eps), jnp.float32)
    bn_shift = jnp.zeros((1, dim_input), jnp.float32)

    return {
        "bn_scale": bn_scale,
        "bn_shift": bn_shift,
        # Conv1d(dim_input, 128, 29, stride=13) — stored (K, C_in, C_out)
        "w0": xavier(ks[0], (29, dim_input, 128), dim_input * 29, 128 * 29),
        "b0": bias_init(ks[1], (1, 128), dim_input * 29),
        # Conv1d(128, 256, 15, stride=7)
        "w1": xavier(ks[2], (15, 128, 256), 128 * 15, 256 * 15),
        "b1": bias_init(ks[3], (1, 256), 128 * 15),
        # Conv1d(256, 512, 3, stride=1)
        "w2": xavier(ks[4], (3, 256, 512), 256 * 3, 512 * 3),
        "b2": bias_init(ks[5], (1, 512), 256 * 3),
        # Linear(512, 512) — stored (in, out)
        "wl": xavier(ks[6], (512, dim_output), 512, dim_output),
        "bl": bias_init(ks[7], (1, dim_output), 512),
    }


if __name__ == "__main__":
    # The stride-13/7/1 conv chain needs T >= 393 for a non-empty output.
    B, T, C_IN = 2, 500, 16
    key = jax.random.PRNGKey(0)
    kx, kp = jax.random.split(key)
    x = jax.random.normal(kx, (B, T, C_IN), dtype=jnp.float32)
    params = init_params(kp, C_IN)

    out = jax.jit(cnn_1d_forward)(params, x)
    out = jax.block_until_ready(out)
    assert out.shape == (B, 512) and out.dtype == jnp.float32

    ref = _ref_forward(params, x)
    err = float(jnp.max(jnp.abs(out - ref)))
    tol = 0.05 * float(jnp.max(jnp.abs(ref))) + 0.05   # bf16 MXU inputs
    assert err <= tol, f"kernel/ref mismatch: max_abs_err={err} > tol={tol}"
    print("KERNEL_OK")
</pallas_src>

<mosaic_0001>
module attributes {stable_mosaic.version = 11 : i64} {
  func.func @_fused_kernel(%arg0: i32, %arg1: memref<1x120x512xbf16, #tpu.memory_space<vmem>>, %arg2: memref<512x128xbf16, #tpu.memory_space<vmem>>, %arg3: memref<1x128xf32, #tpu.memory_space<vmem>>, %arg4: memref<1920x256xbf16, #tpu.memory_space<any>>, %arg5: memref<1x256xf32, #tpu.memory_space<vmem>>, %arg6: memref<768x512xbf16, #tpu.memory_space<any>>, %arg7: memref<1x512xf32, #tpu.memory_space<vmem>>, %arg8: memref<512x512xbf16, #tpu.memory_space<any>>, %arg9: memref<1x512xf32, #tpu.memory_space<vmem>>, %arg10: memref<2x512xf32, #tpu.memory_space<vmem>>, %arg11: memref<8x1920xbf16, #tpu.memory_space<vmem>>, %arg12: memref<1920x256xbf16, #tpu.memory_space<vmem>>, %arg13: memref<768x512xbf16, #tpu.memory_space<vmem>>, %arg14: memref<512x512xbf16, #tpu.memory_space<vmem>>, %arg15: memref<3x!tpu.dma_semaphore, #tpu.memory_space<semaphore_mem>>) attributes {dimension_semantics = [#tpu.dimension_semantics<arbitrary>], iteration_bounds = array<i64: 1>, scalar_prefetch = 0 : i64, scratch_operands = 5 : i64, tpu.core_type = #tpu.core_type<tc>, window_params = [{transform_indices = @transform_0, window_bounds = array<i64: 1, 120, 512>}, {pipeline_mode = #tpu.pipeline_mode<synchronous>, transform_indices = @transform_1, window_bounds = array<i64: 512, 128>}, {pipeline_mode = #tpu.pipeline_mode<synchronous>, transform_indices = @transform_2, window_bounds = array<i64: 1, 128>}, {}, {pipeline_mode = #tpu.pipeline_mode<synchronous>, transform_indices = @transform_4, window_bounds = array<i64: 1, 256>}, {}, {pipeline_mode = #tpu.pipeline_mode<synchronous>, transform_indices = @transform_6, window_bounds = array<i64: 1, 512>}, {}, {pipeline_mode = #tpu.pipeline_mode<synchronous>, transform_indices = @transform_8, window_bounds = array<i64: 1, 512>}, {transform_indices = @transform_9, window_bounds = array<i64: 2, 512>}]} {
    %c0_i32 = arith.constant 0 : i32
    %0 = arith.cmpi eq, %arg0, %c0_i32 : i32
    %1 = arith.extui %0 : i1 to i32
    %c0_i32_0 = arith.constant 0 : i32
    %2 = arith.cmpi ne, %1, %c0_i32_0 : i32
    scf.if %2 {
      %c0_i32_52 = arith.constant 0 : i32
      %93 = tpu.memref_slice %arg15[%c0_i32_52] : memref<3x!tpu.dma_semaphore, #tpu.memory_space<semaphore_mem>> -> memref<1x!tpu.dma_semaphore, #tpu.memory_space<semaphore_mem>>
      %94 = tpu.memref_squeeze %93 : memref<1x!tpu.dma_semaphore, #tpu.memory_space<semaphore_mem>> -> memref<!tpu.dma_semaphore, #tpu.memory_space<semaphore_mem>>
      tpu.enqueue_dma source(%arg4 : memref<1920x256xbf16, #tpu.memory_space<any>>) target(%arg12 : memref<1920x256xbf16, #tpu.memory_space<vmem>>) target_semaphore(%94 : memref<!tpu.dma_semaphore, #tpu.memory_space<semaphore_mem>>)
      %c1_i32 = arith.constant 1 : i32
      %95 = tpu.memref_slice %arg15[%c1_i32] : memref<3x!tpu.dma_semaphore, #tpu.memory_space<semaphore_mem>> -> memref<1x!tpu.dma_semaphore, #tpu.memory_space<semaphore_mem>>
      %96 = tpu.memref_squeeze %95 : memref<1x!tpu.dma_semaphore, #tpu.memory_space<semaphore_mem>> -> memref<!tpu.dma_semaphore, #tpu.memory_space<semaphore_mem>>
      tpu.enqueue_dma source(%arg6 : memref<768x512xbf16, #tpu.memory_space<any>>) target(%arg13 : memref<768x512xbf16, #tpu.memory_space<vmem>>) target_semaphore(%96 : memref<!tpu.dma_semaphore, #tpu.memory_space<semaphore_mem>>)
      %c2_i32 = arith.constant 2 : i32
      %97 = tpu.memref_slice %arg15[%c2_i32] : memref<3x!tpu.dma_semaphore, #tpu.memory_space<semaphore_mem>> -> memref<1x!tpu.dma_semaphore, #tpu.memory_space<semaphore_mem>>
      %98 = tpu.memref_squeeze %97 : memref<1x!tpu.dma_semaphore, #tpu.memory_space<semaphore_mem>> -> memref<!tpu.dma_semaphore, #tpu.memory_space<semaphore_mem>>
      tpu.enqueue_dma source(%arg8 : memref<512x512xbf16, #tpu.memory_space<any>>) target(%arg14 : memref<512x512xbf16, #tpu.memory_space<vmem>>) target_semaphore(%98 : memref<!tpu.dma_semaphore, #tpu.memory_space<semaphore_mem>>)
    } else {
    }
    %c0 = arith.constant 0 : index
    %c0_1 = arith.constant 0 : index
    %c0_2 = arith.constant 0 : index
    %3 = vector.load %arg1[%c0, %c0_1, %c0_2] : memref<1x120x512xbf16, #tpu.memory_space<vmem>>, vector<1x120x512xbf16>
    %4 = vector.shape_cast %3 : vector<1x120x512xbf16> to vector<120x512xbf16>
    %c0_3 = arith.constant 0 : index
    %c0_4 = arith.constant 0 : index
    %5 = vector.load %arg2[%c0_3, %c0_4] : memref<512x128xbf16, #tpu.memory_space<vmem>>, vector<512x128xbf16>
    %cst = arith.constant dense<0.000000e+00> : vector<120x128xf32>
    %6 = tpu.matmul %4, %5, %cst {dimension_numbers = #tpu.dot_dimension_numbers<[1], [0], [0], [1], [0, 0, 1, 1], [], []>} : vector<120x512xbf16>, vector<512x128xbf16>, vector<120x128xf32> -> vector<120x128xf32>
    %c0_5 = arith.constant 0 : index
    %c0_6 = arith.constant 0 : index
    %7 = vector.load %arg3[%c0_5, %c0_6] : memref<1x128xf32, #tpu.memory_space<vmem>>, vector<1x128xf32>
    %8 = vector.broadcast %7 : vector<1x128xf32> to vector<120x128xf32>
    %9 = arith.addf %6, %8 : vector<120x128xf32>
    %cst_7 = arith.constant 0.000000e+00 : f32
    %10 = vector.broadcast %cst_7 : f32 to vector<120x128xf32>
    %11 = arith.maximumf %9, %10 : vector<120x128xf32>
    %12 = arith.truncf %11 : vector<120x128xf32> to vector<120x128xbf16>
    %13 = vector.extract_strided_slice %12 {offsets = [0, 0], sizes = [8, 128], strides = [1, 1]} : vector<120x128xbf16> to vector<8x128xbf16>
    %c0_8 = arith.constant 0 : index
    %c0_9 = arith.constant 0 : index
    %14 = vector.load %arg11[%c0_8, %c0_9] : memref<8x1920xbf16, #tpu.memory_space<vmem>>, vector<8x128xbf16>
    tpu.vector_store %arg11[%c0_8, %c0_9], %13 {strides = array<i32>} : memref<8x1920xbf16, #tpu.memory_space<vmem>>, vector<8x128xbf16>,
    %15 = vector.extract_strided_slice %12 {offsets = [8, 0], sizes = [8, 128], strides = [1, 1]} : vector<120x128xbf16> to vector<8x128xbf16>
    %c0_10 = arith.constant 0 : index
    %c128 = arith.constant 128 : index
    %16 = vector.load %arg11[%c0_10, %c128] : memref<8x1920xbf16, #tpu.memory_space<vmem>>, vector<8x128xbf16>
    tpu.vector_store %arg11[%c0_10, %c128], %15 {strides = array<i32>} : memref<8x1920xbf16, #tpu.memory_space<vmem>>, vector<8x128xbf16>,
    %17 = vector.extract_strided_slice %12 {offsets = [16, 0], sizes = [8, 128], strides = [1, 1]} : vector<120x128xbf16> to vector<8x128xbf16>
    %c0_11 = arith.constant 0 : index
    %c256 = arith.constant 256 : index
    %18 = vector.load %arg11[%c0_11, %c256] : memref<8x1920xbf16, #tpu.memory_space<vmem>>, vector<8x128xbf16>
    tpu.vector_store %arg11[%c0_11, %c256], %17 {strides = array<i32>} : memref<8x1920xbf16, #tpu.memory_space<vmem>>, vector<8x128xbf16>,
    %19 = vector.extract_strided_slice %12 {offsets = [24, 0], sizes = [8, 128], strides = [1, 1]} : vector<120x128xbf16> to vector<8x128xbf16>
    %c0_12 = arith.constant 0 : index
    %c384 = arith.constant 384 : index
    %20 = vector.load %arg11[%c0_12, %c384] : memref<8x1920xbf16, #tpu.memory_space<vmem>>, vector<8x128xbf16>
    tpu.vector_store %arg11[%c0_12, %c384], %19 {strides = array<i32>} : memref<8x1920xbf16, #tpu.memory_space<vmem>>, vector<8x128xbf16>,
    %21 = vector.extract_strided_slice %12 {offsets = [32, 0], sizes = [8, 128], strides = [1, 1]} : vector<120x128xbf16> to vector<8x128xbf16>
    %c0_13 = arith.constant 0 : index
    %c512 = arith.constant 512 : index
    %22 = vector.load %arg11[%c0_13, %c512] : memref<8x1920xbf16, #tpu.memory_space<vmem>>, vector<8x128xbf16>
    tpu.vector_store %arg11[%c0_13, %c512], %21 {strides = array<i32>} : memref<8x1920xbf16, #tpu.memory_space<vmem>>, vector<8x128xbf16>,
    %23 = vector.extract_strided_slice %12 {offsets = [40, 0], sizes = [8, 128], strides = [1, 1]} : vector<120x128xbf16> to vector<8x128xbf16>
    %c0_14 = arith.constant 0 : index
    %c640 = arith.constant 640 : index
    %24 = vector.load %arg11[%c0_14, %c640] : memref<8x1920xbf16, #tpu.memory_space<vmem>>, vector<8x128xbf16>
    tpu.vector_store %arg11[%c0_14, %c640], %23 {strides = array<i32>} : memref<8x1920xbf16, #tpu.memory_space<vmem>>, vector<8x128xbf16>,
    %25 = vector.extract_strided_slice %12 {offsets = [48, 0], sizes = [8, 128], strides = [1, 1]} : vector<120x128xbf16> to vector<8x128xbf16>
    %c0_15 = arith.constant 0 : index
    %c768 = arith.constant 768 : index
    %26 = vector.load %arg11[%c0_15, %c768] : memref<8x1920xbf16, #tpu.memory_space<vmem>>, vector<8x128xbf16>
    tpu.vector_store %arg11[%c0_15, %c768], %25 {strides = array<i32>} : memref<8x1920xbf16, #tpu.memory_space<vmem>>, vector<8x128xbf16>,
    %27 = vector.extract_strided_slice %12 {offsets = [56, 0], sizes = [8, 128], strides = [1, 1]} : vector<120x128xbf16> to vector<8x128xbf16>
    %c0_16 = arith.constant 0 : index
    %c896 = arith.constant 896 : index
    %28 = vector.load %arg11[%c0_16, %c896] : memref<8x1920xbf16, #tpu.memory_space<vmem>>, vector<8x128xbf16>
    tpu.vector_store %arg11[%c0_16, %c896], %27 {strides = array<i32>} : memref<8x1920xbf16, #tpu.memory_space<vmem>>, vector<8x128xbf16>,
    %29 = vector.extract_strided_slice %12 {offsets = [64, 0], sizes = [8, 128], strides = [1, 1]} : vector<120x128xbf16> to vector<8x128xbf16>
    %c0_17 = arith.constant 0 : index
    %c1024 = arith.constant 1024 : index
    %30 = vector.load %arg11[%c0_17, %c1024] : memref<8x1920xbf16, #tpu.memory_space<vmem>>, vector<8x128xbf16>
    tpu.vector_store %arg11[%c0_17, %c1024], %29 {strides = array<i32>} : memref<8x1920xbf16, #tpu.memory_space<vmem>>, vector<8x128xbf16>,
    %31 = vector.extract_strided_slice %12 {offsets = [72, 0], sizes = [8, 128], strides = [1, 1]} : vector<120x128xbf16> to vector<8x128xbf16>
    %c0_18 = arith.constant 0 : index
    %c1152 = arith.constant 1152 : index
    %32 = vector.load %arg11[%c0_18, %c1152] : memref<8x1920xbf16, #tpu.memory_space<vmem>>, vector<8x128xbf16>
    tpu.vector_store %arg11[%c0_18, %c1152], %31 {strides = array<i32>} : memref<8x1920xbf16, #tpu.memory_space<vmem>>, vector<8x128xbf16>,
    %33 = vector.extract_strided_slice %12 {offsets = [80, 0], sizes = [8, 128], strides = [1, 1]} : vector<120x128xbf16> to vector<8x128xbf16>
    %c0_19 = arith.constant 0 : index
    %c1280 = arith.constant 1280 : index
    %34 = vector.load %arg11[%c0_19, %c1280] : memref<8x1920xbf16, #tpu.memory_space<vmem>>, vector<8x128xbf16>
    tpu.vector_store %arg11[%c0_19, %c1280], %33 {strides = array<i32>} : memref<8x1920xbf16, #tpu.memory_space<vmem>>, vector<8x128xbf16>,
    %35 = vector.extract_strided_slice %12 {offsets = [88, 0], sizes = [8, 128], strides = [1, 1]} : vector<120x128xbf16> to vector<8x128xbf16>
    %c0_20 = arith.constant 0 : index
    %c1408 = arith.constant 1408 : index
    %36 = vector.load %arg11[%c0_20, %c1408] : memref<8x1920xbf16, #tpu.memory_space<vmem>>, vector<8x128xbf16>
    tpu.vector_store %arg11[%c0_20, %c1408], %35 {strides = array<i32>} : memref<8x1920xbf16, #tpu.memory_space<vmem>>, vector<8x128xbf16>,
    %37 = vector.extract_strided_slice %12 {offsets = [96, 0], sizes = [8, 128], strides = [1, 1]} : vector<120x128xbf16> to vector<8x128xbf16>
    %c0_21 = arith.constant 0 : index
    %c1536 = arith.constant 1536 : index
    %38 = vector.load %arg11[%c0_21, %c1536] : memref<8x1920xbf16, #tpu.memory_space<vmem>>, vector<8x128xbf16>
    tpu.vector_store %arg11[%c0_21, %c1536], %37 {strides = array<i32>} : memref<8x1920xbf16, #tpu.memory_space<vmem>>, vector<8x128xbf16>,
    %39 = vector.extract_strided_slice %12 {offsets = [104, 0], sizes = [8, 128], strides = [1, 1]} : vector<120x128xbf16> to vector<8x128xbf16>
    %c0_22 = arith.constant 0 : index
    %c1664 = arith.constant 1664 : index
    %40 = vector.load %arg11[%c0_22, %c1664] : memref<8x1920xbf16, #tpu.memory_space<vmem>>, vector<8x128xbf16>
    tpu.vector_store %arg11[%c0_22, %c1664], %39 {strides = array<i32>} : memref<8x1920xbf16, #tpu.memory_space<vmem>>, vector<8x128xbf16>,
    %41 = vector.extract_strided_slice %12 {offsets = [112, 0], sizes = [8, 128], strides = [1, 1]} : vector<120x128xbf16> to vector<8x128xbf16>
    %c0_23 = arith.constant 0 : index
    %c1792 = arith.constant 1792 : index
    %42 = vector.load %arg11[%c0_23, %c1792] : memref<8x1920xbf16, #tpu.memory_space<vmem>>, vector<8x128xbf16>
    tpu.vector_store %arg11[%c0_23, %c1792], %41 {strides = array<i32>} : memref<8x1920xbf16, #tpu.memory_space<vmem>>, vector<8x128xbf16>,
    %43 = arith.extui %0 : i1 to i32
    %c0_i32_24 = arith.constant 0 : i32
    %44 = arith.cmpi ne, %43, %c0_i32_24 : i32
    scf.if %44 {
      %c0_i32_52 = arith.constant 0 : i32
      %93 = tpu.memref_slice %arg15[%c0_i32_52] : memref<3x!tpu.dma_semaphore, #tpu.memory_space<semaphore_mem>> -> memref<1x!tpu.dma_semaphore, #tpu.memory_space<semaphore_mem>>
      %94 = tpu.memref_squeeze %93 : memref<1x!tpu.dma_semaphore, #tpu.memory_space<semaphore_mem>> -> memref<!tpu.dma_semaphore, #tpu.memory_space<semaphore_mem>>
      tpu.wait_dma2 semaphore(%94 : memref<!tpu.dma_semaphore, #tpu.memory_space<semaphore_mem>>) src(%arg4 : memref<1920x256xbf16, #tpu.memory_space<any>>) dst(%arg12 : memref<1920x256xbf16, #tpu.memory_space<vmem>>)
    } else {
    }
    %c0_25 = arith.constant 0 : index
    %c0_26 = arith.constant 0 : index
    %45 = vector.load %arg11[%c0_25, %c0_26] : memref<8x1920xbf16, #tpu.memory_space<vmem>>, vector<8x1920xbf16>
    %c0_27 = arith.constant 0 : index
    %c0_28 = arith.constant 0 : index
    %46 = vector.load %arg12[%c0_27, %c0_28] : memref<1920x256xbf16, #tpu.memory_space<vmem>>, vector<1920x256xbf16>
    %cst_29 = arith.constant dense<0.000000e+00> : vector<8x256xf32>
    %47 = tpu.matmul %45, %46, %cst_29 {dimension_numbers = #tpu.dot_dimension_numbers<[1], [0], [0], [1], [0, 0, 1, 1], [], []>} : vector<8x1920xbf16>, vector<1920x256xbf16>, vector<8x256xf32> -> vector<8x256xf32>
    %c0_30 = arith.constant 0 : index
    %c0_31 = arith.constant 0 : index
    %48 = vector.load %arg5[%c0_30, %c0_31] : memref<1x256xf32, #tpu.memory_space<vmem>>, vector<1x256xf32>
    %49 = vector.broadcast %48 : vector<1x256xf32> to vector<8x256xf32>
    %50 = arith.addf %47, %49 : vector<8x256xf32>
    %cst_32 = arith.constant 0.000000e+00 : f32
    %51 = vector.broadcast %cst_32 : f32 to vector<8x256xf32>
    %52 = arith.maximumf %50, %51 : vector<8x256xf32>
    %53 = vector.extract_strided_slice %52 {offsets = [0, 0], sizes = [2, 256], strides = [1, 1]} : vector<8x256xf32> to vector<2x256xf32>
    %54 = vector.extract_strided_slice %52 {offsets = [4, 0], sizes = [2, 256], strides = [1, 1]} : vector<8x256xf32> to vector<2x256xf32>
    %55 = tpu.concatenate %53, %54 in 0 : vector<2x256xf32>, vector<2x256xf32> -> vector<4x256xf32>
    %56 = vector.extract_strided_slice %52 {offsets = [1, 0], sizes = [2, 256], strides = [1, 1]} : vector<8x256xf32> to vector<2x256xf32>
    %57 = vector.extract_strided_slice %52 {offsets = [5, 0], sizes = [2, 256], strides = [1, 1]} : vector<8x256xf32> to vector<2x256xf32>
    %58 = tpu.concatenate %56, %57 in 0 : vector<2x256xf32>, vector<2x256xf32> -> vector<4x256xf32>
    %59 = vector.extract_strided_slice %52 {offsets = [2, 0], sizes = [2, 256], strides = [1, 1]} : vector<8x256xf32> to vector<2x256xf32>
    %60 = vector.extract_strided_slice %52 {offsets = [6, 0], sizes = [2, 256], strides = [1, 1]} : vector<8x256xf32> to vector<2x256xf32>
    %61 = tpu.concatenate %59, %60 in 0 : vector<2x256xf32>, vector<2x256xf32> -> vector<4x256xf32>
    %62 = tpu.concatenate %55, %58, %61 in 1 : vector<4x256xf32>, vector<4x256xf32>, vector<4x256xf32> -> vector<4x768xf32>
    %63 = arith.truncf %62 : vector<4x768xf32> to vector<4x768xbf16>
    %64 = arith.extui %0 : i1 to i32
    %c0_i32_33 = arith.constant 0 : i32
    %65 = arith.cmpi ne, %64, %c0_i32_33 : i32
    scf.if %65 {
      %c1_i32 = arith.constant 1 : i32
      %93 = tpu.memref_slice %arg15[%c1_i32] : memref<3x!tpu.dma_semaphore, #tpu.memory_space<semaphore_mem>> -> memref<1x!tpu.dma_semaphore, #tpu.memory_space<semaphore_mem>>
      %94 = tpu.memref_squeeze %93 : memref<1x!tpu.dma_semaphore, #tpu.memory_space<semaphore_mem>> -> memref<!tpu.dma_semaphore, #tpu.memory_space<semaphore_mem>>
      tpu.wait_dma2 semaphore(%94 : memref<!tpu.dma_semaphore, #tpu.memory_space<semaphore_mem>>) src(%arg6 : memref<768x512xbf16, #tpu.memory_space<any>>) dst(%arg13 : memref<768x512xbf16, #tpu.memory_space<vmem>>)
    } else {
    }
    %c0_34 = arith.constant 0 : index
    %c0_35 = arith.constant 0 : index
    %66 = vector.load %arg13[%c0_34, %c0_35] : memref<768x512xbf16, #tpu.memory_space<vmem>>, vector<768x512xbf16>
    %cst_36 = arith.constant dense<0.000000e+00> : vector<4x512xf32>
    %67 = tpu.matmul %63, %66, %cst_36 {dimension_numbers = #tpu.dot_dimension_numbers<[1], [0], [0], [1], [0, 0, 1, 1], [], []>} : vector<4x768xbf16>, vector<768x512xbf16>, vector<4x512xf32> -> vector<4x512xf32>
    %c0_37 = arith.constant 0 : index
    %c0_38 = arith.constant 0 : index
    %68 = vector.load %arg7[%c0_37, %c0_38] : memref<1x512xf32, #tpu.memory_space<vmem>>, vector<1x512xf32>
    %69 = vector.broadcast %68 : vector<1x512xf32> to vector<4x512xf32>
    %70 = arith.addf %67, %69 : vector<4x512xf32>
    %cst_39 = arith.constant 0.000000e+00 : f32
    %71 = vector.broadcast %cst_39 : f32 to vector<4x512xf32>
    %72 = arith.maximumf %70, %71 : vector<4x512xf32>
    %73 = vector.extract_strided_slice %72 {offsets = [0, 0], sizes = [2, 512], strides = [1, 1]} : vector<4x512xf32> to vector<2x512xf32>
    %cst_40 = arith.constant dense<0.000000e+00> : vector<512xf32>
    %74 = vector.multi_reduction <add>, %73, %cst_40 [0] : vector<2x512xf32> to vector<512xf32>
    %75 = vector.shape_cast %74 : vector<512xf32> to vector<1x512xf32>
    %cst_41 = arith.constant 2.000000e+00 : f32
    %76 = vector.broadcast %cst_41 : f32 to vector<1x512xf32>
    %77 = arith.divf %75, %76 : vector<1x512xf32>
    %78 = vector.extract_strided_slice %72 {offsets = [2, 0], sizes = [2, 512], strides = [1, 1]} : vector<4x512xf32> to vector<2x512xf32>
    %cst_42 = arith.constant dense<0.000000e+00> : vector<512xf32>
    %79 = vector.multi_reduction <add>, %78, %cst_42 [0] : vector<2x512xf32> to vector<512xf32>
    %80 = vector.shape_cast %79 : vector<512xf32> to vector<1x512xf32>
    %cst_43 = arith.constant 2.000000e+00 : f32
    %81 = vector.broadcast %cst_43 : f32 to vector<1x512xf32>
    %82 = arith.divf %80, %81 : vector<1x512xf32>
    %83 = tpu.concatenate %77, %82 in 0 : vector<1x512xf32>, vector<1x512xf32> -> vector<2x512xf32>
    %84 = arith.extui %0 : i1 to i32
    %c0_i32_44 = arith.constant 0 : i32
    %85 = arith.cmpi ne, %84, %c0_i32_44 : i32
    scf.if %85 {
      %c2_i32 = arith.constant 2 : i32
      %93 = tpu.memref_slice %arg15[%c2_i32] : memref<3x!tpu.dma_semaphore, #tpu.memory_space<semaphore_mem>> -> memref<1x!tpu.dma_semaphore, #tpu.memory_space<semaphore_mem>>
      %94 = tpu.memref_squeeze %93 : memref<1x!tpu.dma_semaphore, #tpu.memory_space<semaphore_mem>> -> memref<!tpu.dma_semaphore, #tpu.memory_space<semaphore_mem>>
      tpu.wait_dma2 semaphore(%94 : memref<!tpu.dma_semaphore, #tpu.memory_space<semaphore_mem>>) src(%arg8 : memref<512x512xbf16, #tpu.memory_space<any>>) dst(%arg14 : memref<512x512xbf16, #tpu.memory_space<vmem>>)
    } else {
    }
    %86 = arith.truncf %83 : vector<2x512xf32> to vector<2x512xbf16>
    %c0_45 = arith.constant 0 : index
    %c0_46 = arith.constant 0 : index
    %87 = vector.load %arg14[%c0_45, %c0_46] : memref<512x512xbf16, #tpu.memory_space<vmem>>, vector<512x512xbf16>
    %cst_47 = arith.constant dense<0.000000e+00> : vector<2x512xf32>
    %88 = tpu.matmul %86, %87, %cst_47 {dimension_numbers = #tpu.dot_dimension_numbers<[1], [0], [0], [1], [0, 0, 1, 1], [], []>} : vector<2x512xbf16>, vector<512x512xbf16>, vector<2x512xf32> -> vector<2x512xf32>
    %c0_48 = arith.constant 0 : index
    %c0_49 = arith.constant 0 : index
    %89 = vector.load %arg9[%c0_48, %c0_49] : memref<1x512xf32, #tpu.memory_space<vmem>>, vector<1x512xf32>
    %90 = vector.broadcast %89 : vector<1x512xf32> to vector<2x512xf32>
    %91 = arith.addf %88, %90 : vector<2x512xf32>
    %c0_50 = arith.constant 0 : index
    %c0_51 = arith.constant 0 : index
    %92 = vector.load %arg10[%c0_50, %c0_51] : memref<2x512xf32, #tpu.memory_space<vmem>>, vector<2x512xf32>
    tpu.vector_store %arg10[%c0_50, %c0_51], %91 {strides = array<i32>} : memref<2x512xf32, #tpu.memory_space<vmem>>, vector<2x512xf32>,
    return
  }
  func.func @transform_0(%arg0: i32) -> (i32, i32, i32) {
    %c0_i32 = arith.constant 0 : i32
    %c0_i32_0 = arith.constant 0 : i32
    %c0_i32_1 = arith.constant 0 : i32
    return %arg0, %c0_i32, %c0_i32_0 : i32, i32, i32
  }
  func.func @transform_1(%arg0: i32) -> (i32, i32) {
    %c0_i32 = arith.constant 0 : i32
    %c0_i32_0 = arith.constant 0 : i32
    %c0_i32_1 = arith.constant 0 : i32
    return %c0_i32, %c0_i32_0 : i32, i32
  }
  func.func @transform_2(%arg0: i32) -> (i32, i32) {
    %c0_i32 = arith.constant 0 : i32
    %c0_i32_0 = arith.constant 0 : i32
    %c0_i32_1 = arith.constant 0 : i32
    return %c0_i32, %c0_i32_0 : i32, i32
  }
  func.func @transform_4(%arg0: i32) -> (i32, i32) {
    %c0_i32 = arith.constant 0 : i32
    %c0_i32_0 = arith.constant 0 : i32
    %c0_i32_1 = arith.constant 0 : i32
    return %c0_i32, %c0_i32_0 : i32, i32
  }
  func.func @transform_6(%arg0: i32) -> (i32, i32) {
    %c0_i32 = arith.constant 0 : i32
    %c0_i32_0 = arith.constant 0 : i32
    %c0_i32_1 = arith.constant 0 : i32
    return %c0_i32, %c0_i32_0 : i32, i32
  }
  func.func @transform_8(%arg0: i32) -> (i32, i32) {
    %c0_i32 = arith.constant 0 : i32
    %c0_i32_0 = arith.constant 0 : i32
    %c0_i32_1 = arith.constant 0 : i32
    return %c0_i32, %c0_i32_0 : i32, i32
  }
  func.func @transform_9(%arg0: i32) -> (i32, i32) {
    %c0_i32 = arith.constant 0 : i32
    %c0_i32_0 = arith.constant 0 : i32
    return %arg0, %c0_i32 : i32, i32
  }
}

</mosaic_0001>

<bundles_post_ra>
// kernel: cnn_1d_forward.1
= control target key start
LH: loop header
LB: loop body
LE: loop exit
PB: predicated region body
PF: predicated region fallthrough
CT: control target
= control target key end

     0   :  { %14 = vsyncpa [#allocation8], 0  ;;  %s11849_s0 = inlined_call_operand.vmem [shape: bf16[1,120,512], index: 0, kind: input, shape index: {}]   ;;  %s11850_s1 = inlined_call_operand.vmem [shape: bf16[512,128], index: 1, kind: input, shape index: {}]   ;;  %s11851_s2 = inlined_call_operand.vmem [shape: f32[1,128], index: 2, kind: input, shape index: {}]   ;;  %s11852_s3 = inlined_call_operand.vmem [shape: bf16[1920,256], index: 3, kind: input, shape index: {}]   ;;  %s11853_s4 = inlined_call_operand.vmem [shape: f32[1,256], index: 4, kind: input, shape index: {}]   ;;  %s11854_s5 = inlined_call_operand.vmem [shape: bf16[768,512], index: 5, kind: input, shape index: {}]   ;;  %s11855_s6 = inlined_call_operand.vmem [shape: f32[1,512], index: 6, kind: input, shape index: {}]   ;;  %s11856_s7 = inlined_call_operand.vmem [shape: bf16[512,512], index: 7, kind: input, shape index: {}]   ;;  %s11857_s8 = inlined_call_operand.vmem [shape: f32[1,512], index: 8, kind: input, shape index: {}]   ;;  %s11858_s9 = inlined_call_operand.hbm [shape: f32[2,512], index: 9, kind: output, shape index: {}]  }
   0x1   :  { %v41_v0 = vld [vmem:[%s11852_s3] sm:$0xff]  ;;  %v43_v1 = vld [vmem:[%s11852_s3 + $0x8] sm:$0xff]  ;;  %v45_v2 = vld [vmem:[%s11852_s3 + $0x10] sm:$0xff] }
   0x2   :  { %42 = vst [vmem:[#allocation3] sm:$0xff] %v41_v0  ;;  %v47_v3 = vld [vmem:[%s11852_s3 + $0x18] sm:$0xff]  ;;  %v49_v4 = vld [vmem:[%s11852_s3 + $0x20] sm:$0xff]  ;;  %v51_v5 = vld [vmem:[%s11852_s3 + $0x28] sm:$0xff] }
   0x3   :  { %44 = vst [vmem:[#allocation3 + $0x8] sm:$0xff] %v43_v1  ;;  %v53_v6 = vld [vmem:[%s11852_s3 + $0x30] sm:$0xff]  ;;  %v55_v7 = vld [vmem:[%s11852_s3 + $0x38] sm:$0xff]  ;;  %v57_v8 = vld [vmem:[%s11852_s3 + $0x40] sm:$0xff] }
   0x4   :  { %46 = vst [vmem:[#allocation3 + $0x10] sm:$0xff] %v45_v2  ;;  %v59_v9 = vld [vmem:[%s11852_s3 + $0x48] sm:$0xff]  ;;  %v61_v10 = vld [vmem:[%s11852_s3 + $0x50] sm:$0xff]  ;;  %v63_v11 = vld [vmem:[%s11852_s3 + $0x58] sm:$0xff] }
   0x5   :  { %48 = vst [vmem:[#allocation3 + $0x18] sm:$0xff] %v47_v3  ;;  %v65_v12 = vld [vmem:[%s11852_s3 + $0x60] sm:$0xff]  ;;  %v67_v13 = vld [vmem:[%s11852_s3 + $0x68] sm:$0xff]  ;;  %v69_v14 = vld [vmem:[%s11852_s3 + $0x70] sm:$0xff] }
   0x6   :  { %50 = vst [vmem:[#allocation3 + $0x20] sm:$0xff] %v49_v4  ;;  %v71_v15 = vld [vmem:[%s11852_s3 + $0x78] sm:$0xff]  ;;  %v73_v16 = vld [vmem:[%s11852_s3 + $0x80] sm:$0xff]  ;;  %v75_v17 = vld [vmem:[%s11852_s3 + $0x88] sm:$0xff] }
   0x7   :  { %52 = vst [vmem:[#allocation3 + $0x28] sm:$0xff] %v51_v5  ;;  %v77_v18 = vld [vmem:[%s11852_s3 + $0x90] sm:$0xff]  ;;  %v79_v19 = vld [vmem:[%s11852_s3 + $0x98] sm:$0xff]  ;;  %v81_v20 = vld [vmem:[%s11852_s3 + $0xa0] sm:$0xff] }
   0x8   :  { %54 = vst [vmem:[#allocation3 + $0x30] sm:$0xff] %v53_v6  ;;  %v83_v21 = vld [vmem:[%s11852_s3 + $0xa8] sm:$0xff]  ;;  %v85_v22 = vld [vmem:[%s11852_s3 + $0xb0] sm:$0xff]  ;;  %v87_v23 = vld [vmem:[%s11852_s3 + $0xb8] sm:$0xff] }
   0x9   :  { %56 = vst [vmem:[#allocation3 + $0x38] sm:$0xff] %v55_v7  ;;  %v89_v24 = vld [vmem:[%s11852_s3 + $0xc0] sm:$0xff]  ;;  %v91_v25 = vld [vmem:[%s11852_s3 + $0xc8] sm:$0xff]  ;;  %v93_v26 = vld [vmem:[%s11852_s3 + $0xd0] sm:$0xff] }
   0xa   :  { %58 = vst [vmem:[#allocation3 + $0x40] sm:$0xff] %v57_v8  ;;  %v95_v27 = vld [vmem:[%s11852_s3 + $0xd8] sm:$0xff]  ;;  %v97_v28 = vld [vmem:[%s11852_s3 + $0xe0] sm:$0xff]  ;;  %v99_v29 = vld [vmem:[%s11852_s3 + $0xe8] sm:$0xff] }
   0xb   :  { %60 = vst [vmem:[#allocation3 + $0x48] sm:$0xff] %v59_v9  ;;  %v101_v30 = vld [vmem:[%s11852_s3 + $0xf0] sm:$0xff]  ;;  %v103_v31 = vld [vmem:[%s11852_s3 + $0xf8] sm:$0xff]  ;;  %v105_v32 = vld [vmem:[%s11852_s3 + $0x100] sm:$0xff] }
   0xc   :  { %62 = vst [vmem:[#allocation3 + $0x50] sm:$0xff] %v61_v10  ;;  %v107_v33 = vld [vmem:[%s11852_s3 + $0x108] sm:$0xff]  ;;  %v109_v34 = vld [vmem:[%s11852_s3 + $0x110] sm:$0xff]  ;;  %v111_v35 = vld [vmem:[%s11852_s3 + $0x118] sm:$0xff] }
   0xd   :  { %64 = vst [vmem:[#allocation3 + $0x58] sm:$0xff] %v63_v11  ;;  %v113_v36 = vld [vmem:[%s11852_s3 + $0x120] sm:$0xff]  ;;  %v115_v37 = vld [vmem:[%s11852_s3 + $0x128] sm:$0xff]  ;;  %v117_v38 = vld [vmem:[%s11852_s3 + $0x130] sm:$0xff] }
   0xe   :  { %66 = vst [vmem:[#allocation3 + $0x60] sm:$0xff] %v65_v12  ;;  %v119_v39 = vld [vmem:[%s11852_s3 + $0x138] sm:$0xff]  ;;  %v121_v40 = vld [vmem:[%s11852_s3 + $0x140] sm:$0xff]  ;;  %v123_v41 = vld [vmem:[%s11852_s3 + $0x148] sm:$0xff] }
   0xf   :  { %68 = vst [vmem:[#allocation3 + $0x68] sm:$0xff] %v67_v13  ;;  %v125_v42 = vld [vmem:[%s11852_s3 + $0x150] sm:$0xff]  ;;  %v127_v43 = vld [vmem:[%s11852_s3 + $0x158] sm:$0xff]  ;;  %v129_v44 = vld [vmem:[%s11852_s3 + $0x160] sm:$0xff] }
  0x10   :  { %70 = vst [vmem:[#allocation3 + $0x70] sm:$0xff] %v69_v14  ;;  %v131_v45 = vld [vmem:[%s11852_s3 + $0x168] sm:$0xff]  ;;  %v133_v46 = vld [vmem:[%s11852_s3 + $0x170] sm:$0xff]  ;;  %v135_v47 = vld [vmem:[%s11852_s3 + $0x178] sm:$0xff] }
  0x11   :  { %72 = vst [vmem:[#allocation3 + $0x78] sm:$0xff] %v71_v15  ;;  %v137_v48 = vld [vmem:[%s11852_s3 + $0x180] sm:$0xff]  ;;  %v139_v49 = vld [vmem:[%s11852_s3 + $0x188] sm:$0xff]  ;;  %v141_v50 = vld [vmem:[%s11852_s3 + $0x190] sm:$0xff] }
  0x12   :  { %74 = vst [vmem:[#allocation3 + $0x80] sm:$0xff] %v73_v16  ;;  %v143_v51 = vld [vmem:[%s11852_s3 + $0x198] sm:$0xff]  ;;  %v145_v52 = vld [vmem:[%s11852_s3 + $0x1a0] sm:$0xff]  ;;  %v147_v53 = vld [vmem:[%s11852_s3 + $0x1a8] sm:$0xff] }
  0x13   :  { %76 = vst [vmem:[#allocation3 + $0x88] sm:$0xff] %v75_v17  ;;  %v149_v54 = vld [vmem:[%s11852_s3 + $0x1b0] sm:$0xff]  ;;  %v151_v55 = vld [vmem:[%s11852_s3 + $0x1b8] sm:$0xff]  ;;  %v153_v56 = vld [vmem:[%s11852_s3 + $0x1c0] sm:$0xff] }
  0x14   :  { %78 = vst [vmem:[#allocation3 + $0x90] sm:$0xff] %v77_v18  ;;  %v155_v57 = vld [vmem:[%s11852_s3 + $0x1c8] sm:$0xff]  ;;  %v157_v58 = vld [vmem:[%s11852_s3 + $0x1d0] sm:$0xff]  ;;  %v159_v59 = vld [vmem:[%s11852_s3 + $0x1d8] sm:$0xff] }
  0x15   :  { %80 = vst [vmem:[#allocation3 + $0x98] sm:$0xff] %v79_v19  ;;  %v161_v60 = vld [vmem:[%s11852_s3 + $0x1e0] sm:$0xff]  ;;  %v163_v61 = vld [vmem:[%s11852_s3 + $0x1e8] sm:$0xff]  ;;  %v165_v62 = vld [vmem:[%s11852_s3 + $0x1f0] sm:$0xff] }
  0x16   :  { %82 = vst [vmem:[#allocation3 + $0xa0] sm:$0xff] %v81_v20  ;;  %v167_v63 = vld [vmem:[%s11852_s3 + $0x1f8] sm:$0xff]  ;;  %v169_v0 = vld [vmem:[%s11852_s3 + $0x200] sm:$0xff]  ;;  %v171_v1 = vld [vmem:[%s11852_s3 + $0x208] sm:$0xff] }
  0x17   :  { %84 = vst [vmem:[#allocation3 + $0xa8] sm:$0xff] %v83_v21  ;;  %v173_v2 = vld [vmem:[%s11852_s3 + $0x210] sm:$0xff]  ;;  %v175_v3 = vld [vmem:[%s11852_s3 + $0x218] sm:$0xff]  ;;  %v177_v4 = vld [vmem:[%s11852_s3 + $0x220] sm:$0xff] }
  0x18   :  { %86 = vst [vmem:[#allocation3 + $0xb0] sm:$0xff] %v85_v22  ;;  %v179_v5 = vld [vmem:[%s11852_s3 + $0x228] sm:$0xff]  ;;  %v181_v6 = vld [vmem:[%s11852_s3 + $0x230] sm:$0xff]  ;;  %v183_v7 = vld [vmem:[%s11852_s3 + $0x238] sm:$0xff] }
  0x19   :  { %88 = vst [vmem:[#allocation3 + $0xb8] sm:$0xff] %v87_v23  ;;  %v185_v8 = vld [vmem:[%s11852_s3 + $0x240] sm:$0xff]  ;;  %v187_v9 = vld [vmem:[%s11852_s3 + $0x248] sm:$0xff]  ;;  %v189_v10 = vld [vmem:[%s11852_s3 + $0x250] sm:$0xff] }
  0x1a   :  { %90 = vst [vmem:[#allocation3 + $0xc0] sm:$0xff] %v89_v24  ;;  %v191_v11 = vld [vmem:[%s11852_s3 + $0x258] sm:$0xff]  ;;  %v193_v12 = vld [vmem:[%s11852_s3 + $0x260] sm:$0xff]  ;;  %v195_v13 = vld [vmem:[%s11852_s3 + $0x268] sm:$0xff] }
  0x1b   :  { %92 = vst [vmem:[#allocation3 + $0xc8] sm:$0xff] %v91_v25  ;;  %v197_v14 = vld [vmem:[%s11852_s3 + $0x270] sm:$0xff]  ;;  %v199_v15 = vld [vmem:[%s11852_s3 + $0x278] sm:$0xff]  ;;  %v201_v16 = vld [vmem:[%s11852_s3 + $0x280] sm:$0xff] }
  0x1c   :  { %94 = vst [vmem:[#allocation3 + $0xd0] sm:$0xff] %v93_v26  ;;  %v203_v17 = vld [vmem:[%s11852_s3 + $0x288] sm:$0xff]  ;;  %v205_v18 = vld [vmem:[%s11852_s3 + $0x290] sm:$0xff]  ;;  %v207_v19 = vld [vmem:[%s11852_s3 + $0x298] sm:$0xff] }
  0x1d   :  { %96 = vst [vmem:[#allocation3 + $0xd8] sm:$0xff] %v95_v27  ;;  %v209_v20 = vld [vmem:[%s11852_s3 + $0x2a0] sm:$0xff]  ;;  %v211_v21 = vld [vmem:[%s11852_s3 + $0x2a8] sm:$0xff]  ;;  %v213_v22 = vld [vmem:[%s11852_s3 + $0x2b0] sm:$0xff] }
  0x1e   :  { %98 = vst [vmem:[#allocation3 + $0xe0] sm:$0xff] %v97_v28  ;;  %v215_v23 = vld [vmem:[%s11852_s3 + $0x2b8] sm:$0xff]  ;;  %v217_v24 = vld [vmem:[%s11852_s3 + $0x2c0] sm:$0xff]  ;;  %v219_v25 = vld [vmem:[%s11852_s3 + $0x2c8] sm:$0xff] }
  0x1f   :  { %100 = vst [vmem:[#allocation3 + $0xe8] sm:$0xff] %v99_v29  ;;  %v221_v26 = vld [vmem:[%s11852_s3 + $0x2d0] sm:$0xff]  ;;  %v223_v27 = vld [vmem:[%s11852_s3 + $0x2d8] sm:$0xff]  ;;  %v225_v28 = vld [vmem:[%s11852_s3 + $0x2e0] sm:$0xff] }
  0x20   :  { %102 = vst [vmem:[#allocation3 + $0xf0] sm:$0xff] %v101_v30  ;;  %v227_v29 = vld [vmem:[%s11852_s3 + $0x2e8] sm:$0xff]  ;;  %v229_v30 = vld [vmem:[%s11852_s3 + $0x2f0] sm:$0xff] }
  0x21   :  { %104 = vst [vmem:[#allocation3 + $0xf8] sm:$0xff] %v103_v31  ;;  %v231_v31 = vld [vmem:[%s11852_s3 + $0x2f8] sm:$0xff] }
  0x22   :  { %106 = vst [vmem:[#allocation3 + $0x100] sm:$0xff] %v105_v32  ;;  %v233_v32 = vld [vmem:[%s11852_s3 + $0x300] sm:$0xff] }
  0x23   :  { %108 = vst [vmem:[#allocation3 + $0x108] sm:$0xff] %v107_v33  ;;  %v235_v33 = vld [vmem:[%s11852_s3 + $0x308] sm:$0xff] }
  0x24   :  { %110 = vst [vmem:[#allocation3 + $0x110] sm:$0xff] %v109_v34  ;;  %v237_v34 = vld [vmem:[%s11852_s3 + $0x310] sm:$0xff] }
  0x25   :  { %112 = vst [vmem:[#allocation3 + $0x118] sm:$0xff] %v111_v35  ;;  %v239_v35 = vld [vmem:[%s11852_s3 + $0x318] sm:$0xff] }
  0x26   :  { %114 = vst [vmem:[#allocation3 + $0x120] sm:$0xff] %v113_v36  ;;  %v241_v36 = vld [vmem:[%s11852_s3 + $0x320] sm:$0xff] }
  0x27   :  { %116 = vst [vmem:[#allocation3 + $0x128] sm:$0xff] %v115_v37  ;;  %v243_v37 = vld [vmem:[%s11852_s3 + $0x328] sm:$0xff] }
  0x28   :  { %118 = vst [vmem:[#allocation3 + $0x130] sm:$0xff] %v117_v38  ;;  %v245_v38 = vld [vmem:[%s11852_s3 + $0x330] sm:$0xff] }
  0x29   :  { %120 = vst [vmem:[#allocation3 + $0x138] sm:$0xff] %v119_v39  ;;  %v247_v39 = vld [vmem:[%s11852_s3 + $0x338] sm:$0xff] }
  0x2a   :  { %122 = vst [vmem:[#allocation3 + $0x140] sm:$0xff] %v121_v40  ;;  %v249_v40 = vld [vmem:[%s11852_s3 + $0x340] sm:$0xff] }
  0x2b   :  { %124 = vst [vmem:[#allocation3 + $0x148] sm:$0xff] %v123_v41  ;;  %v251_v41 = vld [vmem:[%s11852_s3 + $0x348] sm:$0xff] }
  0x2c   :  { %126 = vst [vmem:[#allocation3 + $0x150] sm:$0xff] %v125_v42  ;;  %v253_v42 = vld [vmem:[%s11852_s3 + $0x350] sm:$0xff] }
  0x2d   :  { %128 = vst [vmem:[#allocation3 + $0x158] sm:$0xff] %v127_v43  ;;  %v255_v43 = vld [vmem:[%s11852_s3 + $0x358] sm:$0xff] }
  0x2e   :  { %130 = vst [vmem:[#allocation3 + $0x160] sm:$0xff] %v129_v44  ;;  %v257_v44 = vld [vmem:[%s11852_s3 + $0x360] sm:$0xff] }
  0x2f   :  { %132 = vst [vmem:[#allocation3 + $0x168] sm:$0xff] %v131_v45  ;;  %v259_v45 = vld [vmem:[%s11852_s3 + $0x368] sm:$0xff] }
  0x30   :  { %134 = vst [vmem:[#allocation3 + $0x170] sm:$0xff] %v133_v46  ;;  %v261_v46 = vld [vmem:[%s11852_s3 + $0x370] sm:$0xff] }
  0x31   :  { %136 = vst [vmem:[#allocation3 + $0x178] sm:$0xff] %v135_v47  ;;  %v263_v47 = vld [vmem:[%s11852_s3 + $0x378] sm:$0xff] }
  0x32   :  { %138 = vst [vmem:[#allocation3 + $0x180] sm:$0xff] %v137_v48  ;;  %v265_v48 = vld [vmem:[%s11852_s3 + $0x380] sm:$0xff] }
  0x33   :  { %140 = vst [vmem:[#allocation3 + $0x188] sm:$0xff] %v139_v49  ;;  %v267_v49 = vld [vmem:[%s11852_s3 + $0x388] sm:$0xff] }
  0x34   :  { %142 = vst [vmem:[#allocation3 + $0x190] sm:$0xff] %v141_v50  ;;  %v269_v50 = vld [vmem:[%s11852_s3 + $0x390] sm:$0xff] }
  0x35   :  { %144 = vst [vmem:[#allocation3 + $0x198] sm:$0xff] %v143_v51  ;;  %v271_v51 = vld [vmem:[%s11852_s3 + $0x398] sm:$0xff] }
  0x36   :  { %146 = vst [vmem:[#allocation3 + $0x1a0] sm:$0xff] %v145_v52  ;;  %v273_v52 = vld [vmem:[%s11852_s3 + $0x3a0] sm:$0xff] }
  0x37   :  { %148 = vst [vmem:[#allocation3 + $0x1a8] sm:$0xff] %v147_v53  ;;  %v275_v53 = vld [vmem:[%s11852_s3 + $0x3a8] sm:$0xff] }
  0x38   :  { %150 = vst [vmem:[#allocation3 + $0x1b0] sm:$0xff] %v149_v54  ;;  %v277_v54 = vld [vmem:[%s11852_s3 + $0x3b0] sm:$0xff] }
  0x39   :  { %152 = vst [vmem:[#allocation3 + $0x1b8] sm:$0xff] %v151_v55  ;;  %v279_v55 = vld [vmem:[%s11852_s3 + $0x3b8] sm:$0xff] }
  0x3a   :  { %154 = vst [vmem:[#allocation3 + $0x1c0] sm:$0xff] %v153_v56  ;;  %v281_v56 = vld [vmem:[%s11852_s3 + $0x3c0] sm:$0xff] }
  0x3b   :  { %156 = vst [vmem:[#allocation3 + $0x1c8] sm:$0xff] %v155_v57  ;;  %v283_v57 = vld [vmem:[%s11852_s3 + $0x3c8] sm:$0xff] }
  0x3c   :  { %158 = vst [vmem:[#allocation3 + $0x1d0] sm:$0xff] %v157_v58  ;;  %v285_v58 = vld [vmem:[%s11852_s3 + $0x3d0] sm:$0xff] }
  0x3d   :  { %160 = vst [vmem:[#allocation3 + $0x1d8] sm:$0xff] %v159_v59  ;;  %v287_v59 = vld [vmem:[%s11852_s3 + $0x3d8] sm:$0xff] }
  0x3e   :  { %162 = vst [vmem:[#allocation3 + $0x1e0] sm:$0xff] %v161_v60  ;;  %v289_v60 = vld [vmem:[%s11852_s3 + $0x3e0] sm:$0xff] }
  0x3f   :  { %164 = vst [vmem:[#allocation3 + $0x1e8] sm:$0xff] %v163_v61  ;;  %v291_v61 = vld [vmem:[%s11852_s3 + $0x3e8] sm:$0xff] }
  0x40   :  { %166 = vst [vmem:[#allocation3 + $0x1f0] sm:$0xff] %v165_v62  ;;  %v293_v62 = vld [vmem:[%s11852_s3 + $0x3f0] sm:$0xff] }
  0x41   :  { %168 = vst [vmem:[#allocation3 + $0x1f8] sm:$0xff] %v167_v63  ;;  %v295_v63 = vld [vmem:[%s11852_s3 + $0x3f8] sm:$0xff] }
  0x42   :  { %170 = vst [vmem:[#allocation3 + $0x200] sm:$0xff] %v169_v0  ;;  %v297_v0 = vld [vmem:[%s11852_s3 + $0x400] sm:$0xff] }
  0x43   :  { %172 = vst [vmem:[#allocation3 + $0x208] sm:$0xff] %v171_v1  ;;  %v299_v1 = vld [vmem:[%s11852_s3 + $0x408] sm:$0xff] }
  0x44   :  { %174 = vst [vmem:[#allocation3 + $0x210] sm:$0xff] %v173_v2  ;;  %v301_v2 = vld [vmem:[%s11852_s3 + $0x410] sm:$0xff] }
  0x45   :  { %176 = vst [vmem:[#allocation3 + $0x218] sm:$0xff] %v175_v3  ;;  %v303_v3 = vld [vmem:[%s11852_s3 + $0x418] sm:$0xff] }
  0x46   :  { %178 = vst [vmem:[#allocation3 + $0x220] sm:$0xff] %v177_v4  ;;  %v305_v4 = vld [vmem:[%s11852_s3 + $0x420] sm:$0xff] }
  0x47   :  { %180 = vst [vmem:[#allocation3 + $0x228] sm:$0xff] %v179_v5  ;;  %v307_v5 = vld [vmem:[%s11852_s3 + $0x428] sm:$0xff] }
  0x48   :  { %182 = vst [vmem:[#allocation3 + $0x230] sm:$0xff] %v181_v6  ;;  %v309_v6 = vld [vmem:[%s11852_s3 + $0x430] sm:$0xff] }
  0x49   :  { %184 = vst [vmem:[#allocation3 + $0x238] sm:$0xff] %v183_v7  ;;  %v311_v7 = vld [vmem:[%s11852_s3 + $0x438] sm:$0xff] }
  0x4a   :  { %186 = vst [vmem:[#allocation3 + $0x240] sm:$0xff] %v185_v8  ;;  %v313_v8 = vld [vmem:[%s11852_s3 + $0x440] sm:$0xff] }
  0x4b   :  { %188 = vst [vmem:[#allocation3 + $0x248] sm:$0xff] %v187_v9  ;;  %v315_v9 = vld [vmem:[%s11852_s3 + $0x448] sm:$0xff] }
  0x4c   :  { %190 = vst [vmem:[#allocation3 + $0x250] sm:$0xff] %v189_v10  ;;  %v317_v10 = vld [vmem:[%s11852_s3 + $0x450] sm:$0xff] }
  0x4d   :  { %192 = vst [vmem:[#allocation3 + $0x258] sm:$0xff] %v191_v11  ;;  %v319_v11 = vld [vmem:[%s11852_s3 + $0x458] sm:$0xff] }
  0x4e   :  { %194 = vst [vmem:[#allocation3 + $0x260] sm:$0xff] %v193_v12  ;;  %v321_v12 = vld [vmem:[%s11852_s3 + $0x460] sm:$0xff] }
  0x4f   :  { %196 = vst [vmem:[#allocation3 + $0x268] sm:$0xff] %v195_v13  ;;  %v323_v13 = vld [vmem:[%s11852_s3 + $0x468] sm:$0xff] }
  0x50   :  { %198 = vst [vmem:[#allocation3 + $0x270] sm:$0xff] %v197_v14  ;;  %v325_v14 = vld [vmem:[%s11852_s3 + $0x470] sm:$0xff] }
  0x51   :  { %200 = vst [vmem:[#allocation3 + $0x278] sm:$0xff] %v199_v15  ;;  %v327_v15 = vld [vmem:[%s11852_s3 + $0x478] sm:$0xff] }
  0x52   :  { %202 = vst [vmem:[#allocation3 + $0x280] sm:$0xff] %v201_v16  ;;  %v329_v16 = vld [vmem:[%s11852_s3 + $0x480] sm:$0xff] }
  0x53   :  { %204 = vst [vmem:[#allocation3 + $0x288] sm:$0xff] %v203_v17  ;;  %v331_v17 = vld [vmem:[%s11852_s3 + $0x488] sm:$0xff] }
  0x54   :  { %206 = vst [vmem:[#allocation3 + $0x290] sm:$0xff] %v205_v18  ;;  %v333_v18 = vld [vmem:[%s11852_s3 + $0x490] sm:$0xff] }
  0x55   :  { %208 = vst [vmem:[#allocation3 + $0x298] sm:$0xff] %v207_v19  ;;  %v335_v19 = vld [vmem:[%s11852_s3 + $0x498] sm:$0xff] }
  0x56   :  { %210 = vst [vmem:[#allocation3 + $0x2a0] sm:$0xff] %v209_v20  ;;  %v337_v20 = vld [vmem:[%s11852_s3 + $0x4a0] sm:$0xff] }
  0x57   :  { %212 = vst [vmem:[#allocation3 + $0x2a8] sm:$0xff] %v211_v21  ;;  %v339_v21 = vld [vmem:[%s11852_s3 + $0x4a8] sm:$0xff] }
  0x58   :  { %214 = vst [vmem:[#allocation3 + $0x2b0] sm:$0xff] %v213_v22  ;;  %v341_v22 = vld [vmem:[%s11852_s3 + $0x4b0] sm:$0xff] }
  0x59   :  { %216 = vst [vmem:[#allocation3 + $0x2b8] sm:$0xff] %v215_v23  ;;  %v343_v23 = vld [vmem:[%s11852_s3 + $0x4b8] sm:$0xff] }
  0x5a   :  { %218 = vst [vmem:[#allocation3 + $0x2c0] sm:$0xff] %v217_v24  ;;  %v345_v24 = vld [vmem:[%s11852_s3 + $0x4c0] sm:$0xff] }
  0x5b   :  { %220 = vst [vmem:[#allocation3 + $0x2c8] sm:$0xff] %v219_v25  ;;  %v347_v25 = vld [vmem:[%s11852_s3 + $0x4c8] sm:$0xff] }
  0x5c   :  { %222 = vst [vmem:[#allocation3 + $0x2d0] sm:$0xff] %v221_v26  ;;  %v349_v26 = vld [vmem:[%s11852_s3 + $0x4d0] sm:$0xff] }
  0x5d   :  { %224 = vst [vmem:[#allocation3 + $0x2d8] sm:$0xff] %v223_v27  ;;  %v351_v27 = vld [vmem:[%s11852_s3 + $0x4d8] sm:$0xff] }
  0x5e   :  { %226 = vst [vmem:[#allocation3 + $0x2e0] sm:$0xff] %v225_v28  ;;  %v353_v28 = vld [vmem:[%s11852_s3 + $0x4e0] sm:$0xff] }
  0x5f   :  { %228 = vst [vmem:[#allocation3 + $0x2e8] sm:$0xff] %v227_v29  ;;  %v355_v29 = vld [vmem:[%s11852_s3 + $0x4e8] sm:$0xff] }
  0x60   :  { %230 = vst [vmem:[#allocation3 + $0x2f0] sm:$0xff] %v229_v30  ;;  %v357_v30 = vld [vmem:[%s11852_s3 + $0x4f0] sm:$0xff] }
  0x61   :  { %232 = vst [vmem:[#allocation3 + $0x2f8] sm:$0xff] %v231_v31  ;;  %v359_v31 = vld [vmem:[%s11852_s3 + $0x4f8] sm:$0xff] }
  0x62   :  { %234 = vst [vmem:[#allocation3 + $0x300] sm:$0xff] %v233_v32  ;;  %v361_v32 = vld [vmem:[%s11852_s3 + $0x500] sm:$0xff] }
  0x63   :  { %236 = vst [vmem:[#allocation3 + $0x308] sm:$0xff] %v235_v33  ;;  %v363_v33 = vld [vmem:[%s11852_s3 + $0x508] sm:$0xff] }
  0x64   :  { %238 = vst [vmem:[#allocation3 + $0x310] sm:$0xff] %v237_v34  ;;  %v365_v34 = vld [vmem:[%s11852_s3 + $0x510] sm:$0xff] }
  0x65   :  { %240 = vst [vmem:[#allocation3 + $0x318] sm:$0xff] %v239_v35  ;;  %v367_v35 = vld [vmem:[%s11852_s3 + $0x518] sm:$0xff] }
  0x66   :  { %242 = vst [vmem:[#allocation3 + $0x320] sm:$0xff] %v241_v36  ;;  %v369_v36 = vld [vmem:[%s11852_s3 + $0x520] sm:$0xff] }
  0x67   :  { %244 = vst [vmem:[#allocation3 + $0x328] sm:$0xff] %v243_v37  ;;  %v371_v37 = vld [vmem:[%s11852_s3 + $0x528] sm:$0xff] }
  0x68   :  { %246 = vst [vmem:[#allocation3 + $0x330] sm:$0xff] %v245_v38  ;;  %v373_v38 = vld [vmem:[%s11852_s3 + $0x530] sm:$0xff] }
  0x69   :  { %248 = vst [vmem:[#allocation3 + $0x338] sm:$0xff] %v247_v39  ;;  %v375_v39 = vld [vmem:[%s11852_s3 + $0x538] sm:$0xff] }
  0x6a   :  { %250 = vst [vmem:[#allocation3 + $0x340] sm:$0xff] %v249_v40  ;;  %v377_v40 = vld [vmem:[%s11852_s3 + $0x540] sm:$0xff] }
  0x6b   :  { %252 = vst [vmem:[#allocation3 + $0x348] sm:$0xff] %v251_v41  ;;  %v379_v41 = vld [vmem:[%s11852_s3 + $0x548] sm:$0xff] }
  0x6c   :  { %254 = vst [vmem:[#allocation3 + $0x350] sm:$0xff] %v253_v42  ;;  %v381_v42 = vld [vmem:[%s11852_s3 + $0x550] sm:$0xff] }
  0x6d   :  { %256 = vst [vmem:[#allocation3 + $0x358] sm:$0xff] %v255_v43  ;;  %v383_v43 = vld [vmem:[%s11852_s3 + $0x558] sm:$0xff] }
  0x6e   :  { %258 = vst [vmem:[#allocation3 + $0x360] sm:$0xff] %v257_v44  ;;  %v385_v44 = vld [vmem:[%s11852_s3 + $0x560] sm:$0xff] }
  0x6f   :  { %260 = vst [vmem:[#allocation3 + $0x368] sm:$0xff] %v259_v45  ;;  %v387_v45 = vld [vmem:[%s11852_s3 + $0x568] sm:$0xff] }
  0x70   :  { %262 = vst [vmem:[#allocation3 + $0x370] sm:$0xff] %v261_v46  ;;  %v389_v46 = vld [vmem:[%s11852_s3 + $0x570] sm:$0xff] }
  0x71   :  { %264 = vst [vmem:[#allocation3 + $0x378] sm:$0xff] %v263_v47  ;;  %v391_v47 = vld [vmem:[%s11852_s3 + $0x578] sm:$0xff] }
  0x72   :  { %266 = vst [vmem:[#allocation3 + $0x380] sm:$0xff] %v265_v48  ;;  %v393_v48 = vld [vmem:[%s11852_s3 + $0x580] sm:$0xff] }
  0x73   :  { %268 = vst [vmem:[#allocation3 + $0x388] sm:$0xff] %v267_v49  ;;  %v395_v49 = vld [vmem:[%s11852_s3 + $0x588] sm:$0xff] }
  0x74   :  { %270 = vst [vmem:[#allocation3 + $0x390] sm:$0xff] %v269_v50  ;;  %v397_v50 = vld [vmem:[%s11852_s3 + $0x590] sm:$0xff] }
  0x75   :  { %272 = vst [vmem:[#allocation3 + $0x398] sm:$0xff] %v271_v51  ;;  %v399_v51 = vld [vmem:[%s11852_s3 + $0x598] sm:$0xff] }
  0x76   :  { %274 = vst [vmem:[#allocation3 + $0x3a0] sm:$0xff] %v273_v52  ;;  %v401_v52 = vld [vmem:[%s11852_s3 + $0x5a0] sm:$0xff] }
  0x77   :  { %276 = vst [vmem:[#allocation3 + $0x3a8] sm:$0xff] %v275_v53  ;;  %v403_v53 = vld [vmem:[%s11852_s3 + $0x5a8] sm:$0xff] }
  0x78   :  { %278 = vst [vmem:[#allocation3 + $0x3b0] sm:$0xff] %v277_v54  ;;  %v405_v54 = vld [vmem:[%s11852_s3 + $0x5b0] sm:$0xff] }
  0x79   :  { %280 = vst [vmem:[#allocation3 + $0x3b8] sm:$0xff] %v279_v55  ;;  %v407_v55 = vld [vmem:[%s11852_s3 + $0x5b8] sm:$0xff] }
  0x7a   :  { %282 = vst [vmem:[#allocation3 + $0x3c0] sm:$0xff] %v281_v56  ;;  %v409_v56 = vld [vmem:[%s11852_s3 + $0x5c0] sm:$0xff] }
  0x7b   :  { %284 = vst [vmem:[#allocation3 + $0x3c8] sm:$0xff] %v283_v57  ;;  %v411_v57 = vld [vmem:[%s11852_s3 + $0x5c8] sm:$0xff] }
  0x7c   :  { %286 = vst [vmem:[#allocation3 + $0x3d0] sm:$0xff] %v285_v58  ;;  %v413_v58 = vld [vmem:[%s11852_s3 + $0x5d0] sm:$0xff] }
  0x7d   :  { %288 = vst [vmem:[#allocation3 + $0x3d8] sm:$0xff] %v287_v59  ;;  %v415_v59 = vld [vmem:[%s11852_s3 + $0x5d8] sm:$0xff] }
  0x7e   :  { %290 = vst [vmem:[#allocation3 + $0x3e0] sm:$0xff] %v289_v60  ;;  %v417_v60 = vld [vmem:[%s11852_s3 + $0x5e0] sm:$0xff] }
  0x7f   :  { %292 = vst [vmem:[#allocation3 + $0x3e8] sm:$0xff] %v291_v61  ;;  %v419_v61 = vld [vmem:[%s11852_s3 + $0x5e8] sm:$0xff] }
  0x80   :  { %294 = vst [vmem:[#allocation3 + $0x3f0] sm:$0xff] %v293_v62  ;;  %v421_v62 = vld [vmem:[%s11852_s3 + $0x5f0] sm:$0xff] }
  0x81   :  { %296 = vst [vmem:[#allocation3 + $0x3f8] sm:$0xff] %v295_v63  ;;  %v423_v63 = vld [vmem:[%s11852_s3 + $0x5f8] sm:$0xff] }
  0x82   :  { %298 = vst [vmem:[#allocation3 + $0x400] sm:$0xff] %v297_v0  ;;  %v425_v0 = vld [vmem:[%s11852_s3 + $0x600] sm:$0xff] }
  0x83   :  { %300 = vst [vmem:[#allocation3 + $0x408] sm:$0xff] %v299_v1  ;;  %v427_v1 = vld [vmem:[%s11852_s3 + $0x608] sm:$0xff] }
  0x84   :  { %302 = vst [vmem:[#allocation3 + $0x410] sm:$0xff] %v301_v2  ;;  %v429_v2 = vld [vmem:[%s11852_s3 + $0x610] sm:$0xff] }
  0x85   :  { %304 = vst [vmem:[#allocation3 + $0x418] sm:$0xff] %v303_v3  ;;  %v431_v3 = vld [vmem:[%s11852_s3 + $0x618] sm:$0xff] }
  0x86   :  { %306 = vst [vmem:[#allocation3 + $0x420] sm:$0xff] %v305_v4  ;;  %v433_v4 = vld [vmem:[%s11852_s3 + $0x620] sm:$0xff] }
  0x87   :  { %308 = vst [vmem:[#allocation3 + $0x428] sm:$0xff] %v307_v5  ;;  %v435_v5 = vld [vmem:[%s11852_s3 + $0x628] sm:$0xff] }
  0x88   :  { %310 = vst [vmem:[#allocation3 + $0x430] sm:$0xff] %v309_v6  ;;  %v437_v6 = vld [vmem:[%s11852_s3 + $0x630] sm:$0xff] }
  0x89   :  { %312 = vst [vmem:[#allocation3 + $0x438] sm:$0xff] %v311_v7  ;;  %v439_v7 = vld [vmem:[%s11852_s3 + $0x638] sm:$0xff] }
  0x8a   :  { %314 = vst [vmem:[#allocation3 + $0x440] sm:$0xff] %v313_v8  ;;  %v441_v8 = vld [vmem:[%s11852_s3 + $0x640] sm:$0xff] }
  0x8b   :  { %316 = vst [vmem:[#allocation3 + $0x448] sm:$0xff] %v315_v9  ;;  %v443_v9 = vld [vmem:[%s11852_s3 + $0x648] sm:$0xff] }
  0x8c   :  { %318 = vst [vmem:[#allocation3 + $0x450] sm:$0xff] %v317_v10  ;;  %v445_v10 = vld [vmem:[%s11852_s3 + $0x650] sm:$0xff] }
  0x8d   :  { %320 = vst [vmem:[#allocation3 + $0x458] sm:$0xff] %v319_v11  ;;  %v447_v11 = vld [vmem:[%s11852_s3 + $0x658] sm:$0xff] }
  0x8e   :  { %322 = vst [vmem:[#allocation3 + $0x460] sm:$0xff] %v321_v12  ;;  %v449_v12 = vld [vmem:[%s11852_s3 + $0x660] sm:$0xff] }
  0x8f   :  { %324 = vst [vmem:[#allocation3 + $0x468] sm:$0xff] %v323_v13  ;;  %v451_v13 = vld [vmem:[%s11852_s3 + $0x668] sm:$0xff] }
  0x90   :  { %326 = vst [vmem:[#allocation3 + $0x470] sm:$0xff] %v325_v14  ;;  %v453_v14 = vld [vmem:[%s11852_s3 + $0x670] sm:$0xff] }
  0x91   :  { %328 = vst [vmem:[#allocation3 + $0x478] sm:$0xff] %v327_v15  ;;  %v455_v15 = vld [vmem:[%s11852_s3 + $0x678] sm:$0xff] }
  0x92   :  { %330 = vst [vmem:[#allocation3 + $0x480] sm:$0xff] %v329_v16  ;;  %v457_v16 = vld [vmem:[%s11852_s3 + $0x680] sm:$0xff] }
  0x93   :  { %332 = vst [vmem:[#allocation3 + $0x488] sm:$0xff] %v331_v17  ;;  %v459_v17 = vld [vmem:[%s11852_s3 + $0x688] sm:$0xff] }
  0x94   :  { %334 = vst [vmem:[#allocation3 + $0x490] sm:$0xff] %v333_v18  ;;  %v461_v18 = vld [vmem:[%s11852_s3 + $0x690] sm:$0xff] }
  0x95   :  { %336 = vst [vmem:[#allocation3 + $0x498] sm:$0xff] %v335_v19  ;;  %v463_v19 = vld [vmem:[%s11852_s3 + $0x698] sm:$0xff] }
  0x96   :  { %338 = vst [vmem:[#allocation3 + $0x4a0] sm:$0xff] %v337_v20  ;;  %v465_v20 = vld [vmem:[%s11852_s3 + $0x6a0] sm:$0xff] }
  0x97   :  { %340 = vst [vmem:[#allocation3 + $0x4a8] sm:$0xff] %v339_v21  ;;  %v467_v21 = vld [vmem:[%s11852_s3 + $0x6a8] sm:$0xff] }
  0x98   :  { %342 = vst [vmem:[#allocation3 + $0x4b0] sm:$0xff] %v341_v22  ;;  %v469_v22 = vld [vmem:[%s11852_s3 + $0x6b0] sm:$0xff] }
  0x99   :  { %344 = vst [vmem:[#allocation3 + $0x4b8] sm:$0xff] %v343_v23  ;;  %v471_v23 = vld [vmem:[%s11852_s3 + $0x6b8] sm:$0xff] }
  0x9a   :  { %346 = vst [vmem:[#allocation3 + $0x4c0] sm:$0xff] %v345_v24  ;;  %v473_v24 = vld [vmem:[%s11852_s3 + $0x6c0] sm:$0xff] }
  0x9b   :  { %348 = vst [vmem:[#allocation3 + $0x4c8] sm:$0xff] %v347_v25  ;;  %v475_v25 = vld [vmem:[%s11852_s3 + $0x6c8] sm:$0xff] }
  0x9c   :  { %350 = vst [vmem:[#allocation3 + $0x4d0] sm:$0xff] %v349_v26  ;;  %v477_v26 = vld [vmem:[%s11852_s3 + $0x6d0] sm:$0xff] }
  0x9d   :  { %352 = vst [vmem:[#allocation3 + $0x4d8] sm:$0xff] %v351_v27  ;;  %v479_v27 = vld [vmem:[%s11852_s3 + $0x6d8] sm:$0xff] }
  0x9e   :  { %354 = vst [vmem:[#allocation3 + $0x4e0] sm:$0xff] %v353_v28  ;;  %v481_v28 = vld [vmem:[%s11852_s3 + $0x6e0] sm:$0xff] }
  0x9f   :  { %356 = vst [vmem:[#allocation3 + $0x4e8] sm:$0xff] %v355_v29  ;;  %v483_v29 = vld [vmem:[%s11852_s3 + $0x6e8] sm:$0xff] }
  0xa0   :  { %358 = vst [vmem:[#allocation3 + $0x4f0] sm:$0xff] %v357_v30  ;;  %v485_v30 = vld [vmem:[%s11852_s3 + $0x6f0] sm:$0xff] }
  0xa1   :  { %360 = vst [vmem:[#allocation3 + $0x4f8] sm:$0xff] %v359_v31  ;;  %v487_v31 = vld [vmem:[%s11852_s3 + $0x6f8] sm:$0xff] }
  0xa2   :  { %362 = vst [vmem:[#allocation3 + $0x500] sm:$0xff] %v361_v32  ;;  %v489_v32 = vld [vmem:[%s11852_s3 + $0x700] sm:$0xff] }
  0xa3   :  { %364 = vst [vmem:[#allocation3 + $0x508] sm:$0xff] %v363_v33  ;;  %v491_v33 = vld [vmem:[%s11852_s3 + $0x708] sm:$0xff] }
  0xa4   :  { %366 = vst [vmem:[#allocation3 + $0x510] sm:$0xff] %v365_v34  ;;  %v493_v34 = vld [vmem:[%s11852_s3 + $0x710] sm:$0xff] }
  0xa5   :  { %368 = vst [vmem:[#allocation3 + $0x518] sm:$0xff] %v367_v35  ;;  %v495_v35 = vld [vmem:[%s11852_s3 + $0x718] sm:$0xff] }
  0xa6   :  { %370 = vst [vmem:[#allocation3 + $0x520] sm:$0xff] %v369_v36  ;;  %v497_v36 = vld [vmem:[%s11852_s3 + $0x720] sm:$0xff] }
  0xa7   :  { %372 = vst [vmem:[#allocation3 + $0x528] sm:$0xff] %v371_v37  ;;  %v499_v37 = vld [vmem:[%s11852_s3 + $0x728] sm:$0xff] }
  0xa8   :  { %374 = vst [vmem:[#allocation3 + $0x530] sm:$0xff] %v373_v38  ;;  %v501_v38 = vld [vmem:[%s11852_s3 + $0x730] sm:$0xff] }
  0xa9   :  { %376 = vst [vmem:[#allocation3 + $0x538] sm:$0xff] %v375_v39  ;;  %v503_v39 = vld [vmem:[%s11852_s3 + $0x738] sm:$0xff] }
  0xaa   :  { %378 = vst [vmem:[#allocation3 + $0x540] sm:$0xff] %v377_v40  ;;  %v505_v40 = vld [vmem:[%s11852_s3 + $0x740] sm:$0xff] }
  0xab   :  { %380 = vst [vmem:[#allocation3 + $0x548] sm:$0xff] %v379_v41  ;;  %v507_v41 = vld [vmem:[%s11852_s3 + $0x748] sm:$0xff] }
  0xac   :  { %382 = vst [vmem:[#allocation3 + $0x550] sm:$0xff] %v381_v42  ;;  %v509_v42 = vld [vmem:[%s11852_s3 + $0x750] sm:$0xff] }
  0xad   :  { %384 = vst [vmem:[#allocation3 + $0x558] sm:$0xff] %v383_v43  ;;  %v511_v43 = vld [vmem:[%s11852_s3 + $0x758] sm:$0xff] }
  0xae   :  { %386 = vst [vmem:[#allocation3 + $0x560] sm:$0xff] %v385_v44  ;;  %v513_v44 = vld [vmem:[%s11852_s3 + $0x760] sm:$0xff] }
  0xaf   :  { %388 = vst [vmem:[#allocation3 + $0x568] sm:$0xff] %v387_v45  ;;  %v515_v45 = vld [vmem:[%s11852_s3 + $0x768] sm:$0xff] }
  0xb0   :  { %390 = vst [vmem:[#allocation3 + $0x570] sm:$0xff] %v389_v46  ;;  %v517_v46 = vld [vmem:[%s11852_s3 + $0x770] sm:$0xff] }
  0xb1   :  { %392 = vst [vmem:[#allocation3 + $0x578] sm:$0xff] %v391_v47  ;;  %v519_v47 = vld [vmem:[%s11852_s3 + $0x778] sm:$0xff] }
  0xb2   :  { %394 = vst [vmem:[#allocation3 + $0x580] sm:$0xff] %v393_v48 }
  0xb3   :  { %396 = vst [vmem:[#allocation3 + $0x588] sm:$0xff] %v395_v49 }
  0xb4   :  { %398 = vst [vmem:[#allocation3 + $0x590] sm:$0xff] %v397_v50 }
  0xb5   :  { %400 = vst [vmem:[#allocation3 + $0x598] sm:$0xff] %v399_v51 }
  0xb6   :  { %402 = vst [vmem:[#allocation3 + $0x5a0] sm:$0xff] %v401_v52 }
  0xb7   :  { %404 = vst [vmem:[#allocation3 + $0x5a8] sm:$0xff] %v403_v53 }
  0xb8   :  { %406 = vst [vmem:[#allocation3 + $0x5b0] sm:$0xff] %v405_v54 }
  0xb9   :  { %408 = vst [vmem:[#allocation3 + $0x5b8] sm:$0xff] %v407_v55 }
  0xba   :  { %410 = vst [vmem:[#allocation3 + $0x5c0] sm:$0xff] %v409_v56 }
  0xbb   :  { %412 = vst [vmem:[#allocation3 + $0x5c8] sm:$0xff] %v411_v57 }
  0xbc   :  { %414 = vst [vmem:[#allocation3 + $0x5d0] sm:$0xff] %v413_v58 }
  0xbd   :  { %416 = vst [vmem:[#allocation3 + $0x5d8] sm:$0xff] %v415_v59 }
  0xbe   :  { %418 = vst [vmem:[#allocation3 + $0x5e0] sm:$0xff] %v417_v60 }
  0xbf   :  { %420 = vst [vmem:[#allocation3 + $0x5e8] sm:$0xff] %v419_v61 }
  0xc0   :  { %422 = vst [vmem:[#allocation3 + $0x5f0] sm:$0xff] %v421_v62 }
  0xc1   :  { %424 = vst [vmem:[#allocation3 + $0x5f8] sm:$0xff] %v423_v63 }
  0xc2   :  { %426 = vst [vmem:[#allocation3 + $0x600] sm:$0xff] %v425_v0 }
  0xc3   :  { %428 = vst [vmem:[#allocation3 + $0x608] sm:$0xff] %v427_v1 }
  0xc4   :  { %430 = vst [vmem:[#allocation3 + $0x610] sm:$0xff] %v429_v2 }
  0xc5   :  { %432 = vst [vmem:[#allocation3 + $0x618] sm:$0xff] %v431_v3 }
  0xc6   :  { %434 = vst [vmem:[#allocation3 + $0x620] sm:$0xff] %v433_v4 }
  0xc7   :  { %436 = vst [vmem:[#allocation3 + $0x628] sm:$0xff] %v435_v5 }
  0xc8   :  { %438 = vst [vmem:[#allocation3 + $0x630] sm:$0xff] %v437_v6 }
  0xc9   :  { %440 = vst [vmem:[#allocation3 + $0x638] sm:$0xff] %v439_v7 }
  0xca   :  { %442 = vst [vmem:[#allocation3 + $0x640] sm:$0xff] %v441_v8 }
  0xcb   :  { %444 = vst [vmem:[#allocation3 + $0x648] sm:$0xff] %v443_v9 }
  0xcc   :  { %446 = vst [vmem:[#allocation3 + $0x650] sm:$0xff] %v445_v10 }
  0xcd   :  { %448 = vst [vmem:[#allocation3 + $0x658] sm:$0xff] %v447_v11 }
  0xce   :  { %450 = vst [vmem:[#allocation3 + $0x660] sm:$0xff] %v449_v12 }
  0xcf   :  { %452 = vst [vmem:[#allocation3 + $0x668] sm:$0xff] %v451_v13 }
  0xd0   :  { %454 = vst [vmem:[#allocation3 + $0x670] sm:$0xff] %v453_v14 }
  0xd1   :  { %456 = vst [vmem:[#allocation3 + $0x678] sm:$0xff] %v455_v15 }
  0xd2   :  { %458 = vst [vmem:[#allocation3 + $0x680] sm:$0xff] %v457_v16 }
  0xd3   :  { %460 = vst [vmem:[#allocation3 + $0x688] sm:$0xff] %v459_v17 }
  0xd4   :  { %462 = vst [vmem:[#allocation3 + $0x690] sm:$0xff] %v461_v18 }
  0xd5   :  { %464 = vst [vmem:[#allocation3 + $0x698] sm:$0xff] %v463_v19 }
  0xd6   :  { %466 = vst [vmem:[#allocation3 + $0x6a0] sm:$0xff] %v465_v20 }
  0xd7   :  { %468 = vst [vmem:[#allocation3 + $0x6a8] sm:$0xff] %v467_v21 }
  0xd8   :  { %470 = vst [vmem:[#allocation3 + $0x6b0] sm:$0xff] %v469_v22 }
  0xd9   :  { %472 = vst [vmem:[#allocation3 + $0x6b8] sm:$0xff] %v471_v23 }
  0xda   :  { %474 = vst [vmem:[#allocation3 + $0x6c0] sm:$0xff] %v473_v24 }
  0xdb   :  { %476 = vst [vmem:[#allocation3 + $0x6c8] sm:$0xff] %v475_v25 }
  0xdc   :  { %478 = vst [vmem:[#allocation3 + $0x6d0] sm:$0xff] %v477_v26 }
  0xdd   :  { %480 = vst [vmem:[#allocation3 + $0x6d8] sm:$0xff] %v479_v27 }
  0xde   :  { %482 = vst [vmem:[#allocation3 + $0x6e0] sm:$0xff] %v481_v28 }
  0xdf   :  { %484 = vst [vmem:[#allocation3 + $0x6e8] sm:$0xff] %v483_v29 }
  0xe0   :  { %486 = vst [vmem:[#allocation3 + $0x6f0] sm:$0xff] %v485_v30 }
  0xe1   :  { %488 = vst [vmem:[#allocation3 + $0x6f8] sm:$0xff] %v487_v31 }
  0xe2   :  { %490 = vst [vmem:[#allocation3 + $0x700] sm:$0xff] %v489_v32 }
  0xe3   :  { %492 = vst [vmem:[#allocation3 + $0x708] sm:$0xff] %v491_v33 }
  0xe4   :  { %494 = vst [vmem:[#allocation3 + $0x710] sm:$0xff] %v493_v34 }
  0xe5   :  { %496 = vst [vmem:[#allocation3 + $0x718] sm:$0xff] %v495_v35 }
  0xe6   :  { %498 = vst [vmem:[#allocation3 + $0x720] sm:$0xff] %v497_v36 }
  0xe7   :  { %500 = vst [vmem:[#allocation3 + $0x728] sm:$0xff] %v499_v37 }
  0xe8   :  { %502 = vst [vmem:[#allocation3 + $0x730] sm:$0xff] %v501_v38 }
  0xe9   :  { %504 = vst [vmem:[#allocation3 + $0x738] sm:$0xff] %v503_v39 }
  0xea   :  { %506 = vst [vmem:[#allocation3 + $0x740] sm:$0xff] %v505_v40 }
  0xeb   :  { %508 = vst [vmem:[#allocation3 + $0x748] sm:$0xff] %v507_v41 }
  0xec   :  { %510 = vst [vmem:[#allocation3 + $0x750] sm:$0xff] %v509_v42 }
  0xed   :  { %512 = vst [vmem:[#allocation3 + $0x758] sm:$0xff] %v511_v43 }
  0xee   :  { %514 = vst [vmem:[#allocation3 + $0x760] sm:$0xff] %v513_v44 }
  0xef   :  { %516 = vst [vmem:[#allocation3 + $0x768] sm:$0xff] %v515_v45 }
  0xf0   :  { %518 = vst [vmem:[#allocation3 + $0x770] sm:$0xff] %v517_v46 }
  0xf1   :  { %520 = vst [vmem:[#allocation3 + $0x778] sm:$0xff] %v519_v47 }
  0xf2   :  { %526 = vsyncadd [#allocation6], 30720  ;;  %v538_v48 = vld [vmem:[%s11854_s5] sm:$0xff]  ;;  %v540_v49 = vld [vmem:[%s11854_s5 + $0x8] sm:$0xff] }
  0xf3   :  { %539 = vst [vmem:[#allocation4] sm:$0xff] %v538_v48  ;;  %v542_v50 = vld [vmem:[%s11854_s5 + $0x10] sm:$0xff]  ;;  %v544_v51 = vld [vmem:[%s11854_s5 + $0x18] sm:$0xff]  ;;  %v546_v52 = vld [vmem:[%s11854_s5 + $0x20] sm:$0xff] }
  0xf4   :  { %541 = vst [vmem:[#allocation4 + $0x8] sm:$0xff] %v540_v49  ;;  %v548_v53 = vld [vmem:[%s11854_s5 + $0x28] sm:$0xff]  ;;  %v550_v54 = vld [vmem:[%s11854_s5 + $0x30] sm:$0xff]  ;;  %v552_v55 = vld [vmem:[%s11854_s5 + $0x38] sm:$0xff] }
  0xf5   :  { %543 = vst [vmem:[#allocation4 + $0x10] sm:$0xff] %v542_v50  ;;  %v554_v56 = vld [vmem:[%s11854_s5 + $0x40] sm:$0xff]  ;;  %v556_v57 = vld [vmem:[%s11854_s5 + $0x48] sm:$0xff]  ;;  %v558_v58 = vld [vmem:[%s11854_s5 + $0x50] sm:$0xff] }
  0xf6   :  { %545 = vst [vmem:[#allocation4 + $0x18] sm:$0xff] %v544_v51  ;;  %v560_v59 = vld [vmem:[%s11854_s5 + $0x58] sm:$0xff]  ;;  %v562_v60 = vld [vmem:[%s11854_s5 + $0x60] sm:$0xff]  ;;  %v564_v61 = vld [vmem:[%s11854_s5 + $0x68] sm:$0xff] }
  0xf7   :  { %547 = vst [vmem:[#allocation4 + $0x20] sm:$0xff] %v546_v52  ;;  %v566_v62 = vld [vmem:[%s11854_s5 + $0x70] sm:$0xff]  ;;  %v568_v63 = vld [vmem:[%s11854_s5 + $0x78] sm:$0xff]  ;;  %v570_v0 = vld [vmem:[%s11854_s5 + $0x80] sm:$0xff] }
  0xf8   :  { %549 = vst [vmem:[#allocation4 + $0x28] sm:$0xff] %v548_v53  ;;  %v572_v1 = vld [vmem:[%s11854_s5 + $0x88] sm:$0xff]  ;;  %v574_v2 = vld [vmem:[%s11854_s5 + $0x90] sm:$0xff]  ;;  %v576_v3 = vld [vmem:[%s11854_s5 + $0x98] sm:$0xff] }
  0xf9   :  { %551 = vst [vmem:[#allocation4 + $0x30] sm:$0xff] %v550_v54  ;;  %v578_v4 = vld [vmem:[%s11854_s5 + $0xa0] sm:$0xff]  ;;  %v580_v5 = vld [vmem:[%s11854_s5 + $0xa8] sm:$0xff]  ;;  %v582_v6 = vld [vmem:[%s11854_s5 + $0xb0] sm:$0xff] }
  0xfa   :  { %553 = vst [vmem:[#allocation4 + $0x38] sm:$0xff] %v552_v55  ;;  %v584_v7 = vld [vmem:[%s11854_s5 + $0xb8] sm:$0xff]  ;;  %v586_v8 = vld [vmem:[%s11854_s5 + $0xc0] sm:$0xff]  ;;  %v588_v9 = vld [vmem:[%s11854_s5 + $0xc8] sm:$0xff] }
  0xfb   :  { %555 = vst [vmem:[#allocation4 + $0x40] sm:$0xff] %v554_v56  ;;  %v590_v10 = vld [vmem:[%s11854_s5 + $0xd0] sm:$0xff]  ;;  %v592_v11 = vld [vmem:[%s11854_s5 + $0xd8] sm:$0xff]  ;;  %v594_v12 = vld [vmem:[%s11854_s5 + $0xe0] sm:$0xff] }
  0xfc   :  { %557 = vst [vmem:[#allocation4 + $0x48] sm:$0xff] %v556_v57  ;;  %v596_v13 = vld [vmem:[%s11854_s5 + $0xe8] sm:$0xff]  ;;  %v598_v14 = vld [vmem:[%s11854_s5 + $0xf0] sm:$0xff]  ;;  %v600_v15 = vld [vmem:[%s11854_s5 + $0xf8] sm:$0xff] }
  0xfd   :  { %559 = vst [vmem:[#allocation4 + $0x50] sm:$0xff] %v558_v58  ;;  %v602_v16 = vld [vmem:[%s11854_s5 + $0x100] sm:$0xff]  ;;  %v604_v17 = vld [vmem:[%s11854_s5 + $0x108] sm:$0xff]  ;;  %v606_v18 = vld [vmem:[%s11854_s5 + $0x110] sm:$0xff] }
  0xfe   :  { %561 = vst [vmem:[#allocation4 + $0x58] sm:$0xff] %v560_v59  ;;  %v608_v19 = vld [vmem:[%s11854_s5 + $0x118] sm:$0xff]  ;;  %v610_v20 = vld [vmem:[%s11854_s5 + $0x120] sm:$0xff]  ;;  %v612_v21 = vld [vmem:[%s11854_s5 + $0x128] sm:$0xff] }
  0xff   :  { %563 = vst [vmem:[#allocation4 + $0x60] sm:$0xff] %v562_v60  ;;  %v614_v22 = vld [vmem:[%s11854_s5 + $0x130] sm:$0xff]  ;;  %v616_v23 = vld [vmem:[%s11854_s5 + $0x138] sm:$0xff]  ;;  %v618_v24 = vld [vmem:[%s11854_s5 + $0x140] sm:$0xff] }
 0x100   :  { %565 = vst [vmem:[#allocation4 + $0x68] sm:$0xff] %v564_v61  ;;  %v620_v25 = vld [vmem:[%s11854_s5 + $0x148] sm:$0xff]  ;;  %v622_v26 = vld [vmem:[%s11854_s5 + $0x150] sm:$0xff]  ;;  %v624_v27 = vld [vmem:[%s11854_s5 + $0x158] sm:$0xff] }
 0x101   :  { %567 = vst [vmem:[#allocation4 + $0x70] sm:$0xff] %v566_v62  ;;  %v626_v28 = vld [vmem:[%s11854_s5 + $0x160] sm:$0xff]  ;;  %v628_v29 = vld [vmem:[%s11854_s5 + $0x168] sm:$0xff]  ;;  %v630_v30 = vld [vmem:[%s11854_s5 + $0x170] sm:$0xff] }
 0x102   :  { %569 = vst [vmem:[#allocation4 + $0x78] sm:$0xff] %v568_v63  ;;  %v632_v31 = vld [vmem:[%s11854_s5 + $0x178] sm:$0xff]  ;;  %v634_v32 = vld [vmem:[%s11854_s5 + $0x180] sm:$0xff]  ;;  %v636_v33 = vld [vmem:[%s11854_s5 + $0x188] sm:$0xff] }
 0x103   :  { %571 = vst [vmem:[#allocation4 + $0x80] sm:$0xff] %v570_v0  ;;  %v638_v34 = vld [vmem:[%s11854_s5 + $0x190] sm:$0xff]  ;;  %v640_v35 = vld [vmem:[%s11854_s5 + $0x198] sm:$0xff]  ;;  %v642_v36 = vld [vmem:[%s11854_s5 + $0x1a0] sm:$0xff] }
 0x104   :  { %573 = vst [vmem:[#allocation4 + $0x88] sm:$0xff] %v572_v1  ;;  %v644_v37 = vld [vmem:[%s11854_s5 + $0x1a8] sm:$0xff]  ;;  %v646_v38 = vld [vmem:[%s11854_s5 + $0x1b0] sm:$0xff]  ;;  %v648_v39 = vld [vmem:[%s11854_s5 + $0x1b8] sm:$0xff] }
 0x105   :  { %575 = vst [vmem:[#allocation4 + $0x90] sm:$0xff] %v574_v2  ;;  %v650_v40 = vld [vmem:[%s11854_s5 + $0x1c0] sm:$0xff]  ;;  %v652_v41 = vld [vmem:[%s11854_s5 + $0x1c8] sm:$0xff]  ;;  %v654_v42 = vld [vmem:[%s11854_s5 + $0x1d0] sm:$0xff] }
 0x106   :  { %577 = vst [vmem:[#allocation4 + $0x98] sm:$0xff] %v576_v3  ;;  %v656_v43 = vld [vmem:[%s11854_s5 + $0x1d8] sm:$0xff]  ;;  %v658_v44 = vld [vmem:[%s11854_s5 + $0x1e0] sm:$0xff]  ;;  %v660_v45 = vld [vmem:[%s11854_s5 + $0x1e8] sm:$0xff] }
 0x107   :  { %579 = vst [vmem:[#allocation4 + $0xa0] sm:$0xff] %v578_v4  ;;  %v662_v46 = vld [vmem:[%s11854_s5 + $0x1f0] sm:$0xff]  ;;  %v664_v47 = vld [vmem:[%s11854_s5 + $0x1f8] sm:$0xff]  ;;  %v666_v48 = vld [vmem:[%s11854_s5 + $0x200] sm:$0xff] }
 0x108   :  { %581 = vst [vmem:[#allocation4 + $0xa8] sm:$0xff] %v580_v5  ;;  %v668_v49 = vld [vmem:[%s11854_s5 + $0x208] sm:$0xff]  ;;  %v670_v50 = vld [vmem:[%s11854_s5 + $0x210] sm:$0xff]  ;;  %v672_v51 = vld [vmem:[%s11854_s5 + $0x218] sm:$0xff] }
 0x109   :  { %583 = vst [vmem:[#allocation4 + $0xb0] sm:$0xff] %v582_v6  ;;  %v674_v52 = vld [vmem:[%s11854_s5 + $0x220] sm:$0xff]  ;;  %v676_v53 = vld [vmem:[%s11854_s5 + $0x228] sm:$0xff]  ;;  %v678_v54 = vld [vmem:[%s11854_s5 + $0x230] sm:$0xff] }
 0x10a   :  { %585 = vst [vmem:[#allocation4 + $0xb8] sm:$0xff] %v584_v7  ;;  %v680_v55 = vld [vmem:[%s11854_s5 + $0x238] sm:$0xff]  ;;  %v682_v56 = vld [vmem:[%s11854_s5 + $0x240] sm:$0xff]  ;;  %v684_v57 = vld [vmem:[%s11854_s5 + $0x248] sm:$0xff] }
 0x10b   :  { %587 = vst [vmem:[#allocation4 + $0xc0] sm:$0xff] %v586_v8  ;;  %v686_v58 = vld [vmem:[%s11854_s5 + $0x250] sm:$0xff]  ;;  %v688_v59 = vld [vmem:[%s11854_s5 + $0x258] sm:$0xff]  ;;  %v690_v60 = vld [vmem:[%s11854_s5 + $0x260] sm:$0xff] }
 0x10c   :  { %589 = vst [vmem:[#allocation4 + $0xc8] sm:$0xff] %v588_v9  ;;  %v692_v61 = vld [vmem:[%s11854_s5 + $0x268] sm:$0xff]  ;;  %v694_v62 = vld [vmem:[%s11854_s5 + $0x270] sm:$0xff]  ;;  %v696_v63 = vld [vmem:[%s11854_s5 + $0x278] sm:$0xff] }
 0x10d   :  { %591 = vst [vmem:[#allocation4 + $0xd0] sm:$0xff] %v590_v10  ;;  %v698_v0 = vld [vmem:[%s11854_s5 + $0x280] sm:$0xff]  ;;  %v700_v1 = vld [vmem:[%s11854_s5 + $0x288] sm:$0xff]  ;;  %v702_v2 = vld [vmem:[%s11854_s5 + $0x290] sm:$0xff] }
 0x10e   :  { %593 = vst [vmem:[#allocation4 + $0xd8] sm:$0xff] %v592_v11  ;;  %v704_v3 = vld [vmem:[%s11854_s5 + $0x298] sm:$0xff]  ;;  %v706_v4 = vld [vmem:[%s11854_s5 + $0x2a0] sm:$0xff]  ;;  %v708_v5 = vld [vmem:[%s11854_s5 + $0x2a8] sm:$0xff] }
 0x10f   :  { %595 = vst [vmem:[#allocation4 + $0xe0] sm:$0xff] %v594_v12  ;;  %v710_v6 = vld [vmem:[%s11854_s5 + $0x2b0] sm:$0xff]  ;;  %v712_v7 = vld [vmem:[%s11854_s5 + $0x2b8] sm:$0xff]  ;;  %v714_v8 = vld [vmem:[%s11854_s5 + $0x2c0] sm:$0xff] }
 0x110   :  { %597 = vst [vmem:[#allocation4 + $0xe8] sm:$0xff] %v596_v13  ;;  %v716_v9 = vld [vmem:[%s11854_s5 + $0x2c8] sm:$0xff]  ;;  %v718_v10 = vld [vmem:[%s11854_s5 + $0x2d0] sm:$0xff]  ;;  %v720_v11 = vld [vmem:[%s11854_s5 + $0x2d8] sm:$0xff] }
 0x111   :  { %599 = vst [vmem:[#allocation4 + $0xf0] sm:$0xff] %v598_v14  ;;  %v722_v12 = vld [vmem:[%s11854_s5 + $0x2e0] sm:$0xff]  ;;  %v724_v13 = vld [vmem:[%s11854_s5 + $0x2e8] sm:$0xff]  ;;  %v726_v14 = vld [vmem:[%s11854_s5 + $0x2f0] sm:$0xff] }
 0x112   :  { %601 = vst [vmem:[#allocation4 + $0xf8] sm:$0xff] %v600_v15  ;;  %v728_v15 = vld [vmem:[%s11854_s5 + $0x2f8] sm:$0xff] }
 0x113   :  { %603 = vst [vmem:[#allocation4 + $0x100] sm:$0xff] %v602_v16  ;;  %v730_v16 = vld [vmem:[%s11854_s5 + $0x300] sm:$0xff] }
 0x114   :  { %605 = vst [vmem:[#allocation4 + $0x108] sm:$0xff] %v604_v17  ;;  %v732_v17 = vld [vmem:[%s11854_s5 + $0x308] sm:$0xff] }
 0x115   :  { %607 = vst [vmem:[#allocation4 + $0x110] sm:$0xff] %v606_v18  ;;  %v734_v18 = vld [vmem:[%s11854_s5 + $0x310] sm:$0xff] }
 0x116   :  { %609 = vst [vmem:[#allocation4 + $0x118] sm:$0xff] %v608_v19  ;;  %v736_v19 = vld [vmem:[%s11854_s5 + $0x318] sm:$0xff] }
 0x117   :  { %611 = vst [vmem:[#allocation4 + $0x120] sm:$0xff] %v610_v20  ;;  %v738_v20 = vld [vmem:[%s11854_s5 + $0x320] sm:$0xff] }
 0x118   :  { %613 = vst [vmem:[#allocation4 + $0x128] sm:$0xff] %v612_v21  ;;  %v740_v21 = vld [vmem:[%s11854_s5 + $0x328] sm:$0xff] }
 0x119   :  { %615 = vst [vmem:[#allocation4 + $0x130] sm:$0xff] %v614_v22  ;;  %v742_v22 = vld [vmem:[%s11854_s5 + $0x330] sm:$0xff] }
 0x11a   :  { %617 = vst [vmem:[#allocation4 + $0x138] sm:$0xff] %v616_v23  ;;  %v744_v23 = vld [vmem:[%s11854_s5 + $0x338] sm:$0xff] }
 0x11b   :  { %619 = vst [vmem:[#allocation4 + $0x140] sm:$0xff] %v618_v24  ;;  %v746_v24 = vld [vmem:[%s11854_s5 + $0x340] sm:$0xff] }
 0x11c   :  { %621 = vst [vmem:[#allocation4 + $0x148] sm:$0xff] %v620_v25  ;;  %v748_v25 = vld [vmem:[%s11854_s5 + $0x348] sm:$0xff] }
 0x11d   :  { %623 = vst [vmem:[#allocation4 + $0x150] sm:$0xff] %v622_v26  ;;  %v750_v26 = vld [vmem:[%s11854_s5 + $0x350] sm:$0xff] }
 0x11e   :  { %625 = vst [vmem:[#allocation4 + $0x158] sm:$0xff] %v624_v27  ;;  %v752_v27 = vld [vmem:[%s11854_s5 + $0x358] sm:$0xff] }
 0x11f   :  { %627 = vst [vmem:[#allocation4 + $0x160] sm:$0xff] %v626_v28  ;;  %v754_v28 = vld [vmem:[%s11854_s5 + $0x360] sm:$0xff] }
 0x120   :  { %629 = vst [vmem:[#allocation4 + $0x168] sm:$0xff] %v628_v29  ;;  %v756_v29 = vld [vmem:[%s11854_s5 + $0x368] sm:$0xff] }
 0x121   :  { %631 = vst [vmem:[#allocation4 + $0x170] sm:$0xff] %v630_v30  ;;  %v758_v30 = vld [vmem:[%s11854_s5 + $0x370] sm:$0xff] }
 0x122   :  { %633 = vst [vmem:[#allocation4 + $0x178] sm:$0xff] %v632_v31  ;;  %v760_v31 = vld [vmem:[%s11854_s5 + $0x378] sm:$0xff] }
 0x123   :  { %635 = vst [vmem:[#allocation4 + $0x180] sm:$0xff] %v634_v32  ;;  %v762_v32 = vld [vmem:[%s11854_s5 + $0x380] sm:$0xff] }
 0x124   :  { %637 = vst [vmem:[#allocation4 + $0x188] sm:$0xff] %v636_v33  ;;  %v764_v33 = vld [vmem:[%s11854_s5 + $0x388] sm:$0xff] }
 0x125   :  { %639 = vst [vmem:[#allocation4 + $0x190] sm:$0xff] %v638_v34  ;;  %v766_v34 = vld [vmem:[%s11854_s5 + $0x390] sm:$0xff] }
 0x126   :  { %641 = vst [vmem:[#allocation4 + $0x198] sm:$0xff] %v640_v35  ;;  %v768_v35 = vld [vmem:[%s11854_s5 + $0x398] sm:$0xff] }
 0x127   :  { %643 = vst [vmem:[#allocation4 + $0x1a0] sm:$0xff] %v642_v36  ;;  %v770_v36 = vld [vmem:[%s11854_s5 + $0x3a0] sm:$0xff] }
 0x128   :  { %645 = vst [vmem:[#allocation4 + $0x1a8] sm:$0xff] %v644_v37  ;;  %v772_v37 = vld [vmem:[%s11854_s5 + $0x3a8] sm:$0xff] }
 0x129   :  { %647 = vst [vmem:[#allocation4 + $0x1b0] sm:$0xff] %v646_v38  ;;  %v774_v38 = vld [vmem:[%s11854_s5 + $0x3b0] sm:$0xff] }
 0x12a   :  { %649 = vst [vmem:[#allocation4 + $0x1b8] sm:$0xff] %v648_v39  ;;  %v776_v39 = vld [vmem:[%s11854_s5 + $0x3b8] sm:$0xff] }
 0x12b   :  { %651 = vst [vmem:[#allocation4 + $0x1c0] sm:$0xff] %v650_v40  ;;  %v778_v40 = vld [vmem:[%s11854_s5 + $0x3c0] sm:$0xff] }
 0x12c   :  { %653 = vst [vmem:[#allocation4 + $0x1c8] sm:$0xff] %v652_v41  ;;  %v780_v41 = vld [vmem:[%s11854_s5 + $0x3c8] sm:$0xff] }
 0x12d   :  { %655 = vst [vmem:[#allocation4 + $0x1d0] sm:$0xff] %v654_v42  ;;  %v782_v42 = vld [vmem:[%s11854_s5 + $0x3d0] sm:$0xff] }
 0x12e   :  { %657 = vst [vmem:[#allocation4 + $0x1d8] sm:$0xff] %v656_v43  ;;  %v784_v43 = vld [vmem:[%s11854_s5 + $0x3d8] sm:$0xff] }
 0x12f   :  { %659 = vst [vmem:[#allocation4 + $0x1e0] sm:$0xff] %v658_v44  ;;  %v786_v44 = vld [vmem:[%s11854_s5 + $0x3e0] sm:$0xff] }
 0x130   :  { %661 = vst [vmem:[#allocation4 + $0x1e8] sm:$0xff] %v660_v45  ;;  %v788_v45 = vld [vmem:[%s11854_s5 + $0x3e8] sm:$0xff] }
 0x131   :  { %663 = vst [vmem:[#allocation4 + $0x1f0] sm:$0xff] %v662_v46  ;;  %v790_v46 = vld [vmem:[%s11854_s5 + $0x3f0] sm:$0xff] }
 0x132   :  { %665 = vst [vmem:[#allocation4 + $0x1f8] sm:$0xff] %v664_v47  ;;  %v792_v47 = vld [vmem:[%s11854_s5 + $0x3f8] sm:$0xff] }
 0x133   :  { %667 = vst [vmem:[#allocation4 + $0x200] sm:$0xff] %v666_v48  ;;  %v794_v48 = vld [vmem:[%s11854_s5 + $0x400] sm:$0xff] }
 0x134   :  { %669 = vst [vmem:[#allocation4 + $0x208] sm:$0xff] %v668_v49  ;;  %v796_v49 = vld [vmem:[%s11854_s5 + $0x408] sm:$0xff] }
 0x135   :  { %671 = vst [vmem:[#allocation4 + $0x210] sm:$0xff] %v670_v50  ;;  %v798_v50 = vld [vmem:[%s11854_s5 + $0x410] sm:$0xff] }
 0x136   :  { %673 = vst [vmem:[#allocation4 + $0x218] sm:$0xff] %v672_v51  ;;  %v800_v51 = vld [vmem:[%s11854_s5 + $0x418] sm:$0xff] }
 0x137   :  { %675 = vst [vmem:[#allocation4 + $0x220] sm:$0xff] %v674_v52  ;;  %v802_v52 = vld [vmem:[%s11854_s5 + $0x420] sm:$0xff] }
 0x138   :  { %677 = vst [vmem:[#allocation4 + $0x228] sm:$0xff] %v676_v53  ;;  %v804_v53 = vld [vmem:[%s11854_s5 + $0x428] sm:$0xff] }
 0x139   :  { %679 = vst [vmem:[#allocation4 + $0x230] sm:$0xff] %v678_v54  ;;  %v806_v54 = vld [vmem:[%s11854_s5 + $0x430] sm:$0xff] }
 0x13a   :  { %681 = vst [vmem:[#allocation4 + $0x238] sm:$0xff] %v680_v55  ;;  %v808_v55 = vld [vmem:[%s11854_s5 + $0x438] sm:$0xff] }
 0x13b   :  { %683 = vst [vmem:[#allocation4 + $0x240] sm:$0xff] %v682_v56  ;;  %v810_v56 = vld [vmem:[%s11854_s5 + $0x440] sm:$0xff] }
 0x13c   :  { %685 = vst [vmem:[#allocation4 + $0x248] sm:$0xff] %v684_v57  ;;  %v812_v57 = vld [vmem:[%s11854_s5 + $0x448] sm:$0xff] }
 0x13d   :  { %687 = vst [vmem:[#allocation4 + $0x250] sm:$0xff] %v686_v58  ;;  %v814_v58 = vld [vmem:[%s11854_s5 + $0x450] sm:$0xff] }
 0x13e   :  { %689 = vst [vmem:[#allocation4 + $0x258] sm:$0xff] %v688_v59  ;;  %v816_v59 = vld [vmem:[%s11854_s5 + $0x458] sm:$0xff] }
 0x13f   :  { %691 = vst [vmem:[#allocation4 + $0x260] sm:$0xff] %v690_v60  ;;  %v818_v60 = vld [vmem:[%s11854_s5 + $0x460] sm:$0xff] }
 0x140   :  { %693 = vst [vmem:[#allocation4 + $0x268] sm:$0xff] %v692_v61  ;;  %v820_v61 = vld [vmem:[%s11854_s5 + $0x468] sm:$0xff] }
 0x141   :  { %695 = vst [vmem:[#allocation4 + $0x270] sm:$0xff] %v694_v62  ;;  %v822_v62 = vld [vmem:[%s11854_s5 + $0x470] sm:$0xff] }
 0x142   :  { %697 = vst [vmem:[#allocation4 + $0x278] sm:$0xff] %v696_v63  ;;  %v824_v63 = vld [vmem:[%s11854_s5 + $0x478] sm:$0xff] }
 0x143   :  { %699 = vst [vmem:[#allocation4 + $0x280] sm:$0xff] %v698_v0  ;;  %v826_v0 = vld [vmem:[%s11854_s5 + $0x480] sm:$0xff] }
 0x144   :  { %701 = vst [vmem:[#allocation4 + $0x288] sm:$0xff] %v700_v1  ;;  %v828_v1 = vld [vmem:[%s11854_s5 + $0x488] sm:$0xff] }
 0x145   :  { %703 = vst [vmem:[#allocation4 + $0x290] sm:$0xff] %v702_v2  ;;  %v830_v2 = vld [vmem:[%s11854_s5 + $0x490] sm:$0xff] }
 0x146   :  { %705 = vst [vmem:[#allocation4 + $0x298] sm:$0xff] %v704_v3  ;;  %v832_v3 = vld [vmem:[%s11854_s5 + $0x498] sm:$0xff] }
 0x147   :  { %707 = vst [vmem:[#allocation4 + $0x2a0] sm:$0xff] %v706_v4  ;;  %v834_v4 = vld [vmem:[%s11854_s5 + $0x4a0] sm:$0xff] }
 0x148   :  { %709 = vst [vmem:[#allocation4 + $0x2a8] sm:$0xff] %v708_v5  ;;  %v836_v5 = vld [vmem:[%s11854_s5 + $0x4a8] sm:$0xff] }
 0x149   :  { %711 = vst [vmem:[#allocation4 + $0x2b0] sm:$0xff] %v710_v6  ;;  %v838_v6 = vld [vmem:[%s11854_s5 + $0x4b0] sm:$0xff] }
 0x14a   :  { %713 = vst [vmem:[#allocation4 + $0x2b8] sm:$0xff] %v712_v7  ;;  %v840_v7 = vld [vmem:[%s11854_s5 + $0x4b8] sm:$0xff] }
 0x14b   :  { %715 = vst [vmem:[#allocation4 + $0x2c0] sm:$0xff] %v714_v8  ;;  %v842_v8 = vld [vmem:[%s11854_s5 + $0x4c0] sm:$0xff] }
 0x14c   :  { %717 = vst [vmem:[#allocation4 + $0x2c8] sm:$0xff] %v716_v9  ;;  %v844_v9 = vld [vmem:[%s11854_s5 + $0x4c8] sm:$0xff] }
 0x14d   :  { %719 = vst [vmem:[#allocation4 + $0x2d0] sm:$0xff] %v718_v10  ;;  %v846_v10 = vld [vmem:[%s11854_s5 + $0x4d0] sm:$0xff] }
 0x14e   :  { %721 = vst [vmem:[#allocation4 + $0x2d8] sm:$0xff] %v720_v11  ;;  %v848_v11 = vld [vmem:[%s11854_s5 + $0x4d8] sm:$0xff] }
 0x14f   :  { %723 = vst [vmem:[#allocation4 + $0x2e0] sm:$0xff] %v722_v12  ;;  %v850_v12 = vld [vmem:[%s11854_s5 + $0x4e0] sm:$0xff] }
 0x150   :  { %725 = vst [vmem:[#allocation4 + $0x2e8] sm:$0xff] %v724_v13  ;;  %v852_v13 = vld [vmem:[%s11854_s5 + $0x4e8] sm:$0xff] }
 0x151   :  { %727 = vst [vmem:[#allocation4 + $0x2f0] sm:$0xff] %v726_v14  ;;  %v854_v14 = vld [vmem:[%s11854_s5 + $0x4f0] sm:$0xff] }
 0x152   :  { %729 = vst [vmem:[#allocation4 + $0x2f8] sm:$0xff] %v728_v15  ;;  %v856_v15 = vld [vmem:[%s11854_s5 + $0x4f8] sm:$0xff] }
 0x153   :  { %731 = vst [vmem:[#allocation4 + $0x300] sm:$0xff] %v730_v16  ;;  %v858_v16 = vld [vmem:[%s11854_s5 + $0x500] sm:$0xff] }
 0x154   :  { %733 = vst [vmem:[#allocation4 + $0x308] sm:$0xff] %v732_v17  ;;  %v860_v17 = vld [vmem:[%s11854_s5 + $0x508] sm:$0xff] }
 0x155   :  { %735 = vst [vmem:[#allocation4 + $0x310] sm:$0xff] %v734_v18  ;;  %v862_v18 = vld [vmem:[%s11854_s5 + $0x510] sm:$0xff] }
 0x156   :  { %737 = vst [vmem:[#allocation4 + $0x318] sm:$0xff] %v736_v19  ;;  %v864_v19 = vld [vmem:[%s11854_s5 + $0x518] sm:$0xff] }
 0x157   :  { %739 = vst [vmem:[#allocation4 + $0x320] sm:$0xff] %v738_v20  ;;  %v866_v20 = vld [vmem:[%s11854_s5 + $0x520] sm:$0xff] }
 0x158   :  { %741 = vst [vmem:[#allocation4 + $0x328] sm:$0xff] %v740_v21  ;;  %v868_v21 = vld [vmem:[%s11854_s5 + $0x528] sm:$0xff] }
 0x159   :  { %743 = vst [vmem:[#allocation4 + $0x330] sm:$0xff] %v742_v22  ;;  %v870_v22 = vld [vmem:[%s11854_s5 + $0x530] sm:$0xff] }
 0x15a   :  { %745 = vst [vmem:[#allocation4 + $0x338] sm:$0xff] %v744_v23  ;;  %v872_v23 = vld [vmem:[%s11854_s5 + $0x538] sm:$0xff] }
 0x15b   :  { %747 = vst [vmem:[#allocation4 + $0x340] sm:$0xff] %v746_v24  ;;  %v874_v24 = vld [vmem:[%s11854_s5 + $0x540] sm:$0xff] }
 0x15c   :  { %749 = vst [vmem:[#allocation4 + $0x348] sm:$0xff] %v748_v25  ;;  %v876_v25 = vld [vmem:[%s11854_s5 + $0x548] sm:$0xff] }
 0x15d   :  { %751 = vst [vmem:[#allocation4 + $0x350] sm:$0xff] %v750_v26  ;;  %v878_v26 = vld [vmem:[%s11854_s5 + $0x550] sm:$0xff] }
 0x15e   :  { %753 = vst [vmem:[#allocation4 + $0x358] sm:$0xff] %v752_v27  ;;  %v880_v27 = vld [vmem:[%s11854_s5 + $0x558] sm:$0xff] }
 0x15f   :  { %755 = vst [vmem:[#allocation4 + $0x360] sm:$0xff] %v754_v28  ;;  %v882_v28 = vld [vmem:[%s11854_s5 + $0x560] sm:$0xff] }
 0x160   :  { %757 = vst [vmem:[#allocation4 + $0x368] sm:$0xff] %v756_v29  ;;  %v884_v29 = vld [vmem:[%s11854_s5 + $0x568] sm:$0xff] }
 0x161   :  { %759 = vst [vmem:[#allocation4 + $0x370] sm:$0xff] %v758_v30  ;;  %v886_v30 = vld [vmem:[%s11854_s5 + $0x570] sm:$0xff] }
 0x162   :  { %761 = vst [vmem:[#allocation4 + $0x378] sm:$0xff] %v760_v31  ;;  %v888_v31 = vld [vmem:[%s11854_s5 + $0x578] sm:$0xff] }
 0x163   :  { %763 = vst [vmem:[#allocation4 + $0x380] sm:$0xff] %v762_v32  ;;  %v890_v32 = vld [vmem:[%s11854_s5 + $0x580] sm:$0xff] }
 0x164   :  { %765 = vst [vmem:[#allocation4 + $0x388] sm:$0xff] %v764_v33  ;;  %v892_v33 = vld [vmem:[%s11854_s5 + $0x588] sm:$0xff] }
 0x165   :  { %767 = vst [vmem:[#allocation4 + $0x390] sm:$0xff] %v766_v34  ;;  %v894_v34 = vld [vmem:[%s11854_s5 + $0x590] sm:$0xff] }
 0x166   :  { %769 = vst [vmem:[#allocation4 + $0x398] sm:$0xff] %v768_v35  ;;  %v896_v35 = vld [vmem:[%s11854_s5 + $0x598] sm:$0xff] }
 0x167   :  { %771 = vst [vmem:[#allocation4 + $0x3a0] sm:$0xff] %v770_v36  ;;  %v898_v36 = vld [vmem:[%s11854_s5 + $0x5a0] sm:$0xff] }
 0x168   :  { %773 = vst [vmem:[#allocation4 + $0x3a8] sm:$0xff] %v772_v37  ;;  %v900_v37 = vld [vmem:[%s11854_s5 + $0x5a8] sm:$0xff] }
 0x169   :  { %775 = vst [vmem:[#allocation4 + $0x3b0] sm:$0xff] %v774_v38  ;;  %v902_v38 = vld [vmem:[%s11854_s5 + $0x5b0] sm:$0xff] }
 0x16a   :  { %777 = vst [vmem:[#allocation4 + $0x3b8] sm:$0xff] %v776_v39  ;;  %v904_v39 = vld [vmem:[%s11854_s5 + $0x5b8] sm:$0xff] }
 0x16b   :  { %779 = vst [vmem:[#allocation4 + $0x3c0] sm:$0xff] %v778_v40  ;;  %v906_v40 = vld [vmem:[%s11854_s5 + $0x5c0] sm:$0xff] }
 0x16c   :  { %781 = vst [vmem:[#allocation4 + $0x3c8] sm:$0xff] %v780_v41  ;;  %v908_v41 = vld [vmem:[%s11854_s5 + $0x5c8] sm:$0xff] }
 0x16d   :  { %783 = vst [vmem:[#allocation4 + $0x3d0] sm:$0xff] %v782_v42  ;;  %v910_v42 = vld [vmem:[%s11854_s5 + $0x5d0] sm:$0xff] }
 0x16e   :  { %785 = vst [vmem:[#allocation4 + $0x3d8] sm:$0xff] %v784_v43  ;;  %v912_v43 = vld [vmem:[%s11854_s5 + $0x5d8] sm:$0xff] }
 0x16f   :  { %787 = vst [vmem:[#allocation4 + $0x3e0] sm:$0xff] %v786_v44  ;;  %v914_v44 = vld [vmem:[%s11854_s5 + $0x5e0] sm:$0xff] }
 0x170   :  { %789 = vst [vmem:[#allocation4 + $0x3e8] sm:$0xff] %v788_v45  ;;  %v916_v45 = vld [vmem:[%s11854_s5 + $0x5e8] sm:$0xff] }
 0x171   :  { %791 = vst [vmem:[#allocation4 + $0x3f0] sm:$0xff] %v790_v46  ;;  %v918_v46 = vld [vmem:[%s11854_s5 + $0x5f0] sm:$0xff] }
 0x172   :  { %793 = vst [vmem:[#allocation4 + $0x3f8] sm:$0xff] %v792_v47  ;;  %v920_v47 = vld [vmem:[%s11854_s5 + $0x5f8] sm:$0xff] }
 0x173   :  { %795 = vst [vmem:[#allocation4 + $0x400] sm:$0xff] %v794_v48 }
 0x174   :  { %797 = vst [vmem:[#allocation4 + $0x408] sm:$0xff] %v796_v49 }
 0x175   :  { %799 = vst [vmem:[#allocation4 + $0x410] sm:$0xff] %v798_v50 }
 0x176   :  { %801 = vst [vmem:[#allocation4 + $0x418] sm:$0xff] %v800_v51 }
 0x177   :  { %803 = vst [vmem:[#allocation4 + $0x420] sm:$0xff] %v802_v52 }
 0x178   :  { %805 = vst [vmem:[#allocation4 + $0x428] sm:$0xff] %v804_v53 }
 0x179   :  { %807 = vst [vmem:[#allocation4 + $0x430] sm:$0xff] %v806_v54 }
 0x17a   :  { %809 = vst [vmem:[#allocation4 + $0x438] sm:$0xff] %v808_v55 }
 0x17b   :  { %811 = vst [vmem:[#allocation4 + $0x440] sm:$0xff] %v810_v56 }
 0x17c   :  { %813 = vst [vmem:[#allocation4 + $0x448] sm:$0xff] %v812_v57 }
 0x17d   :  { %815 = vst [vmem:[#allocation4 + $0x450] sm:$0xff] %v814_v58 }
 0x17e   :  { %817 = vst [vmem:[#allocation4 + $0x458] sm:$0xff] %v816_v59 }
 0x17f   :  { %819 = vst [vmem:[#allocation4 + $0x460] sm:$0xff] %v818_v60 }
 0x180   :  { %821 = vst [vmem:[#allocation4 + $0x468] sm:$0xff] %v820_v61 }
 0x181   :  { %823 = vst [vmem:[#allocation4 + $0x470] sm:$0xff] %v822_v62 }
 0x182   :  { %825 = vst [vmem:[#allocation4 + $0x478] sm:$0xff] %v824_v63 }
 0x183   :  { %827 = vst [vmem:[#allocation4 + $0x480] sm:$0xff] %v826_v0 }
 0x184   :  { %829 = vst [vmem:[#allocation4 + $0x488] sm:$0xff] %v828_v1 }
 0x185   :  { %831 = vst [vmem:[#allocation4 + $0x490] sm:$0xff] %v830_v2 }
 0x186   :  { %833 = vst [vmem:[#allocation4 + $0x498] sm:$0xff] %v832_v3 }
 0x187   :  { %835 = vst [vmem:[#allocation4 + $0x4a0] sm:$0xff] %v834_v4 }
 0x188   :  { %837 = vst [vmem:[#allocation4 + $0x4a8] sm:$0xff] %v836_v5 }
 0x189   :  { %839 = vst [vmem:[#allocation4 + $0x4b0] sm:$0xff] %v838_v6 }
 0x18a   :  { %841 = vst [vmem:[#allocation4 + $0x4b8] sm:$0xff] %v840_v7 }
 0x18b   :  { %843 = vst [vmem:[#allocation4 + $0x4c0] sm:$0xff] %v842_v8 }
 0x18c   :  { %845 = vst [vmem:[#allocation4 + $0x4c8] sm:$0xff] %v844_v9 }
 0x18d   :  { %847 = vst [vmem:[#allocation4 + $0x4d0] sm:$0xff] %v846_v10 }
 0x18e   :  { %849 = vst [vmem:[#allocation4 + $0x4d8] sm:$0xff] %v848_v11 }
 0x18f   :  { %851 = vst [vmem:[#allocation4 + $0x4e0] sm:$0xff] %v850_v12 }
 0x190   :  { %853 = vst [vmem:[#allocation4 + $0x4e8] sm:$0xff] %v852_v13 }
 0x191   :  { %855 = vst [vmem:[#allocation4 + $0x4f0] sm:$0xff] %v854_v14 }
 0x192   :  { %857 = vst [vmem:[#allocation4 + $0x4f8] sm:$0xff] %v856_v15 }
 0x193   :  { %859 = vst [vmem:[#allocation4 + $0x500] sm:$0xff] %v858_v16 }
 0x194   :  { %861 = vst [vmem:[#allocation4 + $0x508] sm:$0xff] %v860_v17 }
 0x195   :  { %863 = vst [vmem:[#allocation4 + $0x510] sm:$0xff] %v862_v18 }
 0x196   :  { %865 = vst [vmem:[#allocation4 + $0x518] sm:$0xff] %v864_v19 }
 0x197   :  { %867 = vst [vmem:[#allocation4 + $0x520] sm:$0xff] %v866_v20 }
 0x198   :  { %869 = vst [vmem:[#allocation4 + $0x528] sm:$0xff] %v868_v21 }
 0x199   :  { %871 = vst [vmem:[#allocation4 + $0x530] sm:$0xff] %v870_v22 }
 0x19a   :  { %873 = vst [vmem:[#allocation4 + $0x538] sm:$0xff] %v872_v23 }
 0x19b   :  { %875 = vst [vmem:[#allocation4 + $0x540] sm:$0xff] %v874_v24 }
 0x19c   :  { %877 = vst [vmem:[#allocation4 + $0x548] sm:$0xff] %v876_v25 }
 0x19d   :  { %879 = vst [vmem:[#allocation4 + $0x550] sm:$0xff] %v878_v26 }
 0x19e   :  { %881 = vst [vmem:[#allocation4 + $0x558] sm:$0xff] %v880_v27 }
 0x19f   :  { %883 = vst [vmem:[#allocation4 + $0x560] sm:$0xff] %v882_v28 }
 0x1a0   :  { %885 = vst [vmem:[#allocation4 + $0x568] sm:$0xff] %v884_v29 }
 0x1a1   :  { %887 = vst [vmem:[#allocation4 + $0x570] sm:$0xff] %v886_v30 }
 0x1a2   :  { %889 = vst [vmem:[#allocation4 + $0x578] sm:$0xff] %v888_v31 }
 0x1a3   :  { %891 = vst [vmem:[#allocation4 + $0x580] sm:$0xff] %v890_v32 }
 0x1a4   :  { %893 = vst [vmem:[#allocation4 + $0x588] sm:$0xff] %v892_v33 }
 0x1a5   :  { %895 = vst [vmem:[#allocation4 + $0x590] sm:$0xff] %v894_v34 }
 0x1a6   :  { %897 = vst [vmem:[#allocation4 + $0x598] sm:$0xff] %v896_v35 }
 0x1a7   :  { %899 = vst [vmem:[#allocation4 + $0x5a0] sm:$0xff] %v898_v36 }
 0x1a8   :  { %901 = vst [vmem:[#allocation4 + $0x5a8] sm:$0xff] %v900_v37 }
 0x1a9   :  { %903 = vst [vmem:[#allocation4 + $0x5b0] sm:$0xff] %v902_v38 }
 0x1aa   :  { %905 = vst [vmem:[#allocation4 + $0x5b8] sm:$0xff] %v904_v39 }
 0x1ab   :  { %907 = vst [vmem:[#allocation4 + $0x5c0] sm:$0xff] %v906_v40 }
 0x1ac   :  { %909 = vst [vmem:[#allocation4 + $0x5c8] sm:$0xff] %v908_v41 }
 0x1ad   :  { %911 = vst [vmem:[#allocation4 + $0x5d0] sm:$0xff] %v910_v42 }
 0x1ae   :  { %913 = vst [vmem:[#allocation4 + $0x5d8] sm:$0xff] %v912_v43 }
 0x1af   :  { %915 = vst [vmem:[#allocation4 + $0x5e0] sm:$0xff] %v914_v44 }
 0x1b0   :  { %917 = vst [vmem:[#allocation4 + $0x5e8] sm:$0xff] %v916_v45 }
 0x1b1   :  { %919 = vst [vmem:[#allocation4 + $0x5f0] sm:$0xff] %v918_v46 }
 0x1b2   :  { %921 = vst [vmem:[#allocation4 + $0x5f8] sm:$0xff] %v920_v47 }
 0x1b3   :  { %927 = vsyncadd [#allocation6 + $0x1], 24576  ;;  %v939_v48 = vld [vmem:[%s11856_s7] sm:$0xff]  ;;  %v941_v49 = vld [vmem:[%s11856_s7 + $0x8] sm:$0xff] }
 0x1b4   :  { %940 = vst [vmem:[#allocation5] sm:$0xff] %v939_v48  ;;  %v943_v50 = vld [vmem:[%s11856_s7 + $0x10] sm:$0xff]  ;;  %v945_v51 = vld [vmem:[%s11856_s7 + $0x18] sm:$0xff]  ;;  %v947_v52 = vld [vmem:[%s11856_s7 + $0x20] sm:$0xff] }
 0x1b5   :  { %942 = vst [vmem:[#allocation5 + $0x8] sm:$0xff] %v941_v49  ;;  %v949_v53 = vld [vmem:[%s11856_s7 + $0x28] sm:$0xff]  ;;  %v951_v54 = vld [vmem:[%s11856_s7 + $0x30] sm:$0xff]  ;;  %v953_v55 = vld [vmem:[%s11856_s7 + $0x38] sm:$0xff] }
 0x1b6   :  { %944 = vst [vmem:[#allocation5 + $0x10] sm:$0xff] %v943_v50  ;;  %v955_v56 = vld [vmem:[%s11856_s7 + $0x40] sm:$0xff]  ;;  %v957_v57 = vld [vmem:[%s11856_s7 + $0x48] sm:$0xff]  ;;  %v959_v58 = vld [vmem:[%s11856_s7 + $0x50] sm:$0xff] }
 0x1b7   :  { %946 = vst [vmem:[#allocation5 + $0x18] sm:$0xff] %v945_v51  ;;  %v961_v59 = vld [vmem:[%s11856_s7 + $0x58] sm:$0xff]  ;;  %v963_v60 = vld [vmem:[%s11856_s7 + $0x60] sm:$0xff]  ;;  %v965_v61 = vld [vmem:[%s11856_s7 + $0x68] sm:$0xff] }
 0x1b8   :  { %948 = vst [vmem:[#allocation5 + $0x20] sm:$0xff] %v947_v52  ;;  %v967_v62 = vld [vmem:[%s11856_s7 + $0x70] sm:$0xff]  ;;  %v969_v63 = vld [vmem:[%s11856_s7 + $0x78] sm:$0xff]  ;;  %v971_v0 = vld [vmem:[%s11856_s7 + $0x80] sm:$0xff] }
 0x1b9   :  { %950 = vst [vmem:[#allocation5 + $0x28] sm:$0xff] %v949_v53  ;;  %v973_v1 = vld [vmem:[%s11856_s7 + $0x88] sm:$0xff]  ;;  %v975_v2 = vld [vmem:[%s11856_s7 + $0x90] sm:$0xff]  ;;  %v977_v3 = vld [vmem:[%s11856_s7 + $0x98] sm:$0xff] }
 0x1ba   :  { %952 = vst [vmem:[#allocation5 + $0x30] sm:$0xff] %v951_v54  ;;  %v979_v4 = vld [vmem:[%s11856_s7 + $0xa0] sm:$0xff]  ;;  %v981_v5 = vld [vmem:[%s11856_s7 + $0xa8] sm:$0xff]  ;;  %v983_v6 = vld [vmem:[%s11856_s7 + $0xb0] sm:$0xff] }
 0x1bb   :  { %954 = vst [vmem:[#allocation5 + $0x38] sm:$0xff] %v953_v55  ;;  %v985_v7 = vld [vmem:[%s11856_s7 + $0xb8] sm:$0xff]  ;;  %v987_v8 = vld [vmem:[%s11856_s7 + $0xc0] sm:$0xff]  ;;  %v989_v9 = vld [vmem:[%s11856_s7 + $0xc8] sm:$0xff] }
 0x1bc   :  { %956 = vst [vmem:[#allocation5 + $0x40] sm:$0xff] %v955_v56  ;;  %v991_v10 = vld [vmem:[%s11856_s7 + $0xd0] sm:$0xff]  ;;  %v993_v11 = vld [vmem:[%s11856_s7 + $0xd8] sm:$0xff]  ;;  %v995_v12 = vld [vmem:[%s11856_s7 + $0xe0] sm:$0xff] }
 0x1bd   :  { %958 = vst [vmem:[#allocation5 + $0x48] sm:$0xff] %v957_v57  ;;  %v997_v13 = vld [vmem:[%s11856_s7 + $0xe8] sm:$0xff]  ;;  %v999_v14 = vld [vmem:[%s11856_s7 + $0xf0] sm:$0xff]  ;;  %v1001_v15 = vld [vmem:[%s11856_s7 + $0xf8] sm:$0xff] }
 0x1be   :  { %960 = vst [vmem:[#allocation5 + $0x50] sm:$0xff] %v959_v58  ;;  %v1003_v16 = vld [vmem:[%s11856_s7 + $0x100] sm:$0xff]  ;;  %v1005_v17 = vld [vmem:[%s11856_s7 + $0x108] sm:$0xff]  ;;  %v1007_v18 = vld [vmem:[%s11856_s7 + $0x110] sm:$0xff] }
 0x1bf   :  { %962 = vst [vmem:[#allocation5 + $0x58] sm:$0xff] %v961_v59  ;;  %v1009_v19 = vld [vmem:[%s11856_s7 + $0x118] sm:$0xff]  ;;  %v1011_v20 = vld [vmem:[%s11856_s7 + $0x120] sm:$0xff]  ;;  %v1013_v21 = vld [vmem:[%s11856_s7 + $0x128] sm:$0xff] }
 0x1c0   :  { %964 = vst [vmem:[#allocation5 + $0x60] sm:$0xff] %v963_v60  ;;  %v1015_v22 = vld [vmem:[%s11856_s7 + $0x130] sm:$0xff]  ;;  %v1017_v23 = vld [vmem:[%s11856_s7 + $0x138] sm:$0xff]  ;;  %v1019_v24 = vld [vmem:[%s11856_s7 + $0x140] sm:$0xff] }
 0x1c1   :  { %966 = vst [vmem:[#allocation5 + $0x68] sm:$0xff] %v965_v61  ;;  %v1021_v25 = vld [vmem:[%s11856_s7 + $0x148] sm:$0xff]  ;;  %v1023_v26 = vld [vmem:[%s11856_s7 + $0x150] sm:$0xff]  ;;  %v1025_v27 = vld [vmem:[%s11856_s7 + $0x158] sm:$0xff] }
 0x1c2   :  { %968 = vst [vmem:[#allocation5 + $0x70] sm:$0xff] %v967_v62  ;;  %v1027_v28 = vld [vmem:[%s11856_s7 + $0x160] sm:$0xff]  ;;  %v1029_v29 = vld [vmem:[%s11856_s7 + $0x168] sm:$0xff]  ;;  %v1031_v30 = vld [vmem:[%s11856_s7 + $0x170] sm:$0xff] }
 0x1c3   :  { %970 = vst [vmem:[#allocation5 + $0x78] sm:$0xff] %v969_v63  ;;  %v1033_v31 = vld [vmem:[%s11856_s7 + $0x178] sm:$0xff]  ;;  %v1035_v32 = vld [vmem:[%s11856_s7 + $0x180] sm:$0xff]  ;;  %v1037_v33 = vld [vmem:[%s11856_s7 + $0x188] sm:$0xff] }
 0x1c4   :  { %972 = vst [vmem:[#allocation5 + $0x80] sm:$0xff] %v971_v0  ;;  %v1039_v34 = vld [vmem:[%s11856_s7 + $0x190] sm:$0xff]  ;;  %v1041_v35 = vld [vmem:[%s11856_s7 + $0x198] sm:$0xff]  ;;  %v1043_v36 = vld [vmem:[%s11856_s7 + $0x1a0] sm:$0xff] }
 0x1c5   :  { %974 = vst [vmem:[#allocation5 + $0x88] sm:$0xff] %v973_v1  ;;  %v1045_v37 = vld [vmem:[%s11856_s7 + $0x1a8] sm:$0xff]  ;;  %v1047_v38 = vld [vmem:[%s11856_s7 + $0x1b0] sm:$0xff]  ;;  %v1049_v39 = vld [vmem:[%s11856_s7 + $0x1b8] sm:$0xff] }
 0x1c6   :  { %976 = vst [vmem:[#allocation5 + $0x90] sm:$0xff] %v975_v2  ;;  %v1051_v40 = vld [vmem:[%s11856_s7 + $0x1c0] sm:$0xff]  ;;  %v1053_v41 = vld [vmem:[%s11856_s7 + $0x1c8] sm:$0xff]  ;;  %v1055_v42 = vld [vmem:[%s11856_s7 + $0x1d0] sm:$0xff] }
 0x1c7   :  { %978 = vst [vmem:[#allocation5 + $0x98] sm:$0xff] %v977_v3  ;;  %v1057_v43 = vld [vmem:[%s11856_s7 + $0x1d8] sm:$0xff]  ;;  %v1059_v44 = vld [vmem:[%s11856_s7 + $0x1e0] sm:$0xff]  ;;  %v1061_v45 = vld [vmem:[%s11856_s7 + $0x1e8] sm:$0xff] }
 0x1c8   :  { %980 = vst [vmem:[#allocation5 + $0xa0] sm:$0xff] %v979_v4  ;;  %v1063_v46 = vld [vmem:[%s11856_s7 + $0x1f0] sm:$0xff]  ;;  %v1065_v47 = vld [vmem:[%s11856_s7 + $0x1f8] sm:$0xff]  ;;  %v1067_v48 = vld [vmem:[%s11856_s7 + $0x200] sm:$0xff] }
 0x1c9   :  { %982 = vst [vmem:[#allocation5 + $0xa8] sm:$0xff] %v981_v5  ;;  %v1069_v49 = vld [vmem:[%s11856_s7 + $0x208] sm:$0xff]  ;;  %v1071_v50 = vld [vmem:[%s11856_s7 + $0x210] sm:$0xff]  ;;  %v1073_v51 = vld [vmem:[%s11856_s7 + $0x218] sm:$0xff] }
 0x1ca   :  { %984 = vst [vmem:[#allocation5 + $0xb0] sm:$0xff] %v983_v6  ;;  %v1075_v52 = vld [vmem:[%s11856_s7 + $0x220] sm:$0xff]  ;;  %v1077_v53 = vld [vmem:[%s11856_s7 + $0x228] sm:$0xff]  ;;  %v1079_v54 = vld [vmem:[%s11856_s7 + $0x230] sm:$0xff] }
 0x1cb   :  { %986 = vst [vmem:[#allocation5 + $0xb8] sm:$0xff] %v985_v7  ;;  %v1081_v55 = vld [vmem:[%s11856_s7 + $0x238] sm:$0xff]  ;;  %v1083_v56 = vld [vmem:[%s11856_s7 + $0x240] sm:$0xff]  ;;  %v1085_v57 = vld [vmem:[%s11856_s7 + $0x248] sm:$0xff] }
 0x1cc   :  { %988 = vst [vmem:[#allocation5 + $0xc0] sm:$0xff] %v987_v8  ;;  %v1087_v58 = vld [vmem:[%s11856_s7 + $0x250] sm:$0xff]  ;;  %v1089_v59 = vld [vmem:[%s11856_s7 + $0x258] sm:$0xff]  ;;  %v1091_v60 = vld [vmem:[%s11856_s7 + $0x260] sm:$0xff] }
 0x1cd   :  { %990 = vst [vmem:[#allocation5 + $0xc8] sm:$0xff] %v989_v9  ;;  %v1093_v61 = vld [vmem:[%s11856_s7 + $0x268] sm:$0xff]  ;;  %v1095_v62 = vld [vmem:[%s11856_s7 + $0x270] sm:$0xff]  ;;  %v1097_v63 = vld [vmem:[%s11856_s7 + $0x278] sm:$0xff] }
 0x1ce   :  { %992 = vst [vmem:[#allocation5 + $0xd0] sm:$0xff] %v991_v10  ;;  %v1099_v0 = vld [vmem:[%s11856_s7 + $0x280] sm:$0xff]  ;;  %v1101_v1 = vld [vmem:[%s11856_s7 + $0x288] sm:$0xff]  ;;  %v1103_v2 = vld [vmem:[%s11856_s7 + $0x290] sm:$0xff] }
 0x1cf   :  { %994 = vst [vmem:[#allocation5 + $0xd8] sm:$0xff] %v993_v11  ;;  %v1105_v3 = vld [vmem:[%s11856_s7 + $0x298] sm:$0xff]  ;;  %v1107_v4 = vld [vmem:[%s11856_s7 + $0x2a0] sm:$0xff]  ;;  %v1109_v5 = vld [vmem:[%s11856_s7 + $0x2a8] sm:$0xff] }
 0x1d0   :  { %996 = vst [vmem:[#allocation5 + $0xe0] sm:$0xff] %v995_v12  ;;  %v1111_v6 = vld [vmem:[%s11856_s7 + $0x2b0] sm:$0xff]  ;;  %v1113_v7 = vld [vmem:[%s11856_s7 + $0x2b8] sm:$0xff]  ;;  %v1115_v8 = vld [vmem:[%s11856_s7 + $0x2c0] sm:$0xff] }
 0x1d1   :  { %998 = vst [vmem:[#allocation5 + $0xe8] sm:$0xff] %v997_v13  ;;  %v1117_v9 = vld [vmem:[%s11856_s7 + $0x2c8] sm:$0xff]  ;;  %v1119_v10 = vld [vmem:[%s11856_s7 + $0x2d0] sm:$0xff]  ;;  %v1121_v11 = vld [vmem:[%s11856_s7 + $0x2d8] sm:$0xff] }
 0x1d2   :  { %1000 = vst [vmem:[#allocation5 + $0xf0] sm:$0xff] %v999_v14  ;;  %v1123_v12 = vld [vmem:[%s11856_s7 + $0x2e0] sm:$0xff]  ;;  %v1125_v13 = vld [vmem:[%s11856_s7 + $0x2e8] sm:$0xff]  ;;  %v1127_v14 = vld [vmem:[%s11856_s7 + $0x2f0] sm:$0xff] }
 0x1d3   :  { %1002 = vst [vmem:[#allocation5 + $0xf8] sm:$0xff] %v1001_v15  ;;  %v1129_v15 = vld [vmem:[%s11856_s7 + $0x2f8] sm:$0xff] }
 0x1d4   :  { %1004 = vst [vmem:[#allocation5 + $0x100] sm:$0xff] %v1003_v16  ;;  %v1131_v16 = vld [vmem:[%s11856_s7 + $0x300] sm:$0xff] }
 0x1d5   :  { %1006 = vst [vmem:[#allocation5 + $0x108] sm:$0xff] %v1005_v17  ;;  %v1133_v17 = vld [vmem:[%s11856_s7 + $0x308] sm:$0xff] }
 0x1d6   :  { %1008 = vst [vmem:[#allocation5 + $0x110] sm:$0xff] %v1007_v18  ;;  %v1135_v18 = vld [vmem:[%s11856_s7 + $0x310] sm:$0xff] }
 0x1d7   :  { %1010 = vst [vmem:[#allocation5 + $0x118] sm:$0xff] %v1009_v19  ;;  %v1137_v19 = vld [vmem:[%s11856_s7 + $0x318] sm:$0xff] }
 0x1d8   :  { %1012 = vst [vmem:[#allocation5 + $0x120] sm:$0xff] %v1011_v20  ;;  %v1139_v20 = vld [vmem:[%s11856_s7 + $0x320] sm:$0xff] }
 0x1d9   :  { %1014 = vst [vmem:[#allocation5 + $0x128] sm:$0xff] %v1013_v21  ;;  %v1141_v21 = vld [vmem:[%s11856_s7 + $0x328] sm:$0xff] }
 0x1da   :  { %1016 = vst [vmem:[#allocation5 + $0x130] sm:$0xff] %v1015_v22  ;;  %v1143_v22 = vld [vmem:[%s11856_s7 + $0x330] sm:$0xff] }
 0x1db   :  { %1018 = vst [vmem:[#allocation5 + $0x138] sm:$0xff] %v1017_v23  ;;  %v1145_v23 = vld [vmem:[%s11856_s7 + $0x338] sm:$0xff] }
 0x1dc   :  { %1020 = vst [vmem:[#allocation5 + $0x140] sm:$0xff] %v1019_v24  ;;  %v1147_v24 = vld [vmem:[%s11856_s7 + $0x340] sm:$0xff] }
 0x1dd   :  { %1022 = vst [vmem:[#allocation5 + $0x148] sm:$0xff] %v1021_v25  ;;  %v1149_v25 = vld [vmem:[%s11856_s7 + $0x348] sm:$0xff] }
 0x1de   :  { %1024 = vst [vmem:[#allocation5 + $0x150] sm:$0xff] %v1023_v26  ;;  %v1151_v26 = vld [vmem:[%s11856_s7 + $0x350] sm:$0xff] }
 0x1df   :  { %1026 = vst [vmem:[#allocation5 + $0x158] sm:$0xff] %v1025_v27  ;;  %v1153_v27 = vld [vmem:[%s11856_s7 + $0x358] sm:$0xff] }
 0x1e0   :  { %1028 = vst [vmem:[#allocation5 + $0x160] sm:$0xff] %v1027_v28  ;;  %v1155_v28 = vld [vmem:[%s11856_s7 + $0x360] sm:$0xff] }
 0x1e1   :  { %1030 = vst [vmem:[#allocation5 + $0x168] sm:$0xff] %v1029_v29  ;;  %v1157_v29 = vld [vmem:[%s11856_s7 + $0x368] sm:$0xff] }
 0x1e2   :  { %1032 = vst [vmem:[#allocation5 + $0x170] sm:$0xff] %v1031_v30  ;;  %v1159_v30 = vld [vmem:[%s11856_s7 + $0x370] sm:$0xff] }
 0x1e3   :  { %1034 = vst [vmem:[#allocation5 + $0x178] sm:$0xff] %v1033_v31  ;;  %v1161_v31 = vld [vmem:[%s11856_s7 + $0x378] sm:$0xff] }
 0x1e4   :  { %1036 = vst [vmem:[#allocation5 + $0x180] sm:$0xff] %v1035_v32  ;;  %v1163_v32 = vld [vmem:[%s11856_s7 + $0x380] sm:$0xff] }
 0x1e5   :  { %1038 = vst [vmem:[#allocation5 + $0x188] sm:$0xff] %v1037_v33  ;;  %v1165_v33 = vld [vmem:[%s11856_s7 + $0x388] sm:$0xff] }
 0x1e6   :  { %1040 = vst [vmem:[#allocation5 + $0x190] sm:$0xff] %v1039_v34  ;;  %v1167_v34 = vld [vmem:[%s11856_s7 + $0x390] sm:$0xff] }
 0x1e7   :  { %1042 = vst [vmem:[#allocation5 + $0x198] sm:$0xff] %v1041_v35  ;;  %v1169_v35 = vld [vmem:[%s11856_s7 + $0x398] sm:$0xff] }
 0x1e8   :  { %1044 = vst [vmem:[#allocation5 + $0x1a0] sm:$0xff] %v1043_v36  ;;  %v1171_v36 = vld [vmem:[%s11856_s7 + $0x3a0] sm:$0xff] }
 0x1e9   :  { %1046 = vst [vmem:[#allocation5 + $0x1a8] sm:$0xff] %v1045_v37  ;;  %v1173_v37 = vld [vmem:[%s11856_s7 + $0x3a8] sm:$0xff] }
 0x1ea   :  { %1048 = vst [vmem:[#allocation5 + $0x1b0] sm:$0xff] %v1047_v38  ;;  %v1175_v38 = vld [vmem:[%s11856_s7 + $0x3b0] sm:$0xff] }
 0x1eb   :  { %1050 = vst [vmem:[#allocation5 + $0x1b8] sm:$0xff] %v1049_v39  ;;  %v1177_v39 = vld [vmem:[%s11856_s7 + $0x3b8] sm:$0xff] }
 0x1ec   :  { %1052 = vst [vmem:[#allocation5 + $0x1c0] sm:$0xff] %v1051_v40  ;;  %v1179_v40 = vld [vmem:[%s11856_s7 + $0x3c0] sm:$0xff] }
 0x1ed   :  { %1054 = vst [vmem:[#allocation5 + $0x1c8] sm:$0xff] %v1053_v41  ;;  %v1181_v41 = vld [vmem:[%s11856_s7 + $0x3c8] sm:$0xff] }
 0x1ee   :  { %1056 = vst [vmem:[#allocation5 + $0x1d0] sm:$0xff] %v1055_v42  ;;  %v1183_v42 = vld [vmem:[%s11856_s7 + $0x3d0] sm:$0xff] }
 0x1ef   :  { %1058 = vst [vmem:[#allocation5 + $0x1d8] sm:$0xff] %v1057_v43  ;;  %v1185_v43 = vld [vmem:[%s11856_s7 + $0x3d8] sm:$0xff] }
 0x1f0   :  { %1060 = vst [vmem:[#allocation5 + $0x1e0] sm:$0xff] %v1059_v44  ;;  %v1187_v44 = vld [vmem:[%s11856_s7 + $0x3e0] sm:$0xff] }
 0x1f1   :  { %1062 = vst [vmem:[#allocation5 + $0x1e8] sm:$0xff] %v1061_v45  ;;  %v1189_v45 = vld [vmem:[%s11856_s7 + $0x3e8] sm:$0xff] }
 0x1f2   :  { %1064 = vst [vmem:[#allocation5 + $0x1f0] sm:$0xff] %v1063_v46  ;;  %v1191_v46 = vld [vmem:[%s11856_s7 + $0x3f0] sm:$0xff] }
 0x1f3   :  { %1066 = vst [vmem:[#allocation5 + $0x1f8] sm:$0xff] %v1065_v47  ;;  %v1193_v47 = vld [vmem:[%s11856_s7 + $0x3f8] sm:$0xff] }
 0x1f4   :  { %1068 = vst [vmem:[#allocation5 + $0x200] sm:$0xff] %v1067_v48 }
 0x1f5   :  { %1070 = vst [vmem:[#allocation5 + $0x208] sm:$0xff] %v1069_v49 }
 0x1f6   :  { %1072 = vst [vmem:[#allocation5 + $0x210] sm:$0xff] %v1071_v50 }
 0x1f7   :  { %1074 = vst [vmem:[#allocation5 + $0x218] sm:$0xff] %v1073_v51 }
 0x1f8   :  { %1076 = vst [vmem:[#allocation5 + $0x220] sm:$0xff] %v1075_v52 }
 0x1f9   :  { %1078 = vst [vmem:[#allocation5 + $0x228] sm:$0xff] %v1077_v53 }
 0x1fa   :  { %1080 = vst [vmem:[#allocation5 + $0x230] sm:$0xff] %v1079_v54 }
 0x1fb   :  { %1082 = vst [vmem:[#allocation5 + $0x238] sm:$0xff] %v1081_v55 }
 0x1fc   :  { %1084 = vst [vmem:[#allocation5 + $0x240] sm:$0xff] %v1083_v56 }
 0x1fd   :  { %1086 = vst [vmem:[#allocation5 + $0x248] sm:$0xff] %v1085_v57 }
 0x1fe   :  { %1088 = vst [vmem:[#allocation5 + $0x250] sm:$0xff] %v1087_v58 }
 0x1ff   :  { %1090 = vst [vmem:[#allocation5 + $0x258] sm:$0xff] %v1089_v59 }
 0x200   :  { %1092 = vst [vmem:[#allocation5 + $0x260] sm:$0xff] %v1091_v60 }
 0x201   :  { %1094 = vst [vmem:[#allocation5 + $0x268] sm:$0xff] %v1093_v61 }
 0x202   :  { %1096 = vst [vmem:[#allocation5 + $0x270] sm:$0xff] %v1095_v62 }
 0x203   :  { %1098 = vst [vmem:[#allocation5 + $0x278] sm:$0xff] %v1097_v63 }
 0x204   :  { %1100 = vst [vmem:[#allocation5 + $0x280] sm:$0xff] %v1099_v0 }
 0x205   :  { %1102 = vst [vmem:[#allocation5 + $0x288] sm:$0xff] %v1101_v1 }
 0x206   :  { %1104 = vst [vmem:[#allocation5 + $0x290] sm:$0xff] %v1103_v2 }
 0x207   :  { %1106 = vst [vmem:[#allocation5 + $0x298] sm:$0xff] %v1105_v3 }
 0x208   :  { %1108 = vst [vmem:[#allocation5 + $0x2a0] sm:$0xff] %v1107_v4 }
 0x209   :  { %1110 = vst [vmem:[#allocation5 + $0x2a8] sm:$0xff] %v1109_v5 }
 0x20a   :  { %1112 = vst [vmem:[#allocation5 + $0x2b0] sm:$0xff] %v1111_v6 }
 0x20b   :  { %1114 = vst [vmem:[#allocation5 + $0x2b8] sm:$0xff] %v1113_v7 }
 0x20c   :  { %1116 = vst [vmem:[#allocation5 + $0x2c0] sm:$0xff] %v1115_v8 }
 0x20d   :  { %1118 = vst [vmem:[#allocation5 + $0x2c8] sm:$0xff] %v1117_v9 }
 0x20e   :  { %1120 = vst [vmem:[#allocation5 + $0x2d0] sm:$0xff] %v1119_v10 }
 0x20f   :  { %1122 = vst [vmem:[#allocation5 + $0x2d8] sm:$0xff] %v1121_v11 }
 0x210   :  { %1124 = vst [vmem:[#allocation5 + $0x2e0] sm:$0xff] %v1123_v12 }
 0x211   :  { %1126 = vst [vmem:[#allocation5 + $0x2e8] sm:$0xff] %v1125_v13 }
 0x212   :  { %1128 = vst [vmem:[#allocation5 + $0x2f0] sm:$0xff] %v1127_v14 }
 0x213   :  { %1130 = vst [vmem:[#allocation5 + $0x2f8] sm:$0xff] %v1129_v15 }
 0x214   :  { %1132 = vst [vmem:[#allocation5 + $0x300] sm:$0xff] %v1131_v16 }
 0x215   :  { %1134 = vst [vmem:[#allocation5 + $0x308] sm:$0xff] %v1133_v17 }
 0x216   :  { %1136 = vst [vmem:[#allocation5 + $0x310] sm:$0xff] %v1135_v18 }
 0x217   :  { %1138 = vst [vmem:[#allocation5 + $0x318] sm:$0xff] %v1137_v19 }
 0x218   :  { %1140 = vst [vmem:[#allocation5 + $0x320] sm:$0xff] %v1139_v20 }
 0x219   :  { %1142 = vst [vmem:[#allocation5 + $0x328] sm:$0xff] %v1141_v21 }
 0x21a   :  { %1144 = vst [vmem:[#allocation5 + $0x330] sm:$0xff] %v1143_v22 }
 0x21b   :  { %1146 = vst [vmem:[#allocation5 + $0x338] sm:$0xff] %v1145_v23 }
 0x21c   :  { %1148 = vst [vmem:[#allocation5 + $0x340] sm:$0xff] %v1147_v24 }
 0x21d   :  { %1150 = vst [vmem:[#allocation5 + $0x348] sm:$0xff] %v1149_v25 }
 0x21e   :  { %1152 = vst [vmem:[#allocation5 + $0x350] sm:$0xff] %v1151_v26 }
 0x21f   :  { %1154 = vst [vmem:[#allocation5 + $0x358] sm:$0xff] %v1153_v27 }
 0x220   :  { %1156 = vst [vmem:[#allocation5 + $0x360] sm:$0xff] %v1155_v28 }
 0x221   :  { %1158 = vst [vmem:[#allocation5 + $0x368] sm:$0xff] %v1157_v29 }
 0x222   :  { %1160 = vst [vmem:[#allocation5 + $0x370] sm:$0xff] %v1159_v30 }
 0x223   :  { %1162 = vst [vmem:[#allocation5 + $0x378] sm:$0xff] %v1161_v31 }
 0x224   :  { %1164 = vst [vmem:[#allocation5 + $0x380] sm:$0xff] %v1163_v32 }
 0x225   :  { %1166 = vst [vmem:[#allocation5 + $0x388] sm:$0xff] %v1165_v33 }
 0x226   :  { %1168 = vst [vmem:[#allocation5 + $0x390] sm:$0xff] %v1167_v34 }
 0x227   :  { %1170 = vst [vmem:[#allocation5 + $0x398] sm:$0xff] %v1169_v35 }
 0x228   :  { %1172 = vst [vmem:[#allocation5 + $0x3a0] sm:$0xff] %v1171_v36 }
 0x229   :  { %1174 = vst [vmem:[#allocation5 + $0x3a8] sm:$0xff] %v1173_v37 }
 0x22a   :  { %1176 = vst [vmem:[#allocation5 + $0x3b0] sm:$0xff] %v1175_v38 }
 0x22b   :  { %1178 = vst [vmem:[#allocation5 + $0x3b8] sm:$0xff] %v1177_v39 }
 0x22c   :  { %1180 = vst [vmem:[#allocation5 + $0x3c0] sm:$0xff] %v1179_v40 }
 0x22d   :  { %1182 = vst [vmem:[#allocation5 + $0x3c8] sm:$0xff] %v1181_v41 }
 0x22e   :  { %1184 = vst [vmem:[#allocation5 + $0x3d0] sm:$0xff] %v1183_v42 }
 0x22f   :  { %1186 = vst [vmem:[#allocation5 + $0x3d8] sm:$0xff] %v1185_v43 }
 0x230   :  { %1188 = vst [vmem:[#allocation5 + $0x3e0] sm:$0xff] %v1187_v44 }
 0x231   :  { %1190 = vst [vmem:[#allocation5 + $0x3e8] sm:$0xff] %v1189_v45 }
 0x232   :  { %1192 = vst [vmem:[#allocation5 + $0x3f0] sm:$0xff] %v1191_v46 }
 0x233   :  { %1194 = vst [vmem:[#allocation5 + $0x3f8] sm:$0xff] %v1193_v47 }
 0x234   :  { %1200 = vsyncadd [#allocation6 + $0x2], 16384  ;;  %v8971_v48 = vld [vmem:[%s11850_s1 + $0x38] sm:$0xff]  ;;  %v8970_v52 = vld [vmem:[%s11850_s1 + $0x30] sm:$0xff] }
 0x235   :  { %v8979_v49 = vld [vmem:[%s11850_s1 + $0x78] sm:$0xff]  ;;  %1645 = vmatpush.bf16.msra.mxu0 %v8971_v48  ;;  %v8978_v53 = vld [vmem:[%s11850_s1 + $0x70] sm:$0xff]  ;;  %v8969_v56 = vld [vmem:[%s11850_s1 + $0x28] sm:$0xff] }
 0x236   :  { %v8987_v50 = vld [vmem:[%s11850_s1 + $0xb8] sm:$0xff]  ;;  %1693 = vmatpush.bf16.msra.mxu1 %v8979_v49  ;;  %v8986_v54 = vld [vmem:[%s11850_s1 + $0xb0] sm:$0xff]  ;;  %v8977_v57 = vld [vmem:[%s11850_s1 + $0x68] sm:$0xff] }
 0x237   :  { %v8995_v51 = vld [vmem:[%s11850_s1 + $0xf8] sm:$0xff]  ;;  %1741 = vmatpush.bf16.msra.mxu2 %v8987_v50  ;;  %v8994_v55 = vld [vmem:[%s11850_s1 + $0xf0] sm:$0xff]  ;;  %v8985_v58 = vld [vmem:[%s11850_s1 + $0xa8] sm:$0xff] }
 0x238   :  { %1789 = vmatpush.bf16.msra.mxu3 %v8995_v51  ;;  %v8993_v59 = vld [vmem:[%s11850_s1 + $0xe8] sm:$0xff]  ;;  %v8968_v60 = vld [vmem:[%s11850_s1 + $0x20] sm:$0xff]  ;;  %v8967_v0 = vld [vmem:[%s11850_s1 + $0x18] sm:$0xff] }
 0x239   :  { %1646 = vmatpush.bf16.msra.mxu0 %v8970_v52  ;;  %v8976_v61 = vld [vmem:[%s11850_s1 + $0x60] sm:$0xff]  ;;  %v8975_v1 = vld [vmem:[%s11850_s1 + $0x58] sm:$0xff]  ;;  %v8966_v4 = vld [vmem:[%s11850_s1 + $0x10] sm:$0xff] }
 0x23a   :  { %1694 = vmatpush.bf16.msra.mxu1 %v8978_v53  ;;  %v8984_v62 = vld [vmem:[%s11850_s1 + $0xa0] sm:$0xff]  ;;  %v8983_v2 = vld [vmem:[%s11850_s1 + $0x98] sm:$0xff]  ;;  %v8974_v5 = vld [vmem:[%s11850_s1 + $0x50] sm:$0xff] }
 0x23b   :  { %1742 = vmatpush.bf16.msra.mxu2 %v8986_v54  ;;  %v8992_v63 = vld [vmem:[%s11850_s1 + $0xe0] sm:$0xff]  ;;  %v8991_v3 = vld [vmem:[%s11850_s1 + $0xd8] sm:$0xff]  ;;  %v8982_v6 = vld [vmem:[%s11850_s1 + $0x90] sm:$0xff] }
 0x23c   :  { %1790 = vmatpush.bf16.msra.mxu3 %v8994_v55  ;;  %v8990_v7 = vld [vmem:[%s11850_s1 + $0xd0] sm:$0xff]  ;;  %v8965_v8 = vld [vmem:[%s11850_s1 + $0x8] sm:$0xff]  ;;  %v8964_v12 = vld [vmem:[%s11850_s1] sm:$0xff] }
 0x23d   :  { %1647 = vmatpush.bf16.msra.mxu0 %v8969_v56  ;;  %v8973_v9 = vld [vmem:[%s11850_s1 + $0x48] sm:$0xff]  ;;  %v8972_v13 = vld [vmem:[%s11850_s1 + $0x40] sm:$0xff]  ;;  %v8938_v17 = vld [vmem:[%s11849_s0 + $0xc] sm:$0xf0] }
 0x23e   :  { %1695 = vmatpush.bf16.msra.mxu1 %v8977_v57  ;;  %v8981_v10 = vld [vmem:[%s11850_s1 + $0x88] sm:$0xff]  ;;  %v8980_v14 = vld [vmem:[%s11850_s1 + $0x80] sm:$0xff]  ;;  %v6457_v19 = vld [vmem:[%s11849_s0 + $0x10] sm:$0xf0] }
 0x23f   :  { %1743 = vmatpush.bf16.msra.mxu2 %v8985_v58  ;;  %v8989_v11 = vld [vmem:[%s11850_s1 + $0xc8] sm:$0xff]  ;;  %v8988_v15 = vld [vmem:[%s11850_s1 + $0xc0] sm:$0xff]  ;;  %v8939_v21 = vld [vmem:[%s11849_s0 + $0x14] sm:$0xf0] }
 0x240   :  { %1791 = vmatpush.bf16.msra.mxu3 %v8993_v59  ;;  %v6455_v16 = vld [vmem:[%s11849_s0] sm:$0xf]  ;;  %v8936_v18 = vld [vmem:[%s11849_s0 + $0x4] sm:$0xf]  ;;  %v6463_v20 = vld [vmem:[%s11849_s0 + $0x8] sm:$0xf] }
 0x241   :  { %1648 = vmatpush.bf16.msra.mxu0 %v8968_v60  ;;  %v8937_v22 = vld [vmem:[%s11849_s0 + $0xc] sm:$0xf]  ;;  %v6465_v23 = vld [vmem:[%s11849_s0 + $0x18] sm:$0xf0]  ;;  %v6456_v24 = vor.u32 %v8938_v17, %v6455_v16  ;;  %v6460_v25 = vor.u32 %v8936_v18, %v6457_v19  ;;  %v6464_v26 = vor.u32 %v8939_v21, %v6463_v20  ;;  %v6471_v28 = vld [vmem:[%s11849_s0 + $0x20] sm:$0xf] }
 0x242   :  { %1696 = vmatpush.bf16.msra.mxu1 %v8976_v61  ;;  %v6468_v27 = vor.u32 %v8937_v22, %v6465_v23  ;;  %v8942_v29 = vld [vmem:[%s11849_s0 + $0x2c] sm:$0xf0]  ;;  %v8940_v30 = vld [vmem:[%s11849_s0 + $0x24] sm:$0xf]  ;;  %v6473_v31 = vld [vmem:[%s11849_s0 + $0x30] sm:$0xf0] }
 0x243   :  { %1744 = vmatpush.bf16.msra.mxu2 %v8984_v62  ;;  %v6479_v32 = vld [vmem:[%s11849_s0 + $0x28] sm:$0xf]  ;;  %v8943_v33 = vld [vmem:[%s11849_s0 + $0x34] sm:$0xf0]  ;;  %v8941_v34 = vld [vmem:[%s11849_s0 + $0x2c] sm:$0xf]  ;;  %v6472_v36 = vor.u32 %v8942_v29, %v6471_v28  ;;  %v6476_v37 = vor.u32 %v8940_v30, %v6473_v31 }
 0x244   :  { %1792 = vmatpush.bf16.msra.mxu3 %v8992_v63  ;;  %v6481_v35 = vld [vmem:[%s11849_s0 + $0x38] sm:$0xf0]  ;;  %v6480_v38 = vor.u32 %v8943_v33, %v6479_v32  ;;  %v6487_v40 = vld [vmem:[%s11849_s0 + $0x40] sm:$0xf]  ;;  %v8946_v41 = vld [vmem:[%s11849_s0 + $0x4c] sm:$0xf0] }
 0x245   :  { %1649 = vmatpush.bf16.msra.mxu0 %v8967_v0  ;;  %v6484_v39 = vor.u32 %v8941_v34, %v6481_v35  ;;  %v8944_v42 = vld [vmem:[%s11849_s0 + $0x44] sm:$0xf]  ;;  %v6489_v43 = vld [vmem:[%s11849_s0 + $0x50] sm:$0xf0]  ;;  %v6495_v44 = vld [vmem:[%s11849_s0 + $0x48] sm:$0xf]  ;;  %v6488_v48 = vor.u32 %v8946_v41, %v6487_v40 }
 0x246   :  { %1697 = vmatpush.bf16.msra.mxu1 %v8975_v1  ;;  %v8947_v45 = vld [vmem:[%s11849_s0 + $0x54] sm:$0xf0]  ;;  %v8945_v46 = vld [vmem:[%s11849_s0 + $0x4c] sm:$0xf]  ;;  %v6497_v47 = vld [vmem:[%s11849_s0 + $0x58] sm:$0xf0]  ;;  %v6492_v49 = vor.u32 %v8944_v42, %v6489_v43 }
 0x247   :  { %1745 = vmatpush.bf16.msra.mxu2 %v8983_v2  ;;  %v6496_v50 = vor.u32 %v8947_v45, %v6495_v44  ;;  %v6500_v51 = vor.u32 %v8945_v46, %v6497_v47  ;;  %v6503_v52 = vld [vmem:[%s11849_s0 + $0x60] sm:$0xf]  ;;  %v8950_v53 = vld [vmem:[%s11849_s0 + $0x6c] sm:$0xf0]  ;;  %v8948_v54 = vld [vmem:[%s11849_s0 + $0x64] sm:$0xf] }
 0x248   :  { %1793 = vmatpush.bf16.msra.mxu3 %v8991_v3  ;;  %v6505_v55 = vld [vmem:[%s11849_s0 + $0x70] sm:$0xf0]  ;;  %v6511_v56 = vld [vmem:[%s11849_s0 + $0x68] sm:$0xf]  ;;  %v8951_v57 = vld [vmem:[%s11849_s0 + $0x74] sm:$0xf0]  ;;  %v6504_v60 = vor.u32 %v8950_v53, %v6503_v52 }
 0x249   :  { %1650 = vmatpush.bf16.msra.mxu0 %v8966_v4  ;;  %v8949_v58 = vld [vmem:[%s11849_s0 + $0x6c] sm:$0xf]  ;;  %v6513_v59 = vld [vmem:[%s11849_s0 + $0x78] sm:$0xf0]  ;;  %v6508_v61 = vor.u32 %v8948_v54, %v6505_v55  ;;  %v6512_v62 = vor.u32 %v8951_v57, %v6511_v56  ;;  %v6519_v0 = vld [vmem:[%s11849_s0 + $0x80] sm:$0xf] }
 0x24a   :  { %1698 = vmatpush.bf16.msra.mxu1 %v8974_v5  ;;  %v6516_v63 = vor.u32 %v8949_v58, %v6513_v59  ;;  %v8954_v1 = vld [vmem:[%s11849_s0 + $0x8c] sm:$0xf0]  ;;  %v8952_v2 = vld [vmem:[%s11849_s0 + $0x84] sm:$0xf]  ;;  %v6521_v3 = vld [vmem:[%s11849_s0 + $0x90] sm:$0xf0] }
 0x24b   :  { %1746 = vmatpush.bf16.msra.mxu2 %v8982_v6  ;;  %v6527_v4 = vld [vmem:[%s11849_s0 + $0x88] sm:$0xf]  ;;  %v8955_v5 = vld [vmem:[%s11849_s0 + $0x94] sm:$0xf0]  ;;  %v8953_v6 = vld [vmem:[%s11849_s0 + $0x8c] sm:$0xf] }
 0x24c   :  { %1794 = vmatpush.bf16.msra.mxu3 %v8990_v7  ;;  %v6529_v7 = vld [vmem:[%s11849_s0 + $0x98] sm:$0xf0]  ;;  %v6543_v16 = vld [vmem:[%s11849_s0 + $0xa8] sm:$0xf]  ;;  %v8959_v17 = vld [vmem:[%s11849_s0 + $0xb4] sm:$0xf0] }
 0x24d   :  { %1651 = vmatpush.bf16.msra.mxu0 %v8965_v8  ;;  %v6520_v8 = vor.u32 %v8954_v1, %v6519_v0  ;;  %v8957_v18 = vld [vmem:[%s11849_s0 + $0xac] sm:$0xf]  ;;  %v6545_v19 = vld [vmem:[%s11849_s0 + $0xb8] sm:$0xf0]  ;;  %v6544_v22 = vor.u32 %v8959_v17, %v6543_v16  ;;  %v6559_v28 = vld [vmem:[%s11849_s0 + $0xc8] sm:$0xf] }
 0x24e   :  { %1699 = vmatpush.bf16.msra.mxu1 %v8973_v9  ;;  %v6524_v9 = vor.u32 %v8952_v2, %v6521_v3  ;;  %v6548_v23 = vor.u32 %v8957_v18, %v6545_v19  ;;  %v8963_v29 = vld [vmem:[%s11849_s0 + $0xd4] sm:$0xf0]  ;;  %v8961_v30 = vld [vmem:[%s11849_s0 + $0xcc] sm:$0xf]  ;;  %v6561_v31 = vld [vmem:[%s11849_s0 + $0xd8] sm:$0xf0] }
 0x24f   :  { %1747 = vmatpush.bf16.msra.mxu2 %v8981_v10  ;;  %v6528_v10 = vor.u32 %v8955_v5, %v6527_v4  ;;  %v6560_v34 = vor.u32 %v8963_v29, %v6559_v28  ;;  %v6564_v35 = vor.u32 %v8961_v30, %v6561_v31  ;;  %v11639_v46 = vld [vmem:[%s11851_s2] ss:$0 sm:$0xff] }
 0x250   :  { %1795 = vmatpush.bf16.msra.mxu3 %v8989_v11  ;;  %v6532_v11 = vor.u32 %v8953_v6, %v6529_v7 }
 0x251   :  { %1652 = vmatpush.bf16.msra.mxu0 %v8964_v12  ;;  %v6535_v12 = vld [vmem:[%s11849_s0 + $0xa0] sm:$0xf] }
 0x252   :  { %1700 = vmatpush.bf16.msra.mxu1 %v8972_v13  ;;  %v8958_v13 = vld [vmem:[%s11849_s0 + $0xac] sm:$0xf0] }
 0x253   :  { %1748 = vmatpush.bf16.msra.mxu2 %v8980_v14  ;;  %v8956_v14 = vld [vmem:[%s11849_s0 + $0xa4] sm:$0xf]  ;;  %v6536_v20 = vor.u32 %v8958_v13, %v6535_v12 }
 0x254   :  { %1796 = vmatpush.bf16.msra.mxu3 %v8988_v15  ;;  %1653 = vmatmul.bf16.vlgmr.msra.gmra.mxu0 %v6456_v24  ;;  %v6537_v15 = vld [vmem:[%s11849_s0 + $0xb0] sm:$0xf0]  ;;  %v6551_v24 = vld [vmem:[%s11849_s0 + $0xc0] sm:$0xf] }
 0x255   :  { %1701 = vmatmul.bf16.vlgmr.msra.gmra.mxu1 %v6460_v25  ;;  %v6540_v21 = vor.u32 %v8956_v14, %v6537_v15  ;;  %v8962_v25 = vld [vmem:[%s11849_s0 + $0xcc] sm:$0xf0] }
 0x256   :  { %1749 = vmatmul.bf16.vlgmr.msra.gmra.mxu2 %v6464_v26  ;;  %v8960_v26 = vld [vmem:[%s11849_s0 + $0xc4] sm:$0xf]  ;;  %v6552_v32 = vor.u32 %v8962_v25, %v6551_v24 }
 0x257   :  { %1797 = vmatmul.bf16.vlgmr.msra.gmra.mxu3 %v6468_v27  ;;  %v6553_v27 = vld [vmem:[%s11849_s0 + $0xd0] sm:$0xf0] }
 0x258   :  { %v6556_v33 = vor.u32 %v8960_v26, %v6553_v27 }
 0x264   :  { %1658 = vmatmul.bf16.gmra.mxu0 %v6472_v36  ;;  %v1229_v36 = vld [vmem:[%s11849_s0 + $0xe0] sm:$0xff] }
 0x265   :  { %1706 = vmatmul.bf16.gmra.mxu1 %v6476_v37  ;;  %v1230_v37 = vld [vmem:[%s11849_s0 + $0xe8] sm:$0xff] }
 0x266   :  { %1754 = vmatmul.bf16.gmra.mxu2 %v6480_v38  ;;  %v1385_v38 = vunpack.c.l.b16 %v1229_v36  ;;  %v1387_v40 = vunpack.c.l.b16 %v1230_v37  ;;  %v1388_v41 = vunpack.c.h.b16 %v1230_v37 }
 0x267   :  { %1802 = vmatmul.bf16.gmra.mxu3 %v6484_v39  ;;  %v1386_v39 = vunpack.c.h.b16 %v1229_v36 }
 0x268   :  { %v1417_v42 = vpack.c.b16 %v1385_v38, %v1385_v38  ;;  %v1419_v44 = vpack.c.b16 %v1387_v40, %v1387_v40  ;;  %v1420_v45 = vpack.c.b16 %v1388_v41, %v1388_v41 }
 0x269   :  { %v1418_v43 = vpack.c.b16 %v1386_v39, %v1386_v39 }
 0x274   :  { %1663 = vmatmul.bf16.gmra.mxu0 %v6488_v48 }
 0x275   :  { %1711 = vmatmul.bf16.gmra.mxu1 %v6492_v49 }
 0x276   :  { %1759 = vmatmul.bf16.gmra.mxu2 %v6496_v50 }
 0x277   :  { %1807 = vmatmul.bf16.gmra.mxu3 %v6500_v51 }
 0x284   :  { %1668 = vmatmul.bf16.gmra.mxu0 %v6504_v60 }
 0x285   :  { %1716 = vmatmul.bf16.gmra.mxu1 %v6508_v61 }
 0x286   :  { %1764 = vmatmul.bf16.gmra.mxu2 %v6512_v62 }
 0x287   :  { %1812 = vmatmul.bf16.gmra.mxu3 %v6516_v63 }
 0x294   :  { %1673 = vmatmul.bf16.gmra.mxu0 %v6520_v8 }
 0x295   :  { %1721 = vmatmul.bf16.gmra.mxu1 %v6524_v9 }
 0x296   :  { %1769 = vmatmul.bf16.gmra.mxu2 %v6528_v10 }
 0x297   :  { %1817 = vmatmul.bf16.gmra.mxu3 %v6532_v11 }
 0x2a4   :  { %1678 = vmatmul.bf16.gmra.mxu0 %v6536_v20 }
 0x2a5   :  { %1726 = vmatmul.bf16.gmra.mxu1 %v6540_v21 }
 0x2a6   :  { %1774 = vmatmul.bf16.gmra.mxu2 %v6544_v22 }
 0x2a7   :  { %1822 = vmatmul.bf16.gmra.mxu3 %v6548_v23 }
 0x2b4   :  { %1683 = vmatmul.bf16.gmra.mxu0 %v6552_v32 }
 0x2b5   :  { %1731 = vmatmul.bf16.gmra.mxu1 %v6556_v33 }
 0x2b6   :  { %1779 = vmatmul.bf16.gmra.mxu2 %v6560_v34 }
 0x2b7   :  { %1827 = vmatmul.bf16.gmra.mxu3 %v6564_v35 }
 0x2c4   :  { %1688 = vmatmul.bf16.gmra.mxu0 %v1417_v42 }
 0x2c5   :  { %1736 = vmatmul.bf16.gmra.mxu1 %v1418_v43 }
 0x2c6   :  { %1784 = vmatmul.bf16.gmra.mxu2 %v1419_v44 }
 0x2c7   :  { %1832 = vmatmul.bf16.gmra.mxu3 %v1420_v45 }
 0x2d1   :  { %v1654_v47 = vpop.f32.mrf.mxu0 }
 0x2d2   :  { %v1702_v48 = vpop.f32.mrf.mxu1  ;;  %v1655_v49 = vadd.f32 %v11639_v46, %v1654_v47 }
 0x2d4   :  { %v1703_v52 = vadd.f32 %v1702_v48, %v1655_v49 }
 0x2d9   :  { %v1750_v50 = vpop.f32.mrf.mxu2  ;;  %v1656_v53 = vpop.f32.mrf.mxu0 }
 0x2da   :  { %v1798_v51 = vpop.f32.mrf.mxu3  ;;  %v1704_v54 = vpop.f32.mrf.mxu1  ;;  %v1657_v55 = vadd.f32 %v11639_v46, %v1656_v53  ;;  %v1751_v56 = vadd.f32 %v1750_v50, %v1703_v52 }
 0x2dc   :  { %v1705_v57 = vadd.f32 %v1704_v54, %v1657_v55  ;;  %v1799_v60 = vadd.f32 %v1798_v51, %v1751_v56 }
 0x2de   :  { %v1837_v1 = vmax.f32 %v1799_v60, 0.0 }
 0x2e1   :  { %v1752_v58 = vpop.f32.mrf.mxu2  ;;  %v1659_v62 = vpop.f32.mrf.mxu0 }
 0x2e2   :  { %v1800_v59 = vpop.f32.mrf.mxu3  ;;  %v1753_v61 = vadd.f32 %v1752_v58, %v1705_v57  ;;  %v1707_v63 = vpop.f32.mrf.mxu1  ;;  %v1660_v3 = vadd.f32 %v11639_v46, %v1659_v62 }
 0x2e4   :  { %v1801_v0 = vadd.f32 %v1800_v59, %v1753_v61  ;;  %v1708_v7 = vadd.f32 %v1707_v63, %v1660_v3 }
 0x2e6   :  { %v1838_v2 = vmax.f32 %v1801_v0, 0.0 }
 0x2e8   :  { %v9559_v4 = vpack.c.bf16 %v1838_v2, %v1837_v1 }
 0x2e9   :  { %v1755_v5 = vpop.f32.mrf.mxu2  ;;  %v1661_v8 = vpop.f32.mrf.mxu0 }
 0x2ea   :  { %v1803_v6 = vpop.f32.mrf.mxu3  ;;  %9560 = vst [vmem:[#allocation2] sm:$0xff] %v9559_v4   ;;  %v1709_v9 = vpop.f32.mrf.mxu1  ;;  %v1662_v10 = vadd.f32 %v11639_v46, %v1661_v8  ;;  %v1756_v11 = vadd.f32 %v1755_v5, %v1708_v7 }
 0x2ec   :  { %v1710_v12 = vadd.f32 %v1709_v9, %v1662_v10  ;;  %v1804_v15 = vadd.f32 %v1803_v6, %v1756_v11 }
 0x2ee   :  { %v1839_v20 = vmax.f32 %v1804_v15, 0.0 }
 0x2f1   :  { %v1757_v13 = vpop.f32.mrf.mxu2  ;;  %v1664_v17 = vpop.f32.mrf.mxu0 }
 0x2f2   :  { %v1805_v14 = vpop.f32.mrf.mxu3  ;;  %v1758_v16 = vadd.f32 %v1757_v13, %v1710_v12  ;;  %v1712_v18 = vpop.f32.mrf.mxu1  ;;  %v1665_v22 = vadd.f32 %v11639_v46, %v1664_v17 }
 0x2f4   :  { %v1806_v19 = vadd.f32 %v1805_v14, %v1758_v16  ;;  %v1713_v26 = vadd.f32 %v1712_v18, %v1665_v22 }
 0x2f6   :  { %v1840_v21 = vmax.f32 %v1806_v19, 0.0 }
 0x2f8   :  { %v9564_v23 = vpack.c.bf16 %v1840_v21, %v1839_v20 }
 0x2f9   :  { %v1760_v24 = vpop.f32.mrf.mxu2  ;;  %v1666_v27 = vpop.f32.mrf.mxu0 }
 0x2fa   :  { %v1808_v25 = vpop.f32.mrf.mxu3  ;;  %9591 = vst [vmem:[#allocation2 + $0x8] sm:$0xff] %v9564_v23   ;;  %v1714_v28 = vpop.f32.mrf.mxu1  ;;  %v1667_v29 = vadd.f32 %v11639_v46, %v1666_v27  ;;  %v1761_v30 = vadd.f32 %v1760_v24, %v1713_v26 }
 0x2fc   :  { %v1715_v31 = vadd.f32 %v1714_v28, %v1667_v29  ;;  %v1809_v34 = vadd.f32 %v1808_v25, %v1761_v30 }
 0x2fe   :  { %v1841_v39 = vmax.f32 %v1809_v34, 0.0 }
 0x301   :  { %v1762_v32 = vpop.f32.mrf.mxu2  ;;  %v1669_v36 = vpop.f32.mrf.mxu0 }
 0x302   :  { %v1810_v33 = vpop.f32.mrf.mxu3  ;;  %v1763_v35 = vadd.f32 %v1762_v32, %v1715_v31  ;;  %v1717_v37 = vpop.f32.mrf.mxu1  ;;  %v1670_v41 = vadd.f32 %v11639_v46, %v1669_v36 }
 0x304   :  { %v1811_v38 = vadd.f32 %v1810_v33, %v1763_v35  ;;  %v1718_v45 = vadd.f32 %v1717_v37, %v1670_v41 }
 0x306   :  { %v1842_v40 = vmax.f32 %v1811_v38, 0.0 }
 0x308   :  { %v9569_v42 = vpack.c.bf16 %v1842_v40, %v1841_v39 }
 0x309   :  { %v1765_v43 = vpop.f32.mrf.mxu2  ;;  %v1671_v47 = vpop.f32.mrf.mxu0 }
 0x30a   :  { %v1813_v44 = vpop.f32.mrf.mxu3  ;;  %9592 = vst [vmem:[#allocation2 + $0x10] sm:$0xff] %v9569_v42   ;;  %v1719_v48 = vpop.f32.mrf.mxu1  ;;  %v1672_v49 = vadd.f32 %v11639_v46, %v1671_v47  ;;  %v1766_v50 = vadd.f32 %v1765_v43, %v1718_v45 }
 0x30c   :  { %v1720_v51 = vadd.f32 %v1719_v48, %v1672_v49  ;;  %v1814_v54 = vadd.f32 %v1813_v44, %v1766_v50 }
 0x30e   :  { %v1843_v59 = vmax.f32 %v1814_v54, 0.0 }
 0x311   :  { %v1767_v52 = vpop.f32.mrf.mxu2  ;;  %v1674_v56 = vpop.f32.mrf.mxu0 }
 0x312   :  { %v1815_v53 = vpop.f32.mrf.mxu3  ;;  %v1768_v55 = vadd.f32 %v1767_v52, %v1720_v51  ;;  %v1722_v57 = vpop.f32.mrf.mxu1  ;;  %v1675_v61 = vadd.f32 %v11639_v46, %v1674_v56 }
 0x314   :  { %v1816_v58 = vadd.f32 %v1815_v53, %v1768_v55  ;;  %v1723_v1 = vadd.f32 %v1722_v57, %v1675_v61 }
 0x316   :  { %v1844_v60 = vmax.f32 %v1816_v58, 0.0 }
 0x318   :  { %v9574_v62 = vpack.c.bf16 %v1844_v60, %v1843_v59 }
 0x319   :  { %v1770_v63 = vpop.f32.mrf.mxu2  ;;  %v1676_v2 = vpop.f32.mrf.mxu0 }
 0x31a   :  { %v1818_v0 = vpop.f32.mrf.mxu3  ;;  %9593 = vst [vmem:[#allocation2 + $0x18] sm:$0xff] %v9574_v62   ;;  %v1724_v3 = vpop.f32.mrf.mxu1  ;;  %v1677_v4 = vadd.f32 %v11639_v46, %v1676_v2  ;;  %v1771_v5 = vadd.f32 %v1770_v63, %v1723_v1 }
 0x31c   :  { %v1725_v6 = vadd.f32 %v1724_v3, %v1677_v4  ;;  %v1819_v9 = vadd.f32 %v1818_v0, %v1771_v5 }
 0x31e   :  { %v1845_v14 = vmax.f32 %v1819_v9, 0.0 }
 0x321   :  { %v1772_v7 = vpop.f32.mrf.mxu2  ;;  %v1679_v11 = vpop.f32.mrf.mxu0 }
 0x322   :  { %v1820_v8 = vpop.f32.mrf.mxu3  ;;  %v1773_v10 = vadd.f32 %v1772_v7, %v1725_v6  ;;  %v1727_v12 = vpop.f32.mrf.mxu1  ;;  %v1680_v16 = vadd.f32 %v11639_v46, %v1679_v11 }
 0x324   :  { %v1821_v13 = vadd.f32 %v1820_v8, %v1773_v10  ;;  %v1728_v20 = vadd.f32 %v1727_v12, %v1680_v16 }
 0x326   :  { %v1846_v15 = vmax.f32 %v1821_v13, 0.0 }
 0x328   :  { %v9579_v17 = vpack.c.bf16 %v1846_v15, %v1845_v14 }
 0x329   :  { %v1775_v18 = vpop.f32.mrf.mxu2  ;;  %v1681_v21 = vpop.f32.mrf.mxu0 }
 0x32a   :  { %v1823_v19 = vpop.f32.mrf.mxu3  ;;  %9594 = vst [vmem:[#allocation2 + $0x20] sm:$0xff] %v9579_v17   ;;  %v1729_v22 = vpop.f32.mrf.mxu1  ;;  %v1682_v23 = vadd.f32 %v11639_v46, %v1681_v21  ;;  %v1776_v24 = vadd.f32 %v1775_v18, %v1728_v20 }
 0x32c   :  { %v1730_v25 = vadd.f32 %v1729_v22, %v1682_v23  ;;  %v1824_v28 = vadd.f32 %v1823_v19, %v1776_v24 }
 0x32e   :  { %v1847_v33 = vmax.f32 %v1824_v28, 0.0 }
 0x331   :  { %v1777_v26 = vpop.f32.mrf.mxu2  ;;  %v1684_v30 = vpop.f32.mrf.mxu0 }
 0x332   :  { %v1825_v27 = vpop.f32.mrf.mxu3  ;;  %v1778_v29 = vadd.f32 %v1777_v26, %v1730_v25  ;;  %v1732_v31 = vpop.f32.mrf.mxu1  ;;  %v1685_v35 = vadd.f32 %v11639_v46, %v1684_v30 }
 0x334   :  { %v1826_v32 = vadd.f32 %v1825_v27, %v1778_v29  ;;  %v1733_v39 = vadd.f32 %v1732_v31, %v1685_v35 }
 0x336   :  { %v1848_v34 = vmax.f32 %v1826_v32, 0.0 }
 0x338   :  { %v9584_v36 = vpack.c.bf16 %v1848_v34, %v1847_v33 }
 0x339   :  { %v1780_v37 = vpop.f32.mrf.mxu2  ;;  %v1686_v40 = vpop.f32.mrf.mxu0 }
 0x33a   :  { %v1828_v38 = vpop.f32.mrf.mxu3  ;;  %9595 = vst [vmem:[#allocation2 + $0x28] sm:$0xff] %v9584_v36   ;;  %v1734_v41 = vpop.f32.mrf.mxu1  ;;  %v1687_v42 = vadd.f32 %v11639_v46, %v1686_v40  ;;  %v1781_v43 = vadd.f32 %v1780_v37, %v1733_v39 }
 0x33c   :  { %v1735_v44 = vadd.f32 %v1734_v41, %v1687_v42  ;;  %v1829_v48 = vadd.f32 %v1828_v38, %v1781_v43 }
 0x33e   :  { %v1849_v54 = vmax.f32 %v1829_v48, 0.0 }
 0x341   :  { %v1782_v45 = vpop.f32.mrf.mxu2  ;;  %v1689_v50 = vpop.f32.mrf.mxu0 }
 0x342   :  { %v1830_v47 = vpop.f32.mrf.mxu3  ;;  %v1783_v49 = vadd.f32 %v1782_v45, %v1735_v44  ;;  %v1737_v51 = vpop.f32.mrf.mxu1  ;;  %v1690_v52 = vadd.f32 %v11639_v46, %v1689_v50 }
 0x344   :  { %v1831_v53 = vadd.f32 %v1830_v47, %v1783_v49  ;;  %v1738_v56 = vadd.f32 %v1737_v51, %v1690_v52 }
 0x346   :  { %v1850_v55 = vmax.f32 %v1831_v53, 0.0 }
 0x348   :  { %v9589_v57 = vpack.c.bf16 %v1850_v55, %v1849_v54 }
 0x349   :  { %v1785_v58 = vpop.f32.mrf.mxu2  ;;  %v1691_v61 = vpop.f32.mrf.mxu0 }
 0x34a   :  { %v1833_v59 = vpop.f32.mrf.mxu3  ;;  %9596 = vst [vmem:[#allocation2 + $0x30] sm:$0xff] %v9589_v57   ;;  %v1786_v60 = vadd.f32 %v1785_v58, %v1738_v56  ;;  %v1739_v62 = vpop.f32.mrf.mxu1 }
 0x34c   :  { %v1834_v63 = vadd.f32 %v1833_v59, %v1786_v60 }
 0x34e   :  { %v1851_v0 = vmax.f32 %v1834_v63, 0.0 }
 0x350   :  { %v1866_v1 = vpack.c.bf16 %v1851_v0, %v1851_v0 }
 0x351   :  { %v1787_v2 = vpop.f32.mrf.mxu2 }
 0x352   :  { %v1835_v3 = vpop.f32.mrf.mxu3  ;;  %1881 = vst [vmem:[#allocation2 + $0x38] sm:$0xf] %v1866_v1 }
 0x353   :  { %9626 = dma.done.wait [#allocation6], 30720 }
 0x354   :  { %9627 = vsyncadd [#allocation6], 4294936576  ;;  %v6751_v46 = vld [vmem:[#allocation3 + $0x70] sm:$0xf]  ;;  %v9011_v4 = vld [vmem:[#allocation3 + $0x74] sm:$0xf0] }
 0x355   :  { %v6815_v5 = vld [vmem:[#allocation3 + $0xf0] sm:$0xf]  ;;  %v6752_v6 = vor.u32 %v9011_v4, %v6751_v46  ;;  %v9027_v7 = vld [vmem:[#allocation3 + $0xf4] sm:$0xf0]  ;;  %v6743_v14 = vld [vmem:[#allocation3 + $0x60] sm:$0xf] }
 0x356   :  { %v6879_v8 = vld [vmem:[#allocation3 + $0x170] sm:$0xf]  ;;  %v9043_v9 = vld [vmem:[#allocation3 + $0x174] sm:$0xf0]  ;;  %v6816_v10 = vor.u32 %v9027_v7, %v6815_v5  ;;  %v9009_v16 = vld [vmem:[#allocation3 + $0x64] sm:$0xf0] }
 0x357   :  { %v6880_v11 = vor.u32 %v9043_v9, %v6879_v8  ;;  %v6943_v12 = vld [vmem:[#allocation3 + $0x1f0] sm:$0xf]  ;;  %v9059_v13 = vld [vmem:[#allocation3 + $0x1f4] sm:$0xf0]  ;;  %3396 = vmatpush.bf16.msrb.mxu0 %v6752_v6  ;;  %v6807_v17 = vld [vmem:[#allocation3 + $0xe0] sm:$0xf]  ;;  %v6744_v19 = vor.u32 %v9009_v16, %v6743_v14 }
 0x358   :  { %v6944_v15 = vor.u32 %v9059_v13, %v6943_v12  ;;  %v9025_v18 = vld [vmem:[#allocation3 + $0xe4] sm:$0xf0]  ;;  %3409 = vmatpush.bf16.msrb.mxu1 %v6816_v10  ;;  %v6871_v21 = vld [vmem:[#allocation3 + $0x160] sm:$0xf]  ;;  %v6735_v26 = vld [vmem:[#allocation3 + $0x50] sm:$0xf] }
 0x359   :  { %3422 = vmatpush.bf16.msrb.mxu2 %v6880_v11  ;;  %v6808_v20 = vor.u32 %v9025_v18, %v6807_v17  ;;  %v9041_v22 = vld [vmem:[#allocation3 + $0x164] sm:$0xf0]  ;;  %v6935_v23 = vld [vmem:[#allocation3 + $0x1e0] sm:$0xf]  ;;  %v9007_v27 = vld [vmem:[#allocation3 + $0x54] sm:$0xf0] }
 0x35a   :  { %3435 = vmatpush.bf16.msrb.mxu3 %v6944_v15  ;;  %v6872_v24 = vor.u32 %v9041_v22, %v6871_v21  ;;  %v9057_v25 = vld [vmem:[#allocation3 + $0x1e4] sm:$0xf0]  ;;  %v6799_v29 = vld [vmem:[#allocation3 + $0xd0] sm:$0xf]  ;;  %v9023_v30 = vld [vmem:[#allocation3 + $0xd4] sm:$0xf0]  ;;  %v6736_v32 = vor.u32 %v9007_v27, %v6735_v26 }
 0x35b   :  { %v6936_v28 = vor.u32 %v9057_v25, %v6935_v23  ;;  %v6863_v31 = vld [vmem:[#allocation3 + $0x150] sm:$0xf]  ;;  %3397 = vmatpush.bf16.msrb.mxu0 %v6744_v19  ;;  %v9039_v33 = vld [vmem:[#allocation3 + $0x154] sm:$0xf0]  ;;  %v6800_v36 = vor.u32 %v9023_v30, %v6799_v29  ;;  %v6727_v38 = vld [vmem:[#allocation3 + $0x40] sm:$0xf] }
 0x35c   :  { %v6927_v34 = vld [vmem:[#allocation3 + $0x1d0] sm:$0xf]  ;;  %v9055_v35 = vld [vmem:[#allocation3 + $0x1d4] sm:$0xf0]  ;;  %3410 = vmatpush.bf16.msrb.mxu1 %v6808_v20  ;;  %v6864_v37 = vor.u32 %v9039_v33, %v6863_v31  ;;  %v9005_v39 = vld [vmem:[#allocation3 + $0x44] sm:$0xf0] }
 0x35d   :  { %3423 = vmatpush.bf16.msrb.mxu2 %v6872_v24  ;;  %v6791_v40 = vld [vmem:[#allocation3 + $0xc0] sm:$0xf]  ;;  %v6928_v41 = vor.u32 %v9055_v35, %v6927_v34  ;;  %v9021_v42 = vld [vmem:[#allocation3 + $0xc4] sm:$0xf0]  ;;  %v6728_v48 = vor.u32 %v9005_v39, %v6727_v38  ;;  %v6719_v51 = vld [vmem:[#allocation3 + $0x30] sm:$0xf] }
 0x35e   :  { %3436 = vmatpush.bf16.msrb.mxu3 %v6936_v28  ;;  %v6855_v43 = vld [vmem:[#allocation3 + $0x140] sm:$0xf]  ;;  %v9037_v44 = vld [vmem:[#allocation3 + $0x144] sm:$0xf0]  ;;  %v6792_v49 = vor.u32 %v9021_v42, %v6791_v40  ;;  %v9003_v52 = vld [vmem:[#allocation3 + $0x34] sm:$0xf0] }
 0x35f   :  { %v6919_v45 = vld [vmem:[#allocation3 + $0x1c0] sm:$0xf]  ;;  %v9053_v47 = vld [vmem:[#allocation3 + $0x1c4] sm:$0xf0]  ;;  %3398 = vmatpush.bf16.msrb.mxu0 %v6736_v32  ;;  %v6856_v50 = vor.u32 %v9037_v44, %v6855_v43  ;;  %v6783_v53 = vld [vmem:[#allocation3 + $0xb0] sm:$0xf]  ;;  %v6720_v60 = vor.u32 %v9003_v52, %v6719_v51 }
 0x360   :  { %3411 = vmatpush.bf16.msrb.mxu1 %v6800_v36  ;;  %v6920_v54 = vor.u32 %v9053_v47, %v6919_v45  ;;  %v9019_v55 = vld [vmem:[#allocation3 + $0xb4] sm:$0xf0]  ;;  %v6847_v56 = vld [vmem:[#allocation3 + $0x130] sm:$0xf]  ;;  %v6711_v63 = vld [vmem:[#allocation3 + $0x20] sm:$0xf] }
 0x361   :  { %3424 = vmatpush.bf16.msrb.mxu2 %v6864_v37  ;;  %v9035_v57 = vld [vmem:[#allocation3 + $0x134] sm:$0xf0]  ;;  %v6911_v58 = vld [vmem:[#allocation3 + $0x1b0] sm:$0xf]  ;;  %v6784_v61 = vor.u32 %v9019_v55, %v6783_v53  ;;  %v9001_v0 = vld [vmem:[#allocation3 + $0x24] sm:$0xf0] }
 0x362   :  { %3437 = vmatpush.bf16.msrb.mxu3 %v6928_v41  ;;  %v9051_v59 = vld [vmem:[#allocation3 + $0x1b4] sm:$0xf0]  ;;  %v6848_v62 = vor.u32 %v9035_v57, %v6847_v56  ;;  %v6775_v1 = vld [vmem:[#allocation3 + $0xa0] sm:$0xf]  ;;  %v9017_v3 = vld [vmem:[#allocation3 + $0xa4] sm:$0xf0]  ;;  %v6712_v7 = vor.u32 %v9001_v0, %v6711_v63 }
 0x363   :  { %3399 = vmatpush.bf16.msrb.mxu0 %v6728_v48  ;;  %v6912_v2 = vor.u32 %v9051_v59, %v6911_v58  ;;  %v6839_v46 = vld [vmem:[#allocation3 + $0x120] sm:$0xf]  ;;  %v9033_v4 = vld [vmem:[#allocation3 + $0x124] sm:$0xf0]  ;;  %v6776_v8 = vor.u32 %v9017_v3, %v6775_v1  ;;  %v6703_v10 = vld [vmem:[#allocation3 + $0x10] sm:$0xf] }
 0x364   :  { %3412 = vmatpush.bf16.msrb.mxu1 %v6792_v49  ;;  %v6903_v5 = vld [vmem:[#allocation3 + $0x1a0] sm:$0xf]  ;;  %v9049_v6 = vld [vmem:[#allocation3 + $0x1a4] sm:$0xf0]  ;;  %v6840_v9 = vor.u32 %v9033_v4, %v6839_v46  ;;  %v8999_v11 = vld [vmem:[#allocation3 + $0x14] sm:$0xf0] }
 0x365   :  { %3425 = vmatpush.bf16.msrb.mxu2 %v6856_v50  ;;  %v6767_v12 = vld [vmem:[#allocation3 + $0x90] sm:$0xf]  ;;  %v6904_v13 = vor.u32 %v9049_v6, %v6903_v5  ;;  %v9015_v14 = vld [vmem:[#allocation3 + $0x94] sm:$0xf0]  ;;  %v6704_v19 = vor.u32 %v8999_v11, %v6703_v10  ;;  %v6695_v20 = vld [vmem:[#allocation3] sm:$0xf] }
 0x366   :  { %3438 = vmatpush.bf16.msrb.mxu3 %v6920_v54  ;;  %v6831_v15 = vld [vmem:[#allocation3 + $0x110] sm:$0xf]  ;;  %v9031_v16 = vld [vmem:[#allocation3 + $0x114] sm:$0xf0]  ;;  %v8997_v21 = vld [vmem:[#allocation3 + $0x4] sm:$0xf0]  ;;  %v6768_v22 = vor.u32 %v9015_v14, %v6767_v12 }
 0x367   :  { %3400 = vmatpush.bf16.msrb.mxu0 %v6720_v60  ;;  %v6895_v17 = vld [vmem:[#allocation3 + $0x190] sm:$0xf]  ;;  %v9047_v18 = vld [vmem:[#allocation3 + $0x194] sm:$0xf0]  ;;  %v6832_v23 = vor.u32 %v9031_v16, %v6831_v15  ;;  %v6759_v24 = vld [vmem:[#allocation3 + $0x80] sm:$0xf]  ;;  %v6696_v34 = vor.u32 %v8997_v21, %v6695_v20 }
 0x368   :  { %3413 = vmatpush.bf16.msrb.mxu1 %v6784_v61  ;;  %v9013_v25 = vld [vmem:[#allocation3 + $0x84] sm:$0xf0]  ;;  %v6823_v26 = vld [vmem:[#allocation3 + $0x100] sm:$0xf]  ;;  %v6896_v27 = vor.u32 %v9047_v18, %v6895_v17  ;;  %v7007_v29 = vld [vmem:[#allocation3 + $0x270] sm:$0xf] }
 0x369   :  { %3426 = vmatpush.bf16.msrb.mxu2 %v6848_v62  ;;  %v9029_v28 = vld [vmem:[#allocation3 + $0x104] sm:$0xf0]  ;;  %v9075_v30 = vld [vmem:[#allocation3 + $0x274] sm:$0xf0]  ;;  %v7071_v31 = vld [vmem:[#allocation3 + $0x2f0] sm:$0xf]  ;;  %v6760_v38 = vor.u32 %v9013_v25, %v6759_v24 }
 0x36a   :  { %3439 = vmatpush.bf16.msrb.mxu3 %v6912_v2  ;;  %v9091_v32 = vld [vmem:[#allocation3 + $0x2f4] sm:$0xf0]  ;;  %v7135_v33 = vld [vmem:[#allocation3 + $0x370] sm:$0xf]  ;;  %v6887_v36 = vld [vmem:[#allocation3 + $0x180] sm:$0xf]  ;;  %v6824_v39 = vor.u32 %v9029_v28, %v6823_v26  ;;  %v7008_v42 = vor.u32 %v9075_v30, %v7007_v29 }
 0x36b   :  { %3401 = vmatpush.bf16.msrb.mxu0 %v6712_v7  ;;  %v9107_v35 = vld [vmem:[#allocation3 + $0x374] sm:$0xf0]  ;;  %v9045_v37 = vld [vmem:[#allocation3 + $0x184] sm:$0xf0]  ;;  %v7199_v40 = vld [vmem:[#allocation3 + $0x3f0] sm:$0xf]  ;;  %v7072_v43 = vor.u32 %v9091_v32, %v7071_v31 }
 0x36c   :  { %3414 = vmatpush.bf16.msrb.mxu1 %v6776_v8  ;;  %v9123_v41 = vld [vmem:[#allocation3 + $0x3f4] sm:$0xf0]  ;;  %v6999_v44 = vld [vmem:[#allocation3 + $0x260] sm:$0xf]  ;;  %v7136_v45 = vor.u32 %v9107_v35, %v7135_v33  ;;  %v6888_v47 = vor.u32 %v9045_v37, %v6887_v36  ;;  %v9073_v48 = vld [vmem:[#allocation3 + $0x264] sm:$0xf0] }
 0x36d   :  { %3427 = vmatpush.bf16.msrb.mxu2 %v6840_v9  ;;  %v7063_v49 = vld [vmem:[#allocation3 + $0x2e0] sm:$0xf]  ;;  %v9089_v50 = vld [vmem:[#allocation3 + $0x2e4] sm:$0xf0]  ;;  %v7200_v51 = vor.u32 %v9123_v41, %v7199_v40  ;;  %v7000_v56 = vor.u32 %v9073_v48, %v6999_v44  ;;  %v6991_v58 = vld [vmem:[#allocation3 + $0x250] sm:$0xf] }
 0x36e   :  { %3440 = vmatpush.bf16.msrb.mxu3 %v6904_v13  ;;  %v7127_v52 = vld [vmem:[#allocation3 + $0x360] sm:$0xf]  ;;  %v9105_v53 = vld [vmem:[#allocation3 + $0x364] sm:$0xf0]  ;;  %v7064_v57 = vor.u32 %v9089_v50, %v7063_v49  ;;  %v9071_v59 = vld [vmem:[#allocation3 + $0x254] sm:$0xf0] }
 0x36f   :  { %3402 = vmatpush.bf16.msrb.mxu0 %v6704_v19  ;;  %v7191_v54 = vld [vmem:[#allocation3 + $0x3e0] sm:$0xf]  ;;  %v9121_v55 = vld [vmem:[#allocation3 + $0x3e4] sm:$0xf0]  ;;  %v7128_v60 = vor.u32 %v9105_v53, %v7127_v52  ;;  %v7055_v61 = vld [vmem:[#allocation3 + $0x2d0] sm:$0xf]  ;;  %v6992_v6 = vor.u32 %v9071_v59, %v6991_v58 }
 0x370   :  { %3415 = vmatpush.bf16.msrb.mxu1 %v6768_v22  ;;  %v9087_v62 = vld [vmem:[#allocation3 + $0x2d4] sm:$0xf0]  ;;  %v1890_v63 = vld [vmem:[#allocation2 + $0x8] sm:$0xff]  ;;  %v7192_v0 = vor.u32 %v9121_v55, %v7191_v54  ;;  %v6983_v8 = vld [vmem:[#allocation3 + $0x240] sm:$0xf]  ;;  %vm3794_vm0 = vcmask 1041408  }
 0x371   :  { %3428 = vmatpush.bf16.msrb.mxu2 %v6832_v23  ;;  %v7119_v1 = vld [vmem:[#allocation3 + $0x350] sm:$0xf]  ;;  %v9103_v2 = vld [vmem:[#allocation3 + $0x354] sm:$0xf0]  ;;  %v2153_v3 = vunpack.c.l.b16 %v1890_v63  ;;  %v2154_v46 = vunpack.c.h.b16 %v1890_v63  ;;  %v7056_v7 = vor.u32 %v9087_v62, %v7055_v61  ;;  %v1889_v10 = vld [vmem:[#allocation2] sm:$0xff] }
 0x372   :  { %3441 = vmatpush.bf16.msrb.mxu3 %v6896_v27  ;;  %v7183_v4 = vld [vmem:[#allocation3 + $0x3d0] sm:$0xf]  ;;  %v9119_v5 = vld [vmem:[#allocation3 + $0x3d4] sm:$0xf0]  ;;  %v7120_v11 = vor.u32 %v9103_v2, %v7119_v1  ;;  %v9069_v12 = vld [vmem:[#allocation3 + $0x244] sm:$0xf0]  ;;  %v2151_v15 = vunpack.c.l.b16 %v1889_v10  ;;  %v2152_v17 = vunpack.c.h.b16 %v1889_v10 }
 0x373   :  { %3403 = vmatpush.bf16.msrb.mxu0 %v6696_v34  ;;  %v11656_v9 = vpack.c.b16 %v2153_v3, %v2153_v3  ;;  %v7047_v13 = vld [vmem:[#allocation3 + $0x2c0] sm:$0xf]  ;;  %v9085_v14 = vld [vmem:[#allocation3 + $0x2c4] sm:$0xf0]  ;;  %v11658_v16 = vpack.c.b16 %v2154_v46, %v2154_v46  ;;  %v7184_v18 = vor.u32 %v9119_v5, %v7183_v4  ;;  %v6984_v25 = vor.u32 %v9069_v12, %v6983_v8  ;;  %v6975_v27 = vld [vmem:[#allocation3 + $0x230] sm:$0xf] }
 0x374   :  { %3416 = vmatpush.bf16.msrb.mxu1 %v6760_v38  ;;  %v7111_v19 = vld [vmem:[#allocation3 + $0x340] sm:$0xf]  ;;  %v9101_v20 = vld [vmem:[#allocation3 + $0x344] sm:$0xf0]  ;;  %v11661_v23 = vpack.c.b16 %v2151_v15, %v2151_v15  ;;  %v11664_v24 = vpack.c.b16 %v2152_v17, %v2152_v17  ;;  %v7048_v26 = vor.u32 %v9085_v14, %v7047_v13  ;;  %v9067_v29 = vld [vmem:[#allocation3 + $0x234] sm:$0xf0] }
 0x375   :  { %3429 = vmatpush.bf16.msrb.mxu2 %v6824_v39  ;;  %v7175_v21 = vld [vmem:[#allocation3 + $0x3c0] sm:$0xf]  ;;  %v9117_v22 = vld [vmem:[#allocation3 + $0x3c4] sm:$0xf0]  ;;  %v7112_v28 = vor.u32 %v9101_v20, %v7111_v19  ;;  %v7039_v30 = vld [vmem:[#allocation3 + $0x2b0] sm:$0xf]  ;;  %v6976_v37 = vor.u32 %v9067_v29, %v6975_v27 }
 0x376   :  { %3442 = vmatpush.bf16.msrb.mxu3 %v6888_v47  ;;  %v9083_v31 = vld [vmem:[#allocation3 + $0x2b4] sm:$0xf0]  ;;  %3404 = vmatmul.bf16.vlgmr.msrb.gmra.mxu0 %v11661_v23  ;;  %v7176_v32 = vor.u32 %v9117_v22, %v7175_v21  ;;  %v7103_v33 = vld [vmem:[#allocation3 + $0x330] sm:$0xf]  ;;  %v6967_v39 = vld [vmem:[#allocation3 + $0x220] sm:$0xf] }
 0x377   :  { %3448 = vmatpush.bf16.msra.mxu0 %v7008_v42  ;;  %v9099_v34 = vld [vmem:[#allocation3 + $0x334] sm:$0xf0]  ;;  %3417 = vmatmul.bf16.vlgmr.msrb.gmra.mxu1 %v11664_v24  ;;  %v7167_v35 = vld [vmem:[#allocation3 + $0x3b0] sm:$0xf]  ;;  %v7040_v38 = vor.u32 %v9083_v31, %v7039_v30  ;;  %v9065_v41 = vld [vmem:[#allocation3 + $0x224] sm:$0xf0] }
 0x378   :  { %3461 = vmatpush.bf16.msra.mxu1 %v7072_v43  ;;  %3430 = vmatmul.bf16.vlgmr.msrb.gmra.mxu2 %v11656_v9  ;;  %v9115_v36 = vld [vmem:[#allocation3 + $0x3b4] sm:$0xf0]  ;;  %v7104_v40 = vor.u32 %v9099_v34, %v7103_v33  ;;  %v7031_v42 = vld [vmem:[#allocation3 + $0x2a0] sm:$0xf]  ;;  %v9081_v43 = vld [vmem:[#allocation3 + $0x2a4] sm:$0xf0]  ;;  %v6968_v50 = vor.u32 %v9065_v41, %v6967_v39 }
 0x379   :  { %3474 = vmatpush.bf16.msra.mxu2 %v7136_v45  ;;  %3443 = vmatmul.bf16.vlgmr.msrb.gmra.mxu3 %v11658_v16  ;;  %v7168_v44 = vor.u32 %v9115_v36, %v7167_v35  ;;  %v7095_v45 = vld [vmem:[#allocation3 + $0x320] sm:$0xf]  ;;  %v9097_v47 = vld [vmem:[#allocation3 + $0x324] sm:$0xf0]  ;;  %v6959_v52 = vld [vmem:[#allocation3 + $0x210] sm:$0xf] }
 0x37a   :  { %3487 = vmatpush.bf16.msra.mxu3 %v7200_v51  ;;  %v7159_v48 = vld [vmem:[#allocation3 + $0x3a0] sm:$0xf]  ;;  %v9113_v49 = vld [vmem:[#allocation3 + $0x3a4] sm:$0xf0]  ;;  %v7032_v51 = vor.u32 %v9081_v43, %v7031_v42  ;;  %v7096_v53 = vor.u32 %v9097_v47, %v7095_v45  ;;  %v9063_v54 = vld [vmem:[#allocation3 + $0x214] sm:$0xf0] }
 0x37b   :  { %3449 = vmatpush.bf16.msra.mxu0 %v7000_v56  ;;  %v7023_v55 = vld [vmem:[#allocation3 + $0x290] sm:$0xf]  ;;  %v9079_v56 = vld [vmem:[#allocation3 + $0x294] sm:$0xf0]  ;;  %v6951_v62 = vld [vmem:[#allocation3 + $0x200] sm:$0xf] }
 0x37c   :  { %3462 = vmatpush.bf16.msra.mxu1 %v7064_v57  ;;  %v7160_v57 = vor.u32 %v9113_v49, %v7159_v48  ;;  %v7087_v58 = vld [vmem:[#allocation3 + $0x310] sm:$0xf]  ;;  %v9095_v59 = vld [vmem:[#allocation3 + $0x314] sm:$0xf0]  ;;  %v9061_v63 = vld [vmem:[#allocation3 + $0x204] sm:$0xf0]  ;;  %v7024_v1 = vor.u32 %v9079_v56, %v7023_v55 }
 0x37d   :  { %3475 = vmatpush.bf16.msra.mxu2 %v7128_v60  ;;  %v7151_v60 = vld [vmem:[#allocation3 + $0x390] sm:$0xf]  ;;  %v9111_v61 = vld [vmem:[#allocation3 + $0x394] sm:$0xf0]  ;;  %v7015_v2 = vld [vmem:[#allocation3 + $0x280] sm:$0xf]  ;;  %v7088_v4 = vor.u32 %v9095_v59, %v7087_v58 }
 0x37e   :  { %3488 = vmatpush.bf16.msra.mxu3 %v7192_v0  ;;  %v6960_v0 = vor.u32 %v9063_v54, %v6959_v52  ;;  %v9077_v3 = vld [vmem:[#allocation3 + $0x284] sm:$0xf0]  ;;  %v1891_v46 = vld [vmem:[#allocation2 + $0x10] sm:$0xff]  ;;  %v7079_v5 = vld [vmem:[#allocation3 + $0x300] sm:$0xf]  ;;  %v7152_v8 = vor.u32 %v9111_v61, %v7151_v60 }
 0x37f   :  { %3450 = vmatpush.bf16.msra.mxu0 %v6992_v6  ;;  %v9093_v6 = vld [vmem:[#allocation3 + $0x304] sm:$0xf0]  ;;  %v7263_v10 = vld [vmem:[#allocation3 + $0x470] sm:$0xf]  ;;  %v9155_v13 = vld [vmem:[#allocation3 + $0x4f4] sm:$0xf0]  ;;  %v2155_v17 = vunpack.c.l.b16 %v1891_v46  ;;  %v7016_v19 = vor.u32 %v9077_v3, %v7015_v2  ;;  %v2156_v29 = vunpack.c.h.b16 %v1891_v46 }
 0x380   :  { %3463 = vmatpush.bf16.msra.mxu1 %v7056_v7  ;;  %v1892_v7 = vld [vmem:[#allocation2 + $0x18] sm:$0xff]  ;;  %v7327_v12 = vld [vmem:[#allocation3 + $0x4f0] sm:$0xf]  ;;  %v9171_v15 = vld [vmem:[#allocation3 + $0x574] sm:$0xf0] }
 0x381   :  { %3476 = vmatpush.bf16.msra.mxu2 %v7120_v11  ;;  %v9139_v11 = vld [vmem:[#allocation3 + $0x474] sm:$0xf0]  ;;  %v7391_v14 = vld [vmem:[#allocation3 + $0x570] sm:$0xf]  ;;  %v7143_v20 = vld [vmem:[#allocation3 + $0x380] sm:$0xf]  ;;  %v2157_v22 = vunpack.c.l.b16 %v1892_v7  ;;  %v7328_v30 = vor.u32 %v9155_v13, %v7327_v12  ;;  %v11668_v39 = vpack.c.b16 %v2155_v17, %v2155_v17  ;;  %v11672_v47 = vpack.c.b16 %v2156_v29, %v2156_v29 }
 0x382   :  { %3489 = vmatpush.bf16.msra.mxu3 %v7184_v18  ;;  %v6952_v18 = vor.u32 %v9061_v63, %v6951_v62  ;;  %v9109_v21 = vld [vmem:[#allocation3 + $0x384] sm:$0xf0]  ;;  %v7455_v27 = vld [vmem:[#allocation3 + $0x5f0] sm:$0xf]  ;;  %v7392_v31 = vor.u32 %v9171_v15, %v7391_v14  ;;  %v7319_v34 = vld [vmem:[#allocation3 + $0x4e0] sm:$0xf] }
 0x383   :  { %3451 = vmatpush.bf16.msra.mxu0 %v6984_v25  ;;  %v7080_v25 = vor.u32 %v9093_v6, %v7079_v5  ;;  %v9137_v33 = vld [vmem:[#allocation3 + $0x464] sm:$0xf0]  ;;  %v7144_v35 = vor.u32 %v9109_v21, %v7143_v20  ;;  %v11670_v42 = vpack.c.b16 %v2157_v22, %v2157_v22  ;;  %v7311_v52 = vld [vmem:[#allocation3 + $0x4d0] sm:$0xf]  ;;  %v9151_v54 = vld [vmem:[#allocation3 + $0x4d4] sm:$0xf0] }
 0x384   :  { %3464 = vmatpush.bf16.msra.mxu1 %v7048_v26  ;;  %v7264_v26 = vor.u32 %v9139_v11, %v7263_v10  ;;  %v9153_v36 = vld [vmem:[#allocation3 + $0x4e4] sm:$0xf0]  ;;  %v7375_v55 = vld [vmem:[#allocation3 + $0x550] sm:$0xf]  ;;  %v9167_v56 = vld [vmem:[#allocation3 + $0x554] sm:$0xf0]  ;;  %v7312_v61 = vor.u32 %v9151_v54, %v7311_v52 }
 0x385   :  { %3477 = vmatpush.bf16.msra.mxu2 %v7112_v28  ;;  %v9187_v28 = vld [vmem:[#allocation3 + $0x5f4] sm:$0xf0]  ;;  %v9185_v45 = vld [vmem:[#allocation3 + $0x5e4] sm:$0xf0]  ;;  %v7320_v48 = vor.u32 %v9153_v36, %v7319_v34  ;;  %v7439_v59 = vld [vmem:[#allocation3 + $0x5d0] sm:$0xf]  ;;  %v7376_v62 = vor.u32 %v9167_v56, %v7375_v55 }
 0x386   :  { %3490 = vmatpush.bf16.msra.mxu3 %v7176_v32  ;;  %v7255_v32 = vld [vmem:[#allocation3 + $0x460] sm:$0xf]  ;;  %v7456_v41 = vor.u32 %v9187_v28, %v7455_v27  ;;  %v9183_v60 = vld [vmem:[#allocation3 + $0x5d4] sm:$0xf0]  ;;  %v9149_v2 = vld [vmem:[#allocation3 + $0x4c4] sm:$0xf0] }
 0x387   :  { %3452 = vmatpush.bf16.msra.mxu0 %v6976_v37  ;;  %v7383_v37 = vld [vmem:[#allocation3 + $0x560] sm:$0xf]  ;;  %v7256_v43 = vor.u32 %v9137_v33, %v7255_v32  ;;  %v9165_v46 = vld [vmem:[#allocation3 + $0x544] sm:$0xf0]  ;;  %v7231_v11 = vld [vmem:[#allocation3 + $0x430] sm:$0xf] }
 0x388   :  { %3465 = vmatpush.bf16.msra.mxu1 %v7040_v38  ;;  %v9169_v38 = vld [vmem:[#allocation3 + $0x564] sm:$0xf0]  ;;  %v7239_v63 = vld [vmem:[#allocation3 + $0x440] sm:$0xf]  ;;  %v9131_v12 = vld [vmem:[#allocation3 + $0x434] sm:$0xf0] }
 0x389   :  { %3478 = vmatpush.bf16.msra.mxu2 %v7104_v40  ;;  %v2158_v40 = vunpack.c.h.b16 %v1892_v7  ;;  %v7384_v49 = vor.u32 %v9169_v38, %v7383_v37  ;;  %v7367_v3 = vld [vmem:[#allocation3 + $0x540] sm:$0xf]  ;;  %v9181_v7 = vld [vmem:[#allocation3 + $0x5c4] sm:$0xf0]  ;;  %v7295_v13 = vld [vmem:[#allocation3 + $0x4b0] sm:$0xf] }
 0x38a   :  { %3491 = vmatpush.bf16.msra.mxu3 %v7168_v44  ;;  %v7447_v44 = vld [vmem:[#allocation3 + $0x5e0] sm:$0xf]  ;;  %v7368_v10 = vor.u32 %v9165_v46, %v7367_v3  ;;  %v9147_v14 = vld [vmem:[#allocation3 + $0x4b4] sm:$0xf0]  ;;  %v7359_v15 = vld [vmem:[#allocation3 + $0x530] sm:$0xf] }
 0x38b   :  { %3453 = vmatpush.bf16.msra.mxu0 %v6968_v50  ;;  %v7247_v50 = vld [vmem:[#allocation3 + $0x450] sm:$0xf]  ;;  %v7431_v6 = vld [vmem:[#allocation3 + $0x5c0] sm:$0xf]  ;;  %v9163_v17 = vld [vmem:[#allocation3 + $0x534] sm:$0xf0]  ;;  %v7296_v22 = vor.u32 %v9147_v14, %v7295_v13 }
 0x38c   :  { %3466 = vmatpush.bf16.msra.mxu1 %v7032_v51  ;;  %v9135_v51 = vld [vmem:[#allocation3 + $0x454] sm:$0xf0]  ;;  %v7423_v20 = vld [vmem:[#allocation3 + $0x5b0] sm:$0xf]  ;;  %v9129_v27 = vld [vmem:[#allocation3 + $0x424] sm:$0xf0] }
 0x38d   :  { %3479 = vmatpush.bf16.msra.mxu2 %v7096_v53  ;;  %v11675_v53 = vpack.c.b16 %v2158_v40, %v2158_v40  ;;  %v7248_v58 = vor.u32 %v9135_v51, %v7247_v50  ;;  %v9179_v21 = vld [vmem:[#allocation3 + $0x5b4] sm:$0xf0]  ;;  %v7287_v28 = vld [vmem:[#allocation3 + $0x4a0] sm:$0xf]  ;;  %v9145_v29 = vld [vmem:[#allocation3 + $0x4a4] sm:$0xf0] }
 0x38e   :  { %3492 = vmatpush.bf16.msra.mxu3 %v7160_v57  ;;  %v7448_v57 = vor.u32 %v9185_v45, %v7447_v44  ;;  %v7424_v32 = vor.u32 %v9179_v21, %v7423_v20  ;;  %v7415_v34 = vld [vmem:[#allocation3 + $0x5a0] sm:$0xf]  ;;  %v7288_v36 = vor.u32 %v9145_v29, %v7287_v28  ;;  %v7215_v38 = vld [vmem:[#allocation3 + $0x410] sm:$0xf]  ;;  %v9127_v40 = vld [vmem:[#allocation3 + $0x414] sm:$0xf0] }
 0x38f   :  { %3454 = vmatpush.bf16.msra.mxu0 %v6960_v0  ;;  %v9133_v0 = vld [vmem:[#allocation3 + $0x444] sm:$0xf0]  ;;  %v7343_v44 = vld [vmem:[#allocation3 + $0x510] sm:$0xf]  ;;  %v9159_v45 = vld [vmem:[#allocation3 + $0x514] sm:$0xf0]  ;;  %v7216_v52 = vor.u32 %v9127_v40, %v7215_v38 }
 0x390   :  { %3467 = vmatpush.bf16.msra.mxu1 %v7024_v1  ;;  %v7303_v1 = vld [vmem:[#allocation3 + $0x4c0] sm:$0xf]  ;;  %v7240_v5 = vor.u32 %v9133_v0, %v7239_v63  ;;  %v9175_v50 = vld [vmem:[#allocation3 + $0x594] sm:$0xf0]  ;;  %v9125_v54 = vld [vmem:[#allocation3 + $0x404] sm:$0xf0] }
 0x391   :  { %3480 = vmatpush.bf16.msra.mxu2 %v7088_v4  ;;  %v7440_v4 = vor.u32 %v9183_v60, %v7439_v59  ;;  %v7207_v51 = vld [vmem:[#allocation3 + $0x400] sm:$0xf]  ;;  %v9141_v56 = vld [vmem:[#allocation3 + $0x484] sm:$0xf0]  ;;  %v7519_v63 = vld [vmem:[#allocation3 + $0x670] sm:$0xf] }
 0x392   :  { %3493 = vmatpush.bf16.msra.mxu3 %v7152_v8  ;;  %v7304_v8 = vor.u32 %v9149_v2, %v7303_v1  ;;  %v7271_v55 = vld [vmem:[#allocation3 + $0x480] sm:$0xf]  ;;  %v1893_v60 = vld [vmem:[#allocation2 + $0x20] sm:$0xff]  ;;  %v9203_v0 = vld [vmem:[#allocation3 + $0x674] sm:$0xf0] }
 0x393   :  { %3455 = vmatpush.bf16.msra.mxu0 %v6952_v18  ;;  %v7432_v18 = vor.u32 %v9181_v7, %v7431_v6  ;;  %v7335_v59 = vld [vmem:[#allocation3 + $0x500] sm:$0xf]  ;;  %v7583_v2 = vld [vmem:[#allocation3 + $0x6f0] sm:$0xf]  ;;  %v9219_v3 = vld [vmem:[#allocation3 + $0x6f4] sm:$0xf0]  ;;  %v2160_v13 = vunpack.c.h.b16 %v1893_v60  ;;  %v7520_v14 = vor.u32 %v9203_v0, %v7519_v63 }
 0x394   :  { %3468 = vmatpush.bf16.msra.mxu1 %v7016_v19  ;;  %v7232_v19 = vor.u32 %v9131_v12, %v7231_v11  ;;  %v7647_v46 = vld [vmem:[#allocation3 + $0x770] sm:$0xf]  ;;  %v7399_v6 = vld [vmem:[#allocation3 + $0x580] sm:$0xf]  ;;  %v9173_v7 = vld [vmem:[#allocation3 + $0x584] sm:$0xf0]  ;;  %v7272_v11 = vor.u32 %v9141_v56, %v7271_v55 }
 0x395   :  { %3481 = vmatpush.bf16.msra.mxu2 %v7080_v25  ;;  %v7360_v25 = vor.u32 %v9163_v17, %v7359_v15  ;;  %v7584_v15 = vor.u32 %v9219_v3, %v7583_v2  ;;  %v9010_v17 = vld [vmem:[#allocation3 + $0x74] sm:$0xf]  ;;  %v7400_v21 = vor.u32 %v9173_v7, %v7399_v6  ;;  %v9217_v29 = vld [vmem:[#allocation3 + $0x6e4] sm:$0xf0]  ;;  %v6729_v2 = vld [vmem:[#allocation3 + $0x48] sm:$0xf0] }
 0x396   :  { %3494 = vmatpush.bf16.msra.mxu3 %v7144_v35  ;;  %3456 = vmatmul.bf16.vlgmr.msra.gmra.mxu0 %v11668_v39  ;;  %v9177_v35 = vld [vmem:[#allocation3 + $0x5a4] sm:$0xf0]  ;;  %v7551_v6 = vld [vmem:[#allocation3 + $0x6b0] sm:$0xf]  ;;  %v9211_v7 = vld [vmem:[#allocation3 + $0x6b4] sm:$0xf0] }
 0x397   :  { %3500 = vmatpush.bf16.msrb.mxu0 %v7264_v26  ;;  %3469 = vmatmul.bf16.vlgmr.msra.gmra.mxu1 %v11672_v47  ;;  %v7223_v26 = vld [vmem:[#allocation3 + $0x420] sm:$0xf] }
 0x398   :  { %3513 = vmatpush.bf16.msrb.mxu1 %v7328_v30  ;;  %3482 = vmatmul.bf16.vlgmr.msra.gmra.mxu2 %v11670_v42  ;;  %v7351_v30 = vld [vmem:[#allocation3 + $0x520] sm:$0xf]  ;;  %v7224_v33 = vor.u32 %v9129_v27, %v7223_v26 }
 0x399   :  { %3526 = vmatpush.bf16.msrb.mxu2 %v7392_v31  ;;  %3495 = vmatmul.bf16.vlgmr.msra.gmra.mxu3 %v11675_v53  ;;  %v9161_v31 = vld [vmem:[#allocation3 + $0x524] sm:$0xf0]  ;;  %v7575_v26 = vld [vmem:[#allocation3 + $0x6e0] sm:$0xf] }
 0x39a   :  { %3539 = vmatpush.bf16.msrb.mxu3 %v7456_v41  ;;  %v7352_v37 = vor.u32 %v9161_v31, %v7351_v30  ;;  %v7279_v41 = vld [vmem:[#allocation3 + $0x490] sm:$0xf]  ;;  %v7639_v30 = vld [vmem:[#allocation3 + $0x760] sm:$0xf]  ;;  %v9233_v31 = vld [vmem:[#allocation3 + $0x764] sm:$0xf0]  ;;  %v7576_v38 = vor.u32 %v9217_v29, %v7575_v26 }
 0x39b   :  { %3501 = vmatpush.bf16.msrb.mxu0 %v7256_v43  ;;  %v9143_v43 = vld [vmem:[#allocation3 + $0x494] sm:$0xf0]  ;;  %v7640_v40 = vor.u32 %v9233_v31, %v7639_v30  ;;  %v9000_v30 = vld [vmem:[#allocation3 + $0x24] sm:$0xf]  ;;  %v6713_v31 = vld [vmem:[#allocation3 + $0x28] sm:$0xf0] }
 0x39c   :  { %3514 = vmatpush.bf16.msrb.mxu1 %v7320_v48  ;;  %v7416_v48 = vor.u32 %v9177_v35, %v7415_v34 }
 0x39d   :  { %3527 = vmatpush.bf16.msrb.mxu2 %v7384_v49  ;;  %v7407_v49 = vld [vmem:[#allocation3 + $0x590] sm:$0xf] }
 0x39e   :  { %3540 = vmatpush.bf16.msrb.mxu3 %v7448_v57  ;;  %v7280_v57 = vor.u32 %v9143_v43, %v7279_v41  ;;  %v7408_v1 = vor.u32 %v9175_v50, %v7407_v49  ;;  %v7503_v41 = vld [vmem:[#allocation3 + $0x650] sm:$0xf]  ;;  %v9199_v43 = vld [vmem:[#allocation3 + $0x654] sm:$0xf0] }
 0x39f   :  { %3502 = vmatpush.bf16.msrb.mxu0 %v7248_v58  ;;  %v7344_v58 = vor.u32 %v9159_v45, %v7343_v44  ;;  %v7567_v44 = vld [vmem:[#allocation3 + $0x6d0] sm:$0xf]  ;;  %v9215_v45 = vld [vmem:[#allocation3 + $0x6d4] sm:$0xf0] }
 0x3a0   :  { %3515 = vmatpush.bf16.msrb.mxu1 %v7312_v61  ;;  %v1894_v61 = vld [vmem:[#allocation2 + $0x28] sm:$0xff]  ;;  %v9231_v49 = vld [vmem:[#allocation3 + $0x754] sm:$0xf0]  ;;  %v7568_v55 = vor.u32 %v9215_v45, %v7567_v44  ;;  %v6716_v44 = vor.u32 %v9000_v30, %v6713_v31  ;;  %v8998_v45 = vld [vmem:[#allocation3 + $0x14] sm:$0xf] }
 0x3a1   :  { %3528 = vmatpush.bf16.msrb.mxu2 %v7376_v62  ;;  %v9157_v62 = vld [vmem:[#allocation3 + $0x504] sm:$0xf0]  ;;  %v6937_v30 = vld [vmem:[#allocation3 + $0x1e8] sm:$0xf0] }
 0x3a2   :  { %3541 = vmatpush.bf16.msrb.mxu3 %v7440_v4  ;;  %v7208_v4 = vor.u32 %v9125_v54, %v7207_v51  ;;  %v7336_v12 = vor.u32 %v9157_v62, %v7335_v59  ;;  %v7504_v51 = vor.u32 %v9199_v43, %v7503_v41  ;;  %v6737_v54 = vld [vmem:[#allocation3 + $0x58] sm:$0xf0]  ;;  %v7559_v59 = vld [vmem:[#allocation3 + $0x6c0] sm:$0xf]  ;;  %v9229_v62 = vld [vmem:[#allocation3 + $0x744] sm:$0xf0] }
 0x3a3   :  { %3503 = vmatpush.bf16.msrb.mxu0 %v7240_v5  ;;  %v9235_v5 = vld [vmem:[#allocation3 + $0x774] sm:$0xf0]  ;;  %v7599_v41 = vld [vmem:[#allocation3 + $0x710] sm:$0xf] }
 0x3a4   :  { %3516 = vmatpush.bf16.msrb.mxu1 %v7304_v8  ;;  %v2159_v8 = vunpack.c.l.b16 %v1893_v60  ;;  %v7648_v20 = vor.u32 %v9235_v5, %v7647_v46  ;;  %v9213_v60 = vld [vmem:[#allocation3 + $0x6c4] sm:$0xf0]  ;;  %v9195_v5 = vld [vmem:[#allocation3 + $0x634] sm:$0xf0] }
 0x3a5   :  { %3529 = vmatpush.bf16.msrb.mxu2 %v7368_v10  ;;  %v2161_v10 = vunpack.c.l.b16 %v1894_v61  ;;  %v7560_v3 = vor.u32 %v9213_v60, %v7559_v59  ;;  %v9223_v43 = vld [vmem:[#allocation3 + $0x714] sm:$0xf0]  ;;  %v1896_v59 = vld [vmem:[#allocation2 + $0x38] sm:$0xf]  ;;  %v9221_v60 = vld [vmem:[#allocation3 + $0x704] sm:$0xf0] }
 0x3a6   :  { %3542 = vmatpush.bf16.msrb.mxu3 %v7432_v18  ;;  %v6753_v18 = vld [vmem:[#allocation3 + $0x78] sm:$0xf0]  ;;  %v11680_v27 = vpack.c.b16 %v2159_v8, %v2159_v8  ;;  %v7615_v8 = vld [vmem:[#allocation3 + $0x730] sm:$0xf] }
 0x3a7   :  { %3504 = vmatpush.bf16.msrb.mxu0 %v7232_v19  ;;  %v2162_v19 = vunpack.c.h.b16 %v1894_v61  ;;  %v11682_v28 = vpack.c.b16 %v2161_v10, %v2161_v10  ;;  %v7623_v61 = vld [vmem:[#allocation3 + $0x740] sm:$0xf]  ;;  %v9227_v10 = vld [vmem:[#allocation3 + $0x734] sm:$0xf0] }
 0x3a8   :  { %3517 = vmatpush.bf16.msrb.mxu1 %v7296_v22  ;;  %v7511_v22 = vld [vmem:[#allocation3 + $0x660] sm:$0xf]  ;;  %v7624_v46 = vor.u32 %v9229_v62, %v7623_v61  ;;  %v9026_v61 = vld [vmem:[#allocation3 + $0xf4] sm:$0xf]  ;;  %v6817_v62 = vld [vmem:[#allocation3 + $0xf8] sm:$0xf0] }
 0x3a9   :  { %3530 = vmatpush.bf16.msrb.mxu2 %v7360_v25  ;;  %v9201_v25 = vld [vmem:[#allocation3 + $0x664] sm:$0xf0]  ;;  %v11686_v34 = vpack.c.b16 %v2162_v19, %v2162_v19 }
 0x3aa   :  { %3543 = vmatpush.bf16.msrb.mxu3 %v7424_v32  ;;  %v6756_v32 = vor.u32 %v9010_v17, %v6753_v18  ;;  %v7512_v35 = vor.u32 %v9201_v25, %v7511_v22  ;;  %v7616_v17 = vor.u32 %v9227_v10, %v7615_v8  ;;  %v7479_v18 = vld [vmem:[#allocation3 + $0x620] sm:$0xf]  ;;  %v9193_v19 = vld [vmem:[#allocation3 + $0x624] sm:$0xf0] }
 0x3ab   :  { %3505 = vmatpush.bf16.msrb.mxu0 %v7224_v33  ;;  %v11684_v33 = vpack.c.b16 %v2160_v13, %v2160_v13  ;;  %v9002_v13 = vld [vmem:[#allocation3 + $0x34] sm:$0xf]  ;;  %v7607_v22 = vld [vmem:[#allocation3 + $0x720] sm:$0xf]  ;;  %v9225_v25 = vld [vmem:[#allocation3 + $0x724] sm:$0xf0]  ;;  %v7480_v29 = vor.u32 %v9193_v19, %v7479_v18 }
 0x3ac   :  { %3518 = vmatpush.bf16.msrb.mxu1 %v7288_v36  ;;  %v9008_v36 = vld [vmem:[#allocation3 + $0x64] sm:$0xf] }
 0x3ad   :  { %3531 = vmatpush.bf16.msrb.mxu2 %v7352_v37  ;;  %v6745_v37 = vld [vmem:[#allocation3 + $0x68] sm:$0xf0] }
 0x3ae   :  { %3544 = vmatpush.bf16.msrb.mxu3 %v7416_v48  ;;  %v7631_v48 = vld [vmem:[#allocation3 + $0x750] sm:$0xf]  ;;  %v6748_v50 = vor.u32 %v9008_v36, %v6745_v37  ;;  %v9191_v37 = vld [vmem:[#allocation3 + $0x614] sm:$0xf0] }
 0x3af   :  { %3506 = vmatpush.bf16.msrb.mxu0 %v7216_v52  ;;  %v9006_v52 = vld [vmem:[#allocation3 + $0x54] sm:$0xf]  ;;  %v7632_v56 = vor.u32 %v9231_v49, %v7631_v48  ;;  %v7471_v36 = vld [vmem:[#allocation3 + $0x610] sm:$0xf]  ;;  %v6705_v48 = vld [vmem:[#allocation3 + $0x18] sm:$0xf0] }
 0x3b0   :  { %3519 = vmatpush.bf16.msrb.mxu1 %v7280_v57  ;;  %v7495_v57 = vld [vmem:[#allocation3 + $0x640] sm:$0xf]  ;;  %v6740_v63 = vor.u32 %v9006_v52, %v6737_v54  ;;  %v9205_v54 = vld [vmem:[#allocation3 + $0x684] sm:$0xf0] }
 0x3b1   :  { %3532 = vmatpush.bf16.msrb.mxu2 %v7344_v58  ;;  %v9197_v58 = vld [vmem:[#allocation3 + $0x644] sm:$0xf0]  ;;  %v7463_v49 = vld [vmem:[#allocation3 + $0x600] sm:$0xf] }
 0x3b2   :  { %3545 = vmatpush.bf16.msrb.mxu3 %v7408_v1  ;;  %v7496_v0 = vor.u32 %v9197_v58, %v7495_v57  ;;  %v9004_v1 = vld [vmem:[#allocation3 + $0x44] sm:$0xf]  ;;  %v7527_v52 = vld [vmem:[#allocation3 + $0x680] sm:$0xf]  ;;  %v1895_v58 = vld [vmem:[#allocation2 + $0x30] sm:$0xff] }
 0x3b3   :  { %3507 = vmatpush.bf16.msrb.mxu0 %v7208_v4  ;;  %v7487_v4 = vld [vmem:[#allocation3 + $0x630] sm:$0xf]  ;;  %v7591_v57 = vld [vmem:[#allocation3 + $0x700] sm:$0xf]  ;;  %v7528_v8 = vor.u32 %v9205_v54, %v7527_v52  ;;  %v9070_v54 = vld [vmem:[#allocation3 + $0x254] sm:$0xf] }
 0x3b4   :  { %3520 = vmatpush.bf16.msrb.mxu1 %v7272_v11  ;;  %v6732_v11 = vor.u32 %v9004_v1, %v6729_v2  ;;  %v6881_v1 = vld [vmem:[#allocation3 + $0x178] sm:$0xf0]  ;;  %v9058_v2 = vld [vmem:[#allocation3 + $0x1f4] sm:$0xf]  ;;  %v7592_v10 = vor.u32 %v9221_v60, %v7591_v57  ;;  %v6857_v60 = vld [vmem:[#allocation3 + $0x148] sm:$0xf0] }
 0x3b5   :  { %3533 = vmatpush.bf16.msrb.mxu2 %v7336_v12  ;;  %v7488_v12 = vor.u32 %v9195_v5, %v7487_v4  ;;  %v8996_v4 = vld [vmem:[#allocation3 + $0x4] sm:$0xf]  ;;  %v6697_v5 = vld [vmem:[#allocation3 + $0x8] sm:$0xf0] }
 0x3b6   :  { %3546 = vmatpush.bf16.msrb.mxu3 %v7400_v21  ;;  %3508 = vmatmul.bf16.vlgmr.msrb.gmra.mxu0 %v11680_v27  ;;  %v9209_v21 = vld [vmem:[#allocation3 + $0x6a4] sm:$0xf0]  ;;  %v6700_v19 = vor.u32 %v8996_v4, %v6697_v5  ;;  %v6785_v5 = vld [vmem:[#allocation3 + $0xb8] sm:$0xf0] }
 0x3b7   :  { %3552 = vmatpush.bf16.msra.mxu0 %v7520_v14  ;;  %3521 = vmatmul.bf16.vlgmr.msrb.gmra.mxu1 %v11684_v33  ;;  %v6721_v14 = vld [vmem:[#allocation3 + $0x38] sm:$0xf0] }
 0x3b8   :  { %3565 = vmatpush.bf16.msra.mxu1 %v7584_v15  ;;  %3534 = vmatmul.bf16.vlgmr.msrb.gmra.mxu2 %v11682_v28  ;;  %v7552_v15 = vor.u32 %v9211_v7, %v7551_v6  ;;  %v6724_v26 = vor.u32 %v9002_v13, %v6721_v14  ;;  %v2163_v6 = vunpack.c.l.b16 %v1895_v58  ;;  %v2165_v7 = vunpack.c.l.b16 %v1896_v59  ;;  %v9074_v14 = vld [vmem:[#allocation3 + $0x274] sm:$0xf]  ;;  %v9036_v59 = vld [vmem:[#allocation3 + $0x144] sm:$0xf] }
 0x3b9   :  { %3578 = vmatpush.bf16.msra.mxu2 %v7648_v20  ;;  %3547 = vmatmul.bf16.vlgmr.msrb.gmra.mxu3 %v11686_v34  ;;  %v7543_v20 = vld [vmem:[#allocation3 + $0x6a0] sm:$0xf] }
 0x3ba   :  { %3591 = vmatpush.bf16.msra.mxu3 %v6756_v32  ;;  %v7544_v32 = vor.u32 %v9209_v21, %v7543_v20  ;;  %v6809_v20 = vld [vmem:[#allocation3 + $0xe8] sm:$0xf0]  ;;  %v9040_v21 = vld [vmem:[#allocation3 + $0x164] sm:$0xf] }
 0x3bb   :  { %3553 = vmatpush.bf16.msra.mxu0 %v7512_v35  ;;  %v7608_v35 = vor.u32 %v9225_v25, %v7607_v22  ;;  %v6873_v22 = vld [vmem:[#allocation3 + $0x168] sm:$0xf0]  ;;  %v11692_v25 = vpack.c.b16 %v2163_v6, %v2163_v6  ;;  %v9034_v6 = vld [vmem:[#allocation3 + $0x134] sm:$0xf] }
 0x3bc   :  { %3566 = vmatpush.bf16.msra.mxu1 %v7576_v38  ;;  %v7535_v38 = vld [vmem:[#allocation3 + $0x690] sm:$0xf] }
 0x3bd   :  { %3579 = vmatpush.bf16.msra.mxu2 %v7640_v40  ;;  %v9207_v40 = vld [vmem:[#allocation3 + $0x694] sm:$0xf0] }
 0x3be   :  { %3592 = vmatpush.bf16.msra.mxu3 %v6748_v50  ;;  %v7472_v50 = vor.u32 %v9191_v37, %v7471_v36  ;;  %v6876_v36 = vor.u32 %v9040_v21, %v6873_v22  ;;  %v9072_v37 = vld [vmem:[#allocation3 + $0x264] sm:$0xf]  ;;  %v6905_v22 = vld [vmem:[#allocation3 + $0x1a8] sm:$0xf0] }
 0x3bf   :  { %3554 = vmatpush.bf16.msra.mxu0 %v7504_v51  ;;  %v9189_v51 = vld [vmem:[#allocation3 + $0x604] sm:$0xf0]  ;;  %v9048_v21 = vld [vmem:[#allocation3 + $0x1a4] sm:$0xf] }
 0x3c0   :  { %3567 = vmatpush.bf16.msra.mxu1 %v7568_v55  ;;  %v7536_v55 = vor.u32 %v9207_v40, %v7535_v38  ;;  %v7001_v38 = vld [vmem:[#allocation3 + $0x268] sm:$0xf0]  ;;  %v9022_v40 = vld [vmem:[#allocation3 + $0xd4] sm:$0xf] }
 0x3c1   :  { %3580 = vmatpush.bf16.msra.mxu2 %v7632_v56  ;;  %v7600_v56 = vor.u32 %v9223_v43, %v7599_v41  ;;  %v6801_v43 = vld [vmem:[#allocation3 + $0xd8] sm:$0xf0] }
 0x3c2   :  { %3593 = vmatpush.bf16.msra.mxu3 %v6740_v63  ;;  %v6708_v63 = vor.u32 %v8998_v45, %v6705_v48  ;;  %v6865_v45 = vld [vmem:[#allocation3 + $0x158] sm:$0xf0]  ;;  %v9054_v48 = vld [vmem:[#allocation3 + $0x1d4] sm:$0xf] }
 0x3c3   :  { %3555 = vmatpush.bf16.msra.mxu0 %v7496_v0  ;;  %v9042_v0 = vld [vmem:[#allocation3 + $0x174] sm:$0xf] }
 0x3c4   :  { %3568 = vmatpush.bf16.msra.mxu1 %v7560_v3  ;;  %v7464_v3 = vor.u32 %v9189_v51, %v7463_v49  ;;  %v6884_v13 = vor.u32 %v9042_v0, %v6881_v1  ;;  %v6929_v49 = vld [vmem:[#allocation3 + $0x1d8] sm:$0xf0]  ;;  %v6804_v51 = vor.u32 %v9022_v40, %v6801_v43  ;;  %v6860_v1 = vor.u32 %v9036_v59, %v6857_v60  ;;  %v9044_v59 = vld [vmem:[#allocation3 + $0x184] sm:$0xf]  ;;  %v6889_v60 = vld [vmem:[#allocation3 + $0x188] sm:$0xf0] }
 0x3c5   :  { %3581 = vmatpush.bf16.msra.mxu2 %v7624_v46  ;;  %v6945_v46 = vld [vmem:[#allocation3 + $0x1f8] sm:$0xf0]  ;;  %v6932_v57 = vor.u32 %v9054_v48, %v6929_v49  ;;  %v9062_v49 = vld [vmem:[#allocation3 + $0x214] sm:$0xf] }
 0x3c6   :  { %3594 = vmatpush.bf16.msra.mxu3 %v6732_v11  ;;  %v2164_v11 = vunpack.c.h.b16 %v1895_v58  ;;  %v6948_v18 = vor.u32 %v9058_v2, %v6945_v46  ;;  %v6793_v58 = vld [vmem:[#allocation3 + $0xc8] sm:$0xf0]  ;;  %v9068_v2 = vld [vmem:[#allocation3 + $0x244] sm:$0xf]  ;;  %v9018_v46 = vld [vmem:[#allocation3 + $0xb4] sm:$0xf] }
 0x3c7   :  { %3556 = vmatpush.bf16.msra.mxu0 %v7488_v12  ;;  %v6820_v12 = vor.u32 %v9026_v61, %v6817_v62  ;;  %v9052_v61 = vld [vmem:[#allocation3 + $0x1c4] sm:$0xf]  ;;  %v6921_v62 = vld [vmem:[#allocation3 + $0x1c8] sm:$0xf0]  ;;  %v6769_v40 = vld [vmem:[#allocation3 + $0x98] sm:$0xf0] }
 0x3c8   :  { %3569 = vmatpush.bf16.msra.mxu1 %v7552_v15  ;;  %v7009_v15 = vld [vmem:[#allocation3 + $0x278] sm:$0xf0]  ;;  %v6924_v4 = vor.u32 %v9052_v61, %v6921_v62  ;;  %v9090_v61 = vld [vmem:[#allocation3 + $0x2f4] sm:$0xf] }
 0x3c9   :  { %3582 = vmatpush.bf16.msra.mxu2 %v7616_v17  ;;  %v9024_v17 = vld [vmem:[#allocation3 + $0xe4] sm:$0xf]  ;;  %v7012_v31 = vor.u32 %v9074_v14, %v7009_v15  ;;  %v6977_v14 = vld [vmem:[#allocation3 + $0x238] sm:$0xf0] }
 0x3ca   :  { %3595 = vmatpush.bf16.msra.mxu3 %v6724_v26  ;;  %v11694_v26 = vpack.c.b16 %v2165_v7, %v2165_v7  ;;  %v6849_v7 = vld [vmem:[#allocation3 + $0x138] sm:$0xf0]  ;;  %v9016_v15 = vld [vmem:[#allocation3 + $0xa4] sm:$0xf] }
 0x3cb   :  { %3557 = vmatpush.bf16.msra.mxu0 %v7480_v29  ;;  %v9056_v29 = vld [vmem:[#allocation3 + $0x1e4] sm:$0xf]  ;;  %v6833_v43 = vld [vmem:[#allocation3 + $0x118] sm:$0xf0] }
 0x3cc   :  { %3570 = vmatpush.bf16.msra.mxu1 %v7544_v32  ;;  %v11696_v32 = vpack.c.b16 %v2164_v11, %v2164_v11  ;;  %v6940_v41 = vor.u32 %v9056_v29, %v6937_v30  ;;  %v6788_v11 = vor.u32 %v9018_v46, %v6785_v5  ;;  %v7073_v62 = vld [vmem:[#allocation3 + $0x2f8] sm:$0xf0]  ;;  %v9060_v5 = vld [vmem:[#allocation3 + $0x204] sm:$0xf] }
 0x3cd   :  { %3583 = vmatpush.bf16.msra.mxu2 %v7608_v35  ;;  %v6812_v35 = vor.u32 %v9024_v17, %v6809_v20  ;;  %v6841_v20 = vld [vmem:[#allocation3 + $0x128] sm:$0xf0] }
 0x3ce   :  { %3596 = vmatpush.bf16.msra.mxu3 %v6716_v44  ;;  %v9038_v44 = vld [vmem:[#allocation3 + $0x154] sm:$0xf] }
 0x3cf   :  { %3558 = vmatpush.bf16.msra.mxu0 %v7472_v50  ;;  %v7004_v50 = vor.u32 %v9072_v37, %v7001_v38  ;;  %v6868_v52 = vor.u32 %v9038_v44, %v6865_v45  ;;  %v9014_v37 = vld [vmem:[#allocation3 + $0x94] sm:$0xf]  ;;  %v6908_v38 = vor.u32 %v9048_v21, %v6905_v22  ;;  %v6897_v45 = vld [vmem:[#allocation3 + $0x198] sm:$0xf0] }
 0x3d0   :  { %3571 = vmatpush.bf16.msra.mxu1 %v7536_v55  ;;  %v6993_v55 = vld [vmem:[#allocation3 + $0x258] sm:$0xf0]  ;;  %v9046_v44 = vld [vmem:[#allocation3 + $0x194] sm:$0xf] }
 0x3d1   :  { %3584 = vmatpush.bf16.msra.mxu2 %v7600_v56  ;;  %v9020_v56 = vld [vmem:[#allocation3 + $0xc4] sm:$0xf] }
 0x3d2   :  { %3597 = vmatpush.bf16.msra.mxu3 %v6708_v63  ;;  %v6996_v63 = vor.u32 %v9070_v54, %v6993_v55  ;;  %v6796_v0 = vor.u32 %v9020_v56, %v6793_v58  ;;  %v9012_v54 = vld [vmem:[#allocation3 + $0x84] sm:$0xf]  ;;  %v6761_v55 = vld [vmem:[#allocation3 + $0x88] sm:$0xf0] }
 0x3d3   :  { %3559 = vmatpush.bf16.msra.mxu0 %v7464_v3  ;;  %v6985_v3 = vld [vmem:[#allocation3 + $0x248] sm:$0xf0]  ;;  %v9028_v56 = vld [vmem:[#allocation3 + $0x104] sm:$0xf]  ;;  %v6764_v46 = vor.u32 %v9012_v54, %v6761_v55 }
 0x3d4   :  { %3572 = vmatpush.bf16.msra.mxu1 %v7528_v8  ;;  %v9050_v8 = vld [vmem:[#allocation3 + $0x1b4] sm:$0xf]  ;;  %v6825_v58 = vld [vmem:[#allocation3 + $0x108] sm:$0xf0]  ;;  %v9100_v55 = vld [vmem:[#allocation3 + $0x344] sm:$0xf] }
 0x3d5   :  { %3585 = vmatpush.bf16.msra.mxu2 %v7592_v10  ;;  %v6913_v10 = vld [vmem:[#allocation3 + $0x1b8] sm:$0xf0]  ;;  %v7049_v54 = vld [vmem:[#allocation3 + $0x2c8] sm:$0xf0] }
 0x3d6   :  { %3598 = vmatpush.bf16.msra.mxu3 %v6700_v19  ;;  %3560 = vmatmul.bf16.vlgmr.msra.gmra.mxu0 %v11692_v25  ;;  %v6916_v17 = vor.u32 %v9050_v8, %v6913_v10  ;;  %v9032_v19 = vld [vmem:[#allocation3 + $0x124] sm:$0xf]  ;;  %v7076_v8 = vor.u32 %v9090_v61, %v7073_v62  ;;  %v9138_v10 = vld [vmem:[#allocation3 + $0x474] sm:$0xf] }
 0x3d7   :  { %3604 = vmatpush.bf16.msrb.mxu0 %v6820_v12  ;;  %3573 = vmatmul.bf16.vlgmr.msra.gmra.mxu1 %v11696_v32  ;;  %v6852_v12 = vor.u32 %v9034_v6, %v6849_v7  ;;  %v6953_v6 = vld [vmem:[#allocation3 + $0x208] sm:$0xf0]  ;;  %v6892_v7 = vor.u32 %v9044_v59, %v6889_v60  ;;  %v9132_v59 = vld [vmem:[#allocation3 + $0x444] sm:$0xf]  ;;  %v9082_v61 = vld [vmem:[#allocation3 + $0x2b4] sm:$0xf] }
 0x3d8   :  { %3617 = vmatpush.bf16.msrb.mxu1 %v6884_v13  ;;  %3586 = vmatmul.bf16.vlgmr.msra.gmra.mxu2 %v11694_v26  ;;  %v9066_v13 = vld [vmem:[#allocation3 + $0x234] sm:$0xf]  ;;  %v7241_v60 = vld [vmem:[#allocation3 + $0x448] sm:$0xf0] }
 0x3d9   :  { %3630 = vmatpush.bf16.msrb.mxu2 %v6948_v18  ;;  %3599 = vmatmul.bf16.vlgmr.msra.gmra.mxu3 %v11661_v23  ;;  %v6988_v23 = vor.u32 %v9068_v2, %v6985_v3  ;;  %v6777_v18 = vld [vmem:[#allocation3 + $0xa8] sm:$0xf0]  ;;  %v6980_v29 = vor.u32 %v9066_v13, %v6977_v14  ;;  %v9122_v2 = vld [vmem:[#allocation3 + $0x3f4] sm:$0xf]  ;;  %v7201_v3 = vld [vmem:[#allocation3 + $0x3f8] sm:$0xf0] }
 0x3da   :  { %3643 = vmatpush.bf16.msrb.mxu3 %v7012_v31  ;;  %v6780_v30 = vor.u32 %v9016_v15, %v6777_v18  ;;  %v6844_v31 = vor.u32 %v9032_v19, %v6841_v20  ;;  %v9088_v13 = vld [vmem:[#allocation3 + $0x2e4] sm:$0xf]  ;;  %v7065_v14 = vld [vmem:[#allocation3 + $0x2e8] sm:$0xf0] }
 0x3db   :  { %3605 = vmatpush.bf16.msrb.mxu0 %v6812_v35  ;;  %v9064_v35 = vld [vmem:[#allocation3 + $0x224] sm:$0xf]  ;;  %v7129_v18 = vld [vmem:[#allocation3 + $0x368] sm:$0xf0]  ;;  %v7068_v22 = vor.u32 %v9088_v13, %v7065_v14 }
 0x3dc   :  { %3618 = vmatpush.bf16.msrb.mxu1 %v6876_v36  ;;  %v6969_v36 = vld [vmem:[#allocation3 + $0x228] sm:$0xf0]  ;;  %v9104_v15 = vld [vmem:[#allocation3 + $0x364] sm:$0xf] }
 0x3dd   :  { %3631 = vmatpush.bf16.msrb.mxu2 %v6940_v41  ;;  %v9030_v41 = vld [vmem:[#allocation3 + $0x114] sm:$0xf]  ;;  %v6972_v48 = vor.u32 %v9064_v35, %v6969_v36  ;;  %v9120_v19 = vld [vmem:[#allocation3 + $0x3e4] sm:$0xf]  ;;  %v7193_v20 = vld [vmem:[#allocation3 + $0x3e8] sm:$0xf0] }
 0x3de   :  { %3644 = vmatpush.bf16.msrb.mxu3 %v7004_v50  ;;  %v6961_v50 = vld [vmem:[#allocation3 + $0x218] sm:$0xf0]  ;;  %v7196_v35 = vor.u32 %v9120_v19, %v7193_v20  ;;  %v9086_v36 = vld [vmem:[#allocation3 + $0x2d4] sm:$0xf]  ;;  %v7097_v13 = vld [vmem:[#allocation3 + $0x328] sm:$0xf0] }
 0x3df   :  { %3606 = vmatpush.bf16.msrb.mxu0 %v6804_v51  ;;  %v6772_v51 = vor.u32 %v9014_v37, %v6769_v40  ;;  %v7057_v37 = vld [vmem:[#allocation3 + $0x2d8] sm:$0xf0]  ;;  %v9112_v14 = vld [vmem:[#allocation3 + $0x3a4] sm:$0xf]  ;;  %v7225_v20 = vld [vmem:[#allocation3 + $0x428] sm:$0xf0] }
 0x3e0   :  { %3619 = vmatpush.bf16.msrb.mxu1 %v6868_v52  ;;  %v6836_v52 = vor.u32 %v9030_v41, %v6833_v43  ;;  %v7121_v40 = vld [vmem:[#allocation3 + $0x358] sm:$0xf0]  ;;  %v9118_v41 = vld [vmem:[#allocation3 + $0x3d4] sm:$0xf]  ;;  %v9128_v19 = vld [vmem:[#allocation3 + $0x424] sm:$0xf] }
 0x3e1   :  { %3632 = vmatpush.bf16.msrb.mxu2 %v6932_v57  ;;  %v6900_v57 = vor.u32 %v9046_v44, %v6897_v45  ;;  %v7185_v43 = vld [vmem:[#allocation3 + $0x3d8] sm:$0xf0]  ;;  %v7060_v45 = vor.u32 %v9086_v36, %v7057_v37 }
 0x3e2   :  { %3645 = vmatpush.bf16.msrb.mxu3 %v6996_v63  ;;  %v9106_v63 = vld [vmem:[#allocation3 + $0x374] sm:$0xf] }
 0x3e3   :  { %3607 = vmatpush.bf16.msrb.mxu0 %v6796_v0  ;;  %v6964_v0 = vor.u32 %v9062_v49, %v6961_v50  ;;  %v7249_v49 = vld [vmem:[#allocation3 + $0x458] sm:$0xf0] }
 0x3e4   :  { %3620 = vmatpush.bf16.msrb.mxu1 %v6860_v1  ;;  %v7137_v1 = vld [vmem:[#allocation3 + $0x378] sm:$0xf0] }
 0x3e5   :  { %3633 = vmatpush.bf16.msrb.mxu2 %v6924_v4  ;;  %v6828_v4 = vor.u32 %v9028_v56, %v6825_v58  ;;  %v7113_v56 = vld [vmem:[#allocation3 + $0x348] sm:$0xf0] }
 0x3e6   :  { %3646 = vmatpush.bf16.msrb.mxu3 %v6988_v23  ;;  %v7265_v23 = vld [vmem:[#allocation3 + $0x478] sm:$0xf0] }
 0x3e7   :  { %3608 = vmatpush.bf16.msrb.mxu0 %v6788_v11  ;;  %v7140_v11 = vor.u32 %v9106_v63, %v7137_v1  ;;  %v7268_v21 = vor.u32 %v9138_v10, %v7265_v23  ;;  %v7041_v63 = vld [vmem:[#allocation3 + $0x2b8] sm:$0xf0]  ;;  %v7033_v23 = vld [vmem:[#allocation3 + $0x2a8] sm:$0xf0] }
 0x3e8   :  { %3621 = vmatpush.bf16.msrb.mxu1 %v6852_v12  ;;  %v7204_v12 = vor.u32 %v9122_v2, %v7201_v3  ;;  %v7105_v1 = vld [vmem:[#allocation3 + $0x338] sm:$0xf0]  ;;  %v9114_v2 = vld [vmem:[#allocation3 + $0x3b4] sm:$0xf] }
 0x3e9   :  { %3634 = vmatpush.bf16.msrb.mxu2 %v6916_v17  ;;  %v6956_v17 = vor.u32 %v9060_v5, %v6953_v6  ;;  %v7169_v3 = vld [vmem:[#allocation3 + $0x3b8] sm:$0xf0]  ;;  %v9130_v5 = vld [vmem:[#allocation3 + $0x434] sm:$0xf] }
 0x3ea   :  { %3647 = vmatpush.bf16.msrb.mxu3 %v6980_v29  ;;  %v9136_v29 = vld [vmem:[#allocation3 + $0x464] sm:$0xf]  ;;  %v7233_v6 = vld [vmem:[#allocation3 + $0x438] sm:$0xf0]  ;;  %v7172_v10 = vor.u32 %v9114_v2, %v7169_v3 }
 0x3eb   :  { %3609 = vmatpush.bf16.msrb.mxu0 %v6780_v30  ;;  %v7257_v30 = vld [vmem:[#allocation3 + $0x468] sm:$0xf0]  ;;  %v7457_v3 = vld [vmem:[#allocation3 + $0x5f8] sm:$0xf0] }
 0x3ec   :  { %3622 = vmatpush.bf16.msrb.mxu1 %v6844_v31  ;;  %v7132_v31 = vor.u32 %v9104_v15, %v7129_v18  ;;  %v7260_v44 = vor.u32 %v9136_v29, %v7257_v30  ;;  %v7161_v15 = vld [vmem:[#allocation3 + $0x3a8] sm:$0xf0]  ;;  %v9078_v30 = vld [vmem:[#allocation3 + $0x294] sm:$0xf] }
 0x3ed   :  { %3635 = vmatpush.bf16.msrb.mxu2 %v6908_v38  ;;  %v9102_v38 = vld [vmem:[#allocation3 + $0x354] sm:$0xf]  ;;  %v7164_v29 = vor.u32 %v9112_v14, %v7161_v15 }
 0x3ee   :  { %3648 = vmatpush.bf16.msrb.mxu3 %v6972_v48  ;;  %v9134_v48 = vld [vmem:[#allocation3 + $0x454] sm:$0xf]  ;;  %v7124_v50 = vor.u32 %v9102_v38, %v7121_v40  ;;  %v7089_v38 = vld [vmem:[#allocation3 + $0x318] sm:$0xf0] }
 0x3ef   :  { %3610 = vmatpush.bf16.msrb.mxu0 %v6772_v51  ;;  %v7188_v51 = vor.u32 %v9118_v41, %v7185_v43  ;;  %v9110_v40 = vld [vmem:[#allocation3 + $0x394] sm:$0xf]  ;;  %v7153_v41 = vld [vmem:[#allocation3 + $0x398] sm:$0xf0]  ;;  %v7228_v43 = vor.u32 %v9128_v19, %v7225_v20  ;;  %v7385_v19 = vld [vmem:[#allocation3 + $0x568] sm:$0xf0] }
 0x3f0   :  { %3623 = vmatpush.bf16.msrb.mxu1 %v6836_v52  ;;  %v9084_v52 = vld [vmem:[#allocation3 + $0x2c4] sm:$0xf] }
 0x3f1   :  { %3636 = vmatpush.bf16.msrb.mxu2 %v6900_v57  ;;  %v9116_v57 = vld [vmem:[#allocation3 + $0x3c4] sm:$0xf]  ;;  %v7052_v58 = vor.u32 %v9084_v52, %v7049_v54  ;;  %v7017_v52 = vld [vmem:[#allocation3 + $0x288] sm:$0xf0] }
 0x3f2   :  { %3649 = vmatpush.bf16.msrb.mxu3 %v6964_v0  ;;  %v9098_v0 = vld [vmem:[#allocation3 + $0x334] sm:$0xf] }
 0x3f3   :  { %3611 = vmatpush.bf16.msrb.mxu0 %v6764_v46  ;;  %v7244_v46 = vor.u32 %v9132_v59, %v7241_v60  ;;  %v7145_v59 = vld [vmem:[#allocation3 + $0x388] sm:$0xf0]  ;;  %v9154_v60 = vld [vmem:[#allocation3 + $0x4f4] sm:$0xf] }
 0x3f4   :  { %3624 = vmatpush.bf16.msrb.mxu1 %v6828_v4  ;;  %v7044_v4 = vor.u32 %v9082_v61, %v7041_v63  ;;  %v3418_v37 = vpop.f32.mrf.mxu1  ;;  %v7329_v61 = vld [vmem:[#allocation3 + $0x4f8] sm:$0xf0] }
 0x3f5   :  { %3637 = vmatpush.bf16.msrb.mxu2 %v6892_v7  ;;  %v9080_v7 = vld [vmem:[#allocation3 + $0x2a4] sm:$0xf]  ;;  %v7393_v63 = vld [vmem:[#allocation3 + $0x578] sm:$0xf0] }
 0x3f6   :  { %3650 = vmatpush.bf16.msrb.mxu3 %v6956_v17  ;;  %3612 = vmatmul.bf16.vlgmr.msrb.gmra.mxu0 %v11664_v24  ;;  %v7177_v24 = vld [vmem:[#allocation3 + $0x3c8] sm:$0xf0]  ;;  %v7236_v17 = vor.u32 %v9130_v5, %v7233_v6  ;;  %v7036_v18 = vor.u32 %v9080_v7, %v7033_v23 }
 0x3f7   :  { %3656 = vmatpush.bf16.msra.mxu0 %v7076_v8  ;;  %3625 = vmatmul.bf16.vlgmr.msrb.gmra.mxu1 %v11656_v9  ;;  %v7116_v9 = vor.u32 %v9100_v55, %v7113_v56  ;;  %v7180_v62 = vor.u32 %v9116_v57, %v7177_v24  ;;  %v7108_v8 = vor.u32 %v9098_v0, %v7105_v1  ;;  %v9092_v57 = vld [vmem:[#allocation3 + $0x304] sm:$0xf]  ;;  %v7081_v24 = vld [vmem:[#allocation3 + $0x308] sm:$0xf0]  ;;  %v9186_v0 = vld [vmem:[#allocation3 + $0x5f4] sm:$0xf] }
 0x3f8   :  { %3669 = vmatpush.bf16.msra.mxu1 %v7140_v11  ;;  %3638 = vmatmul.bf16.vlgmr.msrb.gmra.mxu2 %v11658_v16  ;;  %v7252_v16 = vor.u32 %v9134_v48, %v7249_v49  ;;  %v9096_v11 = vld [vmem:[#allocation3 + $0x324] sm:$0xf]  ;;  %v7156_v56 = vor.u32 %v9110_v40, %v7153_v41  ;;  %v7084_v6 = vor.u32 %v9092_v57, %v7081_v24  ;;  %v7313_v41 = vld [vmem:[#allocation3 + $0x4d8] sm:$0xf0]  ;;  %v7305_v57 = vld [vmem:[#allocation3 + $0x4c8] sm:$0xf0] }
 0x3f9   :  { %3682 = vmatpush.bf16.msra.mxu2 %v7204_v12  ;;  %3651 = vmatmul.bf16.vlgmr.msrb.gmra.mxu3 %v11668_v39  ;;  %v11709_v39 = vld [vmem:[%s11853_s4] sm:$0x3]  ;;  %v7460_v14 = vor.u32 %v9186_v0, %v7457_v3  ;;  %v7369_v24 = vld [vmem:[#allocation3 + $0x548] sm:$0xf0]  ;;  %v7297_v0 = vld [vmem:[#allocation3 + $0x4b8] sm:$0xf0] }
 0x3fa   :  { %3695 = vmatpush.bf16.msra.mxu3 %v7268_v21  ;;  %v2139_v12 = vperm.slane %v11709_v39, 0  ;;  %v3405_v21 = vpop.f32.mrf.mxu0 }
 0x3fb   :  { %3657 = vmatpush.bf16.msra.mxu0 %v7068_v22  ;;  %v7100_v22 = vor.u32 %v9096_v11, %v7097_v13  ;;  %v3431_v48 = vpop.f32.mrf.mxu2  ;;  %v7332_v11 = vor.u32 %v9154_v60, %v7329_v61  ;;  %v9152_v13 = vld [vmem:[#allocation3 + $0x4e4] sm:$0xf] }
 0x3fc   :  { %3670 = vmatpush.bf16.msra.mxu1 %v7132_v31  ;;  %v7025_v31 = vld [vmem:[#allocation3 + $0x298] sm:$0xf0]  ;;  %v3406_v36 = vadd.f32 %v3405_v21, %v2139_v12  ;;  %v3444_v54 = vpop.f32.mrf.mxu3  ;;  %v3420_v23 = vpop.f32.mrf.mxu1 }
 0x3fd   :  { %3683 = vmatpush.bf16.msra.mxu2 %v7196_v35  ;;  %v9094_v35 = vld [vmem:[#allocation3 + $0x314] sm:$0xf]  ;;  %v7028_v49 = vor.u32 %v9078_v30, %v7025_v31  ;;  %v9200_v31 = vld [vmem:[#allocation3 + $0x664] sm:$0xf] }
 0x3fe   :  { %3696 = vmatpush.bf16.msra.mxu3 %v7260_v44  ;;  %v9126_v44 = vld [vmem:[#allocation3 + $0x414] sm:$0xf]  ;;  %v7092_v55 = vor.u32 %v9094_v35, %v7089_v38  ;;  %v7513_v35 = vld [vmem:[#allocation3 + $0x668] sm:$0xf0] }
 0x3ff   :  { %3658 = vmatpush.bf16.msra.mxu0 %v7060_v45  ;;  %v3419_v45 = vadd.f32 %v3418_v37, %v3406_v36  ;;  %v9150_v38 = vld [vmem:[#allocation3 + $0x4d4] sm:$0xf] }
 0x400   :  { %3671 = vmatpush.bf16.msra.mxu1 %v7124_v50  ;;  %v7217_v50 = vld [vmem:[#allocation3 + $0x418] sm:$0xf0] }
 0x401   :  { %3684 = vmatpush.bf16.msra.mxu2 %v7188_v51  ;;  %v9076_v51 = vld [vmem:[#allocation3 + $0x284] sm:$0xf] }
 0x402   :  { %3697 = vmatpush.bf16.msra.mxu3 %v7252_v16  ;;  %v9108_v16 = vld [vmem:[#allocation3 + $0x384] sm:$0xf]  ;;  %v7020_v2 = vor.u32 %v9076_v51, %v7017_v52  ;;  %v3407_v5 = vpop.f32.mrf.mxu0  ;;  %v7505_v51 = vld [vmem:[#allocation3 + $0x658] sm:$0xf0]  ;;  %v7316_v52 = vor.u32 %v9150_v38, %v7313_v41 }
 0x403   :  { %3659 = vmatpush.bf16.msra.mxu0 %v7052_v58  ;;  %v3432_v58 = vadd.f32 %v3431_v48, %v3419_v45  ;;  %v7148_v7 = vor.u32 %v9108_v16, %v7145_v59  ;;  %v3433_v20 = vpop.f32.mrf.mxu2  ;;  %v7516_v45 = vor.u32 %v9200_v31, %v7513_v35  ;;  %v9182_v48 = vld [vmem:[#allocation3 + $0x5d4] sm:$0xf]  ;;  %v9196_v59 = vld [vmem:[#allocation3 + $0x644] sm:$0xf]  ;;  %v7425_v5 = vld [vmem:[#allocation3 + $0x5b8] sm:$0xf0] }
 0x404   :  { %3672 = vmatpush.bf16.msra.mxu1 %v7116_v9  ;;  %v7220_v9 = vor.u32 %v9126_v44, %v7217_v50  ;;  %v3446_v30 = vpop.f32.mrf.mxu3  ;;  %v7377_v44 = vld [vmem:[#allocation3 + $0x558] sm:$0xf0]  ;;  %v9198_v50 = vld [vmem:[#allocation3 + $0x654] sm:$0xf] }
 0x405   :  { %3685 = vmatpush.bf16.msra.mxu2 %v7180_v62  ;;  %v9170_v62 = vld [vmem:[#allocation3 + $0x574] sm:$0xf]  ;;  %v11712_v1 = vadd.f32 %v3444_v54, %v3432_v58  ;;  %v7508_v16 = vor.u32 %v9198_v50, %v7505_v51  ;;  %v9180_v58 = vld [vmem:[#allocation3 + $0x5c4] sm:$0xf]  ;;  %v7281_v38 = vld [vmem:[#allocation3 + $0x498] sm:$0xf0] }
 0x406   :  { %3698 = vmatpush.bf16.msra.mxu3 %v7244_v46  ;;  %v9124_v46 = vld [vmem:[#allocation3 + $0x404] sm:$0xf]  ;;  %v7396_v12 = vor.u32 %v9170_v62, %v7393_v63  ;;  %v9142_v35 = vld [vmem:[#allocation3 + $0x494] sm:$0xf]  ;;  %v7345_v41 = vld [vmem:[#allocation3 + $0x518] sm:$0xf0] }
 0x407   :  { %3660 = vmatpush.bf16.msra.mxu0 %v7044_v4  ;;  %v7209_v4 = vld [vmem:[#allocation3 + $0x408] sm:$0xf0]  ;;  %v9190_v51 = vld [vmem:[#allocation3 + $0x614] sm:$0xf] }
 0x408   :  { %3673 = vmatpush.bf16.msra.mxu1 %v7108_v8  ;;  %v9202_v8 = vld [vmem:[#allocation3 + $0x674] sm:$0xf]  ;;  %v7212_v15 = vor.u32 %v9124_v46, %v7209_v4 }
 0x409   :  { %3686 = vmatpush.bf16.msra.mxu2 %v7172_v10  ;;  %v7521_v10 = vld [vmem:[#allocation3 + $0x678] sm:$0xf0]  ;;  %v9178_v4 = vld [vmem:[#allocation3 + $0x5b4] sm:$0xf] }
 0x40a   :  { %3699 = vmatpush.bf16.msra.mxu3 %v7236_v17  ;;  %v7321_v17 = vld [vmem:[#allocation3 + $0x4e8] sm:$0xf0]  ;;  %v7524_v21 = vor.u32 %v9202_v8, %v7521_v10  ;;  %v7489_v8 = vld [vmem:[#allocation3 + $0x638] sm:$0xf0] }
 0x40b   :  { %3661 = vmatpush.bf16.msra.mxu0 %v7036_v18  ;;  %v9168_v18 = vld [vmem:[#allocation3 + $0x564] sm:$0xf]  ;;  %v7324_v36 = vor.u32 %v9152_v13, %v7321_v17  ;;  %v7428_v13 = vor.u32 %v9178_v4, %v7425_v5  ;;  %v7353_v17 = vld [vmem:[#allocation3 + $0x528] sm:$0xf0] }
 0x40c   :  { %3674 = vmatpush.bf16.msra.mxu1 %v7100_v22  ;;  %v9184_v22 = vld [vmem:[#allocation3 + $0x5e4] sm:$0xf]  ;;  %v7388_v37 = vor.u32 %v9168_v18, %v7385_v19  ;;  %v7417_v19 = vld [vmem:[#allocation3 + $0x5a8] sm:$0xf0] }
 0x40d   :  { %3687 = vmatpush.bf16.msra.mxu2 %v7164_v29  ;;  %v7449_v29 = vld [vmem:[#allocation3 + $0x5e8] sm:$0xf0]  ;;  %v9176_v18 = vld [vmem:[#allocation3 + $0x5a4] sm:$0xf] }
 0x40e   :  { %3700 = vmatpush.bf16.msra.mxu3 %v7228_v43  ;;  %v7452_v40 = vor.u32 %v9184_v22, %v7449_v29  ;;  %v9166_v43 = vld [vmem:[#allocation3 + $0x554] sm:$0xf]  ;;  %v7481_v22 = vld [vmem:[#allocation3 + $0x628] sm:$0xf0] }
 0x40f   :  { %3662 = vmatpush.bf16.msra.mxu0 %v7028_v49  ;;  %v7441_v49 = vld [vmem:[#allocation3 + $0x5d8] sm:$0xf0]  ;;  %v7380_v54 = vor.u32 %v9166_v43, %v7377_v44 }
 0x410   :  { %3675 = vmatpush.bf16.msra.mxu1 %v7092_v55  ;;  %v9148_v55 = vld [vmem:[#allocation3 + $0x4c4] sm:$0xf] }
 0x411   :  { %3688 = vmatpush.bf16.msra.mxu2 %v7156_v56  ;;  %v7444_v56 = vor.u32 %v9182_v48, %v7441_v49  ;;  %v7308_v60 = vor.u32 %v9148_v55, %v7305_v57  ;;  %v7409_v48 = vld [vmem:[#allocation3 + $0x598] sm:$0xf0]  ;;  %v7273_v57 = vld [vmem:[#allocation3 + $0x488] sm:$0xf0] }
 0x412   :  { %3701 = vmatpush.bf16.msra.mxu3 %v7220_v9  ;;  %v9146_v9 = vld [vmem:[#allocation3 + $0x4b4] sm:$0xf] }
 0x413   :  { %3663 = vmatpush.bf16.msra.mxu0 %v7020_v2  ;;  %v3457_v62 = vpop.f32.mrf.mxu0  ;;  %v7361_v2 = vld [vmem:[#allocation3 + $0x538] sm:$0xf0]  ;;  %v7300_v23 = vor.u32 %v9146_v9, %v7297_v0 }
 0x414   :  { %3676 = vmatpush.bf16.msra.mxu1 %v7084_v6  ;;  %v3458_v3 = vadd.f32 %v3457_v62, %v11712_v1  ;;  %v3470_v6 = vpop.f32.mrf.mxu1  ;;  %v7649_v9 = vld [vmem:[#allocation3 + $0x778] sm:$0xf0]  ;;  %v9188_v62 = vld [vmem:[#allocation3 + $0x604] sm:$0xf] }
 0x415   :  { %3689 = vmatpush.bf16.msra.mxu2 %v7148_v7  ;;  %v9194_v7 = vld [vmem:[#allocation3 + $0x634] sm:$0xf] }
 0x416   :  { %3702 = vmatpush.bf16.msra.mxu3 %v7212_v15  ;;  %3664 = vmatmul.bf16.vlgmr.msra.gmra.mxu0 %v11672_v47  ;;  %v7433_v47 = vld [vmem:[#allocation3 + $0x5c8] sm:$0xf0]  ;;  %v3471_v10 = vadd.f32 %v3470_v6, %v3458_v3  ;;  %v9160_v15 = vld [vmem:[#allocation3 + $0x524] sm:$0xf]  ;;  %v7492_v1 = vor.u32 %v9194_v7, %v7489_v8 }
 0x417   :  { %3708 = vmatpush.bf16.msrb.mxu0 %v7332_v11  ;;  %3677 = vmatmul.bf16.vlgmr.msra.gmra.mxu1 %v11670_v42  ;;  %v7497_v42 = vld [vmem:[#allocation3 + $0x648] sm:$0xf0]  ;;  %v7436_v63 = vor.u32 %v9180_v58, %v7433_v47  ;;  %v7356_v30 = vor.u32 %v9160_v15, %v7353_v17  ;;  %v9172_v58 = vld [vmem:[#allocation3 + $0x584] sm:$0xf]  ;;  %v9230_v15 = vld [vmem:[#allocation3 + $0x754] sm:$0xf] }
 0x418   :  { %3721 = vmatpush.bf16.msrb.mxu1 %v7396_v12  ;;  %3690 = vmatmul.bf16.vlgmr.msra.gmra.mxu2 %v11675_v53  ;;  %v9164_v53 = vld [vmem:[#allocation3 + $0x544] sm:$0xf]  ;;  %v7500_v46 = vor.u32 %v9196_v59, %v7497_v42  ;;  %v7401_v47 = vld [vmem:[#allocation3 + $0x588] sm:$0xf0]  ;;  %v9218_v42 = vld [vmem:[#allocation3 + $0x6f4] sm:$0xf] }
 0x419   :  { %3734 = vmatpush.bf16.msrb.mxu2 %v7460_v14  ;;  %3703 = vmatmul.bf16.vlgmr.msra.gmra.mxu3 %v11680_v27  ;;  %v7372_v61 = vor.u32 %v9164_v53, %v7369_v24  ;;  %v9162_v27 = vld [vmem:[#allocation3 + $0x534] sm:$0xf]  ;;  %v9144_v12 = vld [vmem:[#allocation3 + $0x4a4] sm:$0xf]  ;;  %v7289_v14 = vld [vmem:[#allocation3 + $0x4a8] sm:$0xf0]  ;;  %v7404_v3 = vor.u32 %v9172_v58, %v7401_v47 }
 0x41a   :  { %3747 = vmatpush.bf16.msrb.mxu3 %v7524_v21  ;;  %v7364_v11 = vor.u32 %v9162_v27, %v7361_v2  ;;  %v9192_v21 = vld [vmem:[#allocation3 + $0x624] sm:$0xf]  ;;  %v7292_v29 = vor.u32 %v9144_v12, %v7289_v14  ;;  %v7577_v7 = vld [vmem:[#allocation3 + $0x6e8] sm:$0xf0]  ;;  %v7569_v14 = vld [vmem:[#allocation3 + $0x6d8] sm:$0xf0] }
 0x41b   :  { %3709 = vmatpush.bf16.msrb.mxu0 %v7324_v36  ;;  %v3483_v20 = vpop.f32.mrf.mxu2  ;;  %v3459_v36 = vpop.f32.mrf.mxu0  ;;  %v7484_v43 = vor.u32 %v9192_v21, %v7481_v22  ;;  %v9156_v53 = vld [vmem:[#allocation3 + $0x504] sm:$0xf]  ;;  %v7633_v17 = vld [vmem:[#allocation3 + $0x758] sm:$0xf0]  ;;  %v7625_v22 = vld [vmem:[#allocation3 + $0x748] sm:$0xf0] }
 0x41c   :  { %3722 = vmatpush.bf16.msrb.mxu1 %v7388_v37  ;;  %v3484_v31 = vadd.f32 %v3483_v20, %v3471_v10  ;;  %v7420_v37 = vor.u32 %v9176_v18, %v7417_v19  ;;  %v3496_v44 = vpop.f32.mrf.mxu3  ;;  %v3472_v49 = vpop.f32.mrf.mxu1  ;;  %v9216_v6 = vld [vmem:[#allocation3 + $0x6e4] sm:$0xf]  ;;  %v7636_v18 = vor.u32 %v9230_v15, %v7633_v17  ;;  %v7561_v20 = vld [vmem:[#allocation3 + $0x6c8] sm:$0xf0]  ;;  %v9226_v36 = vld [vmem:[#allocation3 + $0x734] sm:$0xf] }
 0x41d   :  { %3735 = vmatpush.bf16.msrb.mxu2 %v7452_v40  ;;  %v9158_v40 = vld [vmem:[#allocation3 + $0x514] sm:$0xf]  ;;  %v9232_v10 = vld [vmem:[#allocation3 + $0x764] sm:$0xf] }
 0x41e   :  { %3748 = vmatpush.bf16.msrb.mxu3 %v7516_v45  ;;  %v9174_v45 = vld [vmem:[#allocation3 + $0x594] sm:$0xf]  ;;  %v11719_v50 = vadd.f32 %v3496_v44, %v3484_v31  ;;  %v7348_v55 = vor.u32 %v9158_v40, %v7345_v41  ;;  %v9212_v19 = vld [vmem:[#allocation3 + $0x6c4] sm:$0xf]  ;;  %v7553_v31 = vld [vmem:[#allocation3 + $0x6b8] sm:$0xf0] }
 0x41f   :  { %3710 = vmatpush.bf16.msrb.mxu0 %v7316_v52  ;;  %v7473_v52 = vld [vmem:[#allocation3 + $0x618] sm:$0xf0]  ;;  %v7412_v24 = vor.u32 %v9174_v45, %v7409_v48  ;;  %v9228_v21 = vld [vmem:[#allocation3 + $0x744] sm:$0xf]  ;;  %v7609_v45 = vld [vmem:[#allocation3 + $0x728] sm:$0xf0] }
 0x420   :  { %3723 = vmatpush.bf16.msrb.mxu1 %v7380_v54  ;;  %v7284_v54 = vor.u32 %v9142_v35, %v7281_v38  ;;  %v7476_v59 = vor.u32 %v9190_v51, %v7473_v52  ;;  %v9208_v41 = vld [vmem:[#allocation3 + $0x6a4] sm:$0xf] }
 0x421   :  { %3736 = vmatpush.bf16.msrb.mxu2 %v7444_v56  ;;  %v9140_v56 = vld [vmem:[#allocation3 + $0x484] sm:$0xf] }
 0x422   :  { %3749 = vmatpush.bf16.msrb.mxu3 %v7508_v16  ;;  %v7337_v16 = vld [vmem:[#allocation3 + $0x508] sm:$0xf0]  ;;  %v7276_v27 = vor.u32 %v9140_v56, %v7273_v57  ;;  %v9224_v44 = vld [vmem:[#allocation3 + $0x724] sm:$0xf] }
 0x423   :  { %3711 = vmatpush.bf16.msrb.mxu0 %v7308_v60  ;;  %v7585_v60 = vld [vmem:[#allocation3 + $0x6f8] sm:$0xf0]  ;;  %v3485_v0 = vpop.f32.mrf.mxu2  ;;  %v7340_v2 = vor.u32 %v9156_v53, %v7337_v16  ;;  %v9222_v53 = vld [vmem:[#allocation3 + $0x714] sm:$0xf] }
 0x424   :  { %3724 = vmatpush.bf16.msrb.mxu1 %v7372_v61  ;;  %v9234_v61 = vld [vmem:[#allocation3 + $0x774] sm:$0xf]  ;;  %v3498_v8 = vpop.f32.mrf.mxu3 }
 0x425   :  { %3737 = vmatpush.bf16.msrb.mxu2 %v7436_v63  ;;  %v7465_v63 = vld [vmem:[#allocation3 + $0x608] sm:$0xf0]  ;;  %v7652_v4 = vor.u32 %v9234_v61, %v7649_v9 }
 0x426   :  { %3750 = vmatpush.bf16.msrb.mxu3 %v7500_v46  ;;  %v7588_v46 = vor.u32 %v9218_v42, %v7585_v60  ;;  %v7468_v5 = vor.u32 %v9188_v62, %v7465_v63  ;;  %v7529_v42 = vld [vmem:[#allocation3 + $0x688] sm:$0xf0]  ;;  %v9220_v60 = vld [vmem:[#allocation3 + $0x704] sm:$0xf] }
 0x427   :  { %3712 = vmatpush.bf16.msrb.mxu0 %v7300_v23  ;;  %v7641_v23 = vld [vmem:[#allocation3 + $0x768] sm:$0xf0] }
 0x428   :  { %3725 = vmatpush.bf16.msrb.mxu1 %v7364_v11  ;;  %v7580_v11 = vor.u32 %v9216_v6, %v7577_v7  ;;  %v7644_v12 = vor.u32 %v9232_v10, %v7641_v23  ;;  %v7593_v61 = vld [vmem:[#allocation3 + $0x708] sm:$0xf0] }
 0x429   :  { %3738 = vmatpush.bf16.msrb.mxu2 %v7428_v13  ;;  %v9214_v13 = vld [vmem:[#allocation3 + $0x6d4] sm:$0xf]  ;;  %v7596_v63 = vor.u32 %v9220_v60, %v7593_v61 }
 0x42a   :  { %3751 = vmatpush.bf16.msrb.mxu3 %v7492_v1  ;;  %v7572_v1 = vor.u32 %v9214_v13, %v7569_v14 }
 0x42b   :  { %3713 = vmatpush.bf16.msrb.mxu0 %v7292_v29  ;;  %v7564_v29 = vor.u32 %v9212_v19, %v7561_v20  ;;  %v2140_v20 = vperm.slane %v11709_v39, 1 }
 0x42c   :  { %3726 = vmatpush.bf16.msrb.mxu1 %v7356_v30  ;;  %v7628_v30 = vor.u32 %v9228_v21, %v7625_v22 }
 0x42d   :  { %3739 = vmatpush.bf16.msrb.mxu2 %v7420_v37 }
 0x42e   :  { %3752 = vmatpush.bf16.msrb.mxu3 %v7484_v43  ;;  %v7545_v43 = vld [vmem:[#allocation3 + $0x6a8] sm:$0xf0] }
 0x42f   :  { %3714 = vmatpush.bf16.msrb.mxu0 %v7284_v54  ;;  %v7548_v51 = vor.u32 %v9208_v41, %v7545_v43  ;;  %v7612_v54 = vor.u32 %v9224_v44, %v7609_v45 }
 0x430   :  { %3727 = vmatpush.bf16.msrb.mxu1 %v7348_v55  ;;  %v7537_v55 = vld [vmem:[#allocation3 + $0x698] sm:$0xf0] }
 0x431   :  { %3740 = vmatpush.bf16.msrb.mxu2 %v7412_v24  ;;  %v7601_v24 = vld [vmem:[#allocation3 + $0x718] sm:$0xf0] }
 0x432   :  { %3753 = vmatpush.bf16.msrb.mxu3 %v7476_v59  ;;  %v7604_v47 = vor.u32 %v9222_v53, %v7601_v24  ;;  %v9204_v59 = vld [vmem:[#allocation3 + $0x684] sm:$0xf] }
 0x433   :  { %3715 = vmatpush.bf16.msrb.mxu0 %v7276_v27  ;;  %v7532_v62 = vor.u32 %v9204_v59, %v7529_v42 }
 0x434   :  { %3728 = vmatpush.bf16.msrb.mxu1 %v7340_v2 }
 0x435   :  { %3741 = vmatpush.bf16.msrb.mxu2 %v7404_v3 }
 0x436   :  { %3754 = vmatpush.bf16.msrb.mxu3 %v7468_v5  ;;  %3716 = vmatmul.bf16.vlgmr.msrb.gmra.mxu0 %v11684_v33  ;;  %v3509_v33 = vpop.f32.mrf.mxu0 }
 0x437   :  { %3760 = vmatpush.bf16.msra.mxu0 %v7588_v46  ;;  %3729 = vmatmul.bf16.vlgmr.msrb.gmra.mxu1 %v11682_v28  ;;  %v9210_v28 = vld [vmem:[#allocation3 + $0x6b4] sm:$0xf]  ;;  %v3510_v35 = vadd.f32 %v3509_v33, %v11719_v50 }
 0x438   :  { %3773 = vmatpush.bf16.msra.mxu1 %v7652_v4  ;;  %3742 = vmatmul.bf16.vlgmr.msrb.gmra.mxu2 %v11686_v34  ;;  %v3522_v34 = vpop.f32.mrf.mxu1  ;;  %v7556_v38 = vor.u32 %v9210_v28, %v7553_v31  ;;  %v9206_v50 = vld [vmem:[#allocation3 + $0x694] sm:$0xf] }
 0x439   :  { %3755 = vmatmul.bf16.vlgmr.msrb.gmra.mxu3 %v11692_v25  ;;  %v7617_v25 = vld [vmem:[#allocation3 + $0x738] sm:$0xf0]  ;;  %v3523_v37 = vadd.f32 %v3522_v34, %v3510_v35  ;;  %v7540_v58 = vor.u32 %v9206_v50, %v7537_v55 }
 0x43a   :  { %v7620_v40 = vor.u32 %v9226_v36, %v7617_v25 }
 0x43b   :  { %3761 = vmatpush.bf16.msra.mxu0 %v7580_v11  ;;  %v3535_v48 = vpop.f32.mrf.mxu2 }
 0x43c   :  { %3774 = vmatpush.bf16.msra.mxu1 %v7644_v12  ;;  %v3536_v49 = vadd.f32 %v3535_v48, %v3523_v37  ;;  %v3548_v52 = vpop.f32.mrf.mxu3 }
 0x43e   :  { %v3511_v56 = vpop.f32.mrf.mxu0  ;;  %v3549_v57 = vadd.f32 %v3548_v52, %v3536_v49 }
 0x43f   :  { %3762 = vmatpush.bf16.msra.mxu0 %v7572_v1 }
 0x440   :  { %3775 = vmatpush.bf16.msra.mxu1 %v7636_v18  ;;  %v3524_v16 = vpop.f32.mrf.mxu1 }
 0x443   :  { %3763 = vmatpush.bf16.msra.mxu0 %v7564_v29  ;;  %v3537_v9 = vpop.f32.mrf.mxu2 }
 0x444   :  { %3776 = vmatpush.bf16.msra.mxu1 %v7628_v30  ;;  %v3550_v0 = vpop.f32.mrf.mxu3 }
 0x447   :  { %3764 = vmatpush.bf16.msra.mxu0 %v7556_v38 }
 0x448   :  { %3777 = vmatpush.bf16.msra.mxu1 %v7620_v40 }
 0x44b   :  { %3765 = vmatpush.bf16.msra.mxu0 %v7548_v51 }
 0x44c   :  { %3778 = vmatpush.bf16.msra.mxu1 %v7612_v54 }
 0x44f   :  { %3766 = vmatpush.bf16.msra.mxu0 %v7540_v58 }
 0x450   :  { %3779 = vmatpush.bf16.msra.mxu1 %v7604_v47 }
 0x453   :  { %3767 = vmatpush.bf16.msra.mxu0 %v7532_v62  ;;  %v3561_v27 = vpop.f32.mrf.mxu0 }
 0x454   :  { %3780 = vmatpush.bf16.msra.mxu1 %v7596_v63  ;;  %v3562_v2 = vadd.f32 %v3561_v27, %v3549_v57  ;;  %v3574_v3 = vpop.f32.mrf.mxu1 }
 0x456   :  { %3768 = vmatmul.bf16.vlgmr.msra.gmra.mxu0 %v11696_v32  ;;  %v3575_v46 = vadd.f32 %v3574_v3, %v3562_v2 }
 0x457   :  { %3781 = vmatmul.bf16.vlgmr.msra.gmra.mxu1 %v11694_v26 }
 0x45b   :  { %v3587_v4 = vpop.f32.mrf.mxu2  ;;  %v3563_v6 = vpop.f32.mrf.mxu0 }
 0x45c   :  { %v3588_v5 = vadd.f32 %v3587_v4, %v3575_v46  ;;  %v3576_v8 = vpop.f32.mrf.mxu1  ;;  %v3600_v10 = vpop.f32.mrf.mxu3 }
 0x45d   :  { %v3601_v21 = vadd.f32 %v3600_v10, %v2140_v20 }
 0x45e   :  { %v3786_v7 = vmax.f32 %v3588_v5, 0.0 }
 0x460   :  { %v3790_v23 = vrot.slane %v3786_v7, 2  ;;  %v3797_v11 = vrot.slane %v3786_v7, 1  ;;  %v3801_v12 = vrot.slane %v3786_v7, 3  ;;  %v3807_v13 = vrot.slane %v3786_v7, 4 }
 0x462   :  { %v3795_v14 = vsel %vm3794_vm0, %v3786_v7, %v3790_v23  ;;  %v3805_v32 = vsel %vm3794_vm0, %v3797_v11, %v3801_v12  ;;  %v3811_v26 = vsel %vm3794_vm0, %v3790_v23, %v3807_v13 }
 0x463   :  { %v11731_v15 = vpack.c.bf16 %v3795_v14, %v3795_v14  ;;  %v11733_v17 = vpack.c.bf16 %v3805_v32, %v3805_v32  ;;  %v11735_v1 = vpack.c.bf16 %v3811_v26, %v3811_v26  ;;  %v3589_v18 = vpop.f32.mrf.mxu2 }
 0x464   :  { %v3602_v19 = vpop.f32.mrf.mxu3 }
 0x473   :  { %v3613_v22 = vpop.f32.mrf.mxu0 }
 0x474   :  { %v3614_v29 = vadd.f32 %v3613_v22, %v3601_v21  ;;  %v3626_v33 = vpop.f32.mrf.mxu1 }
 0x476   :  { %v3627_v30 = vadd.f32 %v3626_v33, %v3614_v29 }
 0x47b   :  { %v3639_v28 = vpop.f32.mrf.mxu2  ;;  %v3615_v31 = vpop.f32.mrf.mxu0 }
 0x47c   :  { %v3652_v35 = vpop.f32.mrf.mxu3  ;;  %v3628_v34 = vpop.f32.mrf.mxu1  ;;  %v3640_v39 = vadd.f32 %v3639_v28, %v3627_v30 }
 0x47e   :  { %v3653_v49 = vadd.f32 %v3652_v35, %v3640_v39 }
 0x483   :  { %v3641_v36 = vpop.f32.mrf.mxu2 }
 0x484   :  { %v3654_v25 = vpop.f32.mrf.mxu3 }
 0x493   :  { %v3665_v37 = vpop.f32.mrf.mxu0 }
 0x494   :  { %v3678_v38 = vpop.f32.mrf.mxu1  ;;  %v3666_v54 = vadd.f32 %v3665_v37, %v3653_v49 }
 0x496   :  { %v3679_v55 = vadd.f32 %v3678_v38, %v3666_v54 }
 0x49b   :  { %v3691_v40 = vpop.f32.mrf.mxu2  ;;  %v3667_v43 = vpop.f32.mrf.mxu0 }
 0x49c   :  { %v3704_v41 = vpop.f32.mrf.mxu3  ;;  %v3680_v44 = vpop.f32.mrf.mxu1  ;;  %v3692_v24 = vadd.f32 %v3691_v40, %v3679_v55 }
 0x49e   :  { %v3705_v58 = vadd.f32 %v3704_v41, %v3692_v24 }
 0x4a3   :  { %v3693_v45 = vpop.f32.mrf.mxu2 }
 0x4a4   :  { %v3706_v48 = vpop.f32.mrf.mxu3 }
 0x4b3   :  { %v3717_v51 = vpop.f32.mrf.mxu0 }
 0x4b4   :  { %v3730_v52 = vpop.f32.mrf.mxu1  ;;  %v3718_v59 = vadd.f32 %v3717_v51, %v3705_v58 }
 0x4b6   :  { %v3731_v42 = vadd.f32 %v3730_v52, %v3718_v59 }
 0x4bb   :  { %v3743_v50 = vpop.f32.mrf.mxu2  ;;  %v3719_v57 = vpop.f32.mrf.mxu0 }
 0x4bc   :  { %v3756_v56 = vpop.f32.mrf.mxu3  ;;  %v3732_v53 = vpop.f32.mrf.mxu1  ;;  %v3744_v60 = vadd.f32 %v3743_v50, %v3731_v42 }
 0x4be   :  { %v3757_v61 = vadd.f32 %v3756_v56, %v3744_v60 }
 0x4c3   :  { %v3745_v16 = vpop.f32.mrf.mxu2 }
 0x4c4   :  { %v3758_v47 = vpop.f32.mrf.mxu3 }
 0x4d3   :  { %v3769_v9 = vpop.f32.mrf.mxu0 }
 0x4d4   :  { %v3770_v62 = vadd.f32 %v3769_v9, %v3757_v61  ;;  %v3782_v63 = vpop.f32.mrf.mxu1 }
 0x4d6   :  { %v3783_v0 = vadd.f32 %v3782_v63, %v3770_v62 }
 0x4d8   :  { %v3787_v27 = vmax.f32 %v3783_v0, 0.0 }
 0x4da   :  { %v3791_v2 = vrot.slane %v3787_v27, 2  ;;  %v3798_v3 = vrot.slane %v3787_v27, 1  ;;  %v3802_v46 = vrot.slane %v3787_v27, 3  ;;  %v3808_v4 = vrot.slane %v3787_v27, 4 }
 0x4db   :  { %v3771_v5 = vpop.f32.mrf.mxu0 }
 0x4dc   :  { %v3796_v6 = vsel %vm3794_vm0, %v3787_v27, %v3791_v2  ;;  %v3806_v7 = vsel %vm3794_vm0, %v3798_v3, %v3802_v46  ;;  %v3812_v8 = vsel %vm3794_vm0, %v3791_v2, %v3808_v4  ;;  %v3784_v10 = vpop.f32.mrf.mxu1 }
 0x4dd   :  { %v11741_v23 = vpack.c.bf16 %v3796_v6, %v3796_v6  ;;  %v11743_v11 = vpack.c.bf16 %v3806_v7, %v3806_v7  ;;  %v11745_v12 = vpack.c.bf16 %v3812_v8, %v3812_v8 }
 0x4de   :  { %9628 = dma.done.wait [#allocation6 + $0x1], 24576 }
 0x4df   :  { %9629 = vsyncadd [#allocation6 + $0x1], 4294942720  ;;  %v7767_v13 = vld [vmem:[#allocation4 + $0xe0] sm:$0xf]  ;;  %v9266_v14 = vld [vmem:[#allocation4 + $0xec] sm:$0xf0] }
 0x4e0   :  { %v7895_v32 = vld [vmem:[#allocation4 + $0x1e0] sm:$0xf]  ;;  %v7768_v26 = vor.u32 %v9266_v14, %v7767_v13  ;;  %v9298_v18 = vld [vmem:[#allocation4 + $0x1ec] sm:$0xf0]  ;;  %vm5388_vm2 = vcmask 1040384  }
 0x4e1   :  { %v8023_v19 = vld [vmem:[#allocation4 + $0x2e0] sm:$0xf]  ;;  %v9330_v20 = vld [vmem:[#allocation4 + $0x2ec] sm:$0xf0]  ;;  %v7896_v21 = vor.u32 %v9298_v18, %v7895_v32 }
 0x4e2   :  { %v8024_v22 = vor.u32 %v9330_v20, %v8023_v19  ;;  %v7751_v29 = vld [vmem:[#allocation4 + $0xc0] sm:$0xf]  ;;  %v9262_v33 = vld [vmem:[#allocation4 + $0xcc] sm:$0xf0]  ;;  %4989 = vmatpush.bf16.msra.mxu2 %v7768_v26 }
 0x4e3   :  { %v7879_v30 = vld [vmem:[#allocation4 + $0x1c0] sm:$0xf]  ;;  %v7752_v28 = vor.u32 %v9262_v33, %v7751_v29  ;;  %v9294_v31 = vld [vmem:[#allocation4 + $0x1cc] sm:$0xf0]  ;;  %5002 = vmatpush.bf16.msra.mxu3 %v7896_v21 }
 0x4e4   :  { %v8151_v35 = vld [vmem:[#allocation4 + $0x3e0] sm:$0xf]  ;;  %v9362_v34 = vld [vmem:[#allocation4 + $0x3ec] sm:$0xf0]  ;;  %5015 = vmatpush.bf16.msrb.mxu0 %v8024_v22  ;;  %v7880_v36 = vor.u32 %v9294_v31, %v7879_v30 }
 0x4e5   :  { %v8152_v25 = vor.u32 %v9362_v34, %v8151_v35  ;;  %v8007_v37 = vld [vmem:[#allocation4 + $0x2c0] sm:$0xf]  ;;  %v9326_v38 = vld [vmem:[#allocation4 + $0x2cc] sm:$0xf0] }
 0x4e6   :  { %v7735_v40 = vld [vmem:[#allocation4 + $0xa0] sm:$0xf]  ;;  %v8008_v41 = vor.u32 %v9326_v38, %v8007_v37  ;;  %v9258_v43 = vld [vmem:[#allocation4 + $0xac] sm:$0xf0]  ;;  %4990 = vmatpush.bf16.msra.mxu2 %v7752_v28 }
 0x4e7   :  { %v7863_v44 = vld [vmem:[#allocation4 + $0x1a0] sm:$0xf]  ;;  %v9290_v45 = vld [vmem:[#allocation4 + $0x1ac] sm:$0xf0]  ;;  %5028 = vmatpush.bf16.msrb.mxu1 %v8152_v25  ;;  %v7736_v51 = vor.u32 %v9258_v43, %v7735_v40  ;;  %5003 = vmatpush.bf16.msra.mxu3 %v7880_v36 }
 0x4e8   :  { %v8135_v48 = vld [vmem:[#allocation4 + $0x3c0] sm:$0xf]  ;;  %v9358_v39 = vld [vmem:[#allocation4 + $0x3cc] sm:$0xf0]  ;;  %5016 = vmatpush.bf16.msrb.mxu0 %v8008_v41  ;;  %v7864_v56 = vor.u32 %v9290_v45, %v7863_v44 }
 0x4e9   :  { %v7991_v49 = vld [vmem:[#allocation4 + $0x2a0] sm:$0xf]  ;;  %v8136_v52 = vor.u32 %v9358_v39, %v8135_v48  ;;  %v9322_v54 = vld [vmem:[#allocation4 + $0x2ac] sm:$0xf0] }
 0x4ea   :  { %v7719_v50 = vld [vmem:[#allocation4 + $0x80] sm:$0xf]  ;;  %v9254_v55 = vld [vmem:[#allocation4 + $0x8c] sm:$0xf0]  ;;  %v7992_v57 = vor.u32 %v9322_v54, %v7991_v49  ;;  %4991 = vmatpush.bf16.msra.mxu2 %v7736_v51 }
 0x4eb   :  { %v7847_v53 = vld [vmem:[#allocation4 + $0x180] sm:$0xf]  ;;  %v9286_v24 = vld [vmem:[#allocation4 + $0x18c] sm:$0xf0]  ;;  %5029 = vmatpush.bf16.msrb.mxu1 %v8136_v52  ;;  %v7720_v60 = vor.u32 %v9254_v55, %v7719_v50  ;;  %5004 = vmatpush.bf16.msra.mxu3 %v7864_v56 }
 0x4ec   :  { %v8119_v16 = vld [vmem:[#allocation4 + $0x3a0] sm:$0xf]  ;;  %v9354_v58 = vld [vmem:[#allocation4 + $0x3ac] sm:$0xf0]  ;;  %5017 = vmatpush.bf16.msrb.mxu0 %v7992_v57  ;;  %v7848_v62 = vor.u32 %v9286_v24, %v7847_v53  ;;  %v9264_v24 = vld [vmem:[#allocation4 + $0xe4] sm:$0xf] }
 0x4ed   :  { %v7975_v47 = vld [vmem:[#allocation4 + $0x280] sm:$0xf]  ;;  %v9318_v59 = vld [vmem:[#allocation4 + $0x28c] sm:$0xf0]  ;;  %v8120_v42 = vor.u32 %v9354_v58, %v8119_v16  ;;  %v7769_v58 = vld [vmem:[#allocation4 + $0xf0] sm:$0xf0] }
 0x4ee   :  { %v8103_v61 = vld [vmem:[#allocation4 + $0x380] sm:$0xf]  ;;  %v9350_v9 = vld [vmem:[#allocation4 + $0x38c] sm:$0xf0]  ;;  %v7976_v63 = vor.u32 %v9318_v59, %v7975_v47  ;;  %4992 = vmatpush.bf16.msra.mxu2 %v7720_v60 }
 0x4ef   :  { %v7703_v0 = vld [vmem:[#allocation4 + $0x60] sm:$0xf]  ;;  %v9250_v27 = vld [vmem:[#allocation4 + $0x6c] sm:$0xf0]  ;;  %5030 = vmatpush.bf16.msrb.mxu1 %v8120_v42  ;;  %v8104_v5 = vor.u32 %v9350_v9, %v8103_v61  ;;  %5005 = vmatpush.bf16.msra.mxu3 %v7848_v62  ;;  %v9296_v61 = vld [vmem:[#allocation4 + $0x1e4] sm:$0xf] }
 0x4f0   :  { %v7831_v2 = vld [vmem:[#allocation4 + $0x160] sm:$0xf]  ;;  %v9282_v3 = vld [vmem:[#allocation4 + $0x16c] sm:$0xf0]  ;;  %v7704_v6 = vor.u32 %v9250_v27, %v7703_v0  ;;  %5018 = vmatpush.bf16.msrb.mxu0 %v7976_v63  ;;  %v7897_v9 = vld [vmem:[#allocation4 + $0x1f0] sm:$0xf0] }
 0x4f1   :  { %v7959_v46 = vld [vmem:[#allocation4 + $0x260] sm:$0xf]  ;;  %v9314_v4 = vld [vmem:[#allocation4 + $0x26c] sm:$0xf0]  ;;  %v7832_v10 = vor.u32 %v9282_v3, %v7831_v2  ;;  %v7772_v2 = vor.u32 %v9264_v24, %v7769_v58  ;;  %v7833_v24 = vld [vmem:[#allocation4 + $0x170] sm:$0xf0] }
 0x4f2   :  { %v8087_v7 = vld [vmem:[#allocation4 + $0x360] sm:$0xf]  ;;  %v9346_v8 = vld [vmem:[#allocation4 + $0x36c] sm:$0xf0]  ;;  %v7960_v13 = vor.u32 %v9314_v4, %v7959_v46  ;;  %4993 = vmatpush.bf16.msra.mxu2 %v7704_v6  ;;  %v9260_v6 = vld [vmem:[#allocation4 + $0xc4] sm:$0xf] }
 0x4f3   :  { %v7687_v14 = vld [vmem:[#allocation4 + $0x40] sm:$0xf]  ;;  %v9246_v32 = vld [vmem:[#allocation4 + $0x4c] sm:$0xf0]  ;;  %5031 = vmatpush.bf16.msrb.mxu1 %v8104_v5  ;;  %v8088_v21 = vor.u32 %v9346_v8, %v8087_v7  ;;  %5006 = vmatpush.bf16.msra.mxu3 %v7832_v10  ;;  %v7900_v5 = vor.u32 %v9296_v61, %v7897_v9  ;;  %v7753_v7 = vld [vmem:[#allocation4 + $0xd0] sm:$0xf0] }
 0x4f4   :  { %v7815_v26 = vld [vmem:[#allocation4 + $0x140] sm:$0xf]  ;;  %v9278_v18 = vld [vmem:[#allocation4 + $0x14c] sm:$0xf0]  ;;  %v7688_v22 = vor.u32 %v9246_v32, %v7687_v14  ;;  %5019 = vmatpush.bf16.msrb.mxu0 %v7960_v13  ;;  %v9292_v10 = vld [vmem:[#allocation4 + $0x1c4] sm:$0xf] }
 0x4f5   :  { %v7943_v19 = vld [vmem:[#allocation4 + $0x240] sm:$0xf]  ;;  %v9310_v20 = vld [vmem:[#allocation4 + $0x24c] sm:$0xf0]  ;;  %v7816_v30 = vor.u32 %v9278_v18, %v7815_v26  ;;  %v7881_v13 = vld [vmem:[#allocation4 + $0x1d0] sm:$0xf0]  ;;  %v7756_v18 = vor.u32 %v9260_v6, %v7753_v7 }
 0x4f6   :  { %v8071_v29 = vld [vmem:[#allocation4 + $0x340] sm:$0xf]  ;;  %v9342_v33 = vld [vmem:[#allocation4 + $0x34c] sm:$0xf0]  ;;  %v7944_v28 = vor.u32 %v9310_v20, %v7943_v19  ;;  %4994 = vmatpush.bf16.msra.mxu2 %v7688_v22  ;;  %v9256_v22 = vld [vmem:[#allocation4 + $0xa4] sm:$0xf] }
 0x4f7   :  { %v7671_v31 = vld [vmem:[#allocation4 + $0x20] sm:$0xf]  ;;  %v9242_v35 = vld [vmem:[#allocation4 + $0x2c] sm:$0xf0]  ;;  %5032 = vmatpush.bf16.msrb.mxu1 %v8088_v21  ;;  %v8072_v38 = vor.u32 %v9342_v33, %v8071_v29  ;;  %5007 = vmatpush.bf16.msra.mxu3 %v7816_v30  ;;  %v7884_v21 = vor.u32 %v9292_v10, %v7881_v13  ;;  %v7737_v29 = vld [vmem:[#allocation4 + $0xb0] sm:$0xf0] }
 0x4f8   :  { %v7799_v34 = vld [vmem:[#allocation4 + $0x120] sm:$0xf]  ;;  %v9274_v36 = vld [vmem:[#allocation4 + $0x12c] sm:$0xf0]  ;;  %v7672_v41 = vor.u32 %v9242_v35, %v7671_v31  ;;  %5020 = vmatpush.bf16.msrb.mxu0 %v7944_v28  ;;  %v9288_v30 = vld [vmem:[#allocation4 + $0x1a4] sm:$0xf] }
 0x4f9   :  { %v7927_v25 = vld [vmem:[#allocation4 + $0x220] sm:$0xf]  ;;  %v9306_v37 = vld [vmem:[#allocation4 + $0x22c] sm:$0xf0]  ;;  %v7800_v48 = vor.u32 %v9274_v36, %v7799_v34  ;;  %v7865_v28 = vld [vmem:[#allocation4 + $0x1b0] sm:$0xf0]  ;;  %v7740_v36 = vor.u32 %v9256_v22, %v7737_v29 }
 0x4fa   :  { %v7655_v40 = vld [vmem:[#allocation4] sm:$0xf]  ;;  %v9238_v43 = vld [vmem:[#allocation4 + $0xc] sm:$0xf0]  ;;  %v7928_v39 = vor.u32 %v9306_v37, %v7927_v25  ;;  %4995 = vmatpush.bf16.msra.mxu2 %v7672_v41  ;;  %v7721_v41 = vld [vmem:[#allocation4 + $0x90] sm:$0xf0] }
 0x4fb   :  { %v8055_v44 = vld [vmem:[#allocation4 + $0x320] sm:$0xf]  ;;  %v9338_v45 = vld [vmem:[#allocation4 + $0x32c] sm:$0xf0]  ;;  %5033 = vmatpush.bf16.msrb.mxu1 %v8072_v38  ;;  %v7656_v16 = vor.u32 %v9238_v43, %v7655_v40  ;;  %5008 = vmatpush.bf16.msra.mxu3 %v7800_v48  ;;  %v7868_v38 = vor.u32 %v9288_v30, %v7865_v28  ;;  %v9252_v40 = vld [vmem:[#allocation4 + $0x84] sm:$0xf] }
 0x4fc   :  { %v7783_v49 = vld [vmem:[#allocation4 + $0x100] sm:$0xf]  ;;  %v9270_v51 = vld [vmem:[#allocation4 + $0x10c] sm:$0xf0]  ;;  %v8056_v56 = vor.u32 %v9338_v45, %v8055_v44  ;;  %5021 = vmatpush.bf16.msrb.mxu0 %v7928_v39  ;;  %v9284_v44 = vld [vmem:[#allocation4 + $0x184] sm:$0xf] }
 0x4fd   :  { %v8279_v52 = vld [vmem:[#allocation4 + $0x4e0] sm:$0xf]  ;;  %v9394_v54 = vld [vmem:[#allocation4 + $0x4ec] sm:$0xf0]  ;;  %v7784_v42 = vor.u32 %v9270_v51, %v7783_v49  ;;  %v7849_v45 = vld [vmem:[#allocation4 + $0x190] sm:$0xf0]  ;;  %v7724_v51 = vor.u32 %v9252_v40, %v7721_v41 }
 0x4fe   :  { %v8407_v50 = vld [vmem:[#allocation4 + $0x5e0] sm:$0xf]  ;;  %v9426_v55 = vld [vmem:[#allocation4 + $0x5ec] sm:$0xf0]  ;;  %v8280_v60 = vor.u32 %v9394_v54, %v8279_v52  ;;  %4996 = vmatpush.bf16.msra.mxu2 %v7656_v16  ;;  %v9244_v9 = vld [vmem:[#allocation4 + $0x44] sm:$0xf] }
 0x4ff   :  { %v7911_v57 = vld [vmem:[#allocation4 + $0x200] sm:$0xf]  ;;  %v9302_v53 = vld [vmem:[#allocation4 + $0x20c] sm:$0xf0]  ;;  %v8408_v62 = vor.u32 %v9426_v55, %v8407_v50  ;;  %5034 = vmatpush.bf16.msrb.mxu1 %v8056_v56  ;;  %5009 = vmatpush.bf16.msra.mxu3 %v7784_v42  ;;  %v7852_v50 = vor.u32 %v9284_v44, %v7849_v45  ;;  %v9248_v55 = vld [vmem:[#allocation4 + $0x64] sm:$0xf] }
 0x500   :  { %v8039_v47 = vld [vmem:[#allocation4 + $0x300] sm:$0xf]  ;;  %v9334_v59 = vld [vmem:[#allocation4 + $0x30c] sm:$0xf0]  ;;  %v7912_v63 = vor.u32 %v9302_v53, %v7911_v57  ;;  %v7705_v56 = vld [vmem:[#allocation4 + $0x70] sm:$0xf0] }
 0x501   :  { %v8263_v0 = vld [vmem:[#allocation4 + $0x4c0] sm:$0xf]  ;;  %v9390_v27 = vld [vmem:[#allocation4 + $0x4cc] sm:$0xf0]  ;;  %v8040_v3 = vor.u32 %v9334_v59, %v8039_v47  ;;  %4997 = vmatmul.bf16.vlgmr.msra.gmra.mxu2 %v11731_v15  ;;  %v9280_v53 = vld [vmem:[#allocation4 + $0x164] sm:$0xf]  ;;  %v7708_v59 = vor.u32 %v9248_v55, %v7705_v56 }
 0x502   :  { %v8391_v46 = vld [vmem:[#allocation4 + $0x5c0] sm:$0xf]  ;;  %v9422_v4 = vld [vmem:[#allocation4 + $0x5cc] sm:$0xf0]  ;;  %5041 = vmatpush.bf16.msrb.mxu2 %v8280_v60  ;;  %v8264_v8 = vor.u32 %v9390_v27, %v8263_v0  ;;  %5022 = vmatpush.bf16.msrb.mxu0 %v7912_v63  ;;  %v7836_v61 = vor.u32 %v9280_v53, %v7833_v24  ;;  %v9276_v0 = vld [vmem:[#allocation4 + $0x144] sm:$0xf] }
 0x503   :  { %5054 = vmatpush.bf16.msrb.mxu3 %v8408_v62  ;;  %v8392_v14 = vor.u32 %v9422_v4, %v8391_v46  ;;  %v8247_v32 = vld [vmem:[#allocation4 + $0x4a0] sm:$0xf]  ;;  %v9386_v26 = vld [vmem:[#allocation4 + $0x4ac] sm:$0xf0]  ;;  %5035 = vmatpush.bf16.msrb.mxu1 %v8040_v3  ;;  %v7689_v62 = vld [vmem:[#allocation4 + $0x50] sm:$0xf0] }
 0x504   :  { %v8375_v19 = vld [vmem:[#allocation4 + $0x5a0] sm:$0xf]  ;;  %v9418_v20 = vld [vmem:[#allocation4 + $0x5ac] sm:$0xf0]  ;;  %v8248_v33 = vor.u32 %v9386_v26, %v8247_v32  ;;  %5010 = vmatmul.bf16.vlgmr.msra.gmra.mxu3 %v11741_v23  ;;  %v7817_v27 = vld [vmem:[#allocation4 + $0x150] sm:$0xf0]  ;;  %v7692_v4 = vor.u32 %v9244_v9, %v7689_v62 }
 0x505   :  { %v8376_v31 = vor.u32 %v9418_v20, %v8375_v19  ;;  %v8231_v35 = vld [vmem:[#allocation4 + $0x480] sm:$0xf]  ;;  %v9382_v34 = vld [vmem:[#allocation4 + $0x48c] sm:$0xf0]  ;;  %5023 = vmatmul.bf16.vlgmr.msrb.gmra.mxu0 %v11733_v17  ;;  %v7820_v7 = vor.u32 %v9276_v0, %v7817_v27  ;;  %v7673_v10 = vld [vmem:[#allocation4 + $0x30] sm:$0xf0] }
 0x506   :  { %5067 = vmatpush.bf16.msra.mxu0 %v7772_v2  ;;  %5042 = vmatpush.bf16.msrb.mxu2 %v8264_v8  ;;  %v8359_v25 = vld [vmem:[#allocation4 + $0x580] sm:$0xf]  ;;  %v9414_v37 = vld [vmem:[#allocation4 + $0x58c] sm:$0xf0]  ;;  %v8232_v43 = vor.u32 %v9382_v34, %v8231_v35  ;;  %v9240_v8 = vld [vmem:[#allocation4 + $0x24] sm:$0xf] }
 0x507   :  { %5080 = vmatpush.bf16.msra.mxu1 %v7900_v5  ;;  %5055 = vmatpush.bf16.msrb.mxu3 %v8392_v14  ;;  %v8360_v48 = vor.u32 %v9414_v37, %v8359_v25  ;;  %v8215_v39 = vld [vmem:[#allocation4 + $0x460] sm:$0xf]  ;;  %v9378_v49 = vld [vmem:[#allocation4 + $0x46c] sm:$0xf0]  ;;  %v9272_v32 = vld [vmem:[#allocation4 + $0x124] sm:$0xf]  ;;  %v7676_v22 = vor.u32 %v9240_v8, %v7673_v10 }
 0x508   :  { %5036 = vmatmul.bf16.vlgmr.msrb.gmra.mxu1 %v11743_v11  ;;  %v8343_v52 = vld [vmem:[#allocation4 + $0x560] sm:$0xf]  ;;  %v9410_v54 = vld [vmem:[#allocation4 + $0x56c] sm:$0xf0]  ;;  %v8216_v57 = vor.u32 %v9378_v49, %v8215_v39  ;;  %v7801_v26 = vld [vmem:[#allocation4 + $0x130] sm:$0xf0] }
 0x509   :  { %v8344_v16 = vor.u32 %v9410_v54, %v8343_v52  ;;  %v8199_v58 = vld [vmem:[#allocation4 + $0x440] sm:$0xf]  ;;  %v9374_v47 = vld [vmem:[#allocation4 + $0x44c] sm:$0xf0]  ;;  %v9328_v29 = vld [vmem:[#allocation4 + $0x2e4] sm:$0xf]  ;;  %v7804_v28 = vor.u32 %v9272_v32, %v7801_v26 }
 0x50a   :  { %5068 = vmatpush.bf16.msra.mxu0 %v7756_v18  ;;  %5043 = vmatpush.bf16.msrb.mxu2 %v8248_v33  ;;  %v8327_v42 = vld [vmem:[#allocation4 + $0x540] sm:$0xf]  ;;  %v9406_v60 = vld [vmem:[#allocation4 + $0x54c] sm:$0xf0]  ;;  %v8200_v63 = vor.u32 %v9374_v47, %v8199_v58  ;;  %v8025_v33 = vld [vmem:[#allocation4 + $0x2f0] sm:$0xf0] }
 0x50b   :  { %5081 = vmatpush.bf16.msra.mxu1 %v7884_v21  ;;  %5056 = vmatpush.bf16.msrb.mxu3 %v8376_v31  ;;  %v8328_v2 = vor.u32 %v9406_v60, %v8327_v42  ;;  %v8183_v3 = vld [vmem:[#allocation4 + $0x420] sm:$0xf]  ;;  %v9370_v46 = vld [vmem:[#allocation4 + $0x42c] sm:$0xf0]  ;;  %v9360_v30 = vld [vmem:[#allocation4 + $0x3e4] sm:$0xf]  ;;  %v8028_v40 = vor.u32 %v9328_v29, %v8025_v33 }
 0x50c   :  { %v8311_v5 = vld [vmem:[#allocation4 + $0x520] sm:$0xf]  ;;  %v9402_v6 = vld [vmem:[#allocation4 + $0x52c] sm:$0xf0]  ;;  %v8184_v13 = vor.u32 %v9370_v46, %v8183_v3  ;;  %v8153_v31 = vld [vmem:[#allocation4 + $0x3f0] sm:$0xf0] }
 0x50d   :  { %v8167_v14 = vld [vmem:[#allocation4 + $0x400] sm:$0xf]  ;;  %v8312_v18 = vor.u32 %v9402_v6, %v8311_v5  ;;  %v9366_v19 = vld [vmem:[#allocation4 + $0x40c] sm:$0xf0]  ;;  %v9236_v35 = vld [vmem:[#allocation4 + $0x4] sm:$0xf]  ;;  %v8156_v45 = vor.u32 %v9360_v30, %v8153_v31 }
 0x50e   :  { %5069 = vmatpush.bf16.msra.mxu0 %v7740_v36  ;;  %5044 = vmatpush.bf16.msrb.mxu2 %v8232_v43  ;;  %v8295_v20 = vld [vmem:[#allocation4 + $0x500] sm:$0xf]  ;;  %v9398_v21 = vld [vmem:[#allocation4 + $0x50c] sm:$0xf0]  ;;  %v7657_v34 = vld [vmem:[#allocation4 + $0x10] sm:$0xf0]  ;;  %v8168_v36 = vor.u32 %v9366_v19, %v8167_v14 }
 0x50f   :  { %5082 = vmatpush.bf16.msra.mxu1 %v7868_v38  ;;  %5057 = vmatpush.bf16.msrb.mxu3 %v8360_v48  ;;  %v9392_v25 = vld [vmem:[#allocation4 + $0x4e4] sm:$0xf]  ;;  %v8281_v37 = vld [vmem:[#allocation4 + $0x4f0] sm:$0xf0]  ;;  %v8296_v38 = vor.u32 %v9398_v21, %v8295_v20  ;;  %v7660_v48 = vor.u32 %v9236_v35, %v7657_v34 }
 0x510   :  { %v9268_v41 = vld [vmem:[#allocation4 + $0x104] sm:$0xf]  ;;  %v7785_v43 = vld [vmem:[#allocation4 + $0x110] sm:$0xf0]  ;;  %v8284_v52 = vor.u32 %v9392_v25, %v8281_v37 }
 0x511   :  { %v9324_v44 = vld [vmem:[#allocation4 + $0x2c4] sm:$0xf]  ;;  %v8009_v39 = vld [vmem:[#allocation4 + $0x2d0] sm:$0xf0]  ;;  %v7788_v55 = vor.u32 %v9268_v41, %v7785_v43 }
 0x512   :  { %5070 = vmatpush.bf16.msra.mxu0 %v7724_v51  ;;  %5045 = vmatpush.bf16.msrb.mxu2 %v8216_v57  ;;  %v9424_v49 = vld [vmem:[#allocation4 + $0x5e4] sm:$0xf]  ;;  %v8409_v51 = vld [vmem:[#allocation4 + $0x5f0] sm:$0xf0]  ;;  %v8012_v53 = vor.u32 %v9324_v44, %v8009_v39 }
 0x513   :  { %5083 = vmatpush.bf16.msra.mxu1 %v7852_v50  ;;  %5058 = vmatpush.bf16.msrb.mxu3 %v8344_v16  ;;  %v9356_v54 = vld [vmem:[#allocation4 + $0x3c4] sm:$0xf]  ;;  %v8137_v50 = vld [vmem:[#allocation4 + $0x3d0] sm:$0xf0]  ;;  %v8412_v24 = vor.u32 %v9424_v49, %v8409_v51 }
 0x514   :  { %v9388_v56 = vld [vmem:[#allocation4 + $0x4c4] sm:$0xf]  ;;  %v8265_v57 = vld [vmem:[#allocation4 + $0x4d0] sm:$0xf0]  ;;  %v8140_v58 = vor.u32 %v9356_v54, %v8137_v50 }
 0x515   :  { %v9320_v16 = vld [vmem:[#allocation4 + $0x2a4] sm:$0xf]  ;;  %v7993_v47 = vld [vmem:[#allocation4 + $0x2b0] sm:$0xf0]  ;;  %v8268_v60 = vor.u32 %v9388_v56, %v8265_v57 }
 0x516   :  { %5071 = vmatpush.bf16.msra.mxu0 %v7708_v59  ;;  %5046 = vmatpush.bf16.msrb.mxu2 %v8200_v63  ;;  %v9420_v59 = vld [vmem:[#allocation4 + $0x5c4] sm:$0xf]  ;;  %v8393_v42 = vld [vmem:[#allocation4 + $0x5d0] sm:$0xf0]  ;;  %v7996_v0 = vor.u32 %v9320_v16, %v7993_v47 }
 0x517   :  { %5084 = vmatpush.bf16.msra.mxu1 %v7836_v61  ;;  %5059 = vmatpush.bf16.msrb.mxu3 %v8328_v2  ;;  %v9352_v61 = vld [vmem:[#allocation4 + $0x3a4] sm:$0xf]  ;;  %v8121_v9 = vld [vmem:[#allocation4 + $0x3b0] sm:$0xf0]  ;;  %v8396_v27 = vor.u32 %v9420_v59, %v8393_v42 }
 0x518   :  { %v9384_v62 = vld [vmem:[#allocation4 + $0x4a4] sm:$0xf]  ;;  %v8249_v63 = vld [vmem:[#allocation4 + $0x4b0] sm:$0xf0]  ;;  %v8124_v3 = vor.u32 %v9352_v61, %v8121_v9 }
 0x519   :  { %v9316_v2 = vld [vmem:[#allocation4 + $0x284] sm:$0xf]  ;;  %v7977_v46 = vld [vmem:[#allocation4 + $0x290] sm:$0xf0]  ;;  %v8252_v6 = vor.u32 %v9384_v62, %v8249_v63 }
 0x51a   :  { %5072 = vmatpush.bf16.msra.mxu0 %v7692_v4  ;;  %5047 = vmatpush.bf16.msrb.mxu2 %v8184_v13  ;;  %v9416_v4 = vld [vmem:[#allocation4 + $0x5a4] sm:$0xf]  ;;  %v8377_v5 = vld [vmem:[#allocation4 + $0x5b0] sm:$0xf0]  ;;  %v7980_v14 = vor.u32 %v9316_v2, %v7977_v46  ;;  %v7903_v2 = vld [vmem:[#allocation4 + $0x1e8] sm:$0xf] }
 0x51b   :  { %5085 = vmatpush.bf16.msra.mxu1 %v7820_v7  ;;  %5060 = vmatpush.bf16.msrb.mxu3 %v8312_v18  ;;  %v9348_v7 = vld [vmem:[#allocation4 + $0x384] sm:$0xf]  ;;  %v8105_v8 = vld [vmem:[#allocation4 + $0x390] sm:$0xf0]  ;;  %v8380_v32 = vor.u32 %v9416_v4, %v8377_v5 }
 0x51c   :  { %v9380_v10 = vld [vmem:[#allocation4 + $0x484] sm:$0xf]  ;;  %v8233_v13 = vld [vmem:[#allocation4 + $0x490] sm:$0xf0]  ;;  %v8108_v18 = vor.u32 %v9348_v7, %v8105_v8  ;;  %v8031_v7 = vld [vmem:[#allocation4 + $0x2e8] sm:$0xf] }
 0x51d   :  { %v9312_v26 = vld [vmem:[#allocation4 + $0x264] sm:$0xf]  ;;  %v7961_v19 = vld [vmem:[#allocation4 + $0x270] sm:$0xf0]  ;;  %v9331_v8 = vld [vmem:[#allocation4 + $0x2f4] sm:$0xf0] }
 0x51e   :  { %5073 = vmatpush.bf16.msra.mxu0 %v7676_v22  ;;  %5048 = vmatpush.bf16.msrb.mxu2 %v8168_v36  ;;  %v9412_v20 = vld [vmem:[#allocation4 + $0x584] sm:$0xf]  ;;  %v8361_v21 = vld [vmem:[#allocation4 + $0x590] sm:$0xf0]  ;;  %v8236_v22 = vor.u32 %v9380_v10, %v8233_v13  ;;  %v7964_v31 = vor.u32 %v9312_v26, %v7961_v19  ;;  %v7759_v26 = vld [vmem:[#allocation4 + $0xc8] sm:$0xf] }
 0x51f   :  { %5086 = vmatpush.bf16.msra.mxu1 %v7804_v28  ;;  %5061 = vmatpush.bf16.msrb.mxu3 %v8296_v38  ;;  %v9344_v29 = vld [vmem:[#allocation4 + $0x364] sm:$0xf]  ;;  %v8089_v33 = vld [vmem:[#allocation4 + $0x370] sm:$0xf0]  ;;  %v8364_v35 = vor.u32 %v9412_v20, %v8361_v21  ;;  %v9263_v20 = vld [vmem:[#allocation4 + $0xd4] sm:$0xf0] }
 0x520   :  { %v9376_v30 = vld [vmem:[#allocation4 + $0x464] sm:$0xf]  ;;  %v8217_v28 = vld [vmem:[#allocation4 + $0x470] sm:$0xf0]  ;;  %v8092_v36 = vor.u32 %v9344_v29, %v8089_v33  ;;  %v8159_v21 = vld [vmem:[#allocation4 + $0x3e8] sm:$0xf]  ;;  %v8032_v29 = vor.u32 %v9331_v8, %v8031_v7 }
 0x521   :  { %5049 = vmatmul.bf16.vlgmr.msrb.gmra.mxu2 %v11735_v1  ;;  %v9308_v34 = vld [vmem:[#allocation4 + $0x244] sm:$0xf]  ;;  %v7945_v25 = vld [vmem:[#allocation4 + $0x250] sm:$0xf0]  ;;  %v7887_v33 = vld [vmem:[#allocation4 + $0x1c8] sm:$0xf] }
 0x522   :  { %5093 = vmatpush.bf16.msra.mxu2 %v8028_v40  ;;  %5074 = vmatpush.bf16.msra.mxu0 %v7660_v48  ;;  %v9408_v37 = vld [vmem:[#allocation4 + $0x564] sm:$0xf]  ;;  %v8345_v38 = vld [vmem:[#allocation4 + $0x570] sm:$0xf0]  ;;  %v8220_v40 = vor.u32 %v9376_v30, %v8217_v28  ;;  %v7948_v48 = vor.u32 %v9308_v34, %v7945_v25  ;;  %v9295_v30 = vld [vmem:[#allocation4 + $0x1d4] sm:$0xf0]  ;;  %v7760_v34 = vor.u32 %v9263_v20, %v7759_v26 }
 0x523   :  { %5106 = vmatpush.bf16.msra.mxu3 %v8156_v45  ;;  %5087 = vmatpush.bf16.msra.mxu1 %v7788_v55  ;;  %v9340_v41 = vld [vmem:[#allocation4 + $0x344] sm:$0xf]  ;;  %v8073_v43 = vld [vmem:[#allocation4 + $0x350] sm:$0xf0]  ;;  %v8348_v39 = vor.u32 %v9408_v37, %v8345_v38  ;;  %v7743_v25 = vld [vmem:[#allocation4 + $0xa8] sm:$0xf]  ;;  %v7888_v37 = vor.u32 %v9295_v30, %v7887_v33 }
 0x524   :  { %5062 = vmatmul.bf16.vlgmr.msrb.gmra.mxu3 %v11745_v12  ;;  %v9372_v44 = vld [vmem:[#allocation4 + $0x444] sm:$0xf]  ;;  %v8201_v45 = vld [vmem:[#allocation4 + $0x450] sm:$0xf0]  ;;  %v8076_v51 = vor.u32 %v9340_v41, %v8073_v43  ;;  %v9259_v38 = vld [vmem:[#allocation4 + $0xb4] sm:$0xf0] }
 0x525   :  { %5075 = vmatmul.bf16.vlgmr.msra.gmra.mxu0 %v11731_v15  ;;  %v9304_v49 = vld [vmem:[#allocation4 + $0x224] sm:$0xf]  ;;  %v8329_v50 = vld [vmem:[#allocation4 + $0x550] sm:$0xf0]  ;;  %v8204_v55 = vor.u32 %v9372_v44, %v8201_v45  ;;  %v9359_v41 = vld [vmem:[#allocation4 + $0x3d4] sm:$0xf0] }
 0x526   :  { %5119 = vmatpush.bf16.msrb.mxu0 %v8284_v52  ;;  %5094 = vmatpush.bf16.msra.mxu2 %v8012_v53  ;;  %v7929_v52 = vld [vmem:[#allocation4 + $0x230] sm:$0xf0]  ;;  %v9404_v54 = vld [vmem:[#allocation4 + $0x544] sm:$0xf]  ;;  %v7871_v44 = vld [vmem:[#allocation4 + $0x1a8] sm:$0xf] }
 0x527   :  { %5132 = vmatpush.bf16.msrb.mxu1 %v8412_v24  ;;  %5107 = vmatpush.bf16.msra.mxu3 %v8140_v58  ;;  %v9336_v56 = vld [vmem:[#allocation4 + $0x324] sm:$0xf]  ;;  %v8057_v57 = vld [vmem:[#allocation4 + $0x330] sm:$0xf0]  ;;  %v7932_v16 = vor.u32 %v9304_v49, %v7929_v52  ;;  %v8332_v58 = vor.u32 %v9404_v54, %v8329_v50  ;;  %v9291_v45 = vld [vmem:[#allocation4 + $0x1b4] sm:$0xf0]  ;;  %v7744_v49 = vor.u32 %v9259_v38, %v7743_v25 }
 0x528   :  { %5088 = vmatmul.bf16.vlgmr.msra.gmra.mxu1 %v11741_v23  ;;  %v9368_v53 = vld [vmem:[#allocation4 + $0x424] sm:$0xf]  ;;  %v8185_v24 = vld [vmem:[#allocation4 + $0x430] sm:$0xf0]  ;;  %v7727_v52 = vld [vmem:[#allocation4 + $0x88] sm:$0xf]  ;;  %v7872_v54 = vor.u32 %v9291_v45, %v7871_v44 }
 0x529   :  { %v9300_v47 = vld [vmem:[#allocation4 + $0x204] sm:$0xf]  ;;  %v7913_v59 = vld [vmem:[#allocation4 + $0x210] sm:$0xf0]  ;;  %v8188_v63 = vor.u32 %v9368_v53, %v8185_v24  ;;  %v9255_v50 = vld [vmem:[#allocation4 + $0x94] sm:$0xf0] }
 0x52a   :  { %5120 = vmatpush.bf16.msrb.mxu0 %v8268_v60  ;;  %5095 = vmatpush.bf16.msra.mxu2 %v7996_v0  ;;  %v9332_v42 = vld [vmem:[#allocation4 + $0x304] sm:$0xf]  ;;  %v8060_v60 = vor.u32 %v9336_v56, %v8057_v57  ;;  %v8041_v61 = vld [vmem:[#allocation4 + $0x310] sm:$0xf0]  ;;  %v7775_v0 = vld [vmem:[#allocation4 + $0xe8] sm:$0xf]  ;;  %v7916_v5 = vor.u32 %v9300_v47, %v7913_v59  ;;  %v7728_v47 = vor.u32 %v9255_v50, %v7727_v52 }
 0x52b   :  { %5133 = vmatpush.bf16.msrb.mxu1 %v8396_v27  ;;  %5108 = vmatpush.bf16.msra.mxu3 %v8124_v3  ;;  %v9400_v9 = vld [vmem:[#allocation4 + $0x524] sm:$0xf]  ;;  %v8313_v62 = vld [vmem:[#allocation4 + $0x530] sm:$0xf0]  ;;  %v9267_v27 = vld [vmem:[#allocation4 + $0xf4] sm:$0xf0]  ;;  %v8044_v10 = vor.u32 %v9332_v42, %v8041_v61 }
 0x52c   :  { %v9299_v3 = vld [vmem:[#allocation4 + $0x1f4] sm:$0xf0]  ;;  %v9364_v46 = vld [vmem:[#allocation4 + $0x404] sm:$0xf]  ;;  %v8169_v4 = vld [vmem:[#allocation4 + $0x410] sm:$0xf0]  ;;  %v7776_v13 = vor.u32 %v9267_v27, %v7775_v0 }
 0x52d   :  { %v8172_v19 = vor.u32 %v9364_v46, %v8169_v4  ;;  %v9355_v56 = vld [vmem:[#allocation4 + $0x3b4] sm:$0xf0]  ;;  %v7855_v53 = vld [vmem:[#allocation4 + $0x188] sm:$0xf] }
 0x52e   :  { %5121 = vmatpush.bf16.msrb.mxu0 %v8252_v6  ;;  %5096 = vmatpush.bf16.msra.mxu2 %v7980_v14  ;;  %v8316_v6 = vor.u32 %v9400_v9, %v8313_v62  ;;  %v9396_v14 = vld [vmem:[#allocation4 + $0x504] sm:$0xf]  ;;  %v9287_v24 = vld [vmem:[#allocation4 + $0x194] sm:$0xf0]  ;;  %v7711_v42 = vld [vmem:[#allocation4 + $0x68] sm:$0xf] }
 0x52f   :  { %5134 = vmatpush.bf16.msrb.mxu1 %v8380_v32  ;;  %5109 = vmatpush.bf16.msra.mxu3 %v8108_v18  ;;  %v8297_v32 = vld [vmem:[#allocation4 + $0x510] sm:$0xf0]  ;;  %v7904_v18 = vor.u32 %v9299_v3, %v7903_v2  ;;  %v9251_v61 = vld [vmem:[#allocation4 + $0x74] sm:$0xf0]  ;;  %v8111_v9 = vld [vmem:[#allocation4 + $0x388] sm:$0xf] }
 0x530   :  { %v8300_v28 = vor.u32 %v9396_v14, %v8297_v32  ;;  %v9351_v62 = vld [vmem:[#allocation4 + $0x394] sm:$0xf0]  ;;  %v7839_v0 = vld [vmem:[#allocation4 + $0x168] sm:$0xf]  ;;  %v7712_v46 = vor.u32 %v9251_v61, %v7711_v42 }
 0x531   :  { %v9283_v27 = vld [vmem:[#allocation4 + $0x174] sm:$0xf0]  ;;  %v7967_v2 = vld [vmem:[#allocation4 + $0x268] sm:$0xf]  ;;  %v8112_v4 = vor.u32 %v9351_v62, %v8111_v9  ;;  %v9297_v62 = vld [vmem:[#allocation4 + $0x1ec] sm:$0xf] }
 0x532   :  { %5122 = vmatpush.bf16.msrb.mxu0 %v8236_v22  ;;  %5097 = vmatpush.bf16.msra.mxu2 %v7964_v31  ;;  %v9363_v22 = vld [vmem:[#allocation4 + $0x3f4] sm:$0xf0]  ;;  %v8015_v31 = vld [vmem:[#allocation4 + $0x2c8] sm:$0xf] }
 0x533   :  { %5135 = vmatpush.bf16.msrb.mxu1 %v8364_v35  ;;  %5110 = vmatpush.bf16.msra.mxu3 %v8092_v36  ;;  %v9327_v35 = vld [vmem:[#allocation4 + $0x2d4] sm:$0xf0]  ;;  %v8160_v36 = vor.u32 %v9363_v22, %v8159_v21  ;;  %v8095_v8 = vld [vmem:[#allocation4 + $0x368] sm:$0xf] }
 0x534   :  { %v8016_v43 = vor.u32 %v9327_v35, %v8015_v31  ;;  %v9315_v3 = vld [vmem:[#allocation4 + $0x274] sm:$0xf0]  ;;  %v7823_v14 = vld [vmem:[#allocation4 + $0x148] sm:$0xf] }
 0x535   :  { %v9247_v7 = vld [vmem:[#allocation4 + $0x54] sm:$0xf0]  ;;  %v7951_v26 = vld [vmem:[#allocation4 + $0x248] sm:$0xf] }
 0x536   :  { %5123 = vmatpush.bf16.msrb.mxu0 %v8220_v40  ;;  %5098 = vmatpush.bf16.msra.mxu2 %v7948_v48  ;;  %v8143_v40 = vld [vmem:[#allocation4 + $0x3c8] sm:$0xf]  ;;  %v9279_v32 = vld [vmem:[#allocation4 + $0x154] sm:$0xf0] }
 0x537   :  { %5136 = vmatpush.bf16.msrb.mxu1 %v8348_v39  ;;  %5111 = vmatpush.bf16.msra.mxu3 %v8076_v51  ;;  %v7999_v48 = vld [vmem:[#allocation4 + $0x2a8] sm:$0xf]  ;;  %v9323_v39 = vld [vmem:[#allocation4 + $0x2b4] sm:$0xf0]  ;;  %v8144_v51 = vor.u32 %v9359_v41, %v8143_v40  ;;  %v7824_v22 = vor.u32 %v9279_v32, %v7823_v14  ;;  %v7889_v14 = vld [vmem:[#allocation4 + $0x1d8] sm:$0xf0] }
 0x538   :  { %v8000_v57 = vor.u32 %v9323_v39, %v7999_v48  ;;  %v7679_v21 = vld [vmem:[#allocation4 + $0x28] sm:$0xf]  ;;  %v9343_v30 = vld [vmem:[#allocation4 + $0x354] sm:$0xf0] }
 0x539   :  { %v8079_v33 = vld [vmem:[#allocation4 + $0x348] sm:$0xf]  ;;  %v9275_v35 = vld [vmem:[#allocation4 + $0x134] sm:$0xf0] }
 0x53a   :  { %5124 = vmatpush.bf16.msrb.mxu0 %v8204_v55  ;;  %5099 = vmatpush.bf16.msra.mxu2 %v7932_v16  ;;  %v8127_v55 = vld [vmem:[#allocation4 + $0x3a8] sm:$0xf]  ;;  %v9239_v40 = vld [vmem:[#allocation4 + $0x14] sm:$0xf0] }
 0x53b   :  { %5137 = vmatpush.bf16.msrb.mxu1 %v8332_v58  ;;  %5112 = vmatpush.bf16.msra.mxu3 %v8060_v60  ;;  %v7983_v16 = vld [vmem:[#allocation4 + $0x288] sm:$0xf]  ;;  %v9319_v58 = vld [vmem:[#allocation4 + $0x294] sm:$0xf0]  ;;  %v8128_v59 = vor.u32 %v9355_v56, %v8127_v55  ;;  %v7856_v60 = vor.u32 %v9287_v24, %v7855_v53  ;;  %v9265_v53 = vld [vmem:[#allocation4 + $0xec] sm:$0xf] }
 0x53c   :  { %v7807_v31 = vld [vmem:[#allocation4 + $0x128] sm:$0xf]  ;;  %v9271_v44 = vld [vmem:[#allocation4 + $0x114] sm:$0xf0]  ;;  %v7777_v24 = vld [vmem:[#allocation4 + $0xf8] sm:$0xf0] }
 0x53d   :  { %v7663_v38 = vld [vmem:[#allocation4 + $0x8] sm:$0xf]  ;;  %v9339_v48 = vld [vmem:[#allocation4 + $0x334] sm:$0xf0] }
 0x53e   :  { %5125 = vmatpush.bf16.msrb.mxu0 %v8188_v63  ;;  %5100 = vmatpush.bf16.msra.mxu2 %v7916_v5  ;;  %v7984_v63 = vor.u32 %v9319_v58, %v7983_v16  ;;  %v7695_v5 = vld [vmem:[#allocation4 + $0x48] sm:$0xf]  ;;  %v9303_v55 = vld [vmem:[#allocation4 + $0x214] sm:$0xf0]  ;;  %v7664_v56 = vor.u32 %v9239_v40, %v7663_v38 }
 0x53f   :  { %5138 = vmatpush.bf16.msrb.mxu1 %v8316_v6  ;;  %5113 = vmatpush.bf16.msra.mxu3 %v8044_v10  ;;  %v7840_v6 = vor.u32 %v9283_v27, %v7839_v0  ;;  %v9347_v10 = vld [vmem:[#allocation4 + $0x374] sm:$0xf0]  ;;  %v7791_v41 = vld [vmem:[#allocation4 + $0x108] sm:$0xf]  ;;  %v7780_v0 = vor.u32 %v9265_v53, %v7777_v24  ;;  %v9281_v24 = vld [vmem:[#allocation4 + $0x16c] sm:$0xf] }
 0x540   :  { %v8096_v20 = vor.u32 %v9347_v10, %v8095_v8  ;;  %v8063_v45 = vld [vmem:[#allocation4 + $0x328] sm:$0xf]  ;;  %v7792_v16 = vor.u32 %v9271_v44, %v7791_v41  ;;  %v9391_v9 = vld [vmem:[#allocation4 + $0x4d4] sm:$0xf0] }
 0x541   :  { %5101 = vmatmul.bf16.vlgmr.msra.gmra.mxu2 %v11733_v17  ;;  %v8415_v52 = vld [vmem:[#allocation4 + $0x5e8] sm:$0xf]  ;;  %v9387_v10 = vld [vmem:[#allocation4 + $0x4b4] sm:$0xf0] }
 0x542   :  { %5145 = vmatpush.bf16.msrb.mxu2 %v7776_v13  ;;  %5126 = vmatpush.bf16.msrb.mxu0 %v8172_v19  ;;  %v7968_v13 = vor.u32 %v9315_v3, %v7967_v2  ;;  %v7696_v19 = vor.u32 %v9247_v7, %v7695_v5  ;;  %v7919_v50 = vld [vmem:[#allocation4 + $0x208] sm:$0xf]  ;;  %v9423_v2 = vld [vmem:[#allocation4 + $0x5d4] sm:$0xf0] }
 0x543   :  { %5158 = vmatpush.bf16.msrb.mxu3 %v7904_v18  ;;  %5139 = vmatpush.bf16.msrb.mxu1 %v8300_v28  ;;  %v9311_v18 = vld [vmem:[#allocation4 + $0x254] sm:$0xf0]  ;;  %v8271_v42 = vld [vmem:[#allocation4 + $0x4c8] sm:$0xf]  ;;  %v7920_v61 = vor.u32 %v9303_v55, %v7919_v50 }
 0x544   :  { %5114 = vmatmul.bf16.vlgmr.msra.gmra.mxu3 %v11743_v11  ;;  %v7952_v28 = vor.u32 %v9311_v18, %v7951_v26  ;;  %v8399_v27 = vld [vmem:[#allocation4 + $0x5c8] sm:$0xf]  ;;  %v8272_v5 = vor.u32 %v9391_v9, %v8271_v42  ;;  %v9419_v18 = vld [vmem:[#allocation4 + $0x5b4] sm:$0xf0]  ;;  %v9245_v42 = vld [vmem:[#allocation4 + $0x4c] sm:$0xf] }
 0x545   :  { %5127 = vmatmul.bf16.vlgmr.msrb.gmra.mxu0 %v11735_v1  ;;  %v8255_v7 = vld [vmem:[#allocation4 + $0x4a8] sm:$0xf]  ;;  %v8400_v8 = vor.u32 %v9423_v2, %v8399_v27  ;;  %v9379_v44 = vld [vmem:[#allocation4 + $0x474] sm:$0xf0]  ;;  %v9277_v27 = vld [vmem:[#allocation4 + $0x14c] sm:$0xf] }
 0x546   :  { %5171 = vmatpush.bf16.msra.mxu0 %v8032_v29  ;;  %5146 = vmatpush.bf16.msrb.mxu2 %v7760_v34  ;;  %v9243_v29 = vld [vmem:[#allocation4 + $0x34] sm:$0xf0]  ;;  %v7935_v34 = vld [vmem:[#allocation4 + $0x228] sm:$0xf]  ;;  %v7825_v2 = vld [vmem:[#allocation4 + $0x158] sm:$0xf0] }
 0x547   :  { %5184 = vmatpush.bf16.msra.mxu1 %v8160_v36  ;;  %5159 = vmatpush.bf16.msrb.mxu3 %v7888_v37  ;;  %v9307_v36 = vld [vmem:[#allocation4 + $0x234] sm:$0xf0]  ;;  %v7680_v25 = vor.u32 %v9243_v29, %v7679_v21  ;;  %v8080_v37 = vor.u32 %v9343_v30, %v8079_v33  ;;  %v8383_v26 = vld [vmem:[#allocation4 + $0x5a8] sm:$0xf]  ;;  %v8256_v21 = vor.u32 %v9387_v10, %v8255_v7 }
 0x548   :  { %5140 = vmatmul.bf16.vlgmr.msrb.gmra.mxu1 %v11745_v12  ;;  %v7936_v39 = vor.u32 %v9307_v36, %v7935_v34  ;;  %v8239_v29 = vld [vmem:[#allocation4 + $0x488] sm:$0xf]  ;;  %v8384_v33 = vor.u32 %v9419_v18, %v8383_v26  ;;  %v9383_v30 = vld [vmem:[#allocation4 + $0x494] sm:$0xf0]  ;;  %v9273_v18 = vld [vmem:[#allocation4 + $0x12c] sm:$0xf] }
 0x549   :  { %v8367_v34 = vld [vmem:[#allocation4 + $0x588] sm:$0xf]  ;;  %v9415_v36 = vld [vmem:[#allocation4 + $0x594] sm:$0xf0]  ;;  %v8240_v38 = vor.u32 %v9383_v30, %v8239_v29  ;;  %v9361_v29 = vld [vmem:[#allocation4 + $0x3ec] sm:$0xf] }
 0x54a   :  { %5172 = vmatpush.bf16.msra.mxu0 %v8016_v43  ;;  %5147 = vmatpush.bf16.msrb.mxu2 %v7744_v49  ;;  %v7808_v43 = vor.u32 %v9275_v35, %v7807_v31  ;;  %v8287_v49 = vld [vmem:[#allocation4 + $0x4e8] sm:$0xf]  ;;  %v7873_v31 = vld [vmem:[#allocation4 + $0x1b8] sm:$0xf0]  ;;  %v9375_v53 = vld [vmem:[#allocation4 + $0x454] sm:$0xf0] }
 0x54b   :  { %5185 = vmatpush.bf16.msra.mxu1 %v8144_v51  ;;  %5160 = vmatpush.bf16.msrb.mxu3 %v7872_v54  ;;  %v9395_v51 = vld [vmem:[#allocation4 + $0x4f4] sm:$0xf0]  ;;  %v8223_v41 = vld [vmem:[#allocation4 + $0x468] sm:$0xf]  ;;  %v9237_v30 = vld [vmem:[#allocation4 + $0xc] sm:$0xf] }
 0x54c   :  { %v9427_v54 = vld [vmem:[#allocation4 + $0x5f4] sm:$0xf0]  ;;  %v8288_v58 = vor.u32 %v9395_v51, %v8287_v49  ;;  %v8351_v49 = vld [vmem:[#allocation4 + $0x568] sm:$0xf]  ;;  %v8224_v50 = vor.u32 %v9379_v44, %v8223_v41  ;;  %v9325_v41 = vld [vmem:[#allocation4 + $0x2cc] sm:$0xf] }
 0x54d   :  { %v9411_v51 = vld [vmem:[#allocation4 + $0x574] sm:$0xf0]  ;;  %v8175_v10 = vld [vmem:[#allocation4 + $0x408] sm:$0xf] }
 0x54e   :  { %5173 = vmatpush.bf16.msra.mxu0 %v8000_v57  ;;  %5148 = vmatpush.bf16.msrb.mxu2 %v7728_v47  ;;  %v8064_v57 = vor.u32 %v9339_v48, %v8063_v45  ;;  %v8047_v47 = vld [vmem:[#allocation4 + $0x308] sm:$0xf]  ;;  %v9285_v45 = vld [vmem:[#allocation4 + $0x18c] sm:$0xf]  ;;  %v7857_v48 = vld [vmem:[#allocation4 + $0x198] sm:$0xf0] }
 0x54f   :  { %5186 = vmatpush.bf16.msra.mxu1 %v8128_v59  ;;  %5161 = vmatpush.bf16.msrb.mxu3 %v7856_v60  ;;  %v9335_v59 = vld [vmem:[#allocation4 + $0x314] sm:$0xf0]  ;;  %v8416_v60 = vor.u32 %v9427_v54, %v8415_v52  ;;  %v9249_v52 = vld [vmem:[#allocation4 + $0x6c] sm:$0xf]  ;;  %v7713_v54 = vld [vmem:[#allocation4 + $0x78] sm:$0xf0]  ;;  %v7860_v55 = vor.u32 %v9285_v45, %v7857_v48 }
 0x550   :  { %v8048_v3 = vor.u32 %v9335_v59, %v8047_v47  ;;  %v8335_v47 = vld [vmem:[#allocation4 + $0x548] sm:$0xf]  ;;  %v9407_v59 = vld [vmem:[#allocation4 + $0x554] sm:$0xf0]  ;;  %v8017_v45 = vld [vmem:[#allocation4 + $0x2d8] sm:$0xf0] }
 0x551   :  { %v9399_v26 = vld [vmem:[#allocation4 + $0x514] sm:$0xf0]  ;;  %v9425_v48 = vld [vmem:[#allocation4 + $0x5ec] sm:$0xf] }
 0x552   :  { %5174 = vmatpush.bf16.msra.mxu0 %v7984_v63  ;;  %5149 = vmatpush.bf16.msrb.mxu2 %v7712_v46  ;;  %v7905_v63 = vld [vmem:[#allocation4 + $0x1f8] sm:$0xf0]  ;;  %v9261_v46 = vld [vmem:[#allocation4 + $0xcc] sm:$0xf] }
 0x553   :  { %5187 = vmatpush.bf16.msra.mxu1 %v8112_v4  ;;  %5162 = vmatpush.bf16.msrb.mxu3 %v7840_v6  ;;  %v7761_v4 = vld [vmem:[#allocation4 + $0xd8] sm:$0xf0]  ;;  %v7908_v6 = vor.u32 %v9297_v62, %v7905_v63  ;;  %v8191_v62 = vld [vmem:[#allocation4 + $0x428] sm:$0xf]  ;;  %v8336_v63 = vor.u32 %v9407_v59, %v8335_v47 }
 0x554   :  { %v7764_v32 = vor.u32 %v9261_v46, %v7761_v4  ;;  %v8319_v46 = vld [vmem:[#allocation4 + $0x528] sm:$0xf]  ;;  %v9403_v4 = vld [vmem:[#allocation4 + $0x534] sm:$0xf0]  ;;  %v8401_v47 = vld [vmem:[#allocation4 + $0x5d8] sm:$0xf0] }
 0x556   :  { %5175 = vmatpush.bf16.msra.mxu0 %v7968_v13  ;;  %5150 = vmatpush.bf16.msrb.mxu2 %v7696_v19  ;;  %v9293_v13 = vld [vmem:[#allocation4 + $0x1cc] sm:$0xf] }
 0x557   :  { %5188 = vmatpush.bf16.msra.mxu1 %v8096_v20  ;;  %5163 = vmatpush.bf16.msrb.mxu3 %v7824_v22  ;;  %v9257_v19 = vld [vmem:[#allocation4 + $0xac] sm:$0xf]  ;;  %v7745_v20 = vld [vmem:[#allocation4 + $0xb8] sm:$0xf0]  ;;  %v7892_v22 = vor.u32 %v9293_v13, %v7889_v14  ;;  %v9367_v13 = vld [vmem:[#allocation4 + $0x414] sm:$0xf0] }
 0x558   :  { %v7748_v35 = vor.u32 %v9257_v19, %v7745_v20  ;;  %v8303_v14 = vld [vmem:[#allocation4 + $0x508] sm:$0xf]  ;;  %v7809_v19 = vld [vmem:[#allocation4 + $0x138] sm:$0xf0] }
 0x55a   :  { %5176 = vmatpush.bf16.msra.mxu0 %v7952_v28  ;;  %5151 = vmatpush.bf16.msrb.mxu2 %v7680_v25  ;;  %v9289_v28 = vld [vmem:[#allocation4 + $0x1ac] sm:$0xf] }
 0x55b   :  { %5189 = vmatpush.bf16.msra.mxu1 %v8080_v37  ;;  %5164 = vmatpush.bf16.msrb.mxu3 %v7808_v43  ;;  %v9253_v25 = vld [vmem:[#allocation4 + $0x8c] sm:$0xf]  ;;  %v7729_v37 = vld [vmem:[#allocation4 + $0x98] sm:$0xf0]  ;;  %v7876_v40 = vor.u32 %v9289_v28, %v7873_v31  ;;  %v8368_v43 = vor.u32 %v9415_v36, %v8367_v34  ;;  %v8176_v31 = vor.u32 %v9367_v13, %v8175_v10 }
 0x55c   :  { %v7665_v28 = vld [vmem:[#allocation4 + $0x18] sm:$0xf0]  ;;  %v9393_v34 = vld [vmem:[#allocation4 + $0x4ec] sm:$0xf] }
 0x55d   :  { %v8289_v36 = vld [vmem:[#allocation4 + $0x4f8] sm:$0xf0]  ;;  %v7668_v44 = vor.u32 %v9237_v30, %v7665_v28  ;;  %v9309_v30 = vld [vmem:[#allocation4 + $0x24c] sm:$0xf]  ;;  %v11770_v28 = vld [vmem:[%s11855_s6] sm:$0xf] }
 0x55e   :  { %5177 = vmatpush.bf16.msra.mxu0 %v7936_v39  ;;  %5152 = vmatpush.bf16.msrb.mxu2 %v7664_v56  ;;  %v7732_v39 = vor.u32 %v9253_v25, %v7729_v37  ;;  %v8207_v56 = vld [vmem:[#allocation4 + $0x448] sm:$0xf]  ;;  %v8304_v25 = vor.u32 %v9399_v26, %v8303_v14  ;;  %v9313_v14 = vld [vmem:[#allocation4 + $0x26c] sm:$0xf]  ;;  %v7969_v26 = vld [vmem:[#allocation4 + $0x278] sm:$0xf0] }
 0x55f   :  { %5190 = vmatpush.bf16.msra.mxu1 %v8064_v57  ;;  %5165 = vmatpush.bf16.msrb.mxu3 %v7792_v16  ;;  %v8352_v57 = vor.u32 %v9411_v51, %v8351_v49  ;;  %v7841_v16 = vld [vmem:[#allocation4 + $0x178] sm:$0xf0]  ;;  %v8292_v49 = vor.u32 %v9393_v34, %v8289_v36  ;;  %v9357_v51 = vld [vmem:[#allocation4 + $0x3cc] sm:$0xf] }
 0x560   :  { %v7844_v9 = vor.u32 %v9281_v24, %v7841_v16  ;;  %v8001_v16 = vld [vmem:[#allocation4 + $0x2b8] sm:$0xf0]  ;;  %v9409_v34 = vld [vmem:[#allocation4 + $0x56c] sm:$0xf] }
 0x561   :  { %5153 = vmatmul.bf16.vlgmr.msrb.gmra.mxu2 %v11731_v15  ;;  %v8353_v36 = vld [vmem:[#allocation4 + $0x578] sm:$0xf0] }
 0x562   :  { %5197 = vmatpush.bf16.msra.mxu2 %v8288_v58  ;;  %5178 = vmatpush.bf16.msra.mxu0 %v7920_v61  ;;  %v7716_v58 = vor.u32 %v9249_v52, %v7713_v54  ;;  %v8208_v61 = vor.u32 %v9375_v53, %v8207_v56  ;;  %v8145_v52 = vld [vmem:[#allocation4 + $0x3d8] sm:$0xf0]  ;;  %v8020_v56 = vor.u32 %v9325_v41, %v8017_v45  ;;  %v9321_v53 = vld [vmem:[#allocation4 + $0x2ac] sm:$0xf] }
 0x563   :  { %5210 = vmatpush.bf16.msra.mxu3 %v8416_v60  ;;  %5191 = vmatpush.bf16.msra.mxu1 %v8048_v3  ;;  %v7697_v60 = vld [vmem:[#allocation4 + $0x58] sm:$0xf0]  ;;  %v8148_v24 = vor.u32 %v9357_v51, %v8145_v52  ;;  %v9373_v41 = vld [vmem:[#allocation4 + $0x44c] sm:$0xf] }
 0x564   :  { %5166 = vmatmul.bf16.vlgmr.msrb.gmra.mxu3 %v11741_v23  ;;  %v7700_v3 = vor.u32 %v9245_v42, %v7697_v60  ;;  %v9353_v42 = vld [vmem:[#allocation4 + $0x3ac] sm:$0xf]  ;;  %v8129_v60 = vld [vmem:[#allocation4 + $0x3b8] sm:$0xf0] }
 0x565   :  { %5179 = vmatmul.bf16.vlgmr.msra.gmra.mxu0 %v11733_v17  ;;  %v7937_v52 = vld [vmem:[#allocation4 + $0x238] sm:$0xf0] }
 0x566   :  { %5223 = vmatpush.bf16.msrb.mxu0 %v7780_v0  ;;  %5198 = vmatpush.bf16.msra.mxu2 %v8272_v5  ;;  %v9371_v0 = vld [vmem:[#allocation4 + $0x434] sm:$0xf0]  ;;  %v9241_v5 = vld [vmem:[#allocation4 + $0x2c] sm:$0xf] }
 0x567   :  { %5236 = vmatpush.bf16.msrb.mxu1 %v7908_v6  ;;  %5211 = vmatpush.bf16.msra.mxu3 %v8400_v8  ;;  %v7681_v6 = vld [vmem:[#allocation4 + $0x38] sm:$0xf0]  ;;  %v8192_v7 = vor.u32 %v9371_v0, %v8191_v62  ;;  %v7828_v8 = vor.u32 %v9277_v27, %v7825_v2  ;;  %v8004_v62 = vor.u32 %v9321_v53, %v8001_v16  ;;  %v9317_v0 = vld [vmem:[#allocation4 + $0x28c] sm:$0xf] }
 0x568   :  { %5192 = vmatmul.bf16.vlgmr.msra.gmra.mxu1 %v11743_v11  ;;  %v7684_v20 = vor.u32 %v9241_v5, %v7681_v6  ;;  %v8132_v27 = vor.u32 %v9353_v42, %v8129_v60  ;;  %v7985_v2 = vld [vmem:[#allocation4 + $0x298] sm:$0xf0]  ;;  %v9349_v5 = vld [vmem:[#allocation4 + $0x38c] sm:$0xf] }
 0x569   :  { %v8113_v6 = vld [vmem:[#allocation4 + $0x398] sm:$0xf0]  ;;  %v7988_v10 = vor.u32 %v9317_v0, %v7985_v2  ;;  %v9301_v60 = vld [vmem:[#allocation4 + $0x20c] sm:$0xf] }
 0x56a   :  { %5224 = vmatpush.bf16.msrb.mxu0 %v7764_v32  ;;  %5199 = vmatpush.bf16.msra.mxu2 %v8256_v21  ;;  %v8320_v32 = vor.u32 %v9403_v4, %v8319_v46  ;;  %v9329_v21 = vld [vmem:[#allocation4 + $0x2ec] sm:$0xf]  ;;  %v8385_v46 = vld [vmem:[#allocation4 + $0x5b8] sm:$0xf0] }
 0x56b   :  { %5237 = vmatpush.bf16.msrb.mxu1 %v7892_v22  ;;  %5212 = vmatpush.bf16.msra.mxu3 %v8384_v33  ;;  %v8033_v22 = vld [vmem:[#allocation4 + $0x2f8] sm:$0xf0]  ;;  %v9333_v2 = vld [vmem:[#allocation4 + $0x30c] sm:$0xf] }
 0x56c   :  { %v8161_v33 = vld [vmem:[#allocation4 + $0x3f8] sm:$0xf0]  ;;  %v8036_v37 = vor.u32 %v9329_v21, %v8033_v22  ;;  %v9377_v22 = vld [vmem:[#allocation4 + $0x46c] sm:$0xf] }
 0x56d   :  { %v8097_v21 = vld [vmem:[#allocation4 + $0x378] sm:$0xf0] }
 0x56e   :  { %5225 = vmatpush.bf16.msrb.mxu0 %v7748_v35  ;;  %5200 = vmatpush.bf16.msra.mxu2 %v8240_v38  ;;  %v7812_v35 = vor.u32 %v9273_v18, %v7809_v19  ;;  %v9269_v38 = vld [vmem:[#allocation4 + $0x10c] sm:$0xf]  ;;  %v8369_v19 = vld [vmem:[#allocation4 + $0x598] sm:$0xf0] }
 0x56f   :  { %5238 = vmatpush.bf16.msrb.mxu1 %v7876_v40  ;;  %5213 = vmatpush.bf16.msra.mxu3 %v8368_v43  ;;  %v7793_v40 = vld [vmem:[#allocation4 + $0x118] sm:$0xf0]  ;;  %v8164_v43 = vor.u32 %v9361_v29, %v8161_v33  ;;  %v9413_v18 = vld [vmem:[#allocation4 + $0x58c] sm:$0xf] }
 0x570   :  { %v7796_v54 = vor.u32 %v9269_v38, %v7793_v40  ;;  %v8225_v29 = vld [vmem:[#allocation4 + $0x478] sm:$0xf0]  ;;  %v8372_v33 = vor.u32 %v9413_v18, %v8369_v19 }
 0x571   :  { %v8081_v38 = vld [vmem:[#allocation4 + $0x358] sm:$0xf0] }
 0x572   :  { %5226 = vmatpush.bf16.msrb.mxu0 %v7732_v39  ;;  %5201 = vmatpush.bf16.msra.mxu2 %v8224_v50  ;;  %v8417_v39 = vld [vmem:[#allocation4 + $0x5f8] sm:$0xf0]  ;;  %v9389_v50 = vld [vmem:[#allocation4 + $0x4cc] sm:$0xf] }
 0x573   :  { %5239 = vmatpush.bf16.msrb.mxu1 %v7860_v55  ;;  %5214 = vmatpush.bf16.msra.mxu3 %v8352_v57  ;;  %v8273_v55 = vld [vmem:[#allocation4 + $0x4d8] sm:$0xf0]  ;;  %v8420_v57 = vor.u32 %v9425_v48, %v8417_v39  ;;  %v8356_v39 = vor.u32 %v9409_v34, %v8353_v36 }
 0x574   :  { %v8276_v59 = vor.u32 %v9389_v50, %v8273_v55  ;;  %v8337_v50 = vld [vmem:[#allocation4 + $0x558] sm:$0xf0] }
 0x575   :  { %v8193_v16 = vld [vmem:[#allocation4 + $0x438] sm:$0xf0] }
 0x576   :  { %5227 = vmatpush.bf16.msrb.mxu0 %v7716_v58  ;;  %5202 = vmatpush.bf16.msra.mxu2 %v8208_v61  ;;  %v9421_v58 = vld [vmem:[#allocation4 + $0x5cc] sm:$0xf] }
 0x577   :  { %5240 = vmatpush.bf16.msrb.mxu1 %v7844_v9  ;;  %5215 = vmatpush.bf16.msra.mxu3 %v8336_v63  ;;  %v9385_v61 = vld [vmem:[#allocation4 + $0x4ac] sm:$0xf]  ;;  %v8257_v9 = vld [vmem:[#allocation4 + $0x4b8] sm:$0xf0]  ;;  %v8404_v63 = vor.u32 %v9421_v58, %v8401_v47 }
 0x578   :  { %v8260_v4 = vor.u32 %v9385_v61, %v8257_v9  ;;  %v7921_v9 = vld [vmem:[#allocation4 + $0x218] sm:$0xf0] }
 0x57a   :  { %5228 = vmatpush.bf16.msrb.mxu0 %v7700_v3  ;;  %5203 = vmatpush.bf16.msra.mxu2 %v8192_v7  ;;  %v9417_v3 = vld [vmem:[#allocation4 + $0x5ac] sm:$0xf] }
 0x57b   :  { %5241 = vmatpush.bf16.msrb.mxu1 %v7828_v8  ;;  %5216 = vmatpush.bf16.msra.mxu3 %v8320_v32  ;;  %v9381_v7 = vld [vmem:[#allocation4 + $0x48c] sm:$0xf]  ;;  %v8241_v8 = vld [vmem:[#allocation4 + $0x498] sm:$0xf0]  ;;  %v8388_v13 = vor.u32 %v9417_v3, %v8385_v46  ;;  %v8116_v32 = vor.u32 %v9349_v5, %v8113_v6 }
 0x57c   :  { %v8049_v3 = vld [vmem:[#allocation4 + $0x318] sm:$0xf0] }
 0x57d   :  { %v8177_v5 = vld [vmem:[#allocation4 + $0x418] sm:$0xf0] }
 0x57e   :  { %5229 = vmatpush.bf16.msrb.mxu0 %v7684_v20  ;;  %5204 = vmatpush.bf16.msra.mxu2 %v8176_v31  ;;  %v9345_v20 = vld [vmem:[#allocation4 + $0x36c] sm:$0xf] }
 0x57f   :  { %5242 = vmatpush.bf16.msrb.mxu1 %v7812_v35  ;;  %5217 = vmatpush.bf16.msra.mxu3 %v8304_v25  ;;  %v8100_v31 = vor.u32 %v9345_v20, %v8097_v21  ;;  %v7953_v35 = vld [vmem:[#allocation4 + $0x258] sm:$0xf0]  ;;  %v8228_v25 = vor.u32 %v9377_v22, %v8225_v29  ;;  %v9634_v21 = vmov 2.0   ;;  %v4022_v22 = vperm.slane %v11770_v28, 1 }
 0x580   :  { %v7956_v48 = vor.u32 %v9309_v30, %v7953_v35  ;;  %9600 = vrcp.f32 %v9634_v21 }
 0x581   :  { %5205 = vmatmul.bf16.vlgmr.msra.gmra.mxu2 %v11735_v1 }
 0x582   :  { %5249 = vmatpush.bf16.msrb.mxu2 %v8036_v37  ;;  %5230 = vmatpush.bf16.msrb.mxu0 %v7668_v44  ;;  %v9341_v37 = vld [vmem:[#allocation4 + $0x34c] sm:$0xf]  ;;  %v5024_v40 = vpop.f32.mrf.mxu0  ;;  %v4021_v44 = vperm.slane %v11770_v28, 0 }
 0x583   :  { %5262 = vmatpush.bf16.msrb.mxu3 %v8164_v43  ;;  %5243 = vmatpush.bf16.msrb.mxu1 %v7796_v54  ;;  %v8209_v43 = vld [vmem:[#allocation4 + $0x458] sm:$0xf0]  ;;  %v8084_v51 = vor.u32 %v9341_v37, %v8081_v38  ;;  %v9405_v54 = vld [vmem:[#allocation4 + $0x54c] sm:$0xf] }
 0x584   :  { %5218 = vmatmul.bf16.vlgmr.msra.gmra.mxu3 %v11745_v12  ;;  %v8212_v55 = vor.u32 %v9373_v41, %v8209_v43  ;;  %v4998_v53 = vpop.f32.mrf.mxu2  ;;  %v8340_v42 = vor.u32 %v9405_v54, %v8337_v50 }
 0x585   :  { %5231 = vmatmul.bf16.vlgmr.msrb.gmra.mxu0 %v11731_v15  ;;  %v8244_v15 = vor.u32 %v9381_v7, %v8241_v8  ;;  %v5037_v45 = vpop.f32.mrf.mxu1  ;;  %v4999_v58 = vadd.f32 %v4998_v53, %v4021_v44  ;;  %v7924_v8 = vor.u32 %v9301_v60, %v7921_v9 }
 0x586   :  { %5275 = vmatpush.bf16.msra.mxu0 %v8292_v49  ;;  %5250 = vmatpush.bf16.msrb.mxu2 %v8020_v56  ;;  %v9305_v49 = vld [vmem:[#allocation4 + $0x22c] sm:$0xf]  ;;  %v9601_v30 = vpop.eup %9600 }
 0x587   :  { %5288 = vmatpush.bf16.msra.mxu1 %v8420_v57  ;;  %5263 = vmatpush.bf16.msrb.mxu3 %v8148_v24  ;;  %v9337_v56 = vld [vmem:[#allocation4 + $0x32c] sm:$0xf]  ;;  %v8065_v57 = vld [vmem:[#allocation4 + $0x338] sm:$0xf0]  ;;  %v5011_v47 = vpop.f32.mrf.mxu3  ;;  %vm5338_vm1 = vweird.f32 %v9601_v30 }
 0x588   :  { %5244 = vmatmul.bf16.vlgmr.msrb.gmra.mxu1 %v11741_v23  ;;  %v7972_v23 = vor.u32 %v9313_v14, %v7969_v26  ;;  %v9369_v24 = vld [vmem:[#allocation4 + $0x42c] sm:$0xf]  ;;  %v8068_v61 = vor.u32 %v9337_v56, %v8065_v57  ;;  %v5012_v0 = vadd.f32 %v5011_v47, %v4999_v58 }
 0x589   :  { %v9397_v14 = vld [vmem:[#allocation4 + $0x50c] sm:$0xf] }
 0x58a   :  { %5276 = vmatpush.bf16.msra.mxu0 %v8276_v59  ;;  %5251 = vmatpush.bf16.msrb.mxu2 %v8004_v62  ;;  %v7940_v59 = vor.u32 %v9305_v49, %v7937_v52  ;;  %v9401_v62 = vld [vmem:[#allocation4 + $0x52c] sm:$0xf]  ;;  %v5026_v46 = vpop.f32.mrf.mxu0  ;;  %v5025_v6 = vadd.f32 %v5024_v40, %v5012_v0 }
 0x58b   :  { %5289 = vmatpush.bf16.msra.mxu1 %v8404_v63  ;;  %5264 = vmatpush.bf16.msrb.mxu3 %v8132_v27  ;;  %v8321_v63 = vld [vmem:[#allocation4 + $0x538] sm:$0xf0]  ;;  %v8196_v27 = vor.u32 %v9369_v24, %v8193_v16 }
 0x58c   :  { %v5038_v26 = vadd.f32 %v5037_v45, %v5025_v6  ;;  %v5000_v19 = vpop.f32.mrf.mxu2 }
 0x58d   :  { %v5039_v7 = vpop.f32.mrf.mxu1 }
 0x58e   :  { %5277 = vmatpush.bf16.msra.mxu0 %v8260_v4  ;;  %5252 = vmatpush.bf16.msrb.mxu2 %v7988_v10  ;;  %v9365_v4 = vld [vmem:[#allocation4 + $0x40c] sm:$0xf]  ;;  %v8324_v10 = vor.u32 %v9401_v62, %v8321_v63 }
 0x58f   :  { %5290 = vmatpush.bf16.msra.mxu1 %v8388_v13  ;;  %5265 = vmatpush.bf16.msrb.mxu3 %v8116_v32  ;;  %v8052_v13 = vor.u32 %v9333_v2, %v8049_v3  ;;  %v8305_v32 = vld [vmem:[#allocation4 + $0x518] sm:$0xf0]  ;;  %v8180_v18 = vor.u32 %v9365_v4, %v8177_v5 }
 0x590   :  { %v8308_v20 = vor.u32 %v9397_v14, %v8305_v32 }
 0x592   :  { %5278 = vmatpush.bf16.msra.mxu0 %v8244_v15  ;;  %5253 = vmatpush.bf16.msrb.mxu2 %v7972_v23  ;;  %v5013_v15 = vpop.f32.mrf.mxu3 }
 0x593   :  { %5291 = vmatpush.bf16.msra.mxu1 %v8372_v33  ;;  %5266 = vmatpush.bf16.msrb.mxu3 %v8100_v31 }
 0x596   :  { %5279 = vmatpush.bf16.msra.mxu0 %v8228_v25  ;;  %5254 = vmatpush.bf16.msrb.mxu2 %v7956_v48  ;;  %v5334_v25 = vmul.f32 2.0, %v9601_v30 }
 0x597   :  { %5292 = vmatpush.bf16.msra.mxu1 %v8356_v39  ;;  %5267 = vmatpush.bf16.msrb.mxu3 %v8084_v51 }
 0x59a   :  { %5280 = vmatpush.bf16.msra.mxu0 %v8212_v55  ;;  %5255 = vmatpush.bf16.msrb.mxu2 %v7940_v59 }
 0x59b   :  { %5293 = vmatpush.bf16.msra.mxu1 %v8340_v42  ;;  %5268 = vmatpush.bf16.msrb.mxu3 %v8068_v61 }
 0x59e   :  { %5281 = vmatpush.bf16.msra.mxu0 %v8196_v27  ;;  %5256 = vmatpush.bf16.msrb.mxu2 %v7924_v8 }
 0x59f   :  { %5294 = vmatpush.bf16.msra.mxu1 %v8324_v10  ;;  %5269 = vmatpush.bf16.msrb.mxu3 %v8052_v13 }
 0x5a1   :  { %5257 = vmatmul.bf16.vlgmr.msrb.gmra.mxu2 %v11733_v17 }
 0x5a2   :  { %5282 = vmatpush.bf16.msra.mxu0 %v8180_v18  ;;  %5270 = vmatmul.bf16.vlgmr.msrb.gmra.mxu3 %v11743_v11  ;;  %v5076_v29 = vpop.f32.mrf.mxu0 }
 0x5a3   :  { %5295 = vmatpush.bf16.msra.mxu1 %v8308_v20  ;;  %v5077_v23 = vadd.f32 %v5076_v29, %v4022_v22 }
 0x5a4   :  { %v5050_v31 = vpop.f32.mrf.mxu2 }
 0x5a5   :  { %5283 = vmatmul.bf16.vlgmr.msra.gmra.mxu0 %v11735_v1  ;;  %v5089_v33 = vpop.f32.mrf.mxu1  ;;  %v5051_v34 = vadd.f32 %v5050_v31, %v5038_v26 }
 0x5a6   :  { %5296 = vmatmul.bf16.vlgmr.msra.gmra.mxu1 %v11745_v12  ;;  %v5090_v35 = vadd.f32 %v5089_v33, %v5077_v23  ;;  %v5335_v12 = vsub.f32 1.0, %v5334_v25 }
 0x5a7   :  { %v5063_v36 = vpop.f32.mrf.mxu3 }
 0x5a8   :  { %v5064_v17 = vadd.f32 %v5063_v36, %v5051_v34  ;;  %v5336_v49 = vmul.f32 %v9601_v30, %v5335_v12 }
 0x5aa   :  { %v5301_v11 = vmax.f32 %v5064_v17, 0.0  ;;  %v5078_v37 = vpop.f32.mrf.mxu0  ;;  %v5337_v55 = vadd.f32 %v9601_v30, %v5336_v49 }
 0x5ac   :  { %v5305_v1 = vsel %vm3794_vm0, %v5301_v11, 0.0  ;;  %v5348_v40 = vrot.slane %v5301_v11, 2  ;;  %v5052_v43 = vpop.f32.mrf.mxu2  ;;  %v11780_v16 = vsel %vm5338_vm1, %v9601_v30, %v5337_v55 }
 0x5ad   :  { %v5091_v38 = vpop.f32.mrf.mxu1  ;;  %v5306_v41 = vrot.slane %v5305_v1, 4 }
 0x5ae   :  { %v5356_v44 = vsel %vm3794_vm0, %v5348_v40, 0.0 }
 0x5af   :  { %v5065_v45 = vpop.f32.mrf.mxu3  ;;  %v5307_v48 = vadd.f32 %v5306_v41, %v5305_v1  ;;  %v5357_v39 = vrot.slane %v5356_v44, 4  ;;  %v4023_v1 = vperm.slane %v11770_v28, 2 }
 0x5b1   :  { %v5308_v51 = vrot.slane %v5307_v48, 2  ;;  %v5358_v52 = vadd.f32 %v5357_v39, %v5356_v44 }
 0x5b3   :  { %v5309_v54 = vadd.f32 %v5308_v51, %v5307_v48  ;;  %v5359_v50 = vrot.slane %v5358_v52, 2 }
 0x5b5   :  { %v5310_v56 = vrot.slane %v5309_v54, 1  ;;  %v5360_v57 = vadd.f32 %v5359_v50, %v5358_v52 }
 0x5b7   :  { %v5311_v53 = vadd.f32 %v5310_v56, %v5309_v54  ;;  %v5361_v24 = vrot.slane %v5360_v57, 1 }
 0x5b9   :  { %v5362_v58 = vadd.f32 %v5361_v24, %v5360_v57  ;;  %v5340_v47 = vmul.f32 %v11780_v16, %v5311_v53 }
 0x5bb   :  { %v5384_v59 = vmul.f32 %v5362_v58, %v11780_v16 }
 0x5bd   :  { %v11785_v42 = vsel %vm5388_vm2, %v5340_v47, %v5384_v59 }
 0x5c2   :  { %v5128_v60 = vpop.f32.mrf.mxu0 }
 0x5c4   :  { %v5102_v9 = vpop.f32.mrf.mxu2 }
 0x5c5   :  { %v5141_v61 = vpop.f32.mrf.mxu1  ;;  %v5103_v62 = vadd.f32 %v5102_v9, %v5090_v35 }
 0x5c7   :  { %v5115_v63 = vpop.f32.mrf.mxu3 }
 0x5c8   :  { %v5116_v0 = vadd.f32 %v5115_v63, %v5103_v62 }
 0x5ca   :  { %v5129_v27 = vadd.f32 %v5128_v60, %v5116_v0  ;;  %v5130_v2 = vpop.f32.mrf.mxu0 }
 0x5cc   :  { %v5142_v46 = vadd.f32 %v5141_v61, %v5129_v27  ;;  %v5104_v4 = vpop.f32.mrf.mxu2 }
 0x5cd   :  { %v5143_v3 = vpop.f32.mrf.mxu1 }
 0x5ce   :  { %v5302_v5 = vmax.f32 %v5142_v46, 0.0  ;;  %v4024_v46 = vperm.slane %v11770_v28, 3 }
 0x5cf   :  { %v5117_v6 = vpop.f32.mrf.mxu3 }
 0x5d0   :  { %v5312_v7 = vsel %vm3794_vm0, %v5302_v5, 0.0  ;;  %v5349_v8 = vrot.slane %v5302_v5, 2 }
 0x5d1   :  { %v5313_v10 = vrot.slane %v5312_v7, 4 }
 0x5d2   :  { %v5363_v13 = vsel %vm3794_vm0, %v5349_v8, 0.0 }
 0x5d3   :  { %v5314_v14 = vadd.f32 %v5313_v10, %v5312_v7  ;;  %v5364_v32 = vrot.slane %v5363_v13, 4 }
 0x5d5   :  { %v5315_v26 = vrot.slane %v5314_v14, 2  ;;  %v5365_v18 = vadd.f32 %v5364_v32, %v5363_v13 }
 0x5d7   :  { %v5316_v19 = vadd.f32 %v5315_v26, %v5314_v14  ;;  %v5366_v15 = vrot.slane %v5365_v18, 2 }
 0x5d9   :  { %v5317_v20 = vrot.slane %v5316_v19, 1  ;;  %v5367_v21 = vadd.f32 %v5366_v15, %v5365_v18 }
 0x5db   :  { %v5318_v22 = vadd.f32 %v5317_v20, %v5316_v19  ;;  %v5368_v29 = vrot.slane %v5367_v21, 1 }
 0x5dd   :  { %v5369_v23 = vadd.f32 %v5368_v29, %v5367_v21  ;;  %v5341_v33 = vmul.f32 %v11780_v16, %v5318_v22 }
 0x5df   :  { %v5385_v30 = vmul.f32 %v5369_v23, %v11780_v16 }
 0x5e1   :  { %v11792_v34 = vsel %vm5388_vm2, %v5341_v33, %v5385_v30 }
 0x5e2   :  { %v5180_v31 = vpop.f32.mrf.mxu0 }
 0x5e4   :  { %v5154_v36 = vpop.f32.mrf.mxu2 }
 0x5e5   :  { %v5193_v35 = vpop.f32.mrf.mxu1  ;;  %v5155_v12 = vadd.f32 %v5154_v36, %v4023_v1 }
 0x5e7   :  { %v5167_v17 = vpop.f32.mrf.mxu3 }
 0x5e8   :  { %v5168_v40 = vadd.f32 %v5167_v17, %v5155_v12 }
 0x5ea   :  { %v5182_v25 = vpop.f32.mrf.mxu0  ;;  %v5181_v41 = vadd.f32 %v5180_v31, %v5168_v40 }
 0x5ec   :  { %v5156_v37 = vpop.f32.mrf.mxu2  ;;  %v5194_v43 = vadd.f32 %v5193_v35, %v5181_v41 }
 0x5ed   :  { %v5195_v11 = vpop.f32.mrf.mxu1 }
 0x5ef   :  { %v5169_v38 = vpop.f32.mrf.mxu3 }
 0x602   :  { %v5232_v44 = vpop.f32.mrf.mxu0 }
 0x603   :  { %v5233_v7 = vadd.f32 %v5232_v44, %v4024_v46 }
 0x604   :  { %v5206_v48 = vpop.f32.mrf.mxu2 }
 0x605   :  { %v5245_v45 = vpop.f32.mrf.mxu1  ;;  %v5207_v39 = vadd.f32 %v5206_v48, %v5194_v43 }
 0x606   :  { %v5246_v13 = vadd.f32 %v5245_v45, %v5233_v7 }
 0x607   :  { %v5219_v49 = vpop.f32.mrf.mxu3 }
 0x608   :  { %v5220_v51 = vadd.f32 %v5219_v49, %v5207_v39 }
 0x60a   :  { %v5303_v52 = vmax.f32 %v5220_v51, 0.0  ;;  %v5234_v54 = vpop.f32.mrf.mxu0 }
 0x60c   :  { %v5319_v55 = vsel %vm3794_vm0, %v5303_v52, 0.0  ;;  %v5350_v56 = vrot.slane %v5303_v52, 2  ;;  %v5208_v53 = vpop.f32.mrf.mxu2 }
 0x60d   :  { %v5247_v50 = vpop.f32.mrf.mxu1  ;;  %v5320_v57 = vrot.slane %v5319_v55, 4 }
 0x60e   :  { %v5370_v24 = vsel %vm3794_vm0, %v5350_v56, 0.0 }
 0x60f   :  { %v5221_v58 = vpop.f32.mrf.mxu3  ;;  %v5321_v47 = vadd.f32 %v5320_v57, %v5319_v55  ;;  %v5371_v59 = vrot.slane %v5370_v24, 4 }
 0x611   :  { %v5322_v60 = vrot.slane %v5321_v47, 2  ;;  %v5372_v61 = vadd.f32 %v5371_v59, %v5370_v24 }
 0x613   :  { %v5323_v9 = vadd.f32 %v5322_v60, %v5321_v47  ;;  %v5373_v62 = vrot.slane %v5372_v61, 2 }
 0x615   :  { %v5324_v63 = vrot.slane %v5323_v9, 1  ;;  %v5374_v0 = vadd.f32 %v5373_v62, %v5372_v61 }
 0x617   :  { %v5325_v27 = vadd.f32 %v5324_v63, %v5323_v9  ;;  %v5375_v2 = vrot.slane %v5374_v0, 1 }
 0x619   :  { %v5376_v3 = vadd.f32 %v5375_v2, %v5374_v0  ;;  %v5342_v4 = vmul.f32 %v11780_v16, %v5325_v27 }
 0x61b   :  { %v5386_v5 = vmul.f32 %v5376_v3, %v11780_v16 }
 0x61d   :  { %v11801_v6 = vsel %vm5388_vm2, %v5342_v4, %v5386_v5 }
 0x622   :  { %v5284_v8 = vpop.f32.mrf.mxu0 }
 0x623   :  { %v5297_v10 = vpop.f32.mrf.mxu1 }
 0x624   :  { %v5258_v14 = vpop.f32.mrf.mxu2 }
 0x625   :  { %v5259_v32 = vadd.f32 %v5258_v14, %v5246_v13  ;;  %v5271_v26 = vpop.f32.mrf.mxu3 }
 0x627   :  { %v5272_v18 = vadd.f32 %v5271_v26, %v5259_v32 }
 0x629   :  { %v5285_v15 = vadd.f32 %v5284_v8, %v5272_v18 }
 0x62a   :  { %v5286_v19 = vpop.f32.mrf.mxu0 }
 0x62b   :  { %v5299_v20 = vpop.f32.mrf.mxu1  ;;  %v5298_v21 = vadd.f32 %v5297_v10, %v5285_v15 }
 0x62c   :  { %v5260_v28 = vpop.f32.mrf.mxu2 }
 0x62d   :  { %v5304_v22 = vmax.f32 %v5298_v21, 0.0  ;;  %v5273_v29 = vpop.f32.mrf.mxu3 }
 0x62f   :  { %v5326_v23 = vsel %vm3794_vm0, %v5304_v22, 0.0  ;;  %v5351_v33 = vrot.slane %v5304_v22, 2 }
 0x630   :  { %v5327_v30 = vrot.slane %v5326_v23, 4 }
 0x631   :  { %v5377_v31 = vsel %vm3794_vm0, %v5351_v33, 0.0 }
 0x632   :  { %v5328_v35 = vadd.f32 %v5327_v30, %v5326_v23  ;;  %v5378_v36 = vrot.slane %v5377_v31, 4 }
 0x634   :  { %v5329_v17 = vrot.slane %v5328_v35, 2  ;;  %v5379_v25 = vadd.f32 %v5378_v36, %v5377_v31 }
 0x636   :  { %v5330_v11 = vadd.f32 %v5329_v17, %v5328_v35  ;;  %v5380_v37 = vrot.slane %v5379_v25, 2 }
 0x638   :  { %v5331_v38 = vrot.slane %v5330_v11, 1  ;;  %v5381_v1 = vadd.f32 %v5380_v37, %v5379_v25 }
 0x63a   :  { %v5332_v12 = vadd.f32 %v5331_v38, %v5330_v11  ;;  %v5382_v40 = vrot.slane %v5381_v1, 1 }
 0x63c   :  { %v5383_v41 = vadd.f32 %v5382_v40, %v5381_v1  ;;  %v5343_v43 = vmul.f32 %v11780_v16, %v5332_v12 }
 0x63e   :  { %v5387_v44 = vmul.f32 %v5383_v41, %v11780_v16 }
 0x640   :  { %v11808_v45 = vsel %vm5388_vm2, %v5343_v43, %v5387_v44 }
 0x641   :  { %9630 = dma.done.wait [#allocation6 + $0x2], 16384 }
 0x642   :  { %9631 = vsyncadd [#allocation6 + $0x2], 4294950912  ;;  %v8535_v48 = vld [vmem:[#allocation5 + $0xe0] sm:$0xf]  ;;  %v9458_v39 = vld [vmem:[#allocation5 + $0xec] sm:$0xf0] }
 0x643   :  { %v8663_v49 = vld [vmem:[#allocation5 + $0x1e0] sm:$0xf]  ;;  %v8536_v51 = vor.u32 %v9458_v39, %v8535_v48  ;;  %v9490_v52 = vld [vmem:[#allocation5 + $0x1ec] sm:$0xf0]  ;;  %vm6399_vm3 = vcmask 1045508   ;;  %s6412_s30 = sshll.u32 %s11858_s9, 4  ;;  %s6413_s30 = int_to_ptr.hbm [resolvable:$true] %s6412_s30 }
 0x644   :  { %v8791_v54 = vld [vmem:[#allocation5 + $0x2e0] sm:$0xf]  ;;  %v9522_v50 = vld [vmem:[#allocation5 + $0x2ec] sm:$0xf0]  ;;  %v8664_v55 = vor.u32 %v9490_v52, %v8663_v49  ;;  %vm6401_vm4 = vcmask 1043456  }
 0x645   :  { %v8792_v56 = vor.u32 %v9522_v50, %v8791_v54  ;;  %v8519_v57 = vld [vmem:[#allocation5 + $0xc0] sm:$0xf]  ;;  %v9454_v53 = vld [vmem:[#allocation5 + $0xcc] sm:$0xf0]  ;;  %6183 = vmatpush.bf16.msra.mxu2 %v8536_v51 }
 0x646   :  { %v8647_v24 = vld [vmem:[#allocation5 + $0x1c0] sm:$0xf]  ;;  %v8520_v58 = vor.u32 %v9454_v53, %v8519_v57  ;;  %v9486_v16 = vld [vmem:[#allocation5 + $0x1cc] sm:$0xf0]  ;;  %6196 = vmatpush.bf16.msra.mxu3 %v8664_v55 }
 0x647   :  { %v8919_v47 = vld [vmem:[#allocation5 + $0x3e0] sm:$0xf]  ;;  %v9554_v59 = vld [vmem:[#allocation5 + $0x3ec] sm:$0xf0]  ;;  %6209 = vmatpush.bf16.msrb.mxu0 %v8792_v56  ;;  %v8648_v60 = vor.u32 %v9486_v16, %v8647_v24 }
 0x648   :  { %v8920_v61 = vor.u32 %v9554_v59, %v8919_v47  ;;  %v8775_v9 = vld [vmem:[#allocation5 + $0x2c0] sm:$0xf]  ;;  %v9518_v62 = vld [vmem:[#allocation5 + $0x2cc] sm:$0xf0] }
 0x649   :  { %v8503_v63 = vld [vmem:[#allocation5 + $0xa0] sm:$0xf]  ;;  %v8776_v0 = vor.u32 %v9518_v62, %v8775_v9  ;;  %v9450_v27 = vld [vmem:[#allocation5 + $0xac] sm:$0xf0]  ;;  %6184 = vmatpush.bf16.msra.mxu2 %v8520_v58 }
 0x64a   :  { %v8631_v2 = vld [vmem:[#allocation5 + $0x1a0] sm:$0xf]  ;;  %v9482_v3 = vld [vmem:[#allocation5 + $0x1ac] sm:$0xf0]  ;;  %6222 = vmatpush.bf16.msrb.mxu1 %v8920_v61  ;;  %v8504_v7 = vor.u32 %v9450_v27, %v8503_v63  ;;  %6197 = vmatpush.bf16.msra.mxu3 %v8648_v60 }
 0x64b   :  { %v8903_v46 = vld [vmem:[#allocation5 + $0x3c0] sm:$0xf]  ;;  %v9550_v4 = vld [vmem:[#allocation5 + $0x3cc] sm:$0xf0]  ;;  %6210 = vmatpush.bf16.msrb.mxu0 %v8776_v0  ;;  %v8632_v32 = vor.u32 %v9482_v3, %v8631_v2 }
 0x64c   :  { %v8759_v5 = vld [vmem:[#allocation5 + $0x2a0] sm:$0xf]  ;;  %v8904_v8 = vor.u32 %v9550_v4, %v8903_v46  ;;  %v9514_v10 = vld [vmem:[#allocation5 + $0x2ac] sm:$0xf0] }
 0x64d   :  { %v8487_v13 = vld [vmem:[#allocation5 + $0x80] sm:$0xf]  ;;  %v9446_v14 = vld [vmem:[#allocation5 + $0x8c] sm:$0xf0]  ;;  %v8760_v26 = vor.u32 %v9514_v10, %v8759_v5  ;;  %6185 = vmatpush.bf16.msra.mxu2 %v8504_v7  ;;  %v9456_v5 = vld [vmem:[#allocation5 + $0xe4] sm:$0xf] }
 0x64e   :  { %v8615_v18 = vld [vmem:[#allocation5 + $0x180] sm:$0xf]  ;;  %v9478_v19 = vld [vmem:[#allocation5 + $0x18c] sm:$0xf0]  ;;  %6223 = vmatpush.bf16.msrb.mxu1 %v8904_v8  ;;  %v8488_v29 = vor.u32 %v9446_v14, %v8487_v13  ;;  %6198 = vmatpush.bf16.msra.mxu3 %v8632_v32  ;;  %v8537_v7 = vld [vmem:[#allocation5 + $0xf0] sm:$0xf0] }
 0x64f   :  { %v8887_v15 = vld [vmem:[#allocation5 + $0x3a0] sm:$0xf]  ;;  %v9546_v20 = vld [vmem:[#allocation5 + $0x3ac] sm:$0xf0]  ;;  %6211 = vmatpush.bf16.msrb.mxu0 %v8760_v26  ;;  %v8616_v30 = vor.u32 %v9478_v19, %v8615_v18  ;;  %v9488_v8 = vld [vmem:[#allocation5 + $0x1e4] sm:$0xf] }
 0x650   :  { %v8743_v21 = vld [vmem:[#allocation5 + $0x280] sm:$0xf]  ;;  %v9510_v28 = vld [vmem:[#allocation5 + $0x28c] sm:$0xf0]  ;;  %v8888_v22 = vor.u32 %v9546_v20, %v8887_v15  ;;  %v8665_v10 = vld [vmem:[#allocation5 + $0x1f0] sm:$0xf0] }
 0x651   :  { %v8871_v23 = vld [vmem:[#allocation5 + $0x380] sm:$0xf]  ;;  %v9542_v33 = vld [vmem:[#allocation5 + $0x38c] sm:$0xf0]  ;;  %v8744_v31 = vor.u32 %v9510_v28, %v8743_v21  ;;  %6186 = vmatpush.bf16.msra.mxu2 %v8488_v29  ;;  %v9520_v26 = vld [vmem:[#allocation5 + $0x2e4] sm:$0xf]  ;;  %v8540_v28 = vor.u32 %v9456_v5, %v8537_v7 }
 0x652   :  { %v8471_v35 = vld [vmem:[#allocation5 + $0x60] sm:$0xf]  ;;  %v9442_v36 = vld [vmem:[#allocation5 + $0x6c] sm:$0xf0]  ;;  %6224 = vmatpush.bf16.msrb.mxu1 %v8888_v22  ;;  %v8872_v38 = vor.u32 %v9542_v33, %v8871_v23  ;;  %6199 = vmatpush.bf16.msra.mxu3 %v8616_v30  ;;  %v8793_v19 = vld [vmem:[#allocation5 + $0x2f0] sm:$0xf0]  ;;  %v8668_v23 = vor.u32 %v9488_v8, %v8665_v10 }
 0x653   :  { %v8599_v17 = vld [vmem:[#allocation5 + $0x160] sm:$0xf]  ;;  %v9474_v25 = vld [vmem:[#allocation5 + $0x16c] sm:$0xf0]  ;;  %v8472_v1 = vor.u32 %v9442_v36, %v8471_v35  ;;  %6212 = vmatpush.bf16.msrb.mxu0 %v8744_v31  ;;  %v9552_v22 = vld [vmem:[#allocation5 + $0x3e4] sm:$0xf]  ;;  %v8796_v35 = vor.u32 %v9520_v26, %v8793_v19 }
 0x654   :  { %v8727_v11 = vld [vmem:[#allocation5 + $0x260] sm:$0xf]  ;;  %v9506_v37 = vld [vmem:[#allocation5 + $0x26c] sm:$0xf0]  ;;  %v8600_v41 = vor.u32 %v9474_v25, %v8599_v17  ;;  %v8921_v29 = vld [vmem:[#allocation5 + $0x3f0] sm:$0xf0] }
 0x655   :  { %v8855_v12 = vld [vmem:[#allocation5 + $0x360] sm:$0xf]  ;;  %v9538_v40 = vld [vmem:[#allocation5 + $0x36c] sm:$0xf0]  ;;  %v8728_v43 = vor.u32 %v9506_v37, %v8727_v11  ;;  %6187 = vmatpush.bf16.msra.mxu2 %v8472_v1  ;;  %v9452_v30 = vld [vmem:[#allocation5 + $0xc4] sm:$0xf]  ;;  %v8924_v11 = vor.u32 %v9552_v22, %v8921_v29  ;;  %v11812_v1 = vpack.c.bf16 %v11785_v42, %v11785_v42 }
 0x656   :  { %v8455_v44 = vld [vmem:[#allocation5 + $0x40] sm:$0xf]  ;;  %v9438_v48 = vld [vmem:[#allocation5 + $0x4c] sm:$0xf0]  ;;  %6225 = vmatpush.bf16.msrb.mxu1 %v8872_v38  ;;  %v8856_v54 = vor.u32 %v9538_v40, %v8855_v12  ;;  %6200 = vmatpush.bf16.msra.mxu3 %v8600_v41  ;;  %v8521_v31 = vld [vmem:[#allocation5 + $0xd0] sm:$0xf0] }
 0x657   :  { %v8583_v39 = vld [vmem:[#allocation5 + $0x140] sm:$0xf]  ;;  %v9470_v49 = vld [vmem:[#allocation5 + $0x14c] sm:$0xf0]  ;;  %v8456_v50 = vor.u32 %v9438_v48, %v8455_v44  ;;  %6213 = vmatpush.bf16.msrb.mxu0 %v8728_v43  ;;  %v9484_v17 = vld [vmem:[#allocation5 + $0x1c4] sm:$0xf]  ;;  %v8524_v12 = vor.u32 %v9452_v30, %v8521_v31  ;;  %v11816_v43 = vpack.c.bf16 %v11792_v34, %v11792_v34 }
 0x658   :  { %v8711_v51 = vld [vmem:[#allocation5 + $0x240] sm:$0xf]  ;;  %v9502_v52 = vld [vmem:[#allocation5 + $0x24c] sm:$0xf0]  ;;  %v8584_v57 = vor.u32 %v9470_v49, %v8583_v39  ;;  %v8649_v25 = vld [vmem:[#allocation5 + $0x1d0] sm:$0xf0]  ;;  %v11820_v49 = vpack.c.bf16 %v11801_v6, %v11801_v6 }
 0x659   :  { %v8839_v55 = vld [vmem:[#allocation5 + $0x340] sm:$0xf]  ;;  %v9534_v56 = vld [vmem:[#allocation5 + $0x34c] sm:$0xf0]  ;;  %v8712_v53 = vor.u32 %v9502_v52, %v8711_v51  ;;  %6188 = vmatpush.bf16.msra.mxu2 %v8456_v50  ;;  %v9516_v37 = vld [vmem:[#allocation5 + $0x2c4] sm:$0xf]  ;;  %v8652_v44 = vor.u32 %v9484_v17, %v8649_v25 }
 0x65a   :  { %v8439_v24 = vld [vmem:[#allocation5 + $0x20] sm:$0xf]  ;;  %v9434_v58 = vld [vmem:[#allocation5 + $0x2c] sm:$0xf0]  ;;  %6226 = vmatpush.bf16.msrb.mxu1 %v8856_v54  ;;  %v8840_v61 = vor.u32 %v9534_v56, %v8839_v55  ;;  %6201 = vmatpush.bf16.msra.mxu3 %v8584_v57  ;;  %v8777_v38 = vld [vmem:[#allocation5 + $0x2d0] sm:$0xf0]  ;;  %v11824_v54 = vpack.c.bf16 %v11808_v45, %v11808_v45 }
 0x65b   :  { %v8567_v16 = vld [vmem:[#allocation5 + $0x120] sm:$0xf]  ;;  %v9466_v47 = vld [vmem:[#allocation5 + $0x12c] sm:$0xf0]  ;;  %v8440_v62 = vor.u32 %v9434_v58, %v8439_v24  ;;  %6214 = vmatpush.bf16.msrb.mxu0 %v8712_v53  ;;  %v9548_v40 = vld [vmem:[#allocation5 + $0x3c4] sm:$0xf]  ;;  %v8780_v42 = vor.u32 %v9516_v37, %v8777_v38 }
 0x65c   :  { %v8695_v59 = vld [vmem:[#allocation5 + $0x220] sm:$0xf]  ;;  %v9498_v60 = vld [vmem:[#allocation5 + $0x22c] sm:$0xf0]  ;;  %v8568_v2 = vor.u32 %v9466_v47, %v8567_v16  ;;  %v8905_v41 = vld [vmem:[#allocation5 + $0x3d0] sm:$0xf0] }
 0x65d   :  { %v8423_v9 = vld [vmem:[#allocation5] sm:$0xf]  ;;  %v9430_v63 = vld [vmem:[#allocation5 + $0xc] sm:$0xf0]  ;;  %v8696_v3 = vor.u32 %v9498_v60, %v8695_v59  ;;  %6189 = vmatpush.bf16.msra.mxu2 %v8440_v62  ;;  %v9448_v48 = vld [vmem:[#allocation5 + $0xa4] sm:$0xf]  ;;  %v8908_v34 = vor.u32 %v9548_v40, %v8905_v41 }
 0x65e   :  { %v8823_v0 = vld [vmem:[#allocation5 + $0x320] sm:$0xf]  ;;  %v9530_v27 = vld [vmem:[#allocation5 + $0x32c] sm:$0xf0]  ;;  %6227 = vmatpush.bf16.msrb.mxu1 %v8840_v61  ;;  %v8424_v18 = vor.u32 %v9430_v63, %v8423_v9  ;;  %6202 = vmatpush.bf16.msra.mxu3 %v8568_v2  ;;  %v8505_v39 = vld [vmem:[#allocation5 + $0xb0] sm:$0xf0] }
 0x65f   :  { %v8551_v46 = vld [vmem:[#allocation5 + $0x100] sm:$0xf]  ;;  %v9462_v4 = vld [vmem:[#allocation5 + $0x10c] sm:$0xf0]  ;;  %v8824_v13 = vor.u32 %v9530_v27, %v8823_v0  ;;  %6215 = vmatpush.bf16.msrb.mxu0 %v8696_v3  ;;  %v9480_v51 = vld [vmem:[#allocation5 + $0x1a4] sm:$0xf]  ;;  %v8508_v56 = vor.u32 %v9448_v48, %v8505_v39 }
 0x660   :  { %v8679_v14 = vld [vmem:[#allocation5 + $0x200] sm:$0xf]  ;;  %v9494_v32 = vld [vmem:[#allocation5 + $0x20c] sm:$0xf0]  ;;  %v8552_v21 = vor.u32 %v9462_v4, %v8551_v46  ;;  %v8633_v52 = vld [vmem:[#allocation5 + $0x1b0] sm:$0xf0] }
 0x661   :  { %v8807_v15 = vld [vmem:[#allocation5 + $0x300] sm:$0xf]  ;;  %v9526_v20 = vld [vmem:[#allocation5 + $0x30c] sm:$0xf0]  ;;  %v8680_v33 = vor.u32 %v9494_v32, %v8679_v14  ;;  %6190 = vmatpush.bf16.msra.mxu2 %v8424_v18  ;;  %v9512_v50 = vld [vmem:[#allocation5 + $0x2a4] sm:$0xf]  ;;  %v8636_v53 = vor.u32 %v9480_v51, %v8633_v52 }
 0x662   :  { %6228 = vmatpush.bf16.msrb.mxu1 %v8824_v13  ;;  %v8808_v36 = vor.u32 %v9526_v20, %v8807_v15  ;;  %6203 = vmatpush.bf16.msra.mxu3 %v8552_v21  ;;  %v8761_v55 = vld [vmem:[#allocation5 + $0x2b0] sm:$0xf0]  ;;  %v9544_v57 = vld [vmem:[#allocation5 + $0x3a4] sm:$0xf] }
 0x663   :  { %6216 = vmatpush.bf16.msrb.mxu0 %v8680_v33  ;;  %v8889_v6 = vld [vmem:[#allocation5 + $0x3b0] sm:$0xf0]  ;;  %v9444_v24 = vld [vmem:[#allocation5 + $0x84] sm:$0xf]  ;;  %v8764_v45 = vor.u32 %v9512_v50, %v8761_v55  ;;  %v9459_v50 = vld [vmem:[#allocation5 + $0xf4] sm:$0xf0] }
 0x664   :  { %6191 = vmatmul.bf16.vlgmr.msra.gmra.mxu2 %v11812_v1  ;;  %v8489_v58 = vld [vmem:[#allocation5 + $0x90] sm:$0xf0]  ;;  %v9476_v16 = vld [vmem:[#allocation5 + $0x184] sm:$0xf]  ;;  %v8892_v59 = vor.u32 %v9544_v57, %v8889_v6  ;;  %v8671_v55 = vld [vmem:[#allocation5 + $0x1e8] sm:$0xf] }
 0x665   :  { %6235 = vmatpush.bf16.msrb.mxu2 %v8540_v28  ;;  %6204 = vmatmul.bf16.vlgmr.msra.gmra.mxu3 %v11816_v43  ;;  %v8617_v47 = vld [vmem:[#allocation5 + $0x190] sm:$0xf0]  ;;  %v9508_v60 = vld [vmem:[#allocation5 + $0x284] sm:$0xf]  ;;  %v8492_v9 = vor.u32 %v9444_v24, %v8489_v58  ;;  %v9491_v57 = vld [vmem:[#allocation5 + $0x1f4] sm:$0xf0] }
 0x666   :  { %6248 = vmatpush.bf16.msrb.mxu3 %v8668_v23  ;;  %6229 = vmatpush.bf16.msrb.mxu1 %v8808_v36  ;;  %v8745_v61 = vld [vmem:[#allocation5 + $0x290] sm:$0xf0]  ;;  %v9540_v62 = vld [vmem:[#allocation5 + $0x384] sm:$0xf]  ;;  %v8620_v0 = vor.u32 %v9476_v16, %v8617_v47  ;;  %v8799_v58 = vld [vmem:[#allocation5 + $0x2e8] sm:$0xf] }
 0x667   :  { %6261 = vmatpush.bf16.msra.mxu0 %v8796_v35  ;;  %v8873_v63 = vld [vmem:[#allocation5 + $0x390] sm:$0xf0]  ;;  %v9440_v27 = vld [vmem:[#allocation5 + $0x64] sm:$0xf]  ;;  %v8748_v3 = vor.u32 %v9508_v60, %v8745_v61  ;;  %v8527_v61 = vld [vmem:[#allocation5 + $0xc8] sm:$0xf] }
 0x668   :  { %6217 = vmatmul.bf16.vlgmr.msrb.gmra.mxu0 %v11820_v49  ;;  %v8473_v2 = vld [vmem:[#allocation5 + $0x70] sm:$0xf0]  ;;  %v9472_v46 = vld [vmem:[#allocation5 + $0x164] sm:$0xf]  ;;  %v8876_v5 = vor.u32 %v9540_v62, %v8873_v63  ;;  %v9455_v63 = vld [vmem:[#allocation5 + $0xd4] sm:$0xf0] }
 0x669   :  { %6236 = vmatpush.bf16.msrb.mxu2 %v8524_v12  ;;  %6230 = vmatmul.bf16.vlgmr.msrb.gmra.mxu1 %v11824_v54  ;;  %v8601_v4 = vld [vmem:[#allocation5 + $0x170] sm:$0xf0]  ;;  %v9504_v7 = vld [vmem:[#allocation5 + $0x264] sm:$0xf]  ;;  %v8476_v10 = vor.u32 %v9440_v27, %v8473_v2  ;;  %v9555_v27 = vld [vmem:[#allocation5 + $0x3f4] sm:$0xf0] }
 0x66a   :  { %6274 = vmatpush.bf16.msra.mxu1 %v8924_v11  ;;  %6249 = vmatpush.bf16.msrb.mxu3 %v8652_v44  ;;  %v8729_v8 = vld [vmem:[#allocation5 + $0x270] sm:$0xf0]  ;;  %v9536_v13 = vld [vmem:[#allocation5 + $0x364] sm:$0xf]  ;;  %v8604_v32 = vor.u32 %v9472_v46, %v8601_v4  ;;  %v9487_v46 = vld [vmem:[#allocation5 + $0x1d4] sm:$0xf0] }
 0x66b   :  { %6262 = vmatpush.bf16.msra.mxu0 %v8780_v42  ;;  %v8857_v14 = vld [vmem:[#allocation5 + $0x370] sm:$0xf0]  ;;  %v9436_v26 = vld [vmem:[#allocation5 + $0x44] sm:$0xf]  ;;  %v8732_v19 = vor.u32 %v9504_v7, %v8729_v8  ;;  %v9519_v7 = vld [vmem:[#allocation5 + $0x2d4] sm:$0xf0]  ;;  %v8528_v8 = vor.u32 %v9455_v63, %v8527_v61 }
 0x66c   :  { %v8457_v18 = vld [vmem:[#allocation5 + $0x50] sm:$0xf0]  ;;  %v9468_v15 = vld [vmem:[#allocation5 + $0x144] sm:$0xf]  ;;  %v8860_v21 = vor.u32 %v9536_v13, %v8857_v14  ;;  %v8511_v13 = vld [vmem:[#allocation5 + $0xa8] sm:$0xf] }
 0x66d   :  { %6237 = vmatpush.bf16.msrb.mxu2 %v8508_v56  ;;  %v8585_v20 = vld [vmem:[#allocation5 + $0x150] sm:$0xf0]  ;;  %v9500_v28 = vld [vmem:[#allocation5 + $0x244] sm:$0xf]  ;;  %v8460_v29 = vor.u32 %v9436_v26, %v8457_v18  ;;  %v8911_v26 = vld [vmem:[#allocation5 + $0x3c8] sm:$0xf] }
 0x66e   :  { %6275 = vmatpush.bf16.msra.mxu1 %v8908_v34  ;;  %6250 = vmatpush.bf16.msrb.mxu3 %v8636_v53  ;;  %v8713_v22 = vld [vmem:[#allocation5 + $0x250] sm:$0xf0]  ;;  %v9532_v23 = vld [vmem:[#allocation5 + $0x344] sm:$0xf]  ;;  %v8588_v30 = vor.u32 %v9468_v15, %v8585_v20  ;;  %v8543_v34 = vld [vmem:[#allocation5 + $0xe8] sm:$0xf] }
 0x66f   :  { %6263 = vmatpush.bf16.msra.mxu0 %v8764_v45  ;;  %v8841_v33 = vld [vmem:[#allocation5 + $0x350] sm:$0xf0]  ;;  %v9432_v31 = vld [vmem:[#allocation5 + $0x24] sm:$0xf]  ;;  %v8716_v36 = vor.u32 %v9500_v28, %v8713_v22  ;;  %v9523_v45 = vld [vmem:[#allocation5 + $0x2f4] sm:$0xf0]  ;;  %v8544_v47 = vor.u32 %v9459_v50, %v8543_v34 }
 0x670   :  { %v8441_v35 = vld [vmem:[#allocation5 + $0x30] sm:$0xf0]  ;;  %v9464_v17 = vld [vmem:[#allocation5 + $0x124] sm:$0xf]  ;;  %v8844_v11 = vor.u32 %v9532_v23, %v8841_v33  ;;  %v8800_v2 = vor.u32 %v9523_v45, %v8799_v58  ;;  %v9551_v18 = vld [vmem:[#allocation5 + $0x3d4] sm:$0xf0] }
 0x671   :  { %6238 = vmatpush.bf16.msrb.mxu2 %v8492_v9  ;;  %v8569_v25 = vld [vmem:[#allocation5 + $0x130] sm:$0xf0]  ;;  %v9496_v37 = vld [vmem:[#allocation5 + $0x224] sm:$0xf]  ;;  %v8444_v12 = vor.u32 %v9432_v31, %v8441_v35  ;;  %v8672_v9 = vor.u32 %v9491_v57, %v8671_v55  ;;  %v8639_v15 = vld [vmem:[#allocation5 + $0x1a8] sm:$0xf] }
 0x672   :  { %6276 = vmatpush.bf16.msra.mxu1 %v8892_v59  ;;  %6251 = vmatpush.bf16.msrb.mxu3 %v8620_v0  ;;  %v8697_v38 = vld [vmem:[#allocation5 + $0x230] sm:$0xf0]  ;;  %v9428_v40 = vld [vmem:[#allocation5 + $0x4] sm:$0xf]  ;;  %v8572_v48 = vor.u32 %v9464_v17, %v8569_v25  ;;  %v8927_v0 = vld [vmem:[#allocation5 + $0x3e8] sm:$0xf] }
 0x673   :  { %6264 = vmatpush.bf16.msra.mxu0 %v8748_v3  ;;  %v9528_v41 = vld [vmem:[#allocation5 + $0x324] sm:$0xf]  ;;  %v8825_v44 = vld [vmem:[#allocation5 + $0x330] sm:$0xf0]  ;;  %v8700_v52 = vor.u32 %v9496_v37, %v8697_v38  ;;  %v8655_v3 = vld [vmem:[#allocation5 + $0x1c8] sm:$0xf] }
 0x674   :  { %v8425_v39 = vld [vmem:[#allocation5 + $0x10] sm:$0xf0]  ;;  %v9460_v42 = vld [vmem:[#allocation5 + $0x104] sm:$0xf]  ;;  %v8828_v56 = vor.u32 %v9528_v41, %v8825_v44  ;;  %v8656_v14 = vor.u32 %v9487_v46, %v8655_v3  ;;  %v9483_v20 = vld [vmem:[#allocation5 + $0x1b4] sm:$0xf0] }
 0x675   :  { %6239 = vmatpush.bf16.msrb.mxu2 %v8476_v10  ;;  %v8553_v51 = vld [vmem:[#allocation5 + $0x110] sm:$0xf0]  ;;  %v9492_v6 = vld [vmem:[#allocation5 + $0x204] sm:$0xf]  ;;  %v8428_v24 = vor.u32 %v9428_v40, %v8425_v39  ;;  %v8928_v10 = vor.u32 %v9555_v27, %v8927_v0  ;;  %v9515_v28 = vld [vmem:[#allocation5 + $0x2b4] sm:$0xf0]  ;;  %v8640_v33 = vor.u32 %v9483_v20, %v8639_v15 }
 0x676   :  { %6277 = vmatpush.bf16.msra.mxu1 %v8876_v5  ;;  %6252 = vmatpush.bf16.msrb.mxu3 %v8604_v32  ;;  %v8681_v53 = vld [vmem:[#allocation5 + $0x210] sm:$0xf0]  ;;  %v8556_v16 = vor.u32 %v9460_v42, %v8553_v51  ;;  %v9524_v59 = vld [vmem:[#allocation5 + $0x304] sm:$0xf]  ;;  %v8783_v5 = vld [vmem:[#allocation5 + $0x2c8] sm:$0xf] }
 0x677   :  { %6265 = vmatpush.bf16.msra.mxu0 %v8732_v19  ;;  %v8809_v60 = vld [vmem:[#allocation5 + $0x310] sm:$0xf0]  ;;  %v8684_v62 = vor.u32 %v9492_v6, %v8681_v53  ;;  %v9451_v32 = vld [vmem:[#allocation5 + $0xb4] sm:$0xf0]  ;;  %v8784_v19 = vor.u32 %v9519_v7, %v8783_v5  ;;  %v8495_v23 = vld [vmem:[#allocation5 + $0x88] sm:$0xf] }
 0x678   :  { %v8812_v4 = vor.u32 %v9524_v59, %v8809_v60  ;;  %v8512_v22 = vor.u32 %v9451_v32, %v8511_v13  ;;  %v8895_v31 = vld [vmem:[#allocation5 + $0x3a8] sm:$0xf]  ;;  %v9547_v35 = vld [vmem:[#allocation5 + $0x3b4] sm:$0xf0] }
 0x679   :  { %6240 = vmatpush.bf16.msrb.mxu2 %v8460_v29  ;;  %v8912_v29 = vor.u32 %v9551_v18, %v8911_v26  ;;  %v8623_v17 = vld [vmem:[#allocation5 + $0x188] sm:$0xf]  ;;  %v9479_v25 = vld [vmem:[#allocation5 + $0x194] sm:$0xf0] }
 0x67a   :  { %6278 = vmatpush.bf16.msra.mxu1 %v8860_v21  ;;  %6253 = vmatpush.bf16.msrb.mxu3 %v8588_v30  ;;  %v8767_v21 = vld [vmem:[#allocation5 + $0x2a8] sm:$0xf]  ;;  %v9447_v30 = vld [vmem:[#allocation5 + $0x94] sm:$0xf0]  ;;  %v8624_v41 = vor.u32 %v9479_v25, %v8623_v17 }
 0x67b   :  { %6266 = vmatpush.bf16.msra.mxu0 %v8716_v36  ;;  %v8768_v36 = vor.u32 %v9515_v28, %v8767_v21  ;;  %v9511_v37 = vld [vmem:[#allocation5 + $0x294] sm:$0xf0]  ;;  %v8496_v38 = vor.u32 %v9447_v30, %v8495_v23  ;;  %v8479_v40 = vld [vmem:[#allocation5 + $0x68] sm:$0xf]  ;;  %v9457_v21 = vld [vmem:[#allocation5 + $0xec] sm:$0xf] }
 0x67c   :  { %v9443_v44 = vld [vmem:[#allocation5 + $0x74] sm:$0xf0]  ;;  %v8607_v51 = vld [vmem:[#allocation5 + $0x168] sm:$0xf]  ;;  %v8545_v28 = vld [vmem:[#allocation5 + $0xf8] sm:$0xf0] }
 0x67d   :  { %6241 = vmatpush.bf16.msrb.mxu2 %v8444_v12  ;;  %v8896_v12 = vor.u32 %v9547_v35, %v8895_v31  ;;  %v9543_v39 = vld [vmem:[#allocation5 + $0x394] sm:$0xf0]  ;;  %v8735_v34 = vld [vmem:[#allocation5 + $0x268] sm:$0xf]  ;;  %v8480_v55 = vor.u32 %v9443_v44, %v8479_v40  ;;  %v9521_v35 = vld [vmem:[#allocation5 + $0x2ec] sm:$0xf]  ;;  %v8548_v25 = vor.u32 %v9457_v21, %v8545_v28 }
 0x67e   :  { %6279 = vmatpush.bf16.msra.mxu1 %v8844_v11  ;;  %6254 = vmatpush.bf16.msrb.mxu3 %v8572_v48  ;;  %v8751_v11 = vld [vmem:[#allocation5 + $0x288] sm:$0xf]  ;;  %v9507_v50 = vld [vmem:[#allocation5 + $0x274] sm:$0xf0]  ;;  %v9553_v44 = vld [vmem:[#allocation5 + $0x3ec] sm:$0xf] }
 0x67f   :  { %6267 = vmatpush.bf16.msra.mxu0 %v8700_v52  ;;  %v8879_v48 = vld [vmem:[#allocation5 + $0x388] sm:$0xf]  ;;  %v8752_v42 = vor.u32 %v9511_v37, %v8751_v11  ;;  %v9475_v52 = vld [vmem:[#allocation5 + $0x174] sm:$0xf0]  ;;  %v8736_v45 = vor.u32 %v9507_v50, %v8735_v34  ;;  %v9517_v34 = vld [vmem:[#allocation5 + $0x2cc] sm:$0xf] }
 0x680   :  { %v8463_v57 = vld [vmem:[#allocation5 + $0x48] sm:$0xf]  ;;  %v8608_v6 = vor.u32 %v9475_v52, %v8607_v51  ;;  %v9439_v53 = vld [vmem:[#allocation5 + $0x54] sm:$0xf0]  ;;  %v8657_v51 = vld [vmem:[#allocation5 + $0x1d8] sm:$0xf0] }
 0x681   :  { %6242 = vmatpush.bf16.msrb.mxu2 %v8428_v24  ;;  %v8863_v24 = vld [vmem:[#allocation5 + $0x368] sm:$0xf]  ;;  %v9539_v58 = vld [vmem:[#allocation5 + $0x374] sm:$0xf0]  ;;  %v8464_v61 = vor.u32 %v9439_v53, %v8463_v57  ;;  %v8785_v50 = vld [vmem:[#allocation5 + $0x2d8] sm:$0xf0] }
 0x682   :  { %6280 = vmatpush.bf16.msra.mxu1 %v8828_v56  ;;  %6255 = vmatpush.bf16.msrb.mxu3 %v8556_v16  ;;  %v8880_v56 = vor.u32 %v9543_v39, %v8879_v48  ;;  %v8591_v16 = vld [vmem:[#allocation5 + $0x148] sm:$0xf]  ;;  %v9503_v60 = vld [vmem:[#allocation5 + $0x254] sm:$0xf0]  ;;  %v8929_v48 = vld [vmem:[#allocation5 + $0x3f8] sm:$0xf0] }
 0x683   :  { %6268 = vmatpush.bf16.msra.mxu0 %v8684_v62  ;;  %v8719_v59 = vld [vmem:[#allocation5 + $0x248] sm:$0xf]  ;;  %v9435_v0 = vld [vmem:[#allocation5 + $0x34] sm:$0xf0]  ;;  %v9449_v57 = vld [vmem:[#allocation5 + $0xac] sm:$0xf] }
 0x684   :  { %6243 = vmatmul.bf16.vlgmr.msrb.gmra.mxu2 %v11812_v1  ;;  %v8447_v62 = vld [vmem:[#allocation5 + $0x28] sm:$0xf]  ;;  %v8720_v3 = vor.u32 %v9503_v60, %v8719_v59  ;;  %v9499_v7 = vld [vmem:[#allocation5 + $0x234] sm:$0xf0]  ;;  %v8513_v53 = vld [vmem:[#allocation5 + $0xb8] sm:$0xf0] }
 0x685   :  { %6287 = vmatpush.bf16.msra.mxu2 %v8544_v47  ;;  %6256 = vmatmul.bf16.vlgmr.msrb.gmra.mxu3 %v11816_v43  ;;  %v9471_v47 = vld [vmem:[#allocation5 + $0x154] sm:$0xf0]  ;;  %v8847_v27 = vld [vmem:[#allocation5 + $0x348] sm:$0xf]  ;;  %v9513_v59 = vld [vmem:[#allocation5 + $0x2ac] sm:$0xf] }
 0x686   :  { %6300 = vmatpush.bf16.msra.mxu3 %v8672_v9  ;;  %6281 = vmatpush.bf16.msra.mxu1 %v8812_v4  ;;  %v8864_v9 = vor.u32 %v9539_v58, %v8863_v24  ;;  %v8592_v63 = vor.u32 %v9471_v47, %v8591_v16  ;;  %v8575_v46 = vld [vmem:[#allocation5 + $0x128] sm:$0xf]  ;;  %v9467_v4 = vld [vmem:[#allocation5 + $0x134] sm:$0xf0]  ;;  %v9549_v24 = vld [vmem:[#allocation5 + $0x3cc] sm:$0xf] }
 0x687   :  { %6313 = vmatpush.bf16.msrb.mxu0 %v8800_v2  ;;  %v9535_v2 = vld [vmem:[#allocation5 + $0x354] sm:$0xf0]  ;;  %v8703_v5 = vld [vmem:[#allocation5 + $0x228] sm:$0xf]  ;;  %v8576_v26 = vor.u32 %v9467_v4, %v8575_v46  ;;  %v8913_v58 = vld [vmem:[#allocation5 + $0x3d8] sm:$0xf0] }
 0x688   :  { %6269 = vmatmul.bf16.vlgmr.msra.gmra.mxu0 %v11820_v49  ;;  %v8431_v13 = vld [vmem:[#allocation5 + $0x8] sm:$0xf]  ;;  %v9463_v18 = vld [vmem:[#allocation5 + $0x114] sm:$0xf0]  ;;  %v8704_v20 = vor.u32 %v9499_v7, %v8703_v5  ;;  %v9481_v16 = vld [vmem:[#allocation5 + $0x1ac] sm:$0xf] }
 0x689   :  { %6288 = vmatpush.bf16.msra.mxu2 %v8528_v8  ;;  %6282 = vmatmul.bf16.vlgmr.msra.gmra.mxu1 %v11824_v54  ;;  %v8448_v8 = vor.u32 %v9435_v0, %v8447_v62  ;;  %v8559_v32 = vld [vmem:[#allocation5 + $0x108] sm:$0xf]  ;;  %v9531_v15 = vld [vmem:[#allocation5 + $0x334] sm:$0xf0]  ;;  %v8641_v47 = vld [vmem:[#allocation5 + $0x1b8] sm:$0xf0] }
 0x68a   :  { %6326 = vmatpush.bf16.msrb.mxu1 %v8928_v10  ;;  %6301 = vmatpush.bf16.msra.mxu3 %v8656_v14  ;;  %v8848_v10 = vor.u32 %v9535_v2, %v8847_v27  ;;  %v9431_v14 = vld [vmem:[#allocation5 + $0x14] sm:$0xf0]  ;;  %v8687_v23 = vld [vmem:[#allocation5 + $0x208] sm:$0xf]  ;;  %v8560_v17 = vor.u32 %v9463_v18, %v8559_v32  ;;  %v8769_v60 = vld [vmem:[#allocation5 + $0x2b8] sm:$0xf0] }
 0x68b   :  { %6314 = vmatpush.bf16.msrb.mxu0 %v8784_v19  ;;  %v8831_v19 = vld [vmem:[#allocation5 + $0x328] sm:$0xf]  ;;  %v8432_v30 = vor.u32 %v9431_v14, %v8431_v13  ;;  %v9527_v37 = vld [vmem:[#allocation5 + $0x314] sm:$0xf0]  ;;  %v9445_v62 = vld [vmem:[#allocation5 + $0x8c] sm:$0xf] }
 0x68c   :  { %v8832_v31 = vor.u32 %v9531_v15, %v8831_v19  ;;  %v8815_v11 = vld [vmem:[#allocation5 + $0x308] sm:$0xf]  ;;  %v8497_v0 = vld [vmem:[#allocation5 + $0x98] sm:$0xf0]  ;;  %v9545_v27 = vld [vmem:[#allocation5 + $0x3ac] sm:$0xf] }
 0x68d   :  { %6289 = vmatpush.bf16.msra.mxu2 %v8512_v22  ;;  %v9489_v22 = vld [vmem:[#allocation5 + $0x1ec] sm:$0xf]  ;;  %v8816_v52 = vor.u32 %v9527_v37, %v8815_v11  ;;  %v8897_v2 = vld [vmem:[#allocation5 + $0x3b8] sm:$0xf0] }
 0x68e   :  { %6327 = vmatpush.bf16.msrb.mxu1 %v8912_v29  ;;  %6302 = vmatpush.bf16.msra.mxu3 %v8640_v33  ;;  %v8673_v29 = vld [vmem:[#allocation5 + $0x1f8] sm:$0xf0]  ;;  %v9495_v33 = vld [vmem:[#allocation5 + $0x214] sm:$0xf0]  ;;  %v9477_v46 = vld [vmem:[#allocation5 + $0x18c] sm:$0xf] }
 0x68f   :  { %6315 = vmatpush.bf16.msrb.mxu0 %v8768_v36  ;;  %v8801_v36 = vld [vmem:[#allocation5 + $0x2f8] sm:$0xf0]  ;;  %v8688_v40 = vor.u32 %v9495_v33, %v8687_v23  ;;  %v9509_v5 = vld [vmem:[#allocation5 + $0x28c] sm:$0xf] }
 0x690   :  { %v8804_v39 = vor.u32 %v9521_v35, %v8801_v36  ;;  %v8625_v4 = vld [vmem:[#allocation5 + $0x198] sm:$0xf0]  ;;  %v9441_v13 = vld [vmem:[#allocation5 + $0x6c] sm:$0xf] }
 0x691   :  { %6290 = vmatpush.bf16.msra.mxu2 %v8496_v38  ;;  %v9453_v38 = vld [vmem:[#allocation5 + $0xcc] sm:$0xf]  ;;  %v8753_v7 = vld [vmem:[#allocation5 + $0x298] sm:$0xf0]  ;;  %v8628_v14 = vor.u32 %v9477_v46, %v8625_v4 }
 0x692   :  { %6328 = vmatpush.bf16.msrb.mxu1 %v8896_v12  ;;  %6303 = vmatpush.bf16.msra.mxu3 %v8624_v41  ;;  %v8676_v12 = vor.u32 %v9489_v22, %v8673_v29  ;;  %v8529_v41 = vld [vmem:[#allocation5 + $0xd8] sm:$0xf0]  ;;  %v8756_v19 = vor.u32 %v9509_v5, %v8753_v7  ;;  %v9473_v15 = vld [vmem:[#allocation5 + $0x16c] sm:$0xf] }
 0x693   :  { %6316 = vmatpush.bf16.msrb.mxu0 %v8752_v42  ;;  %v9485_v42 = vld [vmem:[#allocation5 + $0x1cc] sm:$0xf]  ;;  %v8481_v32 = vld [vmem:[#allocation5 + $0x78] sm:$0xf0] }
 0x694   :  { %v8881_v18 = vld [vmem:[#allocation5 + $0x398] sm:$0xf0]  ;;  %v9505_v21 = vld [vmem:[#allocation5 + $0x26c] sm:$0xf]  ;;  %v8484_v22 = vor.u32 %v9441_v13, %v8481_v32 }
 0x695   :  { %6291 = vmatpush.bf16.msra.mxu2 %v8480_v55  ;;  %v8532_v55 = vor.u32 %v9453_v38, %v8529_v41  ;;  %v8737_v28 = vld [vmem:[#allocation5 + $0x278] sm:$0xf0]  ;;  %v9437_v23 = vld [vmem:[#allocation5 + $0x4c] sm:$0xf] }
 0x696   :  { %6329 = vmatpush.bf16.msrb.mxu1 %v8880_v56  ;;  %6304 = vmatpush.bf16.msra.mxu3 %v8608_v6  ;;  %v8932_v56 = vor.u32 %v9553_v44, %v8929_v48  ;;  %v8660_v6 = vor.u32 %v9485_v42, %v8657_v51  ;;  %v8865_v35 = vld [vmem:[#allocation5 + $0x378] sm:$0xf0]  ;;  %v8740_v36 = vor.u32 %v9505_v21, %v8737_v28  ;;  %v9501_v11 = vld [vmem:[#allocation5 + $0x24c] sm:$0xf] }
 0x697   :  { %6317 = vmatpush.bf16.msrb.mxu0 %v8736_v45  ;;  %v8788_v45 = vor.u32 %v9517_v34, %v8785_v50  ;;  %v8721_v37 = vld [vmem:[#allocation5 + $0x258] sm:$0xf0]  ;;  %v9533_v48 = vld [vmem:[#allocation5 + $0x34c] sm:$0xf] }
 0x698   :  { %v8449_v44 = vld [vmem:[#allocation5 + $0x38] sm:$0xf0]  ;;  %v8724_v42 = vor.u32 %v9501_v11, %v8721_v37  ;;  %v9465_v51 = vld [vmem:[#allocation5 + $0x12c] sm:$0xf] }
 0x699   :  { %6292 = vmatpush.bf16.msra.mxu2 %v8464_v61  ;;  %v8516_v61 = vor.u32 %v9449_v57, %v8513_v53  ;;  %v9497_v34 = vld [vmem:[#allocation5 + $0x22c] sm:$0xf]  ;;  %v8705_v50 = vld [vmem:[#allocation5 + $0x238] sm:$0xf0] }
 0x69a   :  { %6330 = vmatpush.bf16.msrb.mxu1 %v8864_v9  ;;  %6305 = vmatpush.bf16.msra.mxu3 %v8592_v63  ;;  %v8916_v9 = vor.u32 %v9549_v24, %v8913_v58  ;;  %v8644_v63 = vor.u32 %v9481_v16, %v8641_v47  ;;  %v9429_v57 = vld [vmem:[#allocation5 + $0xc] sm:$0xf]  ;;  %v8433_v53 = vld [vmem:[#allocation5 + $0x18] sm:$0xf0] }
 0x69b   :  { %6318 = vmatpush.bf16.msrb.mxu0 %v8720_v3  ;;  %v8772_v3 = vor.u32 %v9513_v59, %v8769_v60  ;;  %v9529_v24 = vld [vmem:[#allocation5 + $0x32c] sm:$0xf]  ;;  %v8833_v58 = vld [vmem:[#allocation5 + $0x338] sm:$0xf0] }
 0x69c   :  { %v9461_v16 = vld [vmem:[#allocation5 + $0x10c] sm:$0xf]  ;;  %v8561_v47 = vld [vmem:[#allocation5 + $0x118] sm:$0xf0] }
 0x69d   :  { %6293 = vmatpush.bf16.msra.mxu2 %v8448_v8  ;;  %v8500_v8 = vor.u32 %v9445_v62, %v8497_v0  ;;  %v9493_v59 = vld [vmem:[#allocation5 + $0x20c] sm:$0xf]  ;;  %v8689_v60 = vld [vmem:[#allocation5 + $0x218] sm:$0xf0]  ;;  %v8564_v62 = vor.u32 %v9461_v16, %v8561_v47 }
 0x69e   :  { %6331 = vmatpush.bf16.msrb.mxu1 %v8848_v10  ;;  %6306 = vmatpush.bf16.msra.mxu3 %v8576_v26  ;;  %v8900_v10 = vor.u32 %v9545_v27, %v8897_v2  ;;  %v9541_v26 = vld [vmem:[#allocation5 + $0x38c] sm:$0xf]  ;;  %v8817_v0 = vld [vmem:[#allocation5 + $0x318] sm:$0xf0]  ;;  %v8692_v27 = vor.u32 %v9493_v59, %v8689_v60 }
 0x69f   :  { %6319 = vmatpush.bf16.msrb.mxu0 %v8704_v20  ;;  %v8609_v20 = vld [vmem:[#allocation5 + $0x178] sm:$0xf0]  ;;  %v8884_v29 = vor.u32 %v9541_v26, %v8881_v18 }
 0x6a0   :  { %v8612_v33 = vor.u32 %v9473_v15, %v8609_v20 }
 0x6a1   :  { %6294 = vmatpush.bf16.msra.mxu2 %v8432_v30  ;;  %v8465_v30 = vld [vmem:[#allocation5 + $0x58] sm:$0xf0] }
 0x6a2   :  { %6332 = vmatpush.bf16.msrb.mxu1 %v8832_v31  ;;  %6307 = vmatpush.bf16.msra.mxu3 %v8560_v17  ;;  %v9537_v31 = vld [vmem:[#allocation5 + $0x36c] sm:$0xf]  ;;  %v8468_v38 = vor.u32 %v9437_v23, %v8465_v30 }
 0x6a3   :  { %6320 = vmatpush.bf16.msrb.mxu0 %v8688_v40  ;;  %v9469_v17 = vld [vmem:[#allocation5 + $0x14c] sm:$0xf] }
 0x6a4   :  { %6295 = vmatmul.bf16.vlgmr.msra.gmra.mxu2 %v11812_v1  ;;  %v9433_v40 = vld [vmem:[#allocation5 + $0x2c] sm:$0xf] }
 0x6a5   :  { %6339 = vmatpush.bf16.msrb.mxu2 %v8548_v25  ;;  %6308 = vmatmul.bf16.vlgmr.msra.gmra.mxu3 %v11816_v43  ;;  %v8593_v25 = vld [vmem:[#allocation5 + $0x158] sm:$0xf0] }
 0x6a6   :  { %6352 = vmatpush.bf16.msrb.mxu3 %v8676_v12  ;;  %6333 = vmatpush.bf16.msrb.mxu1 %v8816_v52  ;;  %v8868_v12 = vor.u32 %v9537_v31, %v8865_v35  ;;  %v8596_v41 = vor.u32 %v9469_v17, %v8593_v25  ;;  %v8577_v52 = vld [vmem:[#allocation5 + $0x138] sm:$0xf0] }
 0x6a7   :  { %6365 = vmatpush.bf16.msra.mxu0 %v8804_v39  ;;  %v8849_v39 = vld [vmem:[#allocation5 + $0x358] sm:$0xf0] }
 0x6a8   :  { %6321 = vmatmul.bf16.vlgmr.msrb.gmra.mxu0 %v11820_v49 }
 0x6a9   :  { %6340 = vmatpush.bf16.msrb.mxu2 %v8532_v55  ;;  %6334 = vmatmul.bf16.vlgmr.msrb.gmra.mxu1 %v11824_v54  ;;  %v8452_v55 = vor.u32 %v9433_v40, %v8449_v44 }
 0x6aa   :  { %6378 = vmatpush.bf16.msra.mxu1 %v8932_v56  ;;  %6353 = vmatpush.bf16.msrb.mxu3 %v8660_v6  ;;  %v8852_v56 = vor.u32 %v9533_v48, %v8849_v39  ;;  %v8580_v6 = vor.u32 %v9465_v51, %v8577_v52 }
 0x6ab   :  { %6366 = vmatpush.bf16.msra.mxu0 %v8788_v45  ;;  %v8708_v45 = vor.u32 %v9497_v34, %v8705_v50 }
 0x6ad   :  { %6341 = vmatpush.bf16.msrb.mxu2 %v8516_v61  ;;  %v8436_v61 = vor.u32 %v9429_v57, %v8433_v53 }
 0x6ae   :  { %6379 = vmatpush.bf16.msra.mxu1 %v8916_v9  ;;  %6354 = vmatpush.bf16.msrb.mxu3 %v8644_v63  ;;  %v8836_v9 = vor.u32 %v9529_v24, %v8833_v58  ;;  %v9525_v63 = vld [vmem:[#allocation5 + $0x30c] sm:$0xf] }
 0x6af   :  { %6367 = vmatpush.bf16.msra.mxu0 %v8772_v3  ;;  %v8820_v2 = vor.u32 %v9525_v63, %v8817_v0  ;;  %v5533_v3 = vld [vmem:[%s11857_s8] sm:$0xf]  ;;  %s9635_s8 = smov [#allocation7]  }
 0x6b0   :  { %v5535_v4 = vperm.slane %v5533_v3, 0  ;;  %v5537_v44 = vperm.slane %v5533_v3, 2  ;;  %v5538_v51 = vperm.slane %v5533_v3, 3  ;;  %s6410_s27 = sshll.u32 %s9635_s8, 4  ;;  %s6411_s27 = int_to_ptr.vmem [resolvable:$true] %s6410_s27 }
 0x6b1   :  { %6342 = vmatpush.bf16.msrb.mxu2 %v8500_v8 }
 0x6b2   :  { %6380 = vmatpush.bf16.msra.mxu1 %v8900_v10  ;;  %6355 = vmatpush.bf16.msrb.mxu3 %v8628_v14 }
 0x6b3   :  { %6368 = vmatpush.bf16.msra.mxu0 %v8756_v19 }
 0x6b5   :  { %6343 = vmatpush.bf16.msrb.mxu2 %v8484_v22 }
 0x6b6   :  { %6381 = vmatpush.bf16.msra.mxu1 %v8884_v29  ;;  %6356 = vmatpush.bf16.msrb.mxu3 %v8612_v33 }
 0x6b7   :  { %6369 = vmatpush.bf16.msra.mxu0 %v8740_v36 }
 0x6b9   :  { %6344 = vmatpush.bf16.msrb.mxu2 %v8468_v38 }
 0x6ba   :  { %6382 = vmatpush.bf16.msra.mxu1 %v8868_v12  ;;  %6357 = vmatpush.bf16.msrb.mxu3 %v8596_v41 }
 0x6bb   :  { %6370 = vmatpush.bf16.msra.mxu0 %v8724_v42 }
 0x6bd   :  { %6345 = vmatpush.bf16.msrb.mxu2 %v8452_v55 }
 0x6be   :  { %6383 = vmatpush.bf16.msra.mxu1 %v8852_v56  ;;  %6358 = vmatpush.bf16.msrb.mxu3 %v8580_v6 }
 0x6bf   :  { %6371 = vmatpush.bf16.msra.mxu0 %v8708_v45 }
 0x6c1   :  { %6346 = vmatpush.bf16.msrb.mxu2 %v8436_v61 }
 0x6c2   :  { %6384 = vmatpush.bf16.msra.mxu1 %v8836_v9  ;;  %6359 = vmatpush.bf16.msrb.mxu3 %v8564_v62 }
 0x6c3   :  { %6372 = vmatpush.bf16.msra.mxu0 %v8692_v27 }
 0x6c4   :  { %6347 = vmatmul.bf16.vlgmr.msrb.gmra.mxu2 %v11812_v1 }
 0x6c5   :  { %6360 = vmatmul.bf16.vlgmr.msrb.gmra.mxu3 %v11816_v43 }
 0x6c6   :  { %6385 = vmatpush.bf16.msra.mxu1 %v8820_v2  ;;  %6373 = vmatmul.bf16.vlgmr.msra.gmra.mxu0 %v11820_v49  ;;  %v5536_v49 = vperm.slane %v5533_v3, 1 }
 0x6c9   :  { %6386 = vmatmul.bf16.vlgmr.msra.gmra.mxu1 %v11824_v54 }
 0x6e5   :  { %v6218_v46 = vpop.f32.mrf.mxu0 }
 0x6e6   :  { %v6231_v5 = vpop.f32.mrf.mxu1 }
 0x6e7   :  { %v6192_v7 = vpop.f32.mrf.mxu2 }
 0x6e8   :  { %v6193_v8 = vadd.f32 %v6192_v7, %v5535_v4  ;;  %v6205_v10 = vpop.f32.mrf.mxu3 }
 0x6ea   :  { %v6206_v13 = vadd.f32 %v6205_v10, %v6193_v8 }
 0x6ec   :  { %v6219_v1 = vadd.f32 %v6218_v46, %v6206_v13 }
 0x6ed   :  { %v6220_v14 = vpop.f32.mrf.mxu0 }
 0x6ee   :  { %v6233_v32 = vpop.f32.mrf.mxu1  ;;  %v6232_v43 = vadd.f32 %v6231_v5, %v6219_v1 }
 0x6ef   :  { %v6194_v26 = vpop.f32.mrf.mxu2 }
 0x6f0   :  { %v6207_v18 = vpop.f32.mrf.mxu3 }
 0x705   :  { %v6270_v19 = vpop.f32.mrf.mxu0 }
 0x706   :  { %v6283_v54 = vpop.f32.mrf.mxu1 }
 0x707   :  { %v6244_v15 = vpop.f32.mrf.mxu2 }
 0x708   :  { %v6245_v20 = vadd.f32 %v6244_v15, %v5536_v49  ;;  %v6257_v21 = vpop.f32.mrf.mxu3 }
 0x70a   :  { %v6258_v28 = vadd.f32 %v6257_v21, %v6245_v20 }
 0x70c   :  { %v6271_v22 = vadd.f32 %v6270_v19, %v6258_v28 }
 0x70d   :  { %v6272_v29 = vpop.f32.mrf.mxu0 }
 0x70e   :  { %v6285_v23 = vpop.f32.mrf.mxu1  ;;  %v6284_v33 = vadd.f32 %v6283_v54, %v6271_v22 }
 0x70f   :  { %v6246_v30 = vpop.f32.mrf.mxu2 }
 0x710   :  { %v6395_v31 = vrot.slane %v6284_v33, 6  ;;  %v6259_v35 = vpop.f32.mrf.mxu3 }
 0x712   :  { %v6398_v36 = vsel %vm3794_vm0, %v6232_v43, %v6395_v31 }
 0x725   :  { %v6322_v17 = vpop.f32.mrf.mxu0 }
 0x726   :  { %v6335_v25 = vpop.f32.mrf.mxu1 }
 0x727   :  { %v6296_v11 = vpop.f32.mrf.mxu2 }
 0x728   :  { %v6309_v37 = vpop.f32.mrf.mxu3  ;;  %v6297_v48 = vadd.f32 %v6296_v11, %v5537_v44 }
 0x72a   :  { %v6310_v42 = vadd.f32 %v6309_v37, %v6297_v48 }
 0x72c   :  { %v6323_v50 = vadd.f32 %v6322_v17, %v6310_v42 }
 0x72d   :  { %v6324_v38 = vpop.f32.mrf.mxu0 }
 0x72e   :  { %v6337_v12 = vpop.f32.mrf.mxu1  ;;  %v6336_v53 = vadd.f32 %v6335_v25, %v6323_v50 }
 0x72f   :  { %v6298_v40 = vpop.f32.mrf.mxu2 }
 0x730   :  { %v6311_v41 = vpop.f32.mrf.mxu3  ;;  %v6396_v47 = vrot.slane %v6336_v53, 4 }
 0x743   :  { %v6374_v39 = vpop.f32.mrf.mxu0 }
 0x746   :  { %v6387_v52 = vpop.f32.mrf.mxu1 }
 0x747   :  { %v6348_v34 = vpop.f32.mrf.mxu2 }
 0x748   :  { %v6349_v55 = vadd.f32 %v6348_v34, %v5538_v51  ;;  %v6361_v56 = vpop.f32.mrf.mxu3 }
 0x74a   :  { %v6362_v57 = vadd.f32 %v6361_v56, %v6349_v55 }
 0x74b   :  { %v6376_v6 = vpop.f32.mrf.mxu0 }
 0x74c   :  { %v6375_v24 = vadd.f32 %v6374_v39, %v6362_v57 }
 0x74e   :  { %v6389_v58 = vpop.f32.mrf.mxu1  ;;  %v6388_v45 = vadd.f32 %v6387_v52, %v6375_v24 }
 0x74f   :  { %v6350_v16 = vpop.f32.mrf.mxu2 }
 0x750   :  { %v6397_v59 = vrot.slane %v6388_v45, 2  ;;  %v6363_v60 = vpop.f32.mrf.mxu3 }
 0x752   :  { %v6400_v61 = vsel %vm6399_vm3, %v6396_v47, %v6397_v59 }
 0x753   :  { %v6402_v9 = vsel %vm6401_vm4, %v6398_v36, %v6400_v61 }
 0x754   :  { %6404 = vst [vmem:[#allocation7] sm:$0xff] %v6402_v9 }
 0x755   :  { %6415 = dma.vmem_to_hbm [thread:$0]  %s6411_s27, 128, %s6413_s30, [#allocation8]  }
 0x756   :  { %9632 = dma.done.wait [#allocation8], 128  }
 0x757   :  { %9633 = vsyncadd [#allocation8], 4294967168 }
 0x758   :  { %6420 = vsyncpa [#allocation8], 1 }
 0x759   :  { %6421 = vsyncmov [#allocation6] }
 0x75c   :  { %s6422_s10 = vpop.sfrf %6421 }
 0x75d   :  { %p8933_p0 = scmp.ne.s32.totalorder %s6422_s10, 0 }
 0x75f   :  { %6426 = shalt.err (%p8933_p0)  }
 0x760   :  { %6428 = vsyncmov [#allocation6 + $0x1] }
 0x763   :  { %s6429_s11 = vpop.sfrf %6428 }
 0x764   :  { %p8934_p1 = scmp.ne.s32.totalorder %s6429_s11, 0 }
 0x766   :  { %6433 = shalt.err (%p8934_p1)  }
 0x767   :  { %6435 = vsyncmov [#allocation6 + $0x2] }
 0x76a   :  { %s6436_s9 = vpop.sfrf %6435 }
 0x76b   :  { %p8935_p2 = scmp.ne.s32.totalorder %s6436_s9, 0 }
 0x76d   :  { %6440 = shalt.err (%p8935_p2)  }

</bundles_post_ra>
